<compile_context>
chip_gen: v5e
topology: v5e:2x2
jax: 0.10.0
libtpu: 0.0.40
codegen_flags: <defaults>
</compile_context>

<pallas_src>
from functools import lru_cache, partial

import jax
import jax.numpy as jnp
from jax.experimental import pallas as pl
from jax.experimental.pallas import tpu as pltpu


# ----------------------------------------------------------------------------
# Generation-aware budgets / tiling helpers
# ----------------------------------------------------------------------------
@lru_cache(maxsize=None)
def _vmem_budget():
    """~75% of this chip's VMEM, capped at 112 MiB (v5e/v6e: ~96 MiB,
    v7x: 48 MiB).  Falls back to a conservative 48 MiB if the query fails."""
    try:
        cap = int(pltpu.get_tpu_info().vmem_capacity_bytes)
        return min(cap * 3 // 4, 112 * 1024 * 1024)
    except Exception:
        return 48 * 1024 * 1024


def _tile_target():
    # Smaller tiles under v7x's 64 MiB VMEM; bigger on v5e/v6e's 128 MiB.
    return 256 if _vmem_budget() <= 56 * 1024 * 1024 else 512


def _pick_tile(n, target):
    """Tile size for a cdiv grid: the full axis if it is small, otherwise a
    multiple of 8 (so the second-minor block dim always satisfies layout)."""
    if n <= target:
        return n
    return max(8, (min(target, n) // 8) * 8)


def _spec(block_shape, index_map, single_buffer):
    """BlockSpec; optionally single-buffered for blocks whose index is
    constant along the innermost grid axis (K/V, weights, biases).  Falls
    back to a plain BlockSpec if pipeline_mode/Buffered(1) is unsupported."""
    if single_buffer:
        try:
            return pl.BlockSpec(block_shape, index_map,
                                pipeline_mode=pl.Buffered(1))
        except Exception:
            pass
    return pl.BlockSpec(block_shape, index_map)


# ----------------------------------------------------------------------------
# Multi-projection linear:  y[g] = x[g] @ w[g] (+ b[g]),  w[g] already (K, O)
# ----------------------------------------------------------------------------
def _make_multi_linear_kernel(G, has_bias):
    def kernel(*refs):
        xs = refs[:G]
        ws = refs[G:2 * G]
        off = 2 * G
        bs = refs[off:off + G] if has_bias else None
        outs = refs[(off + G) if has_bias else off:]
        for g in range(G):                       # static unroll over projections
            y = jnp.dot(xs[g][...], ws[g][...],
                        preferred_element_type=jnp.float32)
            if has_bias:
                y = y + bs[g][...]
            outs[g][...] = y.astype(outs[g].dtype)
    return kernel


def _multi_linear(xs, ws, bs=None, *, single_buffer=True):
    """xs[g]: (M, K); ws[g]: (K, O) pre-transposed; bs[g]: (O,)/(1, O) or None.
    One pallas_call, grid over M only; the G weights stay resident per step
    (no activation stacking, no bias stream when bs is None)."""
    G = len(xs)
    M, K = xs[0].shape
    O = ws[0].shape[1]
    tm = _pick_tile(M, _tile_target())
    grid = (pl.cdiv(M, tm),)

    x_spec = pl.BlockSpec((tm, K), lambda m: (m, 0))
    w_spec = _spec((K, O), lambda m: (0, 0), single_buffer)
    o_spec = pl.BlockSpec((tm, O), lambda m: (m, 0))

    in_specs = [x_spec] * G + [w_spec] * G
    args = list(xs) + list(ws)
    if bs is not None:
        b_spec = _spec((1, O), lambda m: (0, 0), single_buffer)
        in_specs += [b_spec] * G
        args += [jnp.reshape(b, (1, O)) for b in bs]

    return pl.pallas_call(
        _make_multi_linear_kernel(G, bs is not None),
        out_shape=tuple(jax.ShapeDtypeStruct((M, O), xs[0].dtype)
                        for _ in range(G)),
        grid=grid,
        in_specs=in_specs,
        out_specs=tuple(o_spec for _ in range(G)),
        compiler_params=pltpu.CompilerParams(
            dimension_semantics=("parallel",),
            vmem_limit_bytes=_vmem_budget()),
    )(*args)


# ----------------------------------------------------------------------------
# Guided attention kernel: one (batch, q-tile) step, all heads inside,
# lane-dense (tq, C) loads/stores.
# ----------------------------------------------------------------------------
def _guided_attn_kernel(scale, num_heads,
                        q_ref, k_ref, v_ref, qi_ref, ki_ref, vi_ref,
                        x_ref, xi_ref):
    C = q_ref.shape[-1]
    hd = C // num_heads

    # Fold the softmax scale into q/qi once per tile (2 VPU multiplies over
    # (tq, C) instead of 2*H multiplies over (tq, Nk)).
    q = q_ref[...] * scale
    qi = qi_ref[...] * scale
    k = k_ref[...]
    v = v_ref[...]
    ki = ki_ref[...]
    vi = vi_ref[...]

    x_parts = []
    xi_parts = []
    for h in range(num_heads):                 # static unroll; heads in-lane
        sl = slice(h * hd, (h + 1) * hd)

        # --- main branch: attn = softmax(q k^T * scale) --------------------
        s = jax.lax.dot_general(
            q[:, sl], k[:, sl], dimension_numbers=(((1,), (1,)), ((), ())),
            preferred_element_type=jnp.float32)
        s = s - jnp.max(s, axis=-1, keepdims=True)
        e = jnp.exp(s)
        attn = e * pl.reciprocal(jnp.sum(e, axis=-1, keepdims=True),
                                 approx=True)
        x_parts.append(jnp.dot(attn.astype(v.dtype), v[:, sl],
                               preferred_element_type=jnp.float32))

        # --- guided branch: softmax((qi ki^T * scale) * attn) @ vi ---------
        si = jax.lax.dot_general(
            qi[:, sl], ki[:, sl], dimension_numbers=(((1,), (1,)), ((), ())),
            preferred_element_type=jnp.float32)
        si = si * attn
        si = si - jnp.max(si, axis=-1, keepdims=True)
        ei = jnp.exp(si)
        # Normalize the (tq, hd) PV result instead of the (tq, Nk) weights.
        ri = pl.reciprocal(jnp.sum(ei, axis=-1, keepdims=True), approx=True)
        xi_parts.append(jnp.dot(ei.astype(vi.dtype), vi[:, sl],
                                preferred_element_type=jnp.float32) * ri)

    # One lane-dense (tq, C) store per output.  (If a bundle dump showed XLU
    # pressure from the concat, switch to a (tq, C) VMEM scratch accumulator.)
    x_ref[...] = jnp.concatenate(x_parts, axis=-1).astype(x_ref.dtype)
    xi_ref[...] = jnp.concatenate(xi_parts, axis=-1).astype(xi_ref.dtype)


def _pallas_guided_attention(q4, k4, v4, qi4, ki4, vi4, scale, num_heads,
                             single_buffer=True):
    """Inputs are the projected activations in (N, B, 1, C) layout (raw
    seq-major order, so no XLA transpose upstream).  Returns two (B, Nq, C)."""
    Nq, B, _, C = q4.shape
    Nk = k4.shape[0]
    tq = _pick_tile(Nq, _tile_target())

    q_spec = pl.BlockSpec((tq, None, None, C), lambda b, i: (i, b, 0, 0))
    # K/V block index is constant along the inner q-tile axis -> single buffer.
    kv_spec = _spec((Nk, None, None, C), lambda b, i: (0, b, 0, 0),
                    single_buffer)
    o_spec = pl.BlockSpec((None, tq, C), lambda b, i: (b, i, 0))

    return pl.pallas_call(
        partial(_guided_attn_kernel, scale, num_heads),
        out_shape=(jax.ShapeDtypeStruct((B, Nq, C), q4.dtype),
                   jax.ShapeDtypeStruct((B, Nq, C), q4.dtype)),
        grid=(B, pl.cdiv(Nq, tq)),
        in_specs=[q_spec, kv_spec, kv_spec, q_spec, kv_spec, kv_spec],
        out_specs=(o_spec, o_spec),
        compiler_params=pltpu.CompilerParams(
            dimension_semantics=("parallel", "parallel"),
            vmem_limit_bytes=_vmem_budget()),
    )(q4, k4, v4, qi4, ki4, vi4)


# ----------------------------------------------------------------------------
# Parameters
# ----------------------------------------------------------------------------
def init_params(key, dim, qkv_bias=False):
    ks = jax.random.split(key, 8)
    s = 1.0 / jnp.sqrt(dim)

    def lin(k):
        # PyTorch nn.Linear weight layout: (out, in)
        return jax.random.uniform(k, (dim, dim), jnp.float32, -s, s)

    params = {
        "wq": lin(ks[0]), "wk": lin(ks[1]), "wv": lin(ks[2]),
        "wq_im": lin(ks[3]), "wk_im": lin(ks[4]), "wv_im": lin(ks[5]),
        "w_proj": lin(ks[6]), "b_proj": jnp.zeros((dim,), jnp.float32),
        "w_proj_im": lin(ks[7]), "b_proj_im": jnp.zeros((dim,), jnp.float32),
    }
    zero = jnp.zeros((dim,), jnp.float32)
    # qkv_bias=False (default): zero biases (used only by the reference path).
    params.update({"bq": zero, "bk": zero, "bv": zero,
                   "bq_im": zero, "bk_im": zero, "bv_im": zero})
    return params


def prepare_params(params, qkv_bias=False):
    """One-time prep: transpose weights to (in, out) so the kernels run plain
    (M, K) @ (K, O) dots and pre-shape biases to (1, O).  Done once, outside
    the per-forward path, so there is no per-call HBM transpose/stack traffic.
    With qkv_bias=False the q/k/v bias streams are dropped entirely."""
    prep = {
        "wq_t": params["wq"].T, "wk_t": params["wk"].T, "wv_t": params["wv"].T,
        "wq_im_t": params["wq_im"].T, "wk_im_t": params["wk_im"].T,
        "wv_im_t": params["wv_im"].T,
        "w_proj_t": params["w_proj"].T, "w_proj_im_t": params["w_proj_im"].T,
        "b_proj": params["b_proj"].reshape(1, -1),
        "b_proj_im": params["b_proj_im"].reshape(1, -1),
    }
    if qkv_bias:
        for n in ("bq", "bk", "bv", "bq_im", "bk_im", "bv_im"):
            prep[n] = params[n].reshape(1, -1)
    return prep


# ----------------------------------------------------------------------------
# Module forward
# ----------------------------------------------------------------------------
def guidence_attention_forward(prep, q, k, v, q_img, k_img, v_img, *,
                               num_heads=8, single_buffer=True):
    """q/k/v/q_img/k_img/v_img: (seq, batch, dim).  Returns (x, x_im), each
    (batch, seq, dim), matching the PyTorch module's forward."""
    Lq, B, C = q.shape
    Lk = k.shape[0]
    hd = C // num_heads
    scale = float(hd) ** -0.5

    # Projections on the free (L*B, C) flatten -> no activation transposes.
    q2, qi2 = q.reshape(Lq * B, C), q_img.reshape(Lq * B, C)
    k2, v2 = k.reshape(Lk * B, C), v.reshape(Lk * B, C)
    ki2, vi2 = k_img.reshape(Lk * B, C), v_img.reshape(Lk * B, C)

    has_qkv_bias = "bq" in prep
    qp, qip = _multi_linear(
        [q2, qi2], [prep["wq_t"], prep["wq_im_t"]],
        bs=[prep["bq"], prep["bq_im"]] if has_qkv_bias else None,
        single_buffer=single_buffer)
    kp, vp, kip, vip = _multi_linear(
        [k2, v2, ki2, vi2],
        [prep["wk_t"], prep["wv_t"], prep["wk_im_t"], prep["wv_im_t"]],
        bs=([prep["bk"], prep["bv"], prep["bk_im"], prep["bv_im"]]
            if has_qkv_bias else None),
        single_buffer=single_buffer)

    # Attention reads the projected activations in (N, B, 1, C) layout via
    # strided (tq, 1, 1, C) blocks (free reshapes below), and writes the
    # (B, Nq, C) outputs lane-dense.
    q4, qi4 = qp.reshape(Lq, B, 1, C), qip.reshape(Lq, B, 1, C)
    k4, v4 = kp.reshape(Lk, B, 1, C), vp.reshape(Lk, B, 1, C)
    ki4, vi4 = kip.reshape(Lk, B, 1, C), vip.reshape(Lk, B, 1, C)

    xh, xih = _pallas_guided_attention(q4, k4, v4, qi4, ki4, vi4,
                                       scale, num_heads,
                                       single_buffer=single_buffer)

    # Fused output projections (proj, proj_im), biases included.
    x2, xi2 = _multi_linear(
        [xh.reshape(B * Lq, C), xih.reshape(B * Lq, C)],
        [prep["w_proj_t"], prep["w_proj_im_t"]],
        bs=[prep["b_proj"], prep["b_proj_im"]],
        single_buffer=single_buffer)
    return x2.reshape(B, Lq, C), xi2.reshape(B, Lq, C)


# ----------------------------------------------------------------------------
# Pure-JAX reference (mirrors the PyTorch forward exactly)
# ----------------------------------------------------------------------------
def reference_forward(params, q, k, v, q_img, k_img, v_img, num_heads=8):
    def lin(x, w, b):
        return x @ w.T + b

    qb = jnp.transpose(q, (1, 0, 2))
    kb = jnp.transpose(k, (1, 0, 2))
    vb = jnp.transpose(v, (1, 0, 2))
    qb = lin(qb, params["wq"], params["bq"])
    kb = lin(kb, params["wk"], params["bk"])
    vb = lin(vb, params["wv"], params["bv"])
    B, Nq, C = qb.shape
    Nk = kb.shape[1]
    hd = C // num_heads
    scale = float(hd) ** -0.5

    def to_heads(x, N):
        return jnp.transpose(x.reshape(B, N, num_heads, hd), (0, 2, 1, 3))

    qh, kh, vh = to_heads(qb, Nq), to_heads(kb, Nk), to_heads(vb, Nk)
    attn = jax.nn.softmax(qh @ jnp.swapaxes(kh, -2, -1) * scale, axis=-1)
    x = jnp.transpose(attn @ vh, (0, 2, 1, 3)).reshape(B, Nq, C)
    x = lin(x, params["w_proj"], params["b_proj"])

    qib = jnp.transpose(q_img, (1, 0, 2))
    kib = jnp.transpose(k_img, (1, 0, 2))
    vib = jnp.transpose(v_img, (1, 0, 2))
    qib = lin(qib, params["wq_im"], params["bq_im"])
    kib = lin(kib, params["wk_im"], params["bk_im"])
    vib = lin(vib, params["wv_im"], params["bv_im"])
    qih, kih, vih = to_heads(qib, Nq), to_heads(kib, Nk), to_heads(vib, Nk)
    attn_img = qih @ jnp.swapaxes(kih, -2, -1) * scale
    attn_img = jax.nn.softmax(attn_img * attn, axis=-1)
    x_im = jnp.transpose(attn_img @ vih, (0, 2, 1, 3)).reshape(B, Nq, C)
    x_im = lin(x_im, params["w_proj_im"], params["b_proj_im"])
    return x, x_im


# ----------------------------------------------------------------------------
if __name__ == "__main__":
    key = jax.random.PRNGKey(0)
    dim, num_heads = 32, 8
    seq, batch = 8, 2

    kp, *kin = jax.random.split(key, 7)
    params = init_params(kp, dim)
    prep = prepare_params(params, qkv_bias=False)   # one-time weight prep

    # module inputs are (seq, batch, dim)
    q = jax.random.normal(kin[0], (seq, batch, dim), jnp.float32)
    k = jax.random.normal(kin[1], (seq, batch, dim), jnp.float32)
    v = jax.random.normal(kin[2], (seq, batch, dim), jnp.float32)
    q_img = jax.random.normal(kin[3], (seq, batch, dim), jnp.float32)
    k_img = jax.random.normal(kin[4], (seq, batch, dim), jnp.float32)
    v_img = jax.random.normal(kin[5], (seq, batch, dim), jnp.float32)

    def run(single_buffer):
        fwd = jax.jit(partial(guidence_attention_forward,
                              num_heads=num_heads,
                              single_buffer=single_buffer))
        out = fwd(prep, q, k, v, q_img, k_img, v_img)
        jax.block_until_ready(out)
        return out

    try:
        x, x_im = run(True)          # with single-buffered K/V + weight blocks
    except Exception:
        x, x_im = run(False)         # fallback: default double buffering

    x_ref, x_im_ref = reference_forward(
        params, q, k, v, q_img, k_img, v_img, num_heads=num_heads)

    assert x.shape == (batch, seq, dim) and x_im.shape == (batch, seq, dim)
    # Tolerance loosened slightly because the in-kernel softmax uses the
    # EUP approximate reciprocal (pl.reciprocal(..., approx=True)).
    assert jnp.allclose(x, x_ref, atol=5e-3, rtol=5e-3)
    assert jnp.allclose(x_im, x_im_ref, atol=5e-3, rtol=5e-3)

    print("KERNEL_OK")
</pallas_src>

<mosaic_0001>
module attributes {stable_mosaic.version = 11 : i64} {
  func.func @kernel(%arg0: i32, %arg1: memref<16x32xf32, #tpu.memory_space<vmem>>, %arg2: memref<16x32xf32, #tpu.memory_space<vmem>>, %arg3: memref<32x32xf32, #tpu.memory_space<vmem>>, %arg4: memref<32x32xf32, #tpu.memory_space<vmem>>, %arg5: memref<1x32xf32, #tpu.memory_space<vmem>>, %arg6: memref<1x32xf32, #tpu.memory_space<vmem>>, %arg7: memref<16x32xf32, #tpu.memory_space<vmem>>, %arg8: memref<16x32xf32, #tpu.memory_space<vmem>>) attributes {dimension_semantics = [#tpu.dimension_semantics<parallel>], iteration_bounds = array<i64: 1>, scalar_prefetch = 0 : i64, scratch_operands = 0 : i64, tpu.core_type = #tpu.core_type<tc>, window_params = [{transform_indices = @transform_0, window_bounds = array<i64: 16, 32>}, {transform_indices = @transform_1, window_bounds = array<i64: 16, 32>}, {pipeline_mode = #tpu.pipeline_mode<synchronous>, transform_indices = @transform_2, window_bounds = array<i64: 32, 32>}, {pipeline_mode = #tpu.pipeline_mode<synchronous>, transform_indices = @transform_3, window_bounds = array<i64: 32, 32>}, {pipeline_mode = #tpu.pipeline_mode<synchronous>, transform_indices = @transform_4, window_bounds = array<i64: 1, 32>}, {pipeline_mode = #tpu.pipeline_mode<synchronous>, transform_indices = @transform_5, window_bounds = array<i64: 1, 32>}, {transform_indices = @transform_6, window_bounds = array<i64: 16, 32>}, {transform_indices = @transform_7, window_bounds = array<i64: 16, 32>}]} {
    %c0 = arith.constant 0 : index
    %c0_0 = arith.constant 0 : index
    %0 = vector.load %arg1[%c0, %c0_0] : memref<16x32xf32, #tpu.memory_space<vmem>>, vector<16x32xf32>
    %c0_1 = arith.constant 0 : index
    %c0_2 = arith.constant 0 : index
    %1 = vector.load %arg3[%c0_1, %c0_2] : memref<32x32xf32, #tpu.memory_space<vmem>>, vector<32x32xf32>
    %cst = arith.constant dense<0.000000e+00> : vector<16x32xf32>
    %2 = tpu.matmul %0, %1, %cst {dimension_numbers = #tpu.dot_dimension_numbers<[1], [0], [0], [1], [0, 0, 1, 1], [], []>} : vector<16x32xf32>, vector<32x32xf32>, vector<16x32xf32> -> vector<16x32xf32>
    %c0_3 = arith.constant 0 : index
    %c0_4 = arith.constant 0 : index
    %3 = vector.load %arg5[%c0_3, %c0_4] : memref<1x32xf32, #tpu.memory_space<vmem>>, vector<1x32xf32>
    %4 = vector.broadcast %3 : vector<1x32xf32> to vector<16x32xf32>
    %5 = arith.addf %2, %4 : vector<16x32xf32>
    %c0_5 = arith.constant 0 : index
    %c0_6 = arith.constant 0 : index
    %6 = vector.load %arg7[%c0_5, %c0_6] : memref<16x32xf32, #tpu.memory_space<vmem>>, vector<16x32xf32>
    tpu.vector_store %arg7[%c0_5, %c0_6], %5 {strides = array<i32>} : memref<16x32xf32, #tpu.memory_space<vmem>>, vector<16x32xf32>,
    %c0_7 = arith.constant 0 : index
    %c0_8 = arith.constant 0 : index
    %7 = vector.load %arg2[%c0_7, %c0_8] : memref<16x32xf32, #tpu.memory_space<vmem>>, vector<16x32xf32>
    %c0_9 = arith.constant 0 : index
    %c0_10 = arith.constant 0 : index
    %8 = vector.load %arg4[%c0_9, %c0_10] : memref<32x32xf32, #tpu.memory_space<vmem>>, vector<32x32xf32>
    %cst_11 = arith.constant dense<0.000000e+00> : vector<16x32xf32>
    %9 = tpu.matmul %7, %8, %cst_11 {dimension_numbers = #tpu.dot_dimension_numbers<[1], [0], [0], [1], [0, 0, 1, 1], [], []>} : vector<16x32xf32>, vector<32x32xf32>, vector<16x32xf32> -> vector<16x32xf32>
    %c0_12 = arith.constant 0 : index
    %c0_13 = arith.constant 0 : index
    %10 = vector.load %arg6[%c0_12, %c0_13] : memref<1x32xf32, #tpu.memory_space<vmem>>, vector<1x32xf32>
    %11 = vector.broadcast %10 : vector<1x32xf32> to vector<16x32xf32>
    %12 = arith.addf %9, %11 : vector<16x32xf32>
    %c0_14 = arith.constant 0 : index
    %c0_15 = arith.constant 0 : index
    %13 = vector.load %arg8[%c0_14, %c0_15] : memref<16x32xf32, #tpu.memory_space<vmem>>, vector<16x32xf32>
    tpu.vector_store %arg8[%c0_14, %c0_15], %12 {strides = array<i32>} : memref<16x32xf32, #tpu.memory_space<vmem>>, vector<16x32xf32>,
    return
  }
  func.func @transform_0(%arg0: i32) -> (i32, i32) {
    %c0_i32 = arith.constant 0 : i32
    %c0_i32_0 = arith.constant 0 : i32
    return %arg0, %c0_i32 : i32, i32
  }
  func.func @transform_1(%arg0: i32) -> (i32, i32) {
    %c0_i32 = arith.constant 0 : i32
    %c0_i32_0 = arith.constant 0 : i32
    return %arg0, %c0_i32 : i32, i32
  }
  func.func @transform_2(%arg0: i32) -> (i32, i32) {
    %c0_i32 = arith.constant 0 : i32
    %c0_i32_0 = arith.constant 0 : i32
    %c0_i32_1 = arith.constant 0 : i32
    return %c0_i32, %c0_i32_0 : i32, i32
  }
  func.func @transform_3(%arg0: i32) -> (i32, i32) {
    %c0_i32 = arith.constant 0 : i32
    %c0_i32_0 = arith.constant 0 : i32
    %c0_i32_1 = arith.constant 0 : i32
    return %c0_i32, %c0_i32_0 : i32, i32
  }
  func.func @transform_4(%arg0: i32) -> (i32, i32) {
    %c0_i32 = arith.constant 0 : i32
    %c0_i32_0 = arith.constant 0 : i32
    %c0_i32_1 = arith.constant 0 : i32
    return %c0_i32, %c0_i32_0 : i32, i32
  }
  func.func @transform_5(%arg0: i32) -> (i32, i32) {
    %c0_i32 = arith.constant 0 : i32
    %c0_i32_0 = arith.constant 0 : i32
    %c0_i32_1 = arith.constant 0 : i32
    return %c0_i32, %c0_i32_0 : i32, i32
  }
  func.func @transform_6(%arg0: i32) -> (i32, i32) {
    %c0_i32 = arith.constant 0 : i32
    %c0_i32_0 = arith.constant 0 : i32
    return %arg0, %c0_i32 : i32, i32
  }
  func.func @transform_7(%arg0: i32) -> (i32, i32) {
    %c0_i32 = arith.constant 0 : i32
    %c0_i32_0 = arith.constant 0 : i32
    return %arg0, %c0_i32 : i32, i32
  }
}

module attributes {stable_mosaic.version = 11 : i64} {
  func.func @kernel(%arg0: i32, %arg1: memref<16x32xf32, #tpu.memory_space<vmem>>, %arg2: memref<16x32xf32, #tpu.memory_space<vmem>>, %arg3: memref<16x32xf32, #tpu.memory_space<vmem>>, %arg4: memref<16x32xf32, #tpu.memory_space<vmem>>, %arg5: memref<32x32xf32, #tpu.memory_space<vmem>>, %arg6: memref<32x32xf32, #tpu.memory_space<vmem>>, %arg7: memref<32x32xf32, #tpu.memory_space<vmem>>, %arg8: memref<32x32xf32, #tpu.memory_space<vmem>>, %arg9: memref<16x32xf32, #tpu.memory_space<vmem>>, %arg10: memref<16x32xf32, #tpu.memory_space<vmem>>, %arg11: memref<16x32xf32, #tpu.memory_space<vmem>>, %arg12: memref<16x32xf32, #tpu.memory_space<vmem>>) attributes {dimension_semantics = [#tpu.dimension_semantics<parallel>], iteration_bounds = array<i64: 1>, scalar_prefetch = 0 : i64, scratch_operands = 0 : i64, tpu.core_type = #tpu.core_type<tc>, window_params = [{transform_indices = @transform_0, window_bounds = array<i64: 16, 32>}, {transform_indices = @transform_1, window_bounds = array<i64: 16, 32>}, {transform_indices = @transform_2, window_bounds = array<i64: 16, 32>}, {transform_indices = @transform_3, window_bounds = array<i64: 16, 32>}, {pipeline_mode = #tpu.pipeline_mode<synchronous>, transform_indices = @transform_4, window_bounds = array<i64: 32, 32>}, {pipeline_mode = #tpu.pipeline_mode<synchronous>, transform_indices = @transform_5, window_bounds = array<i64: 32, 32>}, {pipeline_mode = #tpu.pipeline_mode<synchronous>, transform_indices = @transform_6, window_bounds = array<i64: 32, 32>}, {pipeline_mode = #tpu.pipeline_mode<synchronous>, transform_indices = @transform_7, window_bounds = array<i64: 32, 32>}, {transform_indices = @transform_8, window_bounds = array<i64: 16, 32>}, {transform_indices = @transform_9, window_bounds = array<i64: 16, 32>}, {transform_indices = @transform_10, window_bounds = array<i64: 16, 32>}, {transform_indices = @transform_11, window_bounds = array<i64: 16, 32>}]} {
    %c0 = arith.constant 0 : index
    %c0_0 = arith.constant 0 : index
    %0 = vector.load %arg1[%c0, %c0_0] : memref<16x32xf32, #tpu.memory_space<vmem>>, vector<16x32xf32>
    %c0_1 = arith.constant 0 : index
    %c0_2 = arith.constant 0 : index
    %1 = vector.load %arg5[%c0_1, %c0_2] : memref<32x32xf32, #tpu.memory_space<vmem>>, vector<32x32xf32>
    %cst = arith.constant dense<0.000000e+00> : vector<16x32xf32>
    %2 = tpu.matmul %0, %1, %cst {dimension_numbers = #tpu.dot_dimension_numbers<[1], [0], [0], [1], [0, 0, 1, 1], [], []>} : vector<16x32xf32>, vector<32x32xf32>, vector<16x32xf32> -> vector<16x32xf32>
    %c0_3 = arith.constant 0 : index
    %c0_4 = arith.constant 0 : index
    %3 = vector.load %arg9[%c0_3, %c0_4] : memref<16x32xf32, #tpu.memory_space<vmem>>, vector<16x32xf32>
    tpu.vector_store %arg9[%c0_3, %c0_4], %2 {strides = array<i32>} : memref<16x32xf32, #tpu.memory_space<vmem>>, vector<16x32xf32>,
    %c0_5 = arith.constant 0 : index
    %c0_6 = arith.constant 0 : index
    %4 = vector.load %arg2[%c0_5, %c0_6] : memref<16x32xf32, #tpu.memory_space<vmem>>, vector<16x32xf32>
    %c0_7 = arith.constant 0 : index
    %c0_8 = arith.constant 0 : index
    %5 = vector.load %arg6[%c0_7, %c0_8] : memref<32x32xf32, #tpu.memory_space<vmem>>, vector<32x32xf32>
    %cst_9 = arith.constant dense<0.000000e+00> : vector<16x32xf32>
    %6 = tpu.matmul %4, %5, %cst_9 {dimension_numbers = #tpu.dot_dimension_numbers<[1], [0], [0], [1], [0, 0, 1, 1], [], []>} : vector<16x32xf32>, vector<32x32xf32>, vector<16x32xf32> -> vector<16x32xf32>
    %c0_10 = arith.constant 0 : index
    %c0_11 = arith.constant 0 : index
    %7 = vector.load %arg10[%c0_10, %c0_11] : memref<16x32xf32, #tpu.memory_space<vmem>>, vector<16x32xf32>
    tpu.vector_store %arg10[%c0_10, %c0_11], %6 {strides = array<i32>} : memref<16x32xf32, #tpu.memory_space<vmem>>, vector<16x32xf32>,
    %c0_12 = arith.constant 0 : index
    %c0_13 = arith.constant 0 : index
    %8 = vector.load %arg3[%c0_12, %c0_13] : memref<16x32xf32, #tpu.memory_space<vmem>>, vector<16x32xf32>
    %c0_14 = arith.constant 0 : index
    %c0_15 = arith.constant 0 : index
    %9 = vector.load %arg7[%c0_14, %c0_15] : memref<32x32xf32, #tpu.memory_space<vmem>>, vector<32x32xf32>
    %cst_16 = arith.constant dense<0.000000e+00> : vector<16x32xf32>
    %10 = tpu.matmul %8, %9, %cst_16 {dimension_numbers = #tpu.dot_dimension_numbers<[1], [0], [0], [1], [0, 0, 1, 1], [], []>} : vector<16x32xf32>, vector<32x32xf32>, vector<16x32xf32> -> vector<16x32xf32>
    %c0_17 = arith.constant 0 : index
    %c0_18 = arith.constant 0 : index
    %11 = vector.load %arg11[%c0_17, %c0_18] : memref<16x32xf32, #tpu.memory_space<vmem>>, vector<16x32xf32>
    tpu.vector_store %arg11[%c0_17, %c0_18], %10 {strides = array<i32>} : memref<16x32xf32, #tpu.memory_space<vmem>>, vector<16x32xf32>,
    %c0_19 = arith.constant 0 : index
    %c0_20 = arith.constant 0 : index
    %12 = vector.load %arg4[%c0_19, %c0_20] : memref<16x32xf32, #tpu.memory_space<vmem>>, vector<16x32xf32>
    %c0_21 = arith.constant 0 : index
    %c0_22 = arith.constant 0 : index
    %13 = vector.load %arg8[%c0_21, %c0_22] : memref<32x32xf32, #tpu.memory_space<vmem>>, vector<32x32xf32>
    %cst_23 = arith.constant dense<0.000000e+00> : vector<16x32xf32>
    %14 = tpu.matmul %12, %13, %cst_23 {dimension_numbers = #tpu.dot_dimension_numbers<[1], [0], [0], [1], [0, 0, 1, 1], [], []>} : vector<16x32xf32>, vector<32x32xf32>, vector<16x32xf32> -> vector<16x32xf32>
    %c0_24 = arith.constant 0 : index
    %c0_25 = arith.constant 0 : index
    %15 = vector.load %arg12[%c0_24, %c0_25] : memref<16x32xf32, #tpu.memory_space<vmem>>, vector<16x32xf32>
    tpu.vector_store %arg12[%c0_24, %c0_25], %14 {strides = array<i32>} : memref<16x32xf32, #tpu.memory_space<vmem>>, vector<16x32xf32>,
    return
  }
  func.func @transform_0(%arg0: i32) -> (i32, i32) {
    %c0_i32 = arith.constant 0 : i32
    %c0_i32_0 = arith.constant 0 : i32
    return %arg0, %c0_i32 : i32, i32
  }
  func.func @transform_1(%arg0: i32) -> (i32, i32) {
    %c0_i32 = arith.constant 0 : i32
    %c0_i32_0 = arith.constant 0 : i32
    return %arg0, %c0_i32 : i32, i32
  }
  func.func @transform_2(%arg0: i32) -> (i32, i32) {
    %c0_i32 = arith.constant 0 : i32
    %c0_i32_0 = arith.constant 0 : i32
    return %arg0, %c0_i32 : i32, i32
  }
  func.func @transform_3(%arg0: i32) -> (i32, i32) {
    %c0_i32 = arith.constant 0 : i32
    %c0_i32_0 = arith.constant 0 : i32
    return %arg0, %c0_i32 : i32, i32
  }
  func.func @transform_4(%arg0: i32) -> (i32, i32) {
    %c0_i32 = arith.constant 0 : i32
    %c0_i32_0 = arith.constant 0 : i32
    %c0_i32_1 = arith.constant 0 : i32
    return %c0_i32, %c0_i32_0 : i32, i32
  }
  func.func @transform_5(%arg0: i32) -> (i32, i32) {
    %c0_i32 = arith.constant 0 : i32
    %c0_i32_0 = arith.constant 0 : i32
    %c0_i32_1 = arith.constant 0 : i32
    return %c0_i32, %c0_i32_0 : i32, i32
  }
  func.func @transform_6(%arg0: i32) -> (i32, i32) {
    %c0_i32 = arith.constant 0 : i32
    %c0_i32_0 = arith.constant 0 : i32
    %c0_i32_1 = arith.constant 0 : i32
    return %c0_i32, %c0_i32_0 : i32, i32
  }
  func.func @transform_7(%arg0: i32) -> (i32, i32) {
    %c0_i32 = arith.constant 0 : i32
    %c0_i32_0 = arith.constant 0 : i32
    %c0_i32_1 = arith.constant 0 : i32
    return %c0_i32, %c0_i32_0 : i32, i32
  }
  func.func @transform_8(%arg0: i32) -> (i32, i32) {
    %c0_i32 = arith.constant 0 : i32
    %c0_i32_0 = arith.constant 0 : i32
    return %arg0, %c0_i32 : i32, i32
  }
  func.func @transform_9(%arg0: i32) -> (i32, i32) {
    %c0_i32 = arith.constant 0 : i32
    %c0_i32_0 = arith.constant 0 : i32
    return %arg0, %c0_i32 : i32, i32
  }
  func.func @transform_10(%arg0: i32) -> (i32, i32) {
    %c0_i32 = arith.constant 0 : i32
    %c0_i32_0 = arith.constant 0 : i32
    return %arg0, %c0_i32 : i32, i32
  }
  func.func @transform_11(%arg0: i32) -> (i32, i32) {
    %c0_i32 = arith.constant 0 : i32
    %c0_i32_0 = arith.constant 0 : i32
    return %arg0, %c0_i32 : i32, i32
  }
}

module attributes {stable_mosaic.version = 11 : i64} {
  func.func @kernel(%arg0: i32, %arg1: memref<16x32xf32, #tpu.memory_space<vmem>>, %arg2: memref<16x32xf32, #tpu.memory_space<vmem>>, %arg3: memref<32x32xf32, #tpu.memory_space<vmem>>, %arg4: memref<32x32xf32, #tpu.memory_space<vmem>>, %arg5: memref<16x32xf32, #tpu.memory_space<vmem>>, %arg6: memref<16x32xf32, #tpu.memory_space<vmem>>) attributes {dimension_semantics = [#tpu.dimension_semantics<parallel>], iteration_bounds = array<i64: 1>, scalar_prefetch = 0 : i64, scratch_operands = 0 : i64, tpu.core_type = #tpu.core_type<tc>, window_params = [{transform_indices = @transform_0, window_bounds = array<i64: 16, 32>}, {transform_indices = @transform_1, window_bounds = array<i64: 16, 32>}, {pipeline_mode = #tpu.pipeline_mode<synchronous>, transform_indices = @transform_2, window_bounds = array<i64: 32, 32>}, {pipeline_mode = #tpu.pipeline_mode<synchronous>, transform_indices = @transform_3, window_bounds = array<i64: 32, 32>}, {transform_indices = @transform_4, window_bounds = array<i64: 16, 32>}, {transform_indices = @transform_5, window_bounds = array<i64: 16, 32>}]} {
    %c0 = arith.constant 0 : index
    %c0_0 = arith.constant 0 : index
    %0 = vector.load %arg1[%c0, %c0_0] : memref<16x32xf32, #tpu.memory_space<vmem>>, vector<16x32xf32>
    %c0_1 = arith.constant 0 : index
    %c0_2 = arith.constant 0 : index
    %1 = vector.load %arg3[%c0_1, %c0_2] : memref<32x32xf32, #tpu.memory_space<vmem>>, vector<32x32xf32>
    %cst = arith.constant dense<0.000000e+00> : vector<16x32xf32>
    %2 = tpu.matmul %0, %1, %cst {dimension_numbers = #tpu.dot_dimension_numbers<[1], [0], [0], [1], [0, 0, 1, 1], [], []>} : vector<16x32xf32>, vector<32x32xf32>, vector<16x32xf32> -> vector<16x32xf32>
    %c0_3 = arith.constant 0 : index
    %c0_4 = arith.constant 0 : index
    %3 = vector.load %arg5[%c0_3, %c0_4] : memref<16x32xf32, #tpu.memory_space<vmem>>, vector<16x32xf32>
    tpu.vector_store %arg5[%c0_3, %c0_4], %2 {strides = array<i32>} : memref<16x32xf32, #tpu.memory_space<vmem>>, vector<16x32xf32>,
    %c0_5 = arith.constant 0 : index
    %c0_6 = arith.constant 0 : index
    %4 = vector.load %arg2[%c0_5, %c0_6] : memref<16x32xf32, #tpu.memory_space<vmem>>, vector<16x32xf32>
    %c0_7 = arith.constant 0 : index
    %c0_8 = arith.constant 0 : index
    %5 = vector.load %arg4[%c0_7, %c0_8] : memref<32x32xf32, #tpu.memory_space<vmem>>, vector<32x32xf32>
    %cst_9 = arith.constant dense<0.000000e+00> : vector<16x32xf32>
    %6 = tpu.matmul %4, %5, %cst_9 {dimension_numbers = #tpu.dot_dimension_numbers<[1], [0], [0], [1], [0, 0, 1, 1], [], []>} : vector<16x32xf32>, vector<32x32xf32>, vector<16x32xf32> -> vector<16x32xf32>
    %c0_10 = arith.constant 0 : index
    %c0_11 = arith.constant 0 : index
    %7 = vector.load %arg6[%c0_10, %c0_11] : memref<16x32xf32, #tpu.memory_space<vmem>>, vector<16x32xf32>
    tpu.vector_store %arg6[%c0_10, %c0_11], %6 {strides = array<i32>} : memref<16x32xf32, #tpu.memory_space<vmem>>, vector<16x32xf32>,
    return
  }
  func.func @transform_0(%arg0: i32) -> (i32, i32) {
    %c0_i32 = arith.constant 0 : i32
    %c0_i32_0 = arith.constant 0 : i32
    return %arg0, %c0_i32 : i32, i32
  }
  func.func @transform_1(%arg0: i32) -> (i32, i32) {
    %c0_i32 = arith.constant 0 : i32
    %c0_i32_0 = arith.constant 0 : i32
    return %arg0, %c0_i32 : i32, i32
  }
  func.func @transform_2(%arg0: i32) -> (i32, i32) {
    %c0_i32 = arith.constant 0 : i32
    %c0_i32_0 = arith.constant 0 : i32
    %c0_i32_1 = arith.constant 0 : i32
    return %c0_i32, %c0_i32_0 : i32, i32
  }
  func.func @transform_3(%arg0: i32) -> (i32, i32) {
    %c0_i32 = arith.constant 0 : i32
    %c0_i32_0 = arith.constant 0 : i32
    %c0_i32_1 = arith.constant 0 : i32
    return %c0_i32, %c0_i32_0 : i32, i32
  }
  func.func @transform_4(%arg0: i32) -> (i32, i32) {
    %c0_i32 = arith.constant 0 : i32
    %c0_i32_0 = arith.constant 0 : i32
    return %arg0, %c0_i32 : i32, i32
  }
  func.func @transform_5(%arg0: i32) -> (i32, i32) {
    %c0_i32 = arith.constant 0 : i32
    %c0_i32_0 = arith.constant 0 : i32
    return %arg0, %c0_i32 : i32, i32
  }
}

module attributes {stable_mosaic.version = 11 : i64} {
  func.func @_guided_attn_kernel(%arg0: i32, %arg1: i32, %arg2: memref<8x1x1x32xf32, #tpu.memory_space<vmem>>, %arg3: memref<8x1x1x32xf32, #tpu.memory_space<vmem>>, %arg4: memref<8x1x1x32xf32, #tpu.memory_space<vmem>>, %arg5: memref<8x1x1x32xf32, #tpu.memory_space<vmem>>, %arg6: memref<8x1x1x32xf32, #tpu.memory_space<vmem>>, %arg7: memref<8x1x1x32xf32, #tpu.memory_space<vmem>>, %arg8: memref<1x8x32xf32, #tpu.memory_space<vmem>>, %arg9: memref<1x8x32xf32, #tpu.memory_space<vmem>>) attributes {dimension_semantics = [#tpu.dimension_semantics<parallel>, #tpu.dimension_semantics<parallel>], iteration_bounds = array<i64: 2, 1>, scalar_prefetch = 0 : i64, scratch_operands = 0 : i64, tpu.core_type = #tpu.core_type<tc>, window_params = [{transform_indices = @transform_0, window_bounds = array<i64: 8, 1, 1, 32>}, {pipeline_mode = #tpu.pipeline_mode<synchronous>, transform_indices = @transform_1, window_bounds = array<i64: 8, 1, 1, 32>}, {pipeline_mode = #tpu.pipeline_mode<synchronous>, transform_indices = @transform_2, window_bounds = array<i64: 8, 1, 1, 32>}, {transform_indices = @transform_3, window_bounds = array<i64: 8, 1, 1, 32>}, {pipeline_mode = #tpu.pipeline_mode<synchronous>, transform_indices = @transform_4, window_bounds = array<i64: 8, 1, 1, 32>}, {pipeline_mode = #tpu.pipeline_mode<synchronous>, transform_indices = @transform_5, window_bounds = array<i64: 8, 1, 1, 32>}, {transform_indices = @transform_6, window_bounds = array<i64: 1, 8, 32>}, {transform_indices = @transform_7, window_bounds = array<i64: 1, 8, 32>}]} {
    %c0 = arith.constant 0 : index
    %c0_0 = arith.constant 0 : index
    %c0_1 = arith.constant 0 : index
    %c0_2 = arith.constant 0 : index
    %0 = vector.load %arg2[%c0, %c0_0, %c0_1, %c0_2] : memref<8x1x1x32xf32, #tpu.memory_space<vmem>>, vector<8x1x1x32xf32>
    %1 = vector.shape_cast %0 : vector<8x1x1x32xf32> to vector<8x32xf32>
    %cst = arith.constant 5.000000e-01 : f32
    %2 = vector.broadcast %cst : f32 to vector<8x32xf32>
    %3 = arith.mulf %1, %2 : vector<8x32xf32>
    %c0_3 = arith.constant 0 : index
    %c0_4 = arith.constant 0 : index
    %c0_5 = arith.constant 0 : index
    %c0_6 = arith.constant 0 : index
    %4 = vector.load %arg5[%c0_3, %c0_4, %c0_5, %c0_6] : memref<8x1x1x32xf32, #tpu.memory_space<vmem>>, vector<8x1x1x32xf32>
    %5 = vector.shape_cast %4 : vector<8x1x1x32xf32> to vector<8x32xf32>
    %cst_7 = arith.constant 5.000000e-01 : f32
    %6 = vector.broadcast %cst_7 : f32 to vector<8x32xf32>
    %7 = arith.mulf %5, %6 : vector<8x32xf32>
    %c0_8 = arith.constant 0 : index
    %c0_9 = arith.constant 0 : index
    %c0_10 = arith.constant 0 : index
    %c0_11 = arith.constant 0 : index
    %8 = vector.load %arg3[%c0_8, %c0_9, %c0_10, %c0_11] : memref<8x1x1x32xf32, #tpu.memory_space<vmem>>, vector<8x1x1x32xf32>
    %9 = vector.shape_cast %8 : vector<8x1x1x32xf32> to vector<8x32xf32>
    %c0_12 = arith.constant 0 : index
    %c0_13 = arith.constant 0 : index
    %c0_14 = arith.constant 0 : index
    %c0_15 = arith.constant 0 : index
    %10 = vector.load %arg4[%c0_12, %c0_13, %c0_14, %c0_15] : memref<8x1x1x32xf32, #tpu.memory_space<vmem>>, vector<8x1x1x32xf32>
    %11 = vector.shape_cast %10 : vector<8x1x1x32xf32> to vector<8x32xf32>
    %c0_16 = arith.constant 0 : index
    %c0_17 = arith.constant 0 : index
    %c0_18 = arith.constant 0 : index
    %c0_19 = arith.constant 0 : index
    %12 = vector.load %arg6[%c0_16, %c0_17, %c0_18, %c0_19] : memref<8x1x1x32xf32, #tpu.memory_space<vmem>>, vector<8x1x1x32xf32>
    %13 = vector.shape_cast %12 : vector<8x1x1x32xf32> to vector<8x32xf32>
    %c0_20 = arith.constant 0 : index
    %c0_21 = arith.constant 0 : index
    %c0_22 = arith.constant 0 : index
    %c0_23 = arith.constant 0 : index
    %14 = vector.load %arg7[%c0_20, %c0_21, %c0_22, %c0_23] : memref<8x1x1x32xf32, #tpu.memory_space<vmem>>, vector<8x1x1x32xf32>
    %15 = vector.shape_cast %14 : vector<8x1x1x32xf32> to vector<8x32xf32>
    %16 = vector.extract_strided_slice %3 {offsets = [0, 0], sizes = [8, 4], strides = [1, 1]} : vector<8x32xf32> to vector<8x4xf32>
    %17 = vector.extract_strided_slice %9 {offsets = [0, 0], sizes = [8, 4], strides = [1, 1]} : vector<8x32xf32> to vector<8x4xf32>
    %cst_24 = arith.constant dense<0.000000e+00> : vector<8x8xf32>
    %18 = tpu.matmul %16, %17, %cst_24 {dimension_numbers = #tpu.dot_dimension_numbers<[1], [1], [0], [0], [0, 0, 1, 0], [], []>} : vector<8x4xf32>, vector<8x4xf32>, vector<8x8xf32> -> vector<8x8xf32>
    %cst_25 = arith.constant dense<0xFF800000> : vector<8xf32>
    %19 = vector.multi_reduction <maximumf>, %18, %cst_25 [1] : vector<8x8xf32> to vector<8xf32>
    %20 = vector.shape_cast %19 : vector<8xf32> to vector<8x1xf32>
    %21 = vector.broadcast %20 : vector<8x1xf32> to vector<8x8xf32>
    %22 = arith.subf %18, %21 : vector<8x8xf32>
    %23 = math.exp %22 : vector<8x8xf32>
    %cst_26 = arith.constant dense<0.000000e+00> : vector<8xf32>
    %24 = vector.multi_reduction <add>, %23, %cst_26 [1] : vector<8x8xf32> to vector<8xf32>
    %25 = vector.shape_cast %24 : vector<8xf32> to vector<8x1xf32>
    %26 = tpu.reciprocal %25 {approx = true} : vector<8x1xf32> -> vector<8x1xf32>
    %27 = vector.broadcast %26 : vector<8x1xf32> to vector<8x8xf32>
    %28 = arith.mulf %23, %27 : vector<8x8xf32>
    %29 = vector.extract_strided_slice %11 {offsets = [0, 0], sizes = [8, 4], strides = [1, 1]} : vector<8x32xf32> to vector<8x4xf32>
    %cst_27 = arith.constant dense<0.000000e+00> : vector<8x4xf32>
    %30 = tpu.matmul %28, %29, %cst_27 {dimension_numbers = #tpu.dot_dimension_numbers<[1], [0], [0], [1], [0, 0, 1, 1], [], []>} : vector<8x8xf32>, vector<8x4xf32>, vector<8x4xf32> -> vector<8x4xf32>
    %31 = vector.extract_strided_slice %7 {offsets = [0, 0], sizes = [8, 4], strides = [1, 1]} : vector<8x32xf32> to vector<8x4xf32>
    %32 = vector.extract_strided_slice %13 {offsets = [0, 0], sizes = [8, 4], strides = [1, 1]} : vector<8x32xf32> to vector<8x4xf32>
    %cst_28 = arith.constant dense<0.000000e+00> : vector<8x8xf32>
    %33 = tpu.matmul %31, %32, %cst_28 {dimension_numbers = #tpu.dot_dimension_numbers<[1], [1], [0], [0], [0, 0, 1, 0], [], []>} : vector<8x4xf32>, vector<8x4xf32>, vector<8x8xf32> -> vector<8x8xf32>
    %34 = arith.mulf %33, %28 : vector<8x8xf32>
    %cst_29 = arith.constant dense<0xFF800000> : vector<8xf32>
    %35 = vector.multi_reduction <maximumf>, %34, %cst_29 [1] : vector<8x8xf32> to vector<8xf32>
    %36 = vector.shape_cast %35 : vector<8xf32> to vector<8x1xf32>
    %37 = vector.broadcast %36 : vector<8x1xf32> to vector<8x8xf32>
    %38 = arith.subf %34, %37 : vector<8x8xf32>
    %39 = math.exp %38 : vector<8x8xf32>
    %cst_30 = arith.constant dense<0.000000e+00> : vector<8xf32>
    %40 = vector.multi_reduction <add>, %39, %cst_30 [1] : vector<8x8xf32> to vector<8xf32>
    %41 = vector.shape_cast %40 : vector<8xf32> to vector<8x1xf32>
    %42 = tpu.reciprocal %41 {approx = true} : vector<8x1xf32> -> vector<8x1xf32>
    %43 = vector.extract_strided_slice %15 {offsets = [0, 0], sizes = [8, 4], strides = [1, 1]} : vector<8x32xf32> to vector<8x4xf32>
    %cst_31 = arith.constant dense<0.000000e+00> : vector<8x4xf32>
    %44 = tpu.matmul %39, %43, %cst_31 {dimension_numbers = #tpu.dot_dimension_numbers<[1], [0], [0], [1], [0, 0, 1, 1], [], []>} : vector<8x8xf32>, vector<8x4xf32>, vector<8x4xf32> -> vector<8x4xf32>
    %45 = vector.broadcast %42 : vector<8x1xf32> to vector<8x4xf32>
    %46 = arith.mulf %44, %45 : vector<8x4xf32>
    %47 = vector.extract_strided_slice %3 {offsets = [0, 4], sizes = [8, 4], strides = [1, 1]} : vector<8x32xf32> to vector<8x4xf32>
    %48 = vector.extract_strided_slice %9 {offsets = [0, 4], sizes = [8, 4], strides = [1, 1]} : vector<8x32xf32> to vector<8x4xf32>
    %cst_32 = arith.constant dense<0.000000e+00> : vector<8x8xf32>
    %49 = tpu.matmul %47, %48, %cst_32 {dimension_numbers = #tpu.dot_dimension_numbers<[1], [1], [0], [0], [0, 0, 1, 0], [], []>} : vector<8x4xf32>, vector<8x4xf32>, vector<8x8xf32> -> vector<8x8xf32>
    %cst_33 = arith.constant dense<0xFF800000> : vector<8xf32>
    %50 = vector.multi_reduction <maximumf>, %49, %cst_33 [1] : vector<8x8xf32> to vector<8xf32>
    %51 = vector.shape_cast %50 : vector<8xf32> to vector<8x1xf32>
    %52 = vector.broadcast %51 : vector<8x1xf32> to vector<8x8xf32>
    %53 = arith.subf %49, %52 : vector<8x8xf32>
    %54 = math.exp %53 : vector<8x8xf32>
    %cst_34 = arith.constant dense<0.000000e+00> : vector<8xf32>
    %55 = vector.multi_reduction <add>, %54, %cst_34 [1] : vector<8x8xf32> to vector<8xf32>
    %56 = vector.shape_cast %55 : vector<8xf32> to vector<8x1xf32>
    %57 = tpu.reciprocal %56 {approx = true} : vector<8x1xf32> -> vector<8x1xf32>
    %58 = vector.broadcast %57 : vector<8x1xf32> to vector<8x8xf32>
    %59 = arith.mulf %54, %58 : vector<8x8xf32>
    %60 = vector.extract_strided_slice %11 {offsets = [0, 4], sizes = [8, 4], strides = [1, 1]} : vector<8x32xf32> to vector<8x4xf32>
    %cst_35 = arith.constant dense<0.000000e+00> : vector<8x4xf32>
    %61 = tpu.matmul %59, %60, %cst_35 {dimension_numbers = #tpu.dot_dimension_numbers<[1], [0], [0], [1], [0, 0, 1, 1], [], []>} : vector<8x8xf32>, vector<8x4xf32>, vector<8x4xf32> -> vector<8x4xf32>
    %62 = vector.extract_strided_slice %7 {offsets = [0, 4], sizes = [8, 4], strides = [1, 1]} : vector<8x32xf32> to vector<8x4xf32>
    %63 = vector.extract_strided_slice %13 {offsets = [0, 4], sizes = [8, 4], strides = [1, 1]} : vector<8x32xf32> to vector<8x4xf32>
    %cst_36 = arith.constant dense<0.000000e+00> : vector<8x8xf32>
    %64 = tpu.matmul %62, %63, %cst_36 {dimension_numbers = #tpu.dot_dimension_numbers<[1], [1], [0], [0], [0, 0, 1, 0], [], []>} : vector<8x4xf32>, vector<8x4xf32>, vector<8x8xf32> -> vector<8x8xf32>
    %65 = arith.mulf %64, %59 : vector<8x8xf32>
    %cst_37 = arith.constant dense<0xFF800000> : vector<8xf32>
    %66 = vector.multi_reduction <maximumf>, %65, %cst_37 [1] : vector<8x8xf32> to vector<8xf32>
    %67 = vector.shape_cast %66 : vector<8xf32> to vector<8x1xf32>
    %68 = vector.broadcast %67 : vector<8x1xf32> to vector<8x8xf32>
    %69 = arith.subf %65, %68 : vector<8x8xf32>
    %70 = math.exp %69 : vector<8x8xf32>
    %cst_38 = arith.constant dense<0.000000e+00> : vector<8xf32>
    %71 = vector.multi_reduction <add>, %70, %cst_38 [1] : vector<8x8xf32> to vector<8xf32>
    %72 = vector.shape_cast %71 : vector<8xf32> to vector<8x1xf32>
    %73 = tpu.reciprocal %72 {approx = true} : vector<8x1xf32> -> vector<8x1xf32>
    %74 = vector.extract_strided_slice %15 {offsets = [0, 4], sizes = [8, 4], strides = [1, 1]} : vector<8x32xf32> to vector<8x4xf32>
    %cst_39 = arith.constant dense<0.000000e+00> : vector<8x4xf32>
    %75 = tpu.matmul %70, %74, %cst_39 {dimension_numbers = #tpu.dot_dimension_numbers<[1], [0], [0], [1], [0, 0, 1, 1], [], []>} : vector<8x8xf32>, vector<8x4xf32>, vector<8x4xf32> -> vector<8x4xf32>
    %76 = vector.broadcast %73 : vector<8x1xf32> to vector<8x4xf32>
    %77 = arith.mulf %75, %76 : vector<8x4xf32>
    %78 = vector.extract_strided_slice %3 {offsets = [0, 8], sizes = [8, 4], strides = [1, 1]} : vector<8x32xf32> to vector<8x4xf32>
    %79 = vector.extract_strided_slice %9 {offsets = [0, 8], sizes = [8, 4], strides = [1, 1]} : vector<8x32xf32> to vector<8x4xf32>
    %cst_40 = arith.constant dense<0.000000e+00> : vector<8x8xf32>
    %80 = tpu.matmul %78, %79, %cst_40 {dimension_numbers = #tpu.dot_dimension_numbers<[1], [1], [0], [0], [0, 0, 1, 0], [], []>} : vector<8x4xf32>, vector<8x4xf32>, vector<8x8xf32> -> vector<8x8xf32>
    %cst_41 = arith.constant dense<0xFF800000> : vector<8xf32>
    %81 = vector.multi_reduction <maximumf>, %80, %cst_41 [1] : vector<8x8xf32> to vector<8xf32>
    %82 = vector.shape_cast %81 : vector<8xf32> to vector<8x1xf32>
    %83 = vector.broadcast %82 : vector<8x1xf32> to vector<8x8xf32>
    %84 = arith.subf %80, %83 : vector<8x8xf32>
    %85 = math.exp %84 : vector<8x8xf32>
    %cst_42 = arith.constant dense<0.000000e+00> : vector<8xf32>
    %86 = vector.multi_reduction <add>, %85, %cst_42 [1] : vector<8x8xf32> to vector<8xf32>
    %87 = vector.shape_cast %86 : vector<8xf32> to vector<8x1xf32>
    %88 = tpu.reciprocal %87 {approx = true} : vector<8x1xf32> -> vector<8x1xf32>
    %89 = vector.broadcast %88 : vector<8x1xf32> to vector<8x8xf32>
    %90 = arith.mulf %85, %89 : vector<8x8xf32>
    %91 = vector.extract_strided_slice %11 {offsets = [0, 8], sizes = [8, 4], strides = [1, 1]} : vector<8x32xf32> to vector<8x4xf32>
    %cst_43 = arith.constant dense<0.000000e+00> : vector<8x4xf32>
    %92 = tpu.matmul %90, %91, %cst_43 {dimension_numbers = #tpu.dot_dimension_numbers<[1], [0], [0], [1], [0, 0, 1, 1], [], []>} : vector<8x8xf32>, vector<8x4xf32>, vector<8x4xf32> -> vector<8x4xf32>
    %93 = vector.extract_strided_slice %7 {offsets = [0, 8], sizes = [8, 4], strides = [1, 1]} : vector<8x32xf32> to vector<8x4xf32>
    %94 = vector.extract_strided_slice %13 {offsets = [0, 8], sizes = [8, 4], strides = [1, 1]} : vector<8x32xf32> to vector<8x4xf32>
    %cst_44 = arith.constant dense<0.000000e+00> : vector<8x8xf32>
    %95 = tpu.matmul %93, %94, %cst_44 {dimension_numbers = #tpu.dot_dimension_numbers<[1], [1], [0], [0], [0, 0, 1, 0], [], []>} : vector<8x4xf32>, vector<8x4xf32>, vector<8x8xf32> -> vector<8x8xf32>
    %96 = arith.mulf %95, %90 : vector<8x8xf32>
    %cst_45 = arith.constant dense<0xFF800000> : vector<8xf32>
    %97 = vector.multi_reduction <maximumf>, %96, %cst_45 [1] : vector<8x8xf32> to vector<8xf32>
    %98 = vector.shape_cast %97 : vector<8xf32> to vector<8x1xf32>
    %99 = vector.broadcast %98 : vector<8x1xf32> to vector<8x8xf32>
    %100 = arith.subf %96, %99 : vector<8x8xf32>
    %101 = math.exp %100 : vector<8x8xf32>
    %cst_46 = arith.constant dense<0.000000e+00> : vector<8xf32>
    %102 = vector.multi_reduction <add>, %101, %cst_46 [1] : vector<8x8xf32> to vector<8xf32>
    %103 = vector.shape_cast %102 : vector<8xf32> to vector<8x1xf32>
    %104 = tpu.reciprocal %103 {approx = true} : vector<8x1xf32> -> vector<8x1xf32>
    %105 = vector.extract_strided_slice %15 {offsets = [0, 8], sizes = [8, 4], strides = [1, 1]} : vector<8x32xf32> to vector<8x4xf32>
    %cst_47 = arith.constant dense<0.000000e+00> : vector<8x4xf32>
    %106 = tpu.matmul %101, %105, %cst_47 {dimension_numbers = #tpu.dot_dimension_numbers<[1], [0], [0], [1], [0, 0, 1, 1], [], []>} : vector<8x8xf32>, vector<8x4xf32>, vector<8x4xf32> -> vector<8x4xf32>
    %107 = vector.broadcast %104 : vector<8x1xf32> to vector<8x4xf32>
    %108 = arith.mulf %106, %107 : vector<8x4xf32>
    %109 = vector.extract_strided_slice %3 {offsets = [0, 12], sizes = [8, 4], strides = [1, 1]} : vector<8x32xf32> to vector<8x4xf32>
    %110 = vector.extract_strided_slice %9 {offsets = [0, 12], sizes = [8, 4], strides = [1, 1]} : vector<8x32xf32> to vector<8x4xf32>
    %cst_48 = arith.constant dense<0.000000e+00> : vector<8x8xf32>
    %111 = tpu.matmul %109, %110, %cst_48 {dimension_numbers = #tpu.dot_dimension_numbers<[1], [1], [0], [0], [0, 0, 1, 0], [], []>} : vector<8x4xf32>, vector<8x4xf32>, vector<8x8xf32> -> vector<8x8xf32>
    %cst_49 = arith.constant dense<0xFF800000> : vector<8xf32>
    %112 = vector.multi_reduction <maximumf>, %111, %cst_49 [1] : vector<8x8xf32> to vector<8xf32>
    %113 = vector.shape_cast %112 : vector<8xf32> to vector<8x1xf32>
    %114 = vector.broadcast %113 : vector<8x1xf32> to vector<8x8xf32>
    %115 = arith.subf %111, %114 : vector<8x8xf32>
    %116 = math.exp %115 : vector<8x8xf32>
    %cst_50 = arith.constant dense<0.000000e+00> : vector<8xf32>
    %117 = vector.multi_reduction <add>, %116, %cst_50 [1] : vector<8x8xf32> to vector<8xf32>
    %118 = vector.shape_cast %117 : vector<8xf32> to vector<8x1xf32>
    %119 = tpu.reciprocal %118 {approx = true} : vector<8x1xf32> -> vector<8x1xf32>
    %120 = vector.broadcast %119 : vector<8x1xf32> to vector<8x8xf32>
    %121 = arith.mulf %116, %120 : vector<8x8xf32>
    %122 = vector.extract_strided_slice %11 {offsets = [0, 12], sizes = [8, 4], strides = [1, 1]} : vector<8x32xf32> to vector<8x4xf32>
    %cst_51 = arith.constant dense<0.000000e+00> : vector<8x4xf32>
    %123 = tpu.matmul %121, %122, %cst_51 {dimension_numbers = #tpu.dot_dimension_numbers<[1], [0], [0], [1], [0, 0, 1, 1], [], []>} : vector<8x8xf32>, vector<8x4xf32>, vector<8x4xf32> -> vector<8x4xf32>
    %124 = vector.extract_strided_slice %7 {offsets = [0, 12], sizes = [8, 4], strides = [1, 1]} : vector<8x32xf32> to vector<8x4xf32>
    %125 = vector.extract_strided_slice %13 {offsets = [0, 12], sizes = [8, 4], strides = [1, 1]} : vector<8x32xf32> to vector<8x4xf32>
    %cst_52 = arith.constant dense<0.000000e+00> : vector<8x8xf32>
    %126 = tpu.matmul %124, %125, %cst_52 {dimension_numbers = #tpu.dot_dimension_numbers<[1], [1], [0], [0], [0, 0, 1, 0], [], []>} : vector<8x4xf32>, vector<8x4xf32>, vector<8x8xf32> -> vector<8x8xf32>
    %127 = arith.mulf %126, %121 : vector<8x8xf32>
    %cst_53 = arith.constant dense<0xFF800000> : vector<8xf32>
    %128 = vector.multi_reduction <maximumf>, %127, %cst_53 [1] : vector<8x8xf32> to vector<8xf32>
    %129 = vector.shape_cast %128 : vector<8xf32> to vector<8x1xf32>
    %130 = vector.broadcast %129 : vector<8x1xf32> to vector<8x8xf32>
    %131 = arith.subf %127, %130 : vector<8x8xf32>
    %132 = math.exp %131 : vector<8x8xf32>
    %cst_54 = arith.constant dense<0.000000e+00> : vector<8xf32>
    %133 = vector.multi_reduction <add>, %132, %cst_54 [1] : vector<8x8xf32> to vector<8xf32>
    %134 = vector.shape_cast %133 : vector<8xf32> to vector<8x1xf32>
    %135 = tpu.reciprocal %134 {approx = true} : vector<8x1xf32> -> vector<8x1xf32>
    %136 = vector.extract_strided_slice %15 {offsets = [0, 12], sizes = [8, 4], strides = [1, 1]} : vector<8x32xf32> to vector<8x4xf32>
    %cst_55 = arith.constant dense<0.000000e+00> : vector<8x4xf32>
    %137 = tpu.matmul %132, %136, %cst_55 {dimension_numbers = #tpu.dot_dimension_numbers<[1], [0], [0], [1], [0, 0, 1, 1], [], []>} : vector<8x8xf32>, vector<8x4xf32>, vector<8x4xf32> -> vector<8x4xf32>
    %138 = vector.broadcast %135 : vector<8x1xf32> to vector<8x4xf32>
    %139 = arith.mulf %137, %138 : vector<8x4xf32>
    %140 = vector.extract_strided_slice %3 {offsets = [0, 16], sizes = [8, 4], strides = [1, 1]} : vector<8x32xf32> to vector<8x4xf32>
    %141 = vector.extract_strided_slice %9 {offsets = [0, 16], sizes = [8, 4], strides = [1, 1]} : vector<8x32xf32> to vector<8x4xf32>
    %cst_56 = arith.constant dense<0.000000e+00> : vector<8x8xf32>
    %142 = tpu.matmul %140, %141, %cst_56 {dimension_numbers = #tpu.dot_dimension_numbers<[1], [1], [0], [0], [0, 0, 1, 0], [], []>} : vector<8x4xf32>, vector<8x4xf32>, vector<8x8xf32> -> vector<8x8xf32>
    %cst_57 = arith.constant dense<0xFF800000> : vector<8xf32>
    %143 = vector.multi_reduction <maximumf>, %142, %cst_57 [1] : vector<8x8xf32> to vector<8xf32>
    %144 = vector.shape_cast %143 : vector<8xf32> to vector<8x1xf32>
    %145 = vector.broadcast %144 : vector<8x1xf32> to vector<8x8xf32>
    %146 = arith.subf %142, %145 : vector<8x8xf32>
    %147 = math.exp %146 : vector<8x8xf32>
    %cst_58 = arith.constant dense<0.000000e+00> : vector<8xf32>
    %148 = vector.multi_reduction <add>, %147, %cst_58 [1] : vector<8x8xf32> to vector<8xf32>
    %149 = vector.shape_cast %148 : vector<8xf32> to vector<8x1xf32>
    %150 = tpu.reciprocal %149 {approx = true} : vector<8x1xf32> -> vector<8x1xf32>
    %151 = vector.broadcast %150 : vector<8x1xf32> to vector<8x8xf32>
    %152 = arith.mulf %147, %151 : vector<8x8xf32>
    %153 = vector.extract_strided_slice %11 {offsets = [0, 16], sizes = [8, 4], strides = [1, 1]} : vector<8x32xf32> to vector<8x4xf32>
    %cst_59 = arith.constant dense<0.000000e+00> : vector<8x4xf32>
    %154 = tpu.matmul %152, %153, %cst_59 {dimension_numbers = #tpu.dot_dimension_numbers<[1], [0], [0], [1], [0, 0, 1, 1], [], []>} : vector<8x8xf32>, vector<8x4xf32>, vector<8x4xf32> -> vector<8x4xf32>
    %155 = vector.extract_strided_slice %7 {offsets = [0, 16], sizes = [8, 4], strides = [1, 1]} : vector<8x32xf32> to vector<8x4xf32>
    %156 = vector.extract_strided_slice %13 {offsets = [0, 16], sizes = [8, 4], strides = [1, 1]} : vector<8x32xf32> to vector<8x4xf32>
    %cst_60 = arith.constant dense<0.000000e+00> : vector<8x8xf32>
    %157 = tpu.matmul %155, %156, %cst_60 {dimension_numbers = #tpu.dot_dimension_numbers<[1], [1], [0], [0], [0, 0, 1, 0], [], []>} : vector<8x4xf32>, vector<8x4xf32>, vector<8x8xf32> -> vector<8x8xf32>
    %158 = arith.mulf %157, %152 : vector<8x8xf32>
    %cst_61 = arith.constant dense<0xFF800000> : vector<8xf32>
    %159 = vector.multi_reduction <maximumf>, %158, %cst_61 [1] : vector<8x8xf32> to vector<8xf32>
    %160 = vector.shape_cast %159 : vector<8xf32> to vector<8x1xf32>
    %161 = vector.broadcast %160 : vector<8x1xf32> to vector<8x8xf32>
    %162 = arith.subf %158, %161 : vector<8x8xf32>
    %163 = math.exp %162 : vector<8x8xf32>
    %cst_62 = arith.constant dense<0.000000e+00> : vector<8xf32>
    %164 = vector.multi_reduction <add>, %163, %cst_62 [1] : vector<8x8xf32> to vector<8xf32>
    %165 = vector.shape_cast %164 : vector<8xf32> to vector<8x1xf32>
    %166 = tpu.reciprocal %165 {approx = true} : vector<8x1xf32> -> vector<8x1xf32>
    %167 = vector.extract_strided_slice %15 {offsets = [0, 16], sizes = [8, 4], strides = [1, 1]} : vector<8x32xf32> to vector<8x4xf32>
    %cst_63 = arith.constant dense<0.000000e+00> : vector<8x4xf32>
    %168 = tpu.matmul %163, %167, %cst_63 {dimension_numbers = #tpu.dot_dimension_numbers<[1], [0], [0], [1], [0, 0, 1, 1], [], []>} : vector<8x8xf32>, vector<8x4xf32>, vector<8x4xf32> -> vector<8x4xf32>
    %169 = vector.broadcast %166 : vector<8x1xf32> to vector<8x4xf32>
    %170 = arith.mulf %168, %169 : vector<8x4xf32>
    %171 = vector.extract_strided_slice %3 {offsets = [0, 20], sizes = [8, 4], strides = [1, 1]} : vector<8x32xf32> to vector<8x4xf32>
    %172 = vector.extract_strided_slice %9 {offsets = [0, 20], sizes = [8, 4], strides = [1, 1]} : vector<8x32xf32> to vector<8x4xf32>
    %cst_64 = arith.constant dense<0.000000e+00> : vector<8x8xf32>
    %173 = tpu.matmul %171, %172, %cst_64 {dimension_numbers = #tpu.dot_dimension_numbers<[1], [1], [0], [0], [0, 0, 1, 0], [], []>} : vector<8x4xf32>, vector<8x4xf32>, vector<8x8xf32> -> vector<8x8xf32>
    %cst_65 = arith.constant dense<0xFF800000> : vector<8xf32>
    %174 = vector.multi_reduction <maximumf>, %173, %cst_65 [1] : vector<8x8xf32> to vector<8xf32>
    %175 = vector.shape_cast %174 : vector<8xf32> to vector<8x1xf32>
    %176 = vector.broadcast %175 : vector<8x1xf32> to vector<8x8xf32>
    %177 = arith.subf %173, %176 : vector<8x8xf32>
    %178 = math.exp %177 : vector<8x8xf32>
    %cst_66 = arith.constant dense<0.000000e+00> : vector<8xf32>
    %179 = vector.multi_reduction <add>, %178, %cst_66 [1] : vector<8x8xf32> to vector<8xf32>
    %180 = vector.shape_cast %179 : vector<8xf32> to vector<8x1xf32>
    %181 = tpu.reciprocal %180 {approx = true} : vector<8x1xf32> -> vector<8x1xf32>
    %182 = vector.broadcast %181 : vector<8x1xf32> to vector<8x8xf32>
    %183 = arith.mulf %178, %182 : vector<8x8xf32>
    %184 = vector.extract_strided_slice %11 {offsets = [0, 20], sizes = [8, 4], strides = [1, 1]} : vector<8x32xf32> to vector<8x4xf32>
    %cst_67 = arith.constant dense<0.000000e+00> : vector<8x4xf32>
    %185 = tpu.matmul %183, %184, %cst_67 {dimension_numbers = #tpu.dot_dimension_numbers<[1], [0], [0], [1], [0, 0, 1, 1], [], []>} : vector<8x8xf32>, vector<8x4xf32>, vector<8x4xf32> -> vector<8x4xf32>
    %186 = vector.extract_strided_slice %7 {offsets = [0, 20], sizes = [8, 4], strides = [1, 1]} : vector<8x32xf32> to vector<8x4xf32>
    %187 = vector.extract_strided_slice %13 {offsets = [0, 20], sizes = [8, 4], strides = [1, 1]} : vector<8x32xf32> to vector<8x4xf32>
    %cst_68 = arith.constant dense<0.000000e+00> : vector<8x8xf32>
    %188 = tpu.matmul %186, %187, %cst_68 {dimension_numbers = #tpu.dot_dimension_numbers<[1], [1], [0], [0], [0, 0, 1, 0], [], []>} : vector<8x4xf32>, vector<8x4xf32>, vector<8x8xf32> -> vector<8x8xf32>
    %189 = arith.mulf %188, %183 : vector<8x8xf32>
    %cst_69 = arith.constant dense<0xFF800000> : vector<8xf32>
    %190 = vector.multi_reduction <maximumf>, %189, %cst_69 [1] : vector<8x8xf32> to vector<8xf32>
    %191 = vector.shape_cast %190 : vector<8xf32> to vector<8x1xf32>
    %192 = vector.broadcast %191 : vector<8x1xf32> to vector<8x8xf32>
    %193 = arith.subf %189, %192 : vector<8x8xf32>
    %194 = math.exp %193 : vector<8x8xf32>
    %cst_70 = arith.constant dense<0.000000e+00> : vector<8xf32>
    %195 = vector.multi_reduction <add>, %194, %cst_70 [1] : vector<8x8xf32> to vector<8xf32>
    %196 = vector.shape_cast %195 : vector<8xf32> to vector<8x1xf32>
    %197 = tpu.reciprocal %196 {approx = true} : vector<8x1xf32> -> vector<8x1xf32>
    %198 = vector.extract_strided_slice %15 {offsets = [0, 20], sizes = [8, 4], strides = [1, 1]} : vector<8x32xf32> to vector<8x4xf32>
    %cst_71 = arith.constant dense<0.000000e+00> : vector<8x4xf32>
    %199 = tpu.matmul %194, %198, %cst_71 {dimension_numbers = #tpu.dot_dimension_numbers<[1], [0], [0], [1], [0, 0, 1, 1], [], []>} : vector<8x8xf32>, vector<8x4xf32>, vector<8x4xf32> -> vector<8x4xf32>
    %200 = vector.broadcast %197 : vector<8x1xf32> to vector<8x4xf32>
    %201 = arith.mulf %199, %200 : vector<8x4xf32>
    %202 = vector.extract_strided_slice %3 {offsets = [0, 24], sizes = [8, 4], strides = [1, 1]} : vector<8x32xf32> to vector<8x4xf32>
    %203 = vector.extract_strided_slice %9 {offsets = [0, 24], sizes = [8, 4], strides = [1, 1]} : vector<8x32xf32> to vector<8x4xf32>
    %cst_72 = arith.constant dense<0.000000e+00> : vector<8x8xf32>
    %204 = tpu.matmul %202, %203, %cst_72 {dimension_numbers = #tpu.dot_dimension_numbers<[1], [1], [0], [0], [0, 0, 1, 0], [], []>} : vector<8x4xf32>, vector<8x4xf32>, vector<8x8xf32> -> vector<8x8xf32>
    %cst_73 = arith.constant dense<0xFF800000> : vector<8xf32>
    %205 = vector.multi_reduction <maximumf>, %204, %cst_73 [1] : vector<8x8xf32> to vector<8xf32>
    %206 = vector.shape_cast %205 : vector<8xf32> to vector<8x1xf32>
    %207 = vector.broadcast %206 : vector<8x1xf32> to vector<8x8xf32>
    %208 = arith.subf %204, %207 : vector<8x8xf32>
    %209 = math.exp %208 : vector<8x8xf32>
    %cst_74 = arith.constant dense<0.000000e+00> : vector<8xf32>
    %210 = vector.multi_reduction <add>, %209, %cst_74 [1] : vector<8x8xf32> to vector<8xf32>
    %211 = vector.shape_cast %210 : vector<8xf32> to vector<8x1xf32>
    %212 = tpu.reciprocal %211 {approx = true} : vector<8x1xf32> -> vector<8x1xf32>
    %213 = vector.broadcast %212 : vector<8x1xf32> to vector<8x8xf32>
    %214 = arith.mulf %209, %213 : vector<8x8xf32>
    %215 = vector.extract_strided_slice %11 {offsets = [0, 24], sizes = [8, 4], strides = [1, 1]} : vector<8x32xf32> to vector<8x4xf32>
    %cst_75 = arith.constant dense<0.000000e+00> : vector<8x4xf32>
    %216 = tpu.matmul %214, %215, %cst_75 {dimension_numbers = #tpu.dot_dimension_numbers<[1], [0], [0], [1], [0, 0, 1, 1], [], []>} : vector<8x8xf32>, vector<8x4xf32>, vector<8x4xf32> -> vector<8x4xf32>
    %217 = vector.extract_strided_slice %7 {offsets = [0, 24], sizes = [8, 4], strides = [1, 1]} : vector<8x32xf32> to vector<8x4xf32>
    %218 = vector.extract_strided_slice %13 {offsets = [0, 24], sizes = [8, 4], strides = [1, 1]} : vector<8x32xf32> to vector<8x4xf32>
    %cst_76 = arith.constant dense<0.000000e+00> : vector<8x8xf32>
    %219 = tpu.matmul %217, %218, %cst_76 {dimension_numbers = #tpu.dot_dimension_numbers<[1], [1], [0], [0], [0, 0, 1, 0], [], []>} : vector<8x4xf32>, vector<8x4xf32>, vector<8x8xf32> -> vector<8x8xf32>
    %220 = arith.mulf %219, %214 : vector<8x8xf32>
    %cst_77 = arith.constant dense<0xFF800000> : vector<8xf32>
    %221 = vector.multi_reduction <maximumf>, %220, %cst_77 [1] : vector<8x8xf32> to vector<8xf32>
    %222 = vector.shape_cast %221 : vector<8xf32> to vector<8x1xf32>
    %223 = vector.broadcast %222 : vector<8x1xf32> to vector<8x8xf32>
    %224 = arith.subf %220, %223 : vector<8x8xf32>
    %225 = math.exp %224 : vector<8x8xf32>
    %cst_78 = arith.constant dense<0.000000e+00> : vector<8xf32>
    %226 = vector.multi_reduction <add>, %225, %cst_78 [1] : vector<8x8xf32> to vector<8xf32>
    %227 = vector.shape_cast %226 : vector<8xf32> to vector<8x1xf32>
    %228 = tpu.reciprocal %227 {approx = true} : vector<8x1xf32> -> vector<8x1xf32>
    %229 = vector.extract_strided_slice %15 {offsets = [0, 24], sizes = [8, 4], strides = [1, 1]} : vector<8x32xf32> to vector<8x4xf32>
    %cst_79 = arith.constant dense<0.000000e+00> : vector<8x4xf32>
    %230 = tpu.matmul %225, %229, %cst_79 {dimension_numbers = #tpu.dot_dimension_numbers<[1], [0], [0], [1], [0, 0, 1, 1], [], []>} : vector<8x8xf32>, vector<8x4xf32>, vector<8x4xf32> -> vector<8x4xf32>
    %231 = vector.broadcast %228 : vector<8x1xf32> to vector<8x4xf32>
    %232 = arith.mulf %230, %231 : vector<8x4xf32>
    %233 = vector.extract_strided_slice %3 {offsets = [0, 28], sizes = [8, 4], strides = [1, 1]} : vector<8x32xf32> to vector<8x4xf32>
    %234 = vector.extract_strided_slice %9 {offsets = [0, 28], sizes = [8, 4], strides = [1, 1]} : vector<8x32xf32> to vector<8x4xf32>
    %cst_80 = arith.constant dense<0.000000e+00> : vector<8x8xf32>
    %235 = tpu.matmul %233, %234, %cst_80 {dimension_numbers = #tpu.dot_dimension_numbers<[1], [1], [0], [0], [0, 0, 1, 0], [], []>} : vector<8x4xf32>, vector<8x4xf32>, vector<8x8xf32> -> vector<8x8xf32>
    %cst_81 = arith.constant dense<0xFF800000> : vector<8xf32>
    %236 = vector.multi_reduction <maximumf>, %235, %cst_81 [1] : vector<8x8xf32> to vector<8xf32>
    %237 = vector.shape_cast %236 : vector<8xf32> to vector<8x1xf32>
    %238 = vector.broadcast %237 : vector<8x1xf32> to vector<8x8xf32>
    %239 = arith.subf %235, %238 : vector<8x8xf32>
    %240 = math.exp %239 : vector<8x8xf32>
    %cst_82 = arith.constant dense<0.000000e+00> : vector<8xf32>
    %241 = vector.multi_reduction <add>, %240, %cst_82 [1] : vector<8x8xf32> to vector<8xf32>
    %242 = vector.shape_cast %241 : vector<8xf32> to vector<8x1xf32>
    %243 = tpu.reciprocal %242 {approx = true} : vector<8x1xf32> -> vector<8x1xf32>
    %244 = vector.broadcast %243 : vector<8x1xf32> to vector<8x8xf32>
    %245 = arith.mulf %240, %244 : vector<8x8xf32>
    %246 = vector.extract_strided_slice %11 {offsets = [0, 28], sizes = [8, 4], strides = [1, 1]} : vector<8x32xf32> to vector<8x4xf32>
    %cst_83 = arith.constant dense<0.000000e+00> : vector<8x4xf32>
    %247 = tpu.matmul %245, %246, %cst_83 {dimension_numbers = #tpu.dot_dimension_numbers<[1], [0], [0], [1], [0, 0, 1, 1], [], []>} : vector<8x8xf32>, vector<8x4xf32>, vector<8x4xf32> -> vector<8x4xf32>
    %248 = vector.extract_strided_slice %7 {offsets = [0, 28], sizes = [8, 4], strides = [1, 1]} : vector<8x32xf32> to vector<8x4xf32>
    %249 = vector.extract_strided_slice %13 {offsets = [0, 28], sizes = [8, 4], strides = [1, 1]} : vector<8x32xf32> to vector<8x4xf32>
    %cst_84 = arith.constant dense<0.000000e+00> : vector<8x8xf32>
    %250 = tpu.matmul %248, %249, %cst_84 {dimension_numbers = #tpu.dot_dimension_numbers<[1], [1], [0], [0], [0, 0, 1, 0], [], []>} : vector<8x4xf32>, vector<8x4xf32>, vector<8x8xf32> -> vector<8x8xf32>
    %251 = arith.mulf %250, %245 : vector<8x8xf32>
    %cst_85 = arith.constant dense<0xFF800000> : vector<8xf32>
    %252 = vector.multi_reduction <maximumf>, %251, %cst_85 [1] : vector<8x8xf32> to vector<8xf32>
    %253 = vector.shape_cast %252 : vector<8xf32> to vector<8x1xf32>
    %254 = vector.broadcast %253 : vector<8x1xf32> to vector<8x8xf32>
    %255 = arith.subf %251, %254 : vector<8x8xf32>
    %256 = math.exp %255 : vector<8x8xf32>
    %cst_86 = arith.constant dense<0.000000e+00> : vector<8xf32>
    %257 = vector.multi_reduction <add>, %256, %cst_86 [1] : vector<8x8xf32> to vector<8xf32>
    %258 = vector.shape_cast %257 : vector<8xf32> to vector<8x1xf32>
    %259 = tpu.reciprocal %258 {approx = true} : vector<8x1xf32> -> vector<8x1xf32>
    %260 = vector.extract_strided_slice %15 {offsets = [0, 28], sizes = [8, 4], strides = [1, 1]} : vector<8x32xf32> to vector<8x4xf32>
    %cst_87 = arith.constant dense<0.000000e+00> : vector<8x4xf32>
    %261 = tpu.matmul %256, %260, %cst_87 {dimension_numbers = #tpu.dot_dimension_numbers<[1], [0], [0], [1], [0, 0, 1, 1], [], []>} : vector<8x8xf32>, vector<8x4xf32>, vector<8x4xf32> -> vector<8x4xf32>
    %262 = vector.broadcast %259 : vector<8x1xf32> to vector<8x4xf32>
    %263 = arith.mulf %261, %262 : vector<8x4xf32>
    %264 = tpu.concatenate %30, %61, %92, %123, %154, %185, %216, %247 in 1 : vector<8x4xf32>, vector<8x4xf32>, vector<8x4xf32>, vector<8x4xf32>, vector<8x4xf32>, vector<8x4xf32>, vector<8x4xf32>, vector<8x4xf32> -> vector<8x32xf32>
    %c0_88 = arith.constant 0 : index
    %c0_89 = arith.constant 0 : index
    %c0_90 = arith.constant 0 : index
    %265 = vector.load %arg8[%c0_88, %c0_89, %c0_90] : memref<1x8x32xf32, #tpu.memory_space<vmem>>, vector<1x8x32xf32>
    %266 = vector.shape_cast %265 : vector<1x8x32xf32> to vector<8x32xf32>
    %267 = vector.shape_cast %264 : vector<8x32xf32> to vector<1x8x32xf32>
    tpu.vector_store %arg8[%c0_88, %c0_89, %c0_90], %267 {strides = array<i32>} : memref<1x8x32xf32, #tpu.memory_space<vmem>>, vector<1x8x32xf32>,
    %268 = tpu.concatenate %46, %77, %108, %139, %170, %201, %232, %263 in 1 : vector<8x4xf32>, vector<8x4xf32>, vector<8x4xf32>, vector<8x4xf32>, vector<8x4xf32>, vector<8x4xf32>, vector<8x4xf32>, vector<8x4xf32> -> vector<8x32xf32>
    %c0_91 = arith.constant 0 : index
    %c0_92 = arith.constant 0 : index
    %c0_93 = arith.constant 0 : index
    %269 = vector.load %arg9[%c0_91, %c0_92, %c0_93] : memref<1x8x32xf32, #tpu.memory_space<vmem>>, vector<1x8x32xf32>
    %270 = vector.shape_cast %269 : vector<1x8x32xf32> to vector<8x32xf32>
    %271 = vector.shape_cast %268 : vector<8x32xf32> to vector<1x8x32xf32>
    tpu.vector_store %arg9[%c0_91, %c0_92, %c0_93], %271 {strides = array<i32>} : memref<1x8x32xf32, #tpu.memory_space<vmem>>, vector<1x8x32xf32>,
    return
  }
  func.func @transform_0(%arg0: i32, %arg1: i32) -> (i32, i32, i32, i32) {
    %c0_i32 = arith.constant 0 : i32
    %c0_i32_0 = arith.constant 0 : i32
    %c0_i32_1 = arith.constant 0 : i32
    return %arg1, %arg0, %c0_i32, %c0_i32_0 : i32, i32, i32, i32
  }
  func.func @transform_1(%arg0: i32, %arg1: i32) -> (i32, i32, i32, i32) {
    %c0_i32 = arith.constant 0 : i32
    %c0_i32_0 = arith.constant 0 : i32
    %c0_i32_1 = arith.constant 0 : i32
    %c0_i32_2 = arith.constant 0 : i32
    return %c0_i32, %arg0, %c0_i32_0, %c0_i32_1 : i32, i32, i32, i32
  }
  func.func @transform_2(%arg0: i32, %arg1: i32) -> (i32, i32, i32, i32) {
    %c0_i32 = arith.constant 0 : i32
    %c0_i32_0 = arith.constant 0 : i32
    %c0_i32_1 = arith.constant 0 : i32
    %c0_i32_2 = arith.constant 0 : i32
    return %c0_i32, %arg0, %c0_i32_0, %c0_i32_1 : i32, i32, i32, i32
  }
  func.func @transform_3(%arg0: i32, %arg1: i32) -> (i32, i32, i32, i32) {
    %c0_i32 = arith.constant 0 : i32
    %c0_i32_0 = arith.constant 0 : i32
    %c0_i32_1 = arith.constant 0 : i32
    return %arg1, %arg0, %c0_i32, %c0_i32_0 : i32, i32, i32, i32
  }
  func.func @transform_4(%arg0: i32, %arg1: i32) -> (i32, i32, i32, i32) {
    %c0_i32 = arith.constant 0 : i32
    %c0_i32_0 = arith.constant 0 : i32
    %c0_i32_1 = arith.constant 0 : i32
    %c0_i32_2 = arith.constant 0 : i32
    return %c0_i32, %arg0, %c0_i32_0, %c0_i32_1 : i32, i32, i32, i32
  }
  func.func @transform_5(%arg0: i32, %arg1: i32) -> (i32, i32, i32, i32) {
    %c0_i32 = arith.constant 0 : i32
    %c0_i32_0 = arith.constant 0 : i32
    %c0_i32_1 = arith.constant 0 : i32
    %c0_i32_2 = arith.constant 0 : i32
    return %c0_i32, %arg0, %c0_i32_0, %c0_i32_1 : i32, i32, i32, i32
  }
  func.func @transform_6(%arg0: i32, %arg1: i32) -> (i32, i32, i32) {
    %c0_i32 = arith.constant 0 : i32
    %c0_i32_0 = arith.constant 0 : i32
    return %arg0, %arg1, %c0_i32 : i32, i32, i32
  }
  func.func @transform_7(%arg0: i32, %arg1: i32) -> (i32, i32, i32) {
    %c0_i32 = arith.constant 0 : i32
    %c0_i32_0 = arith.constant 0 : i32
    return %arg0, %arg1, %c0_i32 : i32, i32, i32
  }
}

module attributes {stable_mosaic.version = 11 : i64} {
  func.func @kernel(%arg0: i32, %arg1: memref<16x32xf32, #tpu.memory_space<vmem>>, %arg2: memref<16x32xf32, #tpu.memory_space<vmem>>, %arg3: memref<32x32xf32, #tpu.memory_space<vmem>>, %arg4: memref<32x32xf32, #tpu.memory_space<vmem>>, %arg5: memref<1x32xf32, #tpu.memory_space<vmem>>, %arg6: memref<1x32xf32, #tpu.memory_space<vmem>>, %arg7: memref<16x32xf32, #tpu.memory_space<vmem>>, %arg8: memref<16x32xf32, #tpu.memory_space<vmem>>) attributes {dimension_semantics = [#tpu.dimension_semantics<parallel>], iteration_bounds = array<i64: 1>, scalar_prefetch = 0 : i64, scratch_operands = 0 : i64, tpu.core_type = #tpu.core_type<tc>, window_params = [{transform_indices = @transform_0, window_bounds = array<i64: 16, 32>}, {transform_indices = @transform_1, window_bounds = array<i64: 16, 32>}, {pipeline_mode = #tpu.pipeline_mode<synchronous>, transform_indices = @transform_2, window_bounds = array<i64: 32, 32>}, {pipeline_mode = #tpu.pipeline_mode<synchronous>, transform_indices = @transform_3, window_bounds = array<i64: 32, 32>}, {pipeline_mode = #tpu.pipeline_mode<synchronous>, transform_indices = @transform_4, window_bounds = array<i64: 1, 32>}, {pipeline_mode = #tpu.pipeline_mode<synchronous>, transform_indices = @transform_5, window_bounds = array<i64: 1, 32>}, {transform_indices = @transform_6, window_bounds = array<i64: 16, 32>}, {transform_indices = @transform_7, window_bounds = array<i64: 16, 32>}]} {
    %c0 = arith.constant 0 : index
    %c0_0 = arith.constant 0 : index
    %0 = vector.load %arg1[%c0, %c0_0] : memref<16x32xf32, #tpu.memory_space<vmem>>, vector<16x32xf32>
    %c0_1 = arith.constant 0 : index
    %c0_2 = arith.constant 0 : index
    %1 = vector.load %arg3[%c0_1, %c0_2] : memref<32x32xf32, #tpu.memory_space<vmem>>, vector<32x32xf32>
    %cst = arith.constant dense<0.000000e+00> : vector<16x32xf32>
    %2 = tpu.matmul %0, %1, %cst {dimension_numbers = #tpu.dot_dimension_numbers<[1], [0], [0], [1], [0, 0, 1, 1], [], []>} : vector<16x32xf32>, vector<32x32xf32>, vector<16x32xf32> -> vector<16x32xf32>
    %c0_3 = arith.constant 0 : index
    %c0_4 = arith.constant 0 : index
    %3 = vector.load %arg5[%c0_3, %c0_4] : memref<1x32xf32, #tpu.memory_space<vmem>>, vector<1x32xf32>
    %4 = vector.broadcast %3 : vector<1x32xf32> to vector<16x32xf32>
    %5 = arith.addf %2, %4 : vector<16x32xf32>
    %c0_5 = arith.constant 0 : index
    %c0_6 = arith.constant 0 : index
    %6 = vector.load %arg7[%c0_5, %c0_6] : memref<16x32xf32, #tpu.memory_space<vmem>>, vector<16x32xf32>
    tpu.vector_store %arg7[%c0_5, %c0_6], %5 {strides = array<i32>} : memref<16x32xf32, #tpu.memory_space<vmem>>, vector<16x32xf32>,
    %c0_7 = arith.constant 0 : index
    %c0_8 = arith.constant 0 : index
    %7 = vector.load %arg2[%c0_7, %c0_8] : memref<16x32xf32, #tpu.memory_space<vmem>>, vector<16x32xf32>
    %c0_9 = arith.constant 0 : index
    %c0_10 = arith.constant 0 : index
    %8 = vector.load %arg4[%c0_9, %c0_10] : memref<32x32xf32, #tpu.memory_space<vmem>>, vector<32x32xf32>
    %cst_11 = arith.constant dense<0.000000e+00> : vector<16x32xf32>
    %9 = tpu.matmul %7, %8, %cst_11 {dimension_numbers = #tpu.dot_dimension_numbers<[1], [0], [0], [1], [0, 0, 1, 1], [], []>} : vector<16x32xf32>, vector<32x32xf32>, vector<16x32xf32> -> vector<16x32xf32>
    %c0_12 = arith.constant 0 : index
    %c0_13 = arith.constant 0 : index
    %10 = vector.load %arg6[%c0_12, %c0_13] : memref<1x32xf32, #tpu.memory_space<vmem>>, vector<1x32xf32>
    %11 = vector.broadcast %10 : vector<1x32xf32> to vector<16x32xf32>
    %12 = arith.addf %9, %11 : vector<16x32xf32>
    %c0_14 = arith.constant 0 : index
    %c0_15 = arith.constant 0 : index
    %13 = vector.load %arg8[%c0_14, %c0_15] : memref<16x32xf32, #tpu.memory_space<vmem>>, vector<16x32xf32>
    tpu.vector_store %arg8[%c0_14, %c0_15], %12 {strides = array<i32>} : memref<16x32xf32, #tpu.memory_space<vmem>>, vector<16x32xf32>,
    return
  }
  func.func @transform_0(%arg0: i32) -> (i32, i32) {
    %c0_i32 = arith.constant 0 : i32
    %c0_i32_0 = arith.constant 0 : i32
    return %arg0, %c0_i32 : i32, i32
  }
  func.func @transform_1(%arg0: i32) -> (i32, i32) {
    %c0_i32 = arith.constant 0 : i32
    %c0_i32_0 = arith.constant 0 : i32
    return %arg0, %c0_i32 : i32, i32
  }
  func.func @transform_2(%arg0: i32) -> (i32, i32) {
    %c0_i32 = arith.constant 0 : i32
    %c0_i32_0 = arith.constant 0 : i32
    %c0_i32_1 = arith.constant 0 : i32
    return %c0_i32, %c0_i32_0 : i32, i32
  }
  func.func @transform_3(%arg0: i32) -> (i32, i32) {
    %c0_i32 = arith.constant 0 : i32
    %c0_i32_0 = arith.constant 0 : i32
    %c0_i32_1 = arith.constant 0 : i32
    return %c0_i32, %c0_i32_0 : i32, i32
  }
  func.func @transform_4(%arg0: i32) -> (i32, i32) {
    %c0_i32 = arith.constant 0 : i32
    %c0_i32_0 = arith.constant 0 : i32
    %c0_i32_1 = arith.constant 0 : i32
    return %c0_i32, %c0_i32_0 : i32, i32
  }
  func.func @transform_5(%arg0: i32) -> (i32, i32) {
    %c0_i32 = arith.constant 0 : i32
    %c0_i32_0 = arith.constant 0 : i32
    %c0_i32_1 = arith.constant 0 : i32
    return %c0_i32, %c0_i32_0 : i32, i32
  }
  func.func @transform_6(%arg0: i32) -> (i32, i32) {
    %c0_i32 = arith.constant 0 : i32
    %c0_i32_0 = arith.constant 0 : i32
    return %arg0, %c0_i32 : i32, i32
  }
  func.func @transform_7(%arg0: i32) -> (i32, i32) {
    %c0_i32 = arith.constant 0 : i32
    %c0_i32_0 = arith.constant 0 : i32
    return %arg0, %c0_i32 : i32, i32
  }
}

module attributes {stable_mosaic.version = 11 : i64} {
  func.func @kernel(%arg0: i32, %arg1: memref<16x32xf32, #tpu.memory_space<vmem>>, %arg2: memref<16x32xf32, #tpu.memory_space<vmem>>, %arg3: memref<16x32xf32, #tpu.memory_space<vmem>>, %arg4: memref<16x32xf32, #tpu.memory_space<vmem>>, %arg5: memref<32x32xf32, #tpu.memory_space<vmem>>, %arg6: memref<32x32xf32, #tpu.memory_space<vmem>>, %arg7: memref<32x32xf32, #tpu.memory_space<vmem>>, %arg8: memref<32x32xf32, #tpu.memory_space<vmem>>, %arg9: memref<16x32xf32, #tpu.memory_space<vmem>>, %arg10: memref<16x32xf32, #tpu.memory_space<vmem>>, %arg11: memref<16x32xf32, #tpu.memory_space<vmem>>, %arg12: memref<16x32xf32, #tpu.memory_space<vmem>>) attributes {dimension_semantics = [#tpu.dimension_semantics<parallel>], iteration_bounds = array<i64: 1>, scalar_prefetch = 0 : i64, scratch_operands = 0 : i64, tpu.core_type = #tpu.core_type<tc>, window_params = [{transform_indices = @transform_0, window_bounds = array<i64: 16, 32>}, {transform_indices = @transform_1, window_bounds = array<i64: 16, 32>}, {transform_indices = @transform_2, window_bounds = array<i64: 16, 32>}, {transform_indices = @transform_3, window_bounds = array<i64: 16, 32>}, {pipeline_mode = #tpu.pipeline_mode<synchronous>, transform_indices = @transform_4, window_bounds = array<i64: 32, 32>}, {pipeline_mode = #tpu.pipeline_mode<synchronous>, transform_indices = @transform_5, window_bounds = array<i64: 32, 32>}, {pipeline_mode = #tpu.pipeline_mode<synchronous>, transform_indices = @transform_6, window_bounds = array<i64: 32, 32>}, {pipeline_mode = #tpu.pipeline_mode<synchronous>, transform_indices = @transform_7, window_bounds = array<i64: 32, 32>}, {transform_indices = @transform_8, window_bounds = array<i64: 16, 32>}, {transform_indices = @transform_9, window_bounds = array<i64: 16, 32>}, {transform_indices = @transform_10, window_bounds = array<i64: 16, 32>}, {transform_indices = @transform_11, window_bounds = array<i64: 16, 32>}]} {
    %c0 = arith.constant 0 : index
    %c0_0 = arith.constant 0 : index
    %0 = vector.load %arg1[%c0, %c0_0] : memref<16x32xf32, #tpu.memory_space<vmem>>, vector<16x32xf32>
    %c0_1 = arith.constant 0 : index
    %c0_2 = arith.constant 0 : index
    %1 = vector.load %arg5[%c0_1, %c0_2] : memref<32x32xf32, #tpu.memory_space<vmem>>, vector<32x32xf32>
    %cst = arith.constant dense<0.000000e+00> : vector<16x32xf32>
    %2 = tpu.matmul %0, %1, %cst {dimension_numbers = #tpu.dot_dimension_numbers<[1], [0], [0], [1], [0, 0, 1, 1], [], []>} : vector<16x32xf32>, vector<32x32xf32>, vector<16x32xf32> -> vector<16x32xf32>
    %c0_3 = arith.constant 0 : index
    %c0_4 = arith.constant 0 : index
    %3 = vector.load %arg9[%c0_3, %c0_4] : memref<16x32xf32, #tpu.memory_space<vmem>>, vector<16x32xf32>
    tpu.vector_store %arg9[%c0_3, %c0_4], %2 {strides = array<i32>} : memref<16x32xf32, #tpu.memory_space<vmem>>, vector<16x32xf32>,
    %c0_5 = arith.constant 0 : index
    %c0_6 = arith.constant 0 : index
    %4 = vector.load %arg2[%c0_5, %c0_6] : memref<16x32xf32, #tpu.memory_space<vmem>>, vector<16x32xf32>
    %c0_7 = arith.constant 0 : index
    %c0_8 = arith.constant 0 : index
    %5 = vector.load %arg6[%c0_7, %c0_8] : memref<32x32xf32, #tpu.memory_space<vmem>>, vector<32x32xf32>
    %cst_9 = arith.constant dense<0.000000e+00> : vector<16x32xf32>
    %6 = tpu.matmul %4, %5, %cst_9 {dimension_numbers = #tpu.dot_dimension_numbers<[1], [0], [0], [1], [0, 0, 1, 1], [], []>} : vector<16x32xf32>, vector<32x32xf32>, vector<16x32xf32> -> vector<16x32xf32>
    %c0_10 = arith.constant 0 : index
    %c0_11 = arith.constant 0 : index
    %7 = vector.load %arg10[%c0_10, %c0_11] : memref<16x32xf32, #tpu.memory_space<vmem>>, vector<16x32xf32>
    tpu.vector_store %arg10[%c0_10, %c0_11], %6 {strides = array<i32>} : memref<16x32xf32, #tpu.memory_space<vmem>>, vector<16x32xf32>,
    %c0_12 = arith.constant 0 : index
    %c0_13 = arith.constant 0 : index
    %8 = vector.load %arg3[%c0_12, %c0_13] : memref<16x32xf32, #tpu.memory_space<vmem>>, vector<16x32xf32>
    %c0_14 = arith.constant 0 : index
    %c0_15 = arith.constant 0 : index
    %9 = vector.load %arg7[%c0_14, %c0_15] : memref<32x32xf32, #tpu.memory_space<vmem>>, vector<32x32xf32>
    %cst_16 = arith.constant dense<0.000000e+00> : vector<16x32xf32>
    %10 = tpu.matmul %8, %9, %cst_16 {dimension_numbers = #tpu.dot_dimension_numbers<[1], [0], [0], [1], [0, 0, 1, 1], [], []>} : vector<16x32xf32>, vector<32x32xf32>, vector<16x32xf32> -> vector<16x32xf32>
    %c0_17 = arith.constant 0 : index
    %c0_18 = arith.constant 0 : index
    %11 = vector.load %arg11[%c0_17, %c0_18] : memref<16x32xf32, #tpu.memory_space<vmem>>, vector<16x32xf32>
    tpu.vector_store %arg11[%c0_17, %c0_18], %10 {strides = array<i32>} : memref<16x32xf32, #tpu.memory_space<vmem>>, vector<16x32xf32>,
    %c0_19 = arith.constant 0 : index
    %c0_20 = arith.constant 0 : index
    %12 = vector.load %arg4[%c0_19, %c0_20] : memref<16x32xf32, #tpu.memory_space<vmem>>, vector<16x32xf32>
    %c0_21 = arith.constant 0 : index
    %c0_22 = arith.constant 0 : index
    %13 = vector.load %arg8[%c0_21, %c0_22] : memref<32x32xf32, #tpu.memory_space<vmem>>, vector<32x32xf32>
    %cst_23 = arith.constant dense<0.000000e+00> : vector<16x32xf32>
    %14 = tpu.matmul %12, %13, %cst_23 {dimension_numbers = #tpu.dot_dimension_numbers<[1], [0], [0], [1], [0, 0, 1, 1], [], []>} : vector<16x32xf32>, vector<32x32xf32>, vector<16x32xf32> -> vector<16x32xf32>
    %c0_24 = arith.constant 0 : index
    %c0_25 = arith.constant 0 : index
    %15 = vector.load %arg12[%c0_24, %c0_25] : memref<16x32xf32, #tpu.memory_space<vmem>>, vector<16x32xf32>
    tpu.vector_store %arg12[%c0_24, %c0_25], %14 {strides = array<i32>} : memref<16x32xf32, #tpu.memory_space<vmem>>, vector<16x32xf32>,
    return
  }
  func.func @transform_0(%arg0: i32) -> (i32, i32) {
    %c0_i32 = arith.constant 0 : i32
    %c0_i32_0 = arith.constant 0 : i32
    return %arg0, %c0_i32 : i32, i32
  }
  func.func @transform_1(%arg0: i32) -> (i32, i32) {
    %c0_i32 = arith.constant 0 : i32
    %c0_i32_0 = arith.constant 0 : i32
    return %arg0, %c0_i32 : i32, i32
  }
  func.func @transform_2(%arg0: i32) -> (i32, i32) {
    %c0_i32 = arith.constant 0 : i32
    %c0_i32_0 = arith.constant 0 : i32
    return %arg0, %c0_i32 : i32, i32
  }
  func.func @transform_3(%arg0: i32) -> (i32, i32) {
    %c0_i32 = arith.constant 0 : i32
    %c0_i32_0 = arith.constant 0 : i32
    return %arg0, %c0_i32 : i32, i32
  }
  func.func @transform_4(%arg0: i32) -> (i32, i32) {
    %c0_i32 = arith.constant 0 : i32
    %c0_i32_0 = arith.constant 0 : i32
    %c0_i32_1 = arith.constant 0 : i32
    return %c0_i32, %c0_i32_0 : i32, i32
  }
  func.func @transform_5(%arg0: i32) -> (i32, i32) {
    %c0_i32 = arith.constant 0 : i32
    %c0_i32_0 = arith.constant 0 : i32
    %c0_i32_1 = arith.constant 0 : i32
    return %c0_i32, %c0_i32_0 : i32, i32
  }
  func.func @transform_6(%arg0: i32) -> (i32, i32) {
    %c0_i32 = arith.constant 0 : i32
    %c0_i32_0 = arith.constant 0 : i32
    %c0_i32_1 = arith.constant 0 : i32
    return %c0_i32, %c0_i32_0 : i32, i32
  }
  func.func @transform_7(%arg0: i32) -> (i32, i32) {
    %c0_i32 = arith.constant 0 : i32
    %c0_i32_0 = arith.constant 0 : i32
    %c0_i32_1 = arith.constant 0 : i32
    return %c0_i32, %c0_i32_0 : i32, i32
  }
  func.func @transform_8(%arg0: i32) -> (i32, i32) {
    %c0_i32 = arith.constant 0 : i32
    %c0_i32_0 = arith.constant 0 : i32
    return %arg0, %c0_i32 : i32, i32
  }
  func.func @transform_9(%arg0: i32) -> (i32, i32) {
    %c0_i32 = arith.constant 0 : i32
    %c0_i32_0 = arith.constant 0 : i32
    return %arg0, %c0_i32 : i32, i32
  }
  func.func @transform_10(%arg0: i32) -> (i32, i32) {
    %c0_i32 = arith.constant 0 : i32
    %c0_i32_0 = arith.constant 0 : i32
    return %arg0, %c0_i32 : i32, i32
  }
  func.func @transform_11(%arg0: i32) -> (i32, i32) {
    %c0_i32 = arith.constant 0 : i32
    %c0_i32_0 = arith.constant 0 : i32
    return %arg0, %c0_i32 : i32, i32
  }
}

module attributes {stable_mosaic.version = 11 : i64} {
  func.func @_guided_attn_kernel(%arg0: i32, %arg1: i32, %arg2: memref<8x1x1x32xf32, #tpu.memory_space<vmem>>, %arg3: memref<8x1x1x32xf32, #tpu.memory_space<vmem>>, %arg4: memref<8x1x1x32xf32, #tpu.memory_space<vmem>>, %arg5: memref<8x1x1x32xf32, #tpu.memory_space<vmem>>, %arg6: memref<8x1x1x32xf32, #tpu.memory_space<vmem>>, %arg7: memref<8x1x1x32xf32, #tpu.memory_space<vmem>>, %arg8: memref<1x8x32xf32, #tpu.memory_space<vmem>>, %arg9: memref<1x8x32xf32, #tpu.memory_space<vmem>>) attributes {dimension_semantics = [#tpu.dimension_semantics<parallel>, #tpu.dimension_semantics<parallel>], iteration_bounds = array<i64: 2, 1>, scalar_prefetch = 0 : i64, scratch_operands = 0 : i64, tpu.core_type = #tpu.core_type<tc>, window_params = [{transform_indices = @transform_0, window_bounds = array<i64: 8, 1, 1, 32>}, {transform_indices = @transform_1, window_bounds = array<i64: 8, 1, 1, 32>}, {transform_indices = @transform_2, window_bounds = array<i64: 8, 1, 1, 32>}, {transform_indices = @transform_3, window_bounds = array<i64: 8, 1, 1, 32>}, {transform_indices = @transform_4, window_bounds = array<i64: 8, 1, 1, 32>}, {transform_indices = @transform_5, window_bounds = array<i64: 8, 1, 1, 32>}, {transform_indices = @transform_6, window_bounds = array<i64: 1, 8, 32>}, {transform_indices = @transform_7, window_bounds = array<i64: 1, 8, 32>}]} {
    %c0 = arith.constant 0 : index
    %c0_0 = arith.constant 0 : index
    %c0_1 = arith.constant 0 : index
    %c0_2 = arith.constant 0 : index
    %0 = vector.load %arg2[%c0, %c0_0, %c0_1, %c0_2] : memref<8x1x1x32xf32, #tpu.memory_space<vmem>>, vector<8x1x1x32xf32>
    %1 = vector.shape_cast %0 : vector<8x1x1x32xf32> to vector<8x32xf32>
    %cst = arith.constant 5.000000e-01 : f32
    %2 = vector.broadcast %cst : f32 to vector<8x32xf32>
    %3 = arith.mulf %1, %2 : vector<8x32xf32>
    %c0_3 = arith.constant 0 : index
    %c0_4 = arith.constant 0 : index
    %c0_5 = arith.constant 0 : index
    %c0_6 = arith.constant 0 : index
    %4 = vector.load %arg5[%c0_3, %c0_4, %c0_5, %c0_6] : memref<8x1x1x32xf32, #tpu.memory_space<vmem>>, vector<8x1x1x32xf32>
    %5 = vector.shape_cast %4 : vector<8x1x1x32xf32> to vector<8x32xf32>
    %cst_7 = arith.constant 5.000000e-01 : f32
    %6 = vector.broadcast %cst_7 : f32 to vector<8x32xf32>
    %7 = arith.mulf %5, %6 : vector<8x32xf32>
    %c0_8 = arith.constant 0 : index
    %c0_9 = arith.constant 0 : index
    %c0_10 = arith.constant 0 : index
    %c0_11 = arith.constant 0 : index
    %8 = vector.load %arg3[%c0_8, %c0_9, %c0_10, %c0_11] : memref<8x1x1x32xf32, #tpu.memory_space<vmem>>, vector<8x1x1x32xf32>
    %9 = vector.shape_cast %8 : vector<8x1x1x32xf32> to vector<8x32xf32>
    %c0_12 = arith.constant 0 : index
    %c0_13 = arith.constant 0 : index
    %c0_14 = arith.constant 0 : index
    %c0_15 = arith.constant 0 : index
    %10 = vector.load %arg4[%c0_12, %c0_13, %c0_14, %c0_15] : memref<8x1x1x32xf32, #tpu.memory_space<vmem>>, vector<8x1x1x32xf32>
    %11 = vector.shape_cast %10 : vector<8x1x1x32xf32> to vector<8x32xf32>
    %c0_16 = arith.constant 0 : index
    %c0_17 = arith.constant 0 : index
    %c0_18 = arith.constant 0 : index
    %c0_19 = arith.constant 0 : index
    %12 = vector.load %arg6[%c0_16, %c0_17, %c0_18, %c0_19] : memref<8x1x1x32xf32, #tpu.memory_space<vmem>>, vector<8x1x1x32xf32>
    %13 = vector.shape_cast %12 : vector<8x1x1x32xf32> to vector<8x32xf32>
    %c0_20 = arith.constant 0 : index
    %c0_21 = arith.constant 0 : index
    %c0_22 = arith.constant 0 : index
    %c0_23 = arith.constant 0 : index
    %14 = vector.load %arg7[%c0_20, %c0_21, %c0_22, %c0_23] : memref<8x1x1x32xf32, #tpu.memory_space<vmem>>, vector<8x1x1x32xf32>
    %15 = vector.shape_cast %14 : vector<8x1x1x32xf32> to vector<8x32xf32>
    %16 = vector.extract_strided_slice %3 {offsets = [0, 0], sizes = [8, 4], strides = [1, 1]} : vector<8x32xf32> to vector<8x4xf32>
    %17 = vector.extract_strided_slice %9 {offsets = [0, 0], sizes = [8, 4], strides = [1, 1]} : vector<8x32xf32> to vector<8x4xf32>
    %cst_24 = arith.constant dense<0.000000e+00> : vector<8x8xf32>
    %18 = tpu.matmul %16, %17, %cst_24 {dimension_numbers = #tpu.dot_dimension_numbers<[1], [1], [0], [0], [0, 0, 1, 0], [], []>} : vector<8x4xf32>, vector<8x4xf32>, vector<8x8xf32> -> vector<8x8xf32>
    %cst_25 = arith.constant dense<0xFF800000> : vector<8xf32>
    %19 = vector.multi_reduction <maximumf>, %18, %cst_25 [1] : vector<8x8xf32> to vector<8xf32>
    %20 = vector.shape_cast %19 : vector<8xf32> to vector<8x1xf32>
    %21 = vector.broadcast %20 : vector<8x1xf32> to vector<8x8xf32>
    %22 = arith.subf %18, %21 : vector<8x8xf32>
    %23 = math.exp %22 : vector<8x8xf32>
    %cst_26 = arith.constant dense<0.000000e+00> : vector<8xf32>
    %24 = vector.multi_reduction <add>, %23, %cst_26 [1] : vector<8x8xf32> to vector<8xf32>
    %25 = vector.shape_cast %24 : vector<8xf32> to vector<8x1xf32>
    %26 = tpu.reciprocal %25 {approx = true} : vector<8x1xf32> -> vector<8x1xf32>
    %27 = vector.broadcast %26 : vector<8x1xf32> to vector<8x8xf32>
    %28 = arith.mulf %23, %27 : vector<8x8xf32>
    %29 = vector.extract_strided_slice %11 {offsets = [0, 0], sizes = [8, 4], strides = [1, 1]} : vector<8x32xf32> to vector<8x4xf32>
    %cst_27 = arith.constant dense<0.000000e+00> : vector<8x4xf32>
    %30 = tpu.matmul %28, %29, %cst_27 {dimension_numbers = #tpu.dot_dimension_numbers<[1], [0], [0], [1], [0, 0, 1, 1], [], []>} : vector<8x8xf32>, vector<8x4xf32>, vector<8x4xf32> -> vector<8x4xf32>
    %31 = vector.extract_strided_slice %7 {offsets = [0, 0], sizes = [8, 4], strides = [1, 1]} : vector<8x32xf32> to vector<8x4xf32>
    %32 = vector.extract_strided_slice %13 {offsets = [0, 0], sizes = [8, 4], strides = [1, 1]} : vector<8x32xf32> to vector<8x4xf32>
    %cst_28 = arith.constant dense<0.000000e+00> : vector<8x8xf32>
    %33 = tpu.matmul %31, %32, %cst_28 {dimension_numbers = #tpu.dot_dimension_numbers<[1], [1], [0], [0], [0, 0, 1, 0], [], []>} : vector<8x4xf32>, vector<8x4xf32>, vector<8x8xf32> -> vector<8x8xf32>
    %34 = arith.mulf %33, %28 : vector<8x8xf32>
    %cst_29 = arith.constant dense<0xFF800000> : vector<8xf32>
    %35 = vector.multi_reduction <maximumf>, %34, %cst_29 [1] : vector<8x8xf32> to vector<8xf32>
    %36 = vector.shape_cast %35 : vector<8xf32> to vector<8x1xf32>
    %37 = vector.broadcast %36 : vector<8x1xf32> to vector<8x8xf32>
    %38 = arith.subf %34, %37 : vector<8x8xf32>
    %39 = math.exp %38 : vector<8x8xf32>
    %cst_30 = arith.constant dense<0.000000e+00> : vector<8xf32>
    %40 = vector.multi_reduction <add>, %39, %cst_30 [1] : vector<8x8xf32> to vector<8xf32>
    %41 = vector.shape_cast %40 : vector<8xf32> to vector<8x1xf32>
    %42 = tpu.reciprocal %41 {approx = true} : vector<8x1xf32> -> vector<8x1xf32>
    %43 = vector.extract_strided_slice %15 {offsets = [0, 0], sizes = [8, 4], strides = [1, 1]} : vector<8x32xf32> to vector<8x4xf32>
    %cst_31 = arith.constant dense<0.000000e+00> : vector<8x4xf32>
    %44 = tpu.matmul %39, %43, %cst_31 {dimension_numbers = #tpu.dot_dimension_numbers<[1], [0], [0], [1], [0, 0, 1, 1], [], []>} : vector<8x8xf32>, vector<8x4xf32>, vector<8x4xf32> -> vector<8x4xf32>
    %45 = vector.broadcast %42 : vector<8x1xf32> to vector<8x4xf32>
    %46 = arith.mulf %44, %45 : vector<8x4xf32>
    %47 = vector.extract_strided_slice %3 {offsets = [0, 4], sizes = [8, 4], strides = [1, 1]} : vector<8x32xf32> to vector<8x4xf32>
    %48 = vector.extract_strided_slice %9 {offsets = [0, 4], sizes = [8, 4], strides = [1, 1]} : vector<8x32xf32> to vector<8x4xf32>
    %cst_32 = arith.constant dense<0.000000e+00> : vector<8x8xf32>
    %49 = tpu.matmul %47, %48, %cst_32 {dimension_numbers = #tpu.dot_dimension_numbers<[1], [1], [0], [0], [0, 0, 1, 0], [], []>} : vector<8x4xf32>, vector<8x4xf32>, vector<8x8xf32> -> vector<8x8xf32>
    %cst_33 = arith.constant dense<0xFF800000> : vector<8xf32>
    %50 = vector.multi_reduction <maximumf>, %49, %cst_33 [1] : vector<8x8xf32> to vector<8xf32>
    %51 = vector.shape_cast %50 : vector<8xf32> to vector<8x1xf32>
    %52 = vector.broadcast %51 : vector<8x1xf32> to vector<8x8xf32>
    %53 = arith.subf %49, %52 : vector<8x8xf32>
    %54 = math.exp %53 : vector<8x8xf32>
    %cst_34 = arith.constant dense<0.000000e+00> : vector<8xf32>
    %55 = vector.multi_reduction <add>, %54, %cst_34 [1] : vector<8x8xf32> to vector<8xf32>
    %56 = vector.shape_cast %55 : vector<8xf32> to vector<8x1xf32>
    %57 = tpu.reciprocal %56 {approx = true} : vector<8x1xf32> -> vector<8x1xf32>
    %58 = vector.broadcast %57 : vector<8x1xf32> to vector<8x8xf32>
    %59 = arith.mulf %54, %58 : vector<8x8xf32>
    %60 = vector.extract_strided_slice %11 {offsets = [0, 4], sizes = [8, 4], strides = [1, 1]} : vector<8x32xf32> to vector<8x4xf32>
    %cst_35 = arith.constant dense<0.000000e+00> : vector<8x4xf32>
    %61 = tpu.matmul %59, %60, %cst_35 {dimension_numbers = #tpu.dot_dimension_numbers<[1], [0], [0], [1], [0, 0, 1, 1], [], []>} : vector<8x8xf32>, vector<8x4xf32>, vector<8x4xf32> -> vector<8x4xf32>
    %62 = vector.extract_strided_slice %7 {offsets = [0, 4], sizes = [8, 4], strides = [1, 1]} : vector<8x32xf32> to vector<8x4xf32>
    %63 = vector.extract_strided_slice %13 {offsets = [0, 4], sizes = [8, 4], strides = [1, 1]} : vector<8x32xf32> to vector<8x4xf32>
    %cst_36 = arith.constant dense<0.000000e+00> : vector<8x8xf32>
    %64 = tpu.matmul %62, %63, %cst_36 {dimension_numbers = #tpu.dot_dimension_numbers<[1], [1], [0], [0], [0, 0, 1, 0], [], []>} : vector<8x4xf32>, vector<8x4xf32>, vector<8x8xf32> -> vector<8x8xf32>
    %65 = arith.mulf %64, %59 : vector<8x8xf32>
    %cst_37 = arith.constant dense<0xFF800000> : vector<8xf32>
    %66 = vector.multi_reduction <maximumf>, %65, %cst_37 [1] : vector<8x8xf32> to vector<8xf32>
    %67 = vector.shape_cast %66 : vector<8xf32> to vector<8x1xf32>
    %68 = vector.broadcast %67 : vector<8x1xf32> to vector<8x8xf32>
    %69 = arith.subf %65, %68 : vector<8x8xf32>
    %70 = math.exp %69 : vector<8x8xf32>
    %cst_38 = arith.constant dense<0.000000e+00> : vector<8xf32>
    %71 = vector.multi_reduction <add>, %70, %cst_38 [1] : vector<8x8xf32> to vector<8xf32>
    %72 = vector.shape_cast %71 : vector<8xf32> to vector<8x1xf32>
    %73 = tpu.reciprocal %72 {approx = true} : vector<8x1xf32> -> vector<8x1xf32>
    %74 = vector.extract_strided_slice %15 {offsets = [0, 4], sizes = [8, 4], strides = [1, 1]} : vector<8x32xf32> to vector<8x4xf32>
    %cst_39 = arith.constant dense<0.000000e+00> : vector<8x4xf32>
    %75 = tpu.matmul %70, %74, %cst_39 {dimension_numbers = #tpu.dot_dimension_numbers<[1], [0], [0], [1], [0, 0, 1, 1], [], []>} : vector<8x8xf32>, vector<8x4xf32>, vector<8x4xf32> -> vector<8x4xf32>
    %76 = vector.broadcast %73 : vector<8x1xf32> to vector<8x4xf32>
    %77 = arith.mulf %75, %76 : vector<8x4xf32>
    %78 = vector.extract_strided_slice %3 {offsets = [0, 8], sizes = [8, 4], strides = [1, 1]} : vector<8x32xf32> to vector<8x4xf32>
    %79 = vector.extract_strided_slice %9 {offsets = [0, 8], sizes = [8, 4], strides = [1, 1]} : vector<8x32xf32> to vector<8x4xf32>
    %cst_40 = arith.constant dense<0.000000e+00> : vector<8x8xf32>
    %80 = tpu.matmul %78, %79, %cst_40 {dimension_numbers = #tpu.dot_dimension_numbers<[1], [1], [0], [0], [0, 0, 1, 0], [], []>} : vector<8x4xf32>, vector<8x4xf32>, vector<8x8xf32> -> vector<8x8xf32>
    %cst_41 = arith.constant dense<0xFF800000> : vector<8xf32>
    %81 = vector.multi_reduction <maximumf>, %80, %cst_41 [1] : vector<8x8xf32> to vector<8xf32>
    %82 = vector.shape_cast %81 : vector<8xf32> to vector<8x1xf32>
    %83 = vector.broadcast %82 : vector<8x1xf32> to vector<8x8xf32>
    %84 = arith.subf %80, %83 : vector<8x8xf32>
    %85 = math.exp %84 : vector<8x8xf32>
    %cst_42 = arith.constant dense<0.000000e+00> : vector<8xf32>
    %86 = vector.multi_reduction <add>, %85, %cst_42 [1] : vector<8x8xf32> to vector<8xf32>
    %87 = vector.shape_cast %86 : vector<8xf32> to vector<8x1xf32>
    %88 = tpu.reciprocal %87 {approx = true} : vector<8x1xf32> -> vector<8x1xf32>
    %89 = vector.broadcast %88 : vector<8x1xf32> to vector<8x8xf32>
    %90 = arith.mulf %85, %89 : vector<8x8xf32>
    %91 = vector.extract_strided_slice %11 {offsets = [0, 8], sizes = [8, 4], strides = [1, 1]} : vector<8x32xf32> to vector<8x4xf32>
    %cst_43 = arith.constant dense<0.000000e+00> : vector<8x4xf32>
    %92 = tpu.matmul %90, %91, %cst_43 {dimension_numbers = #tpu.dot_dimension_numbers<[1], [0], [0], [1], [0, 0, 1, 1], [], []>} : vector<8x8xf32>, vector<8x4xf32>, vector<8x4xf32> -> vector<8x4xf32>
    %93 = vector.extract_strided_slice %7 {offsets = [0, 8], sizes = [8, 4], strides = [1, 1]} : vector<8x32xf32> to vector<8x4xf32>
    %94 = vector.extract_strided_slice %13 {offsets = [0, 8], sizes = [8, 4], strides = [1, 1]} : vector<8x32xf32> to vector<8x4xf32>
    %cst_44 = arith.constant dense<0.000000e+00> : vector<8x8xf32>
    %95 = tpu.matmul %93, %94, %cst_44 {dimension_numbers = #tpu.dot_dimension_numbers<[1], [1], [0], [0], [0, 0, 1, 0], [], []>} : vector<8x4xf32>, vector<8x4xf32>, vector<8x8xf32> -> vector<8x8xf32>
    %96 = arith.mulf %95, %90 : vector<8x8xf32>
    %cst_45 = arith.constant dense<0xFF800000> : vector<8xf32>
    %97 = vector.multi_reduction <maximumf>, %96, %cst_45 [1] : vector<8x8xf32> to vector<8xf32>
    %98 = vector.shape_cast %97 : vector<8xf32> to vector<8x1xf32>
    %99 = vector.broadcast %98 : vector<8x1xf32> to vector<8x8xf32>
    %100 = arith.subf %96, %99 : vector<8x8xf32>
    %101 = math.exp %100 : vector<8x8xf32>
    %cst_46 = arith.constant dense<0.000000e+00> : vector<8xf32>
    %102 = vector.multi_reduction <add>, %101, %cst_46 [1] : vector<8x8xf32> to vector<8xf32>
    %103 = vector.shape_cast %102 : vector<8xf32> to vector<8x1xf32>
    %104 = tpu.reciprocal %103 {approx = true} : vector<8x1xf32> -> vector<8x1xf32>
    %105 = vector.extract_strided_slice %15 {offsets = [0, 8], sizes = [8, 4], strides = [1, 1]} : vector<8x32xf32> to vector<8x4xf32>
    %cst_47 = arith.constant dense<0.000000e+00> : vector<8x4xf32>
    %106 = tpu.matmul %101, %105, %cst_47 {dimension_numbers = #tpu.dot_dimension_numbers<[1], [0], [0], [1], [0, 0, 1, 1], [], []>} : vector<8x8xf32>, vector<8x4xf32>, vector<8x4xf32> -> vector<8x4xf32>
    %107 = vector.broadcast %104 : vector<8x1xf32> to vector<8x4xf32>
    %108 = arith.mulf %106, %107 : vector<8x4xf32>
    %109 = vector.extract_strided_slice %3 {offsets = [0, 12], sizes = [8, 4], strides = [1, 1]} : vector<8x32xf32> to vector<8x4xf32>
    %110 = vector.extract_strided_slice %9 {offsets = [0, 12], sizes = [8, 4], strides = [1, 1]} : vector<8x32xf32> to vector<8x4xf32>
    %cst_48 = arith.constant dense<0.000000e+00> : vector<8x8xf32>
    %111 = tpu.matmul %109, %110, %cst_48 {dimension_numbers = #tpu.dot_dimension_numbers<[1], [1], [0], [0], [0, 0, 1, 0], [], []>} : vector<8x4xf32>, vector<8x4xf32>, vector<8x8xf32> -> vector<8x8xf32>
    %cst_49 = arith.constant dense<0xFF800000> : vector<8xf32>
    %112 = vector.multi_reduction <maximumf>, %111, %cst_49 [1] : vector<8x8xf32> to vector<8xf32>
    %113 = vector.shape_cast %112 : vector<8xf32> to vector<8x1xf32>
    %114 = vector.broadcast %113 : vector<8x1xf32> to vector<8x8xf32>
    %115 = arith.subf %111, %114 : vector<8x8xf32>
    %116 = math.exp %115 : vector<8x8xf32>
    %cst_50 = arith.constant dense<0.000000e+00> : vector<8xf32>
    %117 = vector.multi_reduction <add>, %116, %cst_50 [1] : vector<8x8xf32> to vector<8xf32>
    %118 = vector.shape_cast %117 : vector<8xf32> to vector<8x1xf32>
    %119 = tpu.reciprocal %118 {approx = true} : vector<8x1xf32> -> vector<8x1xf32>
    %120 = vector.broadcast %119 : vector<8x1xf32> to vector<8x8xf32>
    %121 = arith.mulf %116, %120 : vector<8x8xf32>
    %122 = vector.extract_strided_slice %11 {offsets = [0, 12], sizes = [8, 4], strides = [1, 1]} : vector<8x32xf32> to vector<8x4xf32>
    %cst_51 = arith.constant dense<0.000000e+00> : vector<8x4xf32>
    %123 = tpu.matmul %121, %122, %cst_51 {dimension_numbers = #tpu.dot_dimension_numbers<[1], [0], [0], [1], [0, 0, 1, 1], [], []>} : vector<8x8xf32>, vector<8x4xf32>, vector<8x4xf32> -> vector<8x4xf32>
    %124 = vector.extract_strided_slice %7 {offsets = [0, 12], sizes = [8, 4], strides = [1, 1]} : vector<8x32xf32> to vector<8x4xf32>
    %125 = vector.extract_strided_slice %13 {offsets = [0, 12], sizes = [8, 4], strides = [1, 1]} : vector<8x32xf32> to vector<8x4xf32>
    %cst_52 = arith.constant dense<0.000000e+00> : vector<8x8xf32>
    %126 = tpu.matmul %124, %125, %cst_52 {dimension_numbers = #tpu.dot_dimension_numbers<[1], [1], [0], [0], [0, 0, 1, 0], [], []>} : vector<8x4xf32>, vector<8x4xf32>, vector<8x8xf32> -> vector<8x8xf32>
    %127 = arith.mulf %126, %121 : vector<8x8xf32>
    %cst_53 = arith.constant dense<0xFF800000> : vector<8xf32>
    %128 = vector.multi_reduction <maximumf>, %127, %cst_53 [1] : vector<8x8xf32> to vector<8xf32>
    %129 = vector.shape_cast %128 : vector<8xf32> to vector<8x1xf32>
    %130 = vector.broadcast %129 : vector<8x1xf32> to vector<8x8xf32>
    %131 = arith.subf %127, %130 : vector<8x8xf32>
    %132 = math.exp %131 : vector<8x8xf32>
    %cst_54 = arith.constant dense<0.000000e+00> : vector<8xf32>
    %133 = vector.multi_reduction <add>, %132, %cst_54 [1] : vector<8x8xf32> to vector<8xf32>
    %134 = vector.shape_cast %133 : vector<8xf32> to vector<8x1xf32>
    %135 = tpu.reciprocal %134 {approx = true} : vector<8x1xf32> -> vector<8x1xf32>
    %136 = vector.extract_strided_slice %15 {offsets = [0, 12], sizes = [8, 4], strides = [1, 1]} : vector<8x32xf32> to vector<8x4xf32>
    %cst_55 = arith.constant dense<0.000000e+00> : vector<8x4xf32>
    %137 = tpu.matmul %132, %136, %cst_55 {dimension_numbers = #tpu.dot_dimension_numbers<[1], [0], [0], [1], [0, 0, 1, 1], [], []>} : vector<8x8xf32>, vector<8x4xf32>, vector<8x4xf32> -> vector<8x4xf32>
    %138 = vector.broadcast %135 : vector<8x1xf32> to vector<8x4xf32>
    %139 = arith.mulf %137, %138 : vector<8x4xf32>
    %140 = vector.extract_strided_slice %3 {offsets = [0, 16], sizes = [8, 4], strides = [1, 1]} : vector<8x32xf32> to vector<8x4xf32>
    %141 = vector.extract_strided_slice %9 {offsets = [0, 16], sizes = [8, 4], strides = [1, 1]} : vector<8x32xf32> to vector<8x4xf32>
    %cst_56 = arith.constant dense<0.000000e+00> : vector<8x8xf32>
    %142 = tpu.matmul %140, %141, %cst_56 {dimension_numbers = #tpu.dot_dimension_numbers<[1], [1], [0], [0], [0, 0, 1, 0], [], []>} : vector<8x4xf32>, vector<8x4xf32>, vector<8x8xf32> -> vector<8x8xf32>
    %cst_57 = arith.constant dense<0xFF800000> : vector<8xf32>
    %143 = vector.multi_reduction <maximumf>, %142, %cst_57 [1] : vector<8x8xf32> to vector<8xf32>
    %144 = vector.shape_cast %143 : vector<8xf32> to vector<8x1xf32>
    %145 = vector.broadcast %144 : vector<8x1xf32> to vector<8x8xf32>
    %146 = arith.subf %142, %145 : vector<8x8xf32>
    %147 = math.exp %146 : vector<8x8xf32>
    %cst_58 = arith.constant dense<0.000000e+00> : vector<8xf32>
    %148 = vector.multi_reduction <add>, %147, %cst_58 [1] : vector<8x8xf32> to vector<8xf32>
    %149 = vector.shape_cast %148 : vector<8xf32> to vector<8x1xf32>
    %150 = tpu.reciprocal %149 {approx = true} : vector<8x1xf32> -> vector<8x1xf32>
    %151 = vector.broadcast %150 : vector<8x1xf32> to vector<8x8xf32>
    %152 = arith.mulf %147, %151 : vector<8x8xf32>
    %153 = vector.extract_strided_slice %11 {offsets = [0, 16], sizes = [8, 4], strides = [1, 1]} : vector<8x32xf32> to vector<8x4xf32>
    %cst_59 = arith.constant dense<0.000000e+00> : vector<8x4xf32>
    %154 = tpu.matmul %152, %153, %cst_59 {dimension_numbers = #tpu.dot_dimension_numbers<[1], [0], [0], [1], [0, 0, 1, 1], [], []>} : vector<8x8xf32>, vector<8x4xf32>, vector<8x4xf32> -> vector<8x4xf32>
    %155 = vector.extract_strided_slice %7 {offsets = [0, 16], sizes = [8, 4], strides = [1, 1]} : vector<8x32xf32> to vector<8x4xf32>
    %156 = vector.extract_strided_slice %13 {offsets = [0, 16], sizes = [8, 4], strides = [1, 1]} : vector<8x32xf32> to vector<8x4xf32>
    %cst_60 = arith.constant dense<0.000000e+00> : vector<8x8xf32>
    %157 = tpu.matmul %155, %156, %cst_60 {dimension_numbers = #tpu.dot_dimension_numbers<[1], [1], [0], [0], [0, 0, 1, 0], [], []>} : vector<8x4xf32>, vector<8x4xf32>, vector<8x8xf32> -> vector<8x8xf32>
    %158 = arith.mulf %157, %152 : vector<8x8xf32>
    %cst_61 = arith.constant dense<0xFF800000> : vector<8xf32>
    %159 = vector.multi_reduction <maximumf>, %158, %cst_61 [1] : vector<8x8xf32> to vector<8xf32>
    %160 = vector.shape_cast %159 : vector<8xf32> to vector<8x1xf32>
    %161 = vector.broadcast %160 : vector<8x1xf32> to vector<8x8xf32>
    %162 = arith.subf %158, %161 : vector<8x8xf32>
    %163 = math.exp %162 : vector<8x8xf32>
    %cst_62 = arith.constant dense<0.000000e+00> : vector<8xf32>
    %164 = vector.multi_reduction <add>, %163, %cst_62 [1] : vector<8x8xf32> to vector<8xf32>
    %165 = vector.shape_cast %164 : vector<8xf32> to vector<8x1xf32>
    %166 = tpu.reciprocal %165 {approx = true} : vector<8x1xf32> -> vector<8x1xf32>
    %167 = vector.extract_strided_slice %15 {offsets = [0, 16], sizes = [8, 4], strides = [1, 1]} : vector<8x32xf32> to vector<8x4xf32>
    %cst_63 = arith.constant dense<0.000000e+00> : vector<8x4xf32>
    %168 = tpu.matmul %163, %167, %cst_63 {dimension_numbers = #tpu.dot_dimension_numbers<[1], [0], [0], [1], [0, 0, 1, 1], [], []>} : vector<8x8xf32>, vector<8x4xf32>, vector<8x4xf32> -> vector<8x4xf32>
    %169 = vector.broadcast %166 : vector<8x1xf32> to vector<8x4xf32>
    %170 = arith.mulf %168, %169 : vector<8x4xf32>
    %171 = vector.extract_strided_slice %3 {offsets = [0, 20], sizes = [8, 4], strides = [1, 1]} : vector<8x32xf32> to vector<8x4xf32>
    %172 = vector.extract_strided_slice %9 {offsets = [0, 20], sizes = [8, 4], strides = [1, 1]} : vector<8x32xf32> to vector<8x4xf32>
    %cst_64 = arith.constant dense<0.000000e+00> : vector<8x8xf32>
    %173 = tpu.matmul %171, %172, %cst_64 {dimension_numbers = #tpu.dot_dimension_numbers<[1], [1], [0], [0], [0, 0, 1, 0], [], []>} : vector<8x4xf32>, vector<8x4xf32>, vector<8x8xf32> -> vector<8x8xf32>
    %cst_65 = arith.constant dense<0xFF800000> : vector<8xf32>
    %174 = vector.multi_reduction <maximumf>, %173, %cst_65 [1] : vector<8x8xf32> to vector<8xf32>
    %175 = vector.shape_cast %174 : vector<8xf32> to vector<8x1xf32>
    %176 = vector.broadcast %175 : vector<8x1xf32> to vector<8x8xf32>
    %177 = arith.subf %173, %176 : vector<8x8xf32>
    %178 = math.exp %177 : vector<8x8xf32>
    %cst_66 = arith.constant dense<0.000000e+00> : vector<8xf32>
    %179 = vector.multi_reduction <add>, %178, %cst_66 [1] : vector<8x8xf32> to vector<8xf32>
    %180 = vector.shape_cast %179 : vector<8xf32> to vector<8x1xf32>
    %181 = tpu.reciprocal %180 {approx = true} : vector<8x1xf32> -> vector<8x1xf32>
    %182 = vector.broadcast %181 : vector<8x1xf32> to vector<8x8xf32>
    %183 = arith.mulf %178, %182 : vector<8x8xf32>
    %184 = vector.extract_strided_slice %11 {offsets = [0, 20], sizes = [8, 4], strides = [1, 1]} : vector<8x32xf32> to vector<8x4xf32>
    %cst_67 = arith.constant dense<0.000000e+00> : vector<8x4xf32>
    %185 = tpu.matmul %183, %184, %cst_67 {dimension_numbers = #tpu.dot_dimension_numbers<[1], [0], [0], [1], [0, 0, 1, 1], [], []>} : vector<8x8xf32>, vector<8x4xf32>, vector<8x4xf32> -> vector<8x4xf32>
    %186 = vector.extract_strided_slice %7 {offsets = [0, 20], sizes = [8, 4], strides = [1, 1]} : vector<8x32xf32> to vector<8x4xf32>
    %187 = vector.extract_strided_slice %13 {offsets = [0, 20], sizes = [8, 4], strides = [1, 1]} : vector<8x32xf32> to vector<8x4xf32>
    %cst_68 = arith.constant dense<0.000000e+00> : vector<8x8xf32>
    %188 = tpu.matmul %186, %187, %cst_68 {dimension_numbers = #tpu.dot_dimension_numbers<[1], [1], [0], [0], [0, 0, 1, 0], [], []>} : vector<8x4xf32>, vector<8x4xf32>, vector<8x8xf32> -> vector<8x8xf32>
    %189 = arith.mulf %188, %183 : vector<8x8xf32>
    %cst_69 = arith.constant dense<0xFF800000> : vector<8xf32>
    %190 = vector.multi_reduction <maximumf>, %189, %cst_69 [1] : vector<8x8xf32> to vector<8xf32>
    %191 = vector.shape_cast %190 : vector<8xf32> to vector<8x1xf32>
    %192 = vector.broadcast %191 : vector<8x1xf32> to vector<8x8xf32>
    %193 = arith.subf %189, %192 : vector<8x8xf32>
    %194 = math.exp %193 : vector<8x8xf32>
    %cst_70 = arith.constant dense<0.000000e+00> : vector<8xf32>
    %195 = vector.multi_reduction <add>, %194, %cst_70 [1] : vector<8x8xf32> to vector<8xf32>
    %196 = vector.shape_cast %195 : vector<8xf32> to vector<8x1xf32>
    %197 = tpu.reciprocal %196 {approx = true} : vector<8x1xf32> -> vector<8x1xf32>
    %198 = vector.extract_strided_slice %15 {offsets = [0, 20], sizes = [8, 4], strides = [1, 1]} : vector<8x32xf32> to vector<8x4xf32>
    %cst_71 = arith.constant dense<0.000000e+00> : vector<8x4xf32>
    %199 = tpu.matmul %194, %198, %cst_71 {dimension_numbers = #tpu.dot_dimension_numbers<[1], [0], [0], [1], [0, 0, 1, 1], [], []>} : vector<8x8xf32>, vector<8x4xf32>, vector<8x4xf32> -> vector<8x4xf32>
    %200 = vector.broadcast %197 : vector<8x1xf32> to vector<8x4xf32>
    %201 = arith.mulf %199, %200 : vector<8x4xf32>
    %202 = vector.extract_strided_slice %3 {offsets = [0, 24], sizes = [8, 4], strides = [1, 1]} : vector<8x32xf32> to vector<8x4xf32>
    %203 = vector.extract_strided_slice %9 {offsets = [0, 24], sizes = [8, 4], strides = [1, 1]} : vector<8x32xf32> to vector<8x4xf32>
    %cst_72 = arith.constant dense<0.000000e+00> : vector<8x8xf32>
    %204 = tpu.matmul %202, %203, %cst_72 {dimension_numbers = #tpu.dot_dimension_numbers<[1], [1], [0], [0], [0, 0, 1, 0], [], []>} : vector<8x4xf32>, vector<8x4xf32>, vector<8x8xf32> -> vector<8x8xf32>
    %cst_73 = arith.constant dense<0xFF800000> : vector<8xf32>
    %205 = vector.multi_reduction <maximumf>, %204, %cst_73 [1] : vector<8x8xf32> to vector<8xf32>
    %206 = vector.shape_cast %205 : vector<8xf32> to vector<8x1xf32>
    %207 = vector.broadcast %206 : vector<8x1xf32> to vector<8x8xf32>
    %208 = arith.subf %204, %207 : vector<8x8xf32>
    %209 = math.exp %208 : vector<8x8xf32>
    %cst_74 = arith.constant dense<0.000000e+00> : vector<8xf32>
    %210 = vector.multi_reduction <add>, %209, %cst_74 [1] : vector<8x8xf32> to vector<8xf32>
    %211 = vector.shape_cast %210 : vector<8xf32> to vector<8x1xf32>
    %212 = tpu.reciprocal %211 {approx = true} : vector<8x1xf32> -> vector<8x1xf32>
    %213 = vector.broadcast %212 : vector<8x1xf32> to vector<8x8xf32>
    %214 = arith.mulf %209, %213 : vector<8x8xf32>
    %215 = vector.extract_strided_slice %11 {offsets = [0, 24], sizes = [8, 4], strides = [1, 1]} : vector<8x32xf32> to vector<8x4xf32>
    %cst_75 = arith.constant dense<0.000000e+00> : vector<8x4xf32>
    %216 = tpu.matmul %214, %215, %cst_75 {dimension_numbers = #tpu.dot_dimension_numbers<[1], [0], [0], [1], [0, 0, 1, 1], [], []>} : vector<8x8xf32>, vector<8x4xf32>, vector<8x4xf32> -> vector<8x4xf32>
    %217 = vector.extract_strided_slice %7 {offsets = [0, 24], sizes = [8, 4], strides = [1, 1]} : vector<8x32xf32> to vector<8x4xf32>
    %218 = vector.extract_strided_slice %13 {offsets = [0, 24], sizes = [8, 4], strides = [1, 1]} : vector<8x32xf32> to vector<8x4xf32>
    %cst_76 = arith.constant dense<0.000000e+00> : vector<8x8xf32>
    %219 = tpu.matmul %217, %218, %cst_76 {dimension_numbers = #tpu.dot_dimension_numbers<[1], [1], [0], [0], [0, 0, 1, 0], [], []>} : vector<8x4xf32>, vector<8x4xf32>, vector<8x8xf32> -> vector<8x8xf32>
    %220 = arith.mulf %219, %214 : vector<8x8xf32>
    %cst_77 = arith.constant dense<0xFF800000> : vector<8xf32>
    %221 = vector.multi_reduction <maximumf>, %220, %cst_77 [1] : vector<8x8xf32> to vector<8xf32>
    %222 = vector.shape_cast %221 : vector<8xf32> to vector<8x1xf32>
    %223 = vector.broadcast %222 : vector<8x1xf32> to vector<8x8xf32>
    %224 = arith.subf %220, %223 : vector<8x8xf32>
    %225 = math.exp %224 : vector<8x8xf32>
    %cst_78 = arith.constant dense<0.000000e+00> : vector<8xf32>
    %226 = vector.multi_reduction <add>, %225, %cst_78 [1] : vector<8x8xf32> to vector<8xf32>
    %227 = vector.shape_cast %226 : vector<8xf32> to vector<8x1xf32>
    %228 = tpu.reciprocal %227 {approx = true} : vector<8x1xf32> -> vector<8x1xf32>
    %229 = vector.extract_strided_slice %15 {offsets = [0, 24], sizes = [8, 4], strides = [1, 1]} : vector<8x32xf32> to vector<8x4xf32>
    %cst_79 = arith.constant dense<0.000000e+00> : vector<8x4xf32>
    %230 = tpu.matmul %225, %229, %cst_79 {dimension_numbers = #tpu.dot_dimension_numbers<[1], [0], [0], [1], [0, 0, 1, 1], [], []>} : vector<8x8xf32>, vector<8x4xf32>, vector<8x4xf32> -> vector<8x4xf32>
    %231 = vector.broadcast %228 : vector<8x1xf32> to vector<8x4xf32>
    %232 = arith.mulf %230, %231 : vector<8x4xf32>
    %233 = vector.extract_strided_slice %3 {offsets = [0, 28], sizes = [8, 4], strides = [1, 1]} : vector<8x32xf32> to vector<8x4xf32>
    %234 = vector.extract_strided_slice %9 {offsets = [0, 28], sizes = [8, 4], strides = [1, 1]} : vector<8x32xf32> to vector<8x4xf32>
    %cst_80 = arith.constant dense<0.000000e+00> : vector<8x8xf32>
    %235 = tpu.matmul %233, %234, %cst_80 {dimension_numbers = #tpu.dot_dimension_numbers<[1], [1], [0], [0], [0, 0, 1, 0], [], []>} : vector<8x4xf32>, vector<8x4xf32>, vector<8x8xf32> -> vector<8x8xf32>
    %cst_81 = arith.constant dense<0xFF800000> : vector<8xf32>
    %236 = vector.multi_reduction <maximumf>, %235, %cst_81 [1] : vector<8x8xf32> to vector<8xf32>
    %237 = vector.shape_cast %236 : vector<8xf32> to vector<8x1xf32>
    %238 = vector.broadcast %237 : vector<8x1xf32> to vector<8x8xf32>
    %239 = arith.subf %235, %238 : vector<8x8xf32>
    %240 = math.exp %239 : vector<8x8xf32>
    %cst_82 = arith.constant dense<0.000000e+00> : vector<8xf32>
    %241 = vector.multi_reduction <add>, %240, %cst_82 [1] : vector<8x8xf32> to vector<8xf32>
    %242 = vector.shape_cast %241 : vector<8xf32> to vector<8x1xf32>
    %243 = tpu.reciprocal %242 {approx = true} : vector<8x1xf32> -> vector<8x1xf32>
    %244 = vector.broadcast %243 : vector<8x1xf32> to vector<8x8xf32>
    %245 = arith.mulf %240, %244 : vector<8x8xf32>
    %246 = vector.extract_strided_slice %11 {offsets = [0, 28], sizes = [8, 4], strides = [1, 1]} : vector<8x32xf32> to vector<8x4xf32>
    %cst_83 = arith.constant dense<0.000000e+00> : vector<8x4xf32>
    %247 = tpu.matmul %245, %246, %cst_83 {dimension_numbers = #tpu.dot_dimension_numbers<[1], [0], [0], [1], [0, 0, 1, 1], [], []>} : vector<8x8xf32>, vector<8x4xf32>, vector<8x4xf32> -> vector<8x4xf32>
    %248 = vector.extract_strided_slice %7 {offsets = [0, 28], sizes = [8, 4], strides = [1, 1]} : vector<8x32xf32> to vector<8x4xf32>
    %249 = vector.extract_strided_slice %13 {offsets = [0, 28], sizes = [8, 4], strides = [1, 1]} : vector<8x32xf32> to vector<8x4xf32>
    %cst_84 = arith.constant dense<0.000000e+00> : vector<8x8xf32>
    %250 = tpu.matmul %248, %249, %cst_84 {dimension_numbers = #tpu.dot_dimension_numbers<[1], [1], [0], [0], [0, 0, 1, 0], [], []>} : vector<8x4xf32>, vector<8x4xf32>, vector<8x8xf32> -> vector<8x8xf32>
    %251 = arith.mulf %250, %245 : vector<8x8xf32>
    %cst_85 = arith.constant dense<0xFF800000> : vector<8xf32>
    %252 = vector.multi_reduction <maximumf>, %251, %cst_85 [1] : vector<8x8xf32> to vector<8xf32>
    %253 = vector.shape_cast %252 : vector<8xf32> to vector<8x1xf32>
    %254 = vector.broadcast %253 : vector<8x1xf32> to vector<8x8xf32>
    %255 = arith.subf %251, %254 : vector<8x8xf32>
    %256 = math.exp %255 : vector<8x8xf32>
    %cst_86 = arith.constant dense<0.000000e+00> : vector<8xf32>
    %257 = vector.multi_reduction <add>, %256, %cst_86 [1] : vector<8x8xf32> to vector<8xf32>
    %258 = vector.shape_cast %257 : vector<8xf32> to vector<8x1xf32>
    %259 = tpu.reciprocal %258 {approx = true} : vector<8x1xf32> -> vector<8x1xf32>
    %260 = vector.extract_strided_slice %15 {offsets = [0, 28], sizes = [8, 4], strides = [1, 1]} : vector<8x32xf32> to vector<8x4xf32>
    %cst_87 = arith.constant dense<0.000000e+00> : vector<8x4xf32>
    %261 = tpu.matmul %256, %260, %cst_87 {dimension_numbers = #tpu.dot_dimension_numbers<[1], [0], [0], [1], [0, 0, 1, 1], [], []>} : vector<8x8xf32>, vector<8x4xf32>, vector<8x4xf32> -> vector<8x4xf32>
    %262 = vector.broadcast %259 : vector<8x1xf32> to vector<8x4xf32>
    %263 = arith.mulf %261, %262 : vector<8x4xf32>
    %264 = tpu.concatenate %30, %61, %92, %123, %154, %185, %216, %247 in 1 : vector<8x4xf32>, vector<8x4xf32>, vector<8x4xf32>, vector<8x4xf32>, vector<8x4xf32>, vector<8x4xf32>, vector<8x4xf32>, vector<8x4xf32> -> vector<8x32xf32>
    %c0_88 = arith.constant 0 : index
    %c0_89 = arith.constant 0 : index
    %c0_90 = arith.constant 0 : index
    %265 = vector.load %arg8[%c0_88, %c0_89, %c0_90] : memref<1x8x32xf32, #tpu.memory_space<vmem>>, vector<1x8x32xf32>
    %266 = vector.shape_cast %265 : vector<1x8x32xf32> to vector<8x32xf32>
    %267 = vector.shape_cast %264 : vector<8x32xf32> to vector<1x8x32xf32>
    tpu.vector_store %arg8[%c0_88, %c0_89, %c0_90], %267 {strides = array<i32>} : memref<1x8x32xf32, #tpu.memory_space<vmem>>, vector<1x8x32xf32>,
    %268 = tpu.concatenate %46, %77, %108, %139, %170, %201, %232, %263 in 1 : vector<8x4xf32>, vector<8x4xf32>, vector<8x4xf32>, vector<8x4xf32>, vector<8x4xf32>, vector<8x4xf32>, vector<8x4xf32>, vector<8x4xf32> -> vector<8x32xf32>
    %c0_91 = arith.constant 0 : index
    %c0_92 = arith.constant 0 : index
    %c0_93 = arith.constant 0 : index
    %269 = vector.load %arg9[%c0_91, %c0_92, %c0_93] : memref<1x8x32xf32, #tpu.memory_space<vmem>>, vector<1x8x32xf32>
    %270 = vector.shape_cast %269 : vector<1x8x32xf32> to vector<8x32xf32>
    %271 = vector.shape_cast %268 : vector<8x32xf32> to vector<1x8x32xf32>
    tpu.vector_store %arg9[%c0_91, %c0_92, %c0_93], %271 {strides = array<i32>} : memref<1x8x32xf32, #tpu.memory_space<vmem>>, vector<1x8x32xf32>,
    return
  }
  func.func @transform_0(%arg0: i32, %arg1: i32) -> (i32, i32, i32, i32) {
    %c0_i32 = arith.constant 0 : i32
    %c0_i32_0 = arith.constant 0 : i32
    %c0_i32_1 = arith.constant 0 : i32
    return %arg1, %arg0, %c0_i32, %c0_i32_0 : i32, i32, i32, i32
  }
  func.func @transform_1(%arg0: i32, %arg1: i32) -> (i32, i32, i32, i32) {
    %c0_i32 = arith.constant 0 : i32
    %c0_i32_0 = arith.constant 0 : i32
    %c0_i32_1 = arith.constant 0 : i32
    %c0_i32_2 = arith.constant 0 : i32
    return %c0_i32, %arg0, %c0_i32_0, %c0_i32_1 : i32, i32, i32, i32
  }
  func.func @transform_2(%arg0: i32, %arg1: i32) -> (i32, i32, i32, i32) {
    %c0_i32 = arith.constant 0 : i32
    %c0_i32_0 = arith.constant 0 : i32
    %c0_i32_1 = arith.constant 0 : i32
    %c0_i32_2 = arith.constant 0 : i32
    return %c0_i32, %arg0, %c0_i32_0, %c0_i32_1 : i32, i32, i32, i32
  }
  func.func @transform_3(%arg0: i32, %arg1: i32) -> (i32, i32, i32, i32) {
    %c0_i32 = arith.constant 0 : i32
    %c0_i32_0 = arith.constant 0 : i32
    %c0_i32_1 = arith.constant 0 : i32
    return %arg1, %arg0, %c0_i32, %c0_i32_0 : i32, i32, i32, i32
  }
  func.func @transform_4(%arg0: i32, %arg1: i32) -> (i32, i32, i32, i32) {
    %c0_i32 = arith.constant 0 : i32
    %c0_i32_0 = arith.constant 0 : i32
    %c0_i32_1 = arith.constant 0 : i32
    %c0_i32_2 = arith.constant 0 : i32
    return %c0_i32, %arg0, %c0_i32_0, %c0_i32_1 : i32, i32, i32, i32
  }
  func.func @transform_5(%arg0: i32, %arg1: i32) -> (i32, i32, i32, i32) {
    %c0_i32 = arith.constant 0 : i32
    %c0_i32_0 = arith.constant 0 : i32
    %c0_i32_1 = arith.constant 0 : i32
    %c0_i32_2 = arith.constant 0 : i32
    return %c0_i32, %arg0, %c0_i32_0, %c0_i32_1 : i32, i32, i32, i32
  }
  func.func @transform_6(%arg0: i32, %arg1: i32) -> (i32, i32, i32) {
    %c0_i32 = arith.constant 0 : i32
    %c0_i32_0 = arith.constant 0 : i32
    return %arg0, %arg1, %c0_i32 : i32, i32, i32
  }
  func.func @transform_7(%arg0: i32, %arg1: i32) -> (i32, i32, i32) {
    %c0_i32 = arith.constant 0 : i32
    %c0_i32_0 = arith.constant 0 : i32
    return %arg0, %arg1, %c0_i32 : i32, i32, i32
  }
}

module attributes {stable_mosaic.version = 11 : i64} {
  func.func @kernel(%arg0: i32, %arg1: memref<16x32xf32, #tpu.memory_space<vmem>>, %arg2: memref<16x32xf32, #tpu.memory_space<vmem>>, %arg3: memref<32x32xf32, #tpu.memory_space<vmem>>, %arg4: memref<32x32xf32, #tpu.memory_space<vmem>>, %arg5: memref<16x32xf32, #tpu.memory_space<vmem>>, %arg6: memref<16x32xf32, #tpu.memory_space<vmem>>) attributes {dimension_semantics = [#tpu.dimension_semantics<parallel>], iteration_bounds = array<i64: 1>, scalar_prefetch = 0 : i64, scratch_operands = 0 : i64, tpu.core_type = #tpu.core_type<tc>, window_params = [{transform_indices = @transform_0, window_bounds = array<i64: 16, 32>}, {transform_indices = @transform_1, window_bounds = array<i64: 16, 32>}, {pipeline_mode = #tpu.pipeline_mode<synchronous>, transform_indices = @transform_2, window_bounds = array<i64: 32, 32>}, {pipeline_mode = #tpu.pipeline_mode<synchronous>, transform_indices = @transform_3, window_bounds = array<i64: 32, 32>}, {transform_indices = @transform_4, window_bounds = array<i64: 16, 32>}, {transform_indices = @transform_5, window_bounds = array<i64: 16, 32>}]} {
    %c0 = arith.constant 0 : index
    %c0_0 = arith.constant 0 : index
    %0 = vector.load %arg1[%c0, %c0_0] : memref<16x32xf32, #tpu.memory_space<vmem>>, vector<16x32xf32>
    %c0_1 = arith.constant 0 : index
    %c0_2 = arith.constant 0 : index
    %1 = vector.load %arg3[%c0_1, %c0_2] : memref<32x32xf32, #tpu.memory_space<vmem>>, vector<32x32xf32>
    %cst = arith.constant dense<0.000000e+00> : vector<16x32xf32>
    %2 = tpu.matmul %0, %1, %cst {dimension_numbers = #tpu.dot_dimension_numbers<[1], [0], [0], [1], [0, 0, 1, 1], [], []>} : vector<16x32xf32>, vector<32x32xf32>, vector<16x32xf32> -> vector<16x32xf32>
    %c0_3 = arith.constant 0 : index
    %c0_4 = arith.constant 0 : index
    %3 = vector.load %arg5[%c0_3, %c0_4] : memref<16x32xf32, #tpu.memory_space<vmem>>, vector<16x32xf32>
    tpu.vector_store %arg5[%c0_3, %c0_4], %2 {strides = array<i32>} : memref<16x32xf32, #tpu.memory_space<vmem>>, vector<16x32xf32>,
    %c0_5 = arith.constant 0 : index
    %c0_6 = arith.constant 0 : index
    %4 = vector.load %arg2[%c0_5, %c0_6] : memref<16x32xf32, #tpu.memory_space<vmem>>, vector<16x32xf32>
    %c0_7 = arith.constant 0 : index
    %c0_8 = arith.constant 0 : index
    %5 = vector.load %arg4[%c0_7, %c0_8] : memref<32x32xf32, #tpu.memory_space<vmem>>, vector<32x32xf32>
    %cst_9 = arith.constant dense<0.000000e+00> : vector<16x32xf32>
    %6 = tpu.matmul %4, %5, %cst_9 {dimension_numbers = #tpu.dot_dimension_numbers<[1], [0], [0], [1], [0, 0, 1, 1], [], []>} : vector<16x32xf32>, vector<32x32xf32>, vector<16x32xf32> -> vector<16x32xf32>
    %c0_10 = arith.constant 0 : index
    %c0_11 = arith.constant 0 : index
    %7 = vector.load %arg6[%c0_10, %c0_11] : memref<16x32xf32, #tpu.memory_space<vmem>>, vector<16x32xf32>
    tpu.vector_store %arg6[%c0_10, %c0_11], %6 {strides = array<i32>} : memref<16x32xf32, #tpu.memory_space<vmem>>, vector<16x32xf32>,
    return
  }
  func.func @transform_0(%arg0: i32) -> (i32, i32) {
    %c0_i32 = arith.constant 0 : i32
    %c0_i32_0 = arith.constant 0 : i32
    return %arg0, %c0_i32 : i32, i32
  }
  func.func @transform_1(%arg0: i32) -> (i32, i32) {
    %c0_i32 = arith.constant 0 : i32
    %c0_i32_0 = arith.constant 0 : i32
    return %arg0, %c0_i32 : i32, i32
  }
  func.func @transform_2(%arg0: i32) -> (i32, i32) {
    %c0_i32 = arith.constant 0 : i32
    %c0_i32_0 = arith.constant 0 : i32
    %c0_i32_1 = arith.constant 0 : i32
    return %c0_i32, %c0_i32_0 : i32, i32
  }
  func.func @transform_3(%arg0: i32) -> (i32, i32) {
    %c0_i32 = arith.constant 0 : i32
    %c0_i32_0 = arith.constant 0 : i32
    %c0_i32_1 = arith.constant 0 : i32
    return %c0_i32, %c0_i32_0 : i32, i32
  }
  func.func @transform_4(%arg0: i32) -> (i32, i32) {
    %c0_i32 = arith.constant 0 : i32
    %c0_i32_0 = arith.constant 0 : i32
    return %arg0, %c0_i32 : i32, i32
  }
  func.func @transform_5(%arg0: i32) -> (i32, i32) {
    %c0_i32 = arith.constant 0 : i32
    %c0_i32_0 = arith.constant 0 : i32
    return %arg0, %c0_i32 : i32, i32
  }
}

</mosaic_0001>

<bundles_post_ra>
// kernel: guidence_attention_forward.4
= control target key start
LH: loop header
LB: loop body
LE: loop exit
PB: predicated region body
PF: predicated region fallthrough
CT: control target
= control target key end

     0   :  { %11 = vsyncpa [#allocation3], 0  ;;  %s314_s0 = inlined_call_operand.hbm [shape: f32[16,32], index: 0, kind: input, shape index: {}]   ;;  %s315_s1 = inlined_call_operand.vmem [shape: f32[16,32], index: 1, kind: input, shape index: {}]   ;;  %s316_s2 = inlined_call_operand.hbm [shape: f32[32,32], index: 2, kind: input, shape index: {}]   ;;  %s317_s3 = inlined_call_operand.hbm [shape: f32[32,32], index: 3, kind: input, shape index: {}]   ;;  %s318_s4 = inlined_call_operand.vmem [shape: f32[16,32], index: 4, kind: output, shape index: {0}]   ;;  %s319_s5 = inlined_call_operand.vmem [shape: f32[16,32], index: 5, kind: output, shape index: {1}]  }
   0x1   :  { %12 = vsyncpa [#allocation5], 0  ;;  %s32_s20 = sshll.u32 %s316_s2, 4  ;;  %s244_s21 = smov [#allocation4]   ;;  %s33_s20 = int_to_ptr.hbm [resolvable:$true] %s32_s20 }
   0x2   :  { %s34_s22 = sshll.u32 %s244_s21, 4  ;;  %s17_s25 = sshll.u32 %s314_s0, 4  ;;  %s35_s22 = int_to_ptr.vmem [resolvable:$true] %s34_s22  ;;  %s18_s25 = int_to_ptr.hbm [resolvable:$true] %s17_s25 }
   0x3   :  { %s245_s26 = smov 128   ;;  %s246_s27 = smov 8  }
   0x4   :  { %40 = dma.hbm_to_vmem [thread:$0]  %s33_s20, 512, %s35_s22, [#allocation5], %s245_s26, %s245_s26, %s246_s27  }
   0x5   :  { %s247_s28 = smov [#allocation2]   ;;  %s45_s7 = sshll.u32 %s317_s3, 4  ;;  %s46_s7 = int_to_ptr.hbm [resolvable:$true] %s45_s7 }
   0x6   :  { %s19_s29 = sshll.u32 %s247_s28, 4  ;;  %s248_s2 = smov [#allocation6]   ;;  %s20_s29 = int_to_ptr.vmem [resolvable:$true] %s19_s29 }
   0x7   :  { %25 = dma.hbm_to_vmem [thread:$0]  %s18_s25, 256, %s20_s29, [#allocation3], %s245_s26, %s245_s26, %s246_s27  }
   0x8   :  { %s47_s8 = sshll.u32 %s248_s2, 4  ;;  %s48_s8 = int_to_ptr.vmem [resolvable:$true] %s47_s8 }
   0x9   :  { %53 = dma.hbm_to_vmem [thread:$0]  %s46_s7, 512, %s48_s8, [#allocation5], %s245_s26, %s245_s26, %s246_s27  }
   0xa   :  { %240 = dma.done.wait [#allocation3], 256  }
   0xb   :  { %241 = vsyncadd [#allocation3], 4294967040 }
   0xc   :  { %242 = dma.done.wait [#allocation5], 1024  }
   0xd   :  { %243 = vsyncadd [#allocation5], 4294966272  ;;  %v71_v0 = vld [vmem:[#allocation4 + $0x18] sm:$0xff]  ;;  %v70_v2 = vld [vmem:[#allocation4 + $0x10] sm:$0xff]  ;;  %vm72_vm0 = vcmask 261120  }
   0xe   :  { %v109_v1 = vld [vmem:[#allocation6 + $0x18] sm:$0xff]  ;;  %155 = vmatpush.msra.mxu2 %v71_v0  ;;  %v108_v3 = vld [vmem:[#allocation6 + $0x10] sm:$0xff]  ;;  %v69_v4 = vld [vmem:[#allocation4 + $0x8] sm:$0xff]  ;;  %91 = vmatpush.msra.mxu0 %v71_v0 }
   0xf   :  { %159 = vmatpush.msra.mxu3 %v109_v1  ;;  %v107_v5 = vld [vmem:[#allocation6 + $0x8] sm:$0xff]  ;;  %128 = vmatpush.msra.mxu1 %v109_v1  ;;  %v68_v6 = vld [vmem:[#allocation4] sm:$0xff]  ;;  %v67_v8 = vld [vmem:[#allocation2 + $0x8] sm:$0xff] }
  0x10   :  { %156 = vmatpush.msra.mxu2 %v70_v2  ;;  %v106_v7 = vld [vmem:[#allocation6] sm:$0xff]  ;;  %92 = vmatpush.msra.mxu0 %v70_v2  ;;  %v105_v9 = vld [vmem:[%s315_s1 + $0x8] sm:$0xff]  ;;  %v66_v10 = vld [vmem:[#allocation2] sm:$0xff] }
  0x11   :  { %160 = vmatpush.msra.mxu3 %v108_v3  ;;  %129 = vmatpush.msra.mxu1 %v108_v3  ;;  %v104_v11 = vld [vmem:[%s315_s1] sm:$0xff] }
  0x12   :  { %157 = vmatpush.msra.mxu2 %v69_v4  ;;  %93 = vmatpush.msra.mxu0 %v69_v4 }
  0x13   :  { %161 = vmatpush.msra.mxu3 %v107_v5  ;;  %130 = vmatpush.msra.mxu1 %v107_v5 }
  0x14   :  { %158 = vmatpush.msra.mxu2 %v68_v6  ;;  %94 = vmatpush.msra.mxu0 %v68_v6 }
  0x15   :  { %162 = vmatpush.msra.mxu3 %v106_v7  ;;  %152 = vmatmul.msk.f32.vlgmr.msra.gmra.mxu2 %vm72_vm0, %v67_v8 }
  0x16   :  { %154 = vmatmul.msk.f32.vlgmr.msra.gmra.mxu3 %vm72_vm0, %v105_v9  ;;  %131 = vmatpush.msra.mxu1 %v106_v7 }
  0x17   :  { %151 = vmatmul.msk.f32.vlgmr.msra.gmra.mxu0 %vm72_vm0, %v66_v10  ;;  %153 = vmatmul.msk.f32.vlgmr.msra.gmra.mxu1 %vm72_vm0, %v104_v11 }
  0x94   :  { %v96_v12 = vpop.f32.mrf.mxu0  ;;  %v133_v13 = vpop.f32.mrf.mxu1 }
  0x95   :  { %102 = vst.msk [vmem:[%s318_s4] sm:$0xff] %vm72_vm0, %v96_v12 }
  0x96   :  { %139 = vst.msk [vmem:[%s319_s5] sm:$0xff] %vm72_vm0, %v133_v13 }
  0x98   :  { %v99_v14 = vpop.f32.mrf.mxu2 }
  0x99   :  { %v136_v15 = vpop.f32.mrf.mxu3  ;;  %103 = vst.msk [vmem:[%s318_s4 + $0x8] sm:$0xff] %vm72_vm0, %v99_v14 }
  0x9a   :  { %140 = vst.msk [vmem:[%s319_s5 + $0x8] sm:$0xff] %vm72_vm0, %v136_v15 }
  0x9b   :  { %149 = vsyncpa [#allocation3], 1 }
  0x9c   :  { %150 = vsyncpa [#allocation5], 1 }

// kernel: guidence_attention_forward.7
= control target key start
LH: loop header
LB: loop body
LE: loop exit
PB: predicated region body
PF: predicated region fallthrough
CT: control target
= control target key end

     0   :  { %13 = vsyncpa [#allocation3], 0  ;;  %s400_s0 = inlined_call_operand.vmem [shape: f32[16,32], index: 0, kind: input, shape index: {}]   ;;  %s401_s1 = inlined_call_operand.vmem [shape: f32[16,32], index: 1, kind: input, shape index: {}]   ;;  %s402_s2 = inlined_call_operand.hbm [shape: f32[32,32], index: 2, kind: input, shape index: {}]   ;;  %s403_s3 = inlined_call_operand.hbm [shape: f32[32,32], index: 3, kind: input, shape index: {}]   ;;  %s404_s4 = inlined_call_operand.vmem [shape: f32[1,32], index: 4, kind: input, shape index: {}]   ;;  %s405_s5 = inlined_call_operand.vmem [shape: f32[1,32], index: 5, kind: input, shape index: {}]   ;;  %s406_s6 = inlined_call_operand.hbm [shape: f32[16,32], index: 6, kind: output, shape index: {0}]   ;;  %s407_s7 = inlined_call_operand.hbm [shape: f32[16,32], index: 7, kind: output, shape index: {1}]  }
   0x1   :  { %14 = vsyncpa [#allocation6], 0 }
   0x2   :  { %15 = vsyncpa [#allocation4], 0 }
   0x3   :  { %16 = vsyncpa [#allocation9], 0  ;;  %s25_s26 = sshll.u32 %s402_s2, 4  ;;  %s304_s27 = smov [#allocation2]   ;;  %s26_s26 = int_to_ptr.hbm [resolvable:$true] %s25_s26 }
   0x4   :  { %s27_s28 = sshll.u32 %s304_s27, 4  ;;  %s38_s8 = sshll.u32 %s403_s3, 4  ;;  %s28_s28 = int_to_ptr.vmem [resolvable:$true] %s27_s28  ;;  %s39_s8 = int_to_ptr.hbm [resolvable:$true] %s38_s8 }
   0x5   :  { %s305_s9 = smov 128   ;;  %s306_s10 = smov 8  }
   0x6   :  { %33 = dma.hbm_to_vmem [thread:$0]  %s26_s26, 512, %s28_s28, [#allocation3], %s305_s9, %s305_s9, %s306_s10  }
   0x7   :  { %s307_s11 = smov [#allocation5]  }
   0x8   :  { %s40_s12 = sshll.u32 %s307_s11, 4  ;;  %s41_s12 = int_to_ptr.vmem [resolvable:$true] %s40_s12 }
   0x9   :  { %46 = dma.hbm_to_vmem [thread:$0]  %s39_s8, 512, %s41_s12, [#allocation6], %s305_s9, %s305_s9, %s306_s10  }
   0xa   :  { %296 = dma.done.wait [#allocation3], 512  }
   0xb   :  { %297 = vsyncadd [#allocation3], 4294966784 }
   0xc   :  { %298 = dma.done.wait [#allocation6], 512  }
   0xd   :  { %299 = vsyncadd [#allocation6], 4294966784  ;;  %v64_v0 = vld [vmem:[#allocation2 + $0x18] sm:$0xff]  ;;  %v63_v2 = vld [vmem:[#allocation2 + $0x10] sm:$0xff]  ;;  %vm69_vm0 = vcmask 261120   ;;  %s148_s25 = sshll.u32 %s406_s6, 4  ;;  %s149_s25 = int_to_ptr.hbm [resolvable:$true] %s148_s25 }
   0xe   :  { %v106_v1 = vld [vmem:[#allocation5 + $0x18] sm:$0xff]  ;;  %184 = vmatpush.msra.mxu2 %v64_v0  ;;  %v105_v3 = vld [vmem:[#allocation5 + $0x10] sm:$0xff]  ;;  %v62_v4 = vld [vmem:[#allocation2 + $0x8] sm:$0xff]  ;;  %88 = vmatpush.msra.mxu0 %v64_v0  ;;  %s309_s26 = smov [#allocation8]   ;;  %s161_s29 = sshll.u32 %s407_s7, 4  ;;  %s162_s29 = int_to_ptr.hbm [resolvable:$true] %s161_s29 }
   0xf   :  { %188 = vmatpush.msra.mxu3 %v106_v1  ;;  %v104_v5 = vld [vmem:[#allocation5 + $0x8] sm:$0xff]  ;;  %129 = vmatpush.msra.mxu1 %v106_v1  ;;  %v61_v6 = vld [vmem:[#allocation2] sm:$0xff]  ;;  %s159_s27 = sshll.u32 %s309_s26, 4  ;;  %s160_s27 = int_to_ptr.vmem [resolvable:$true] %s159_s27 }
  0x10   :  { %185 = vmatpush.msra.mxu2 %v63_v2  ;;  %v103_v7 = vld [vmem:[#allocation5] sm:$0xff]  ;;  %89 = vmatpush.msra.mxu0 %v63_v2  ;;  %v60_v8 = vld [vmem:[%s400_s0 + $0x8] sm:$0xff] }
  0x11   :  { %189 = vmatpush.msra.mxu3 %v105_v3  ;;  %130 = vmatpush.msra.mxu1 %v105_v3  ;;  %v102_v9 = vld [vmem:[%s401_s1 + $0x8] sm:$0xff]  ;;  %v59_v10 = vld [vmem:[%s400_s0] sm:$0xff] }
  0x12   :  { %186 = vmatpush.msra.mxu2 %v62_v4  ;;  %90 = vmatpush.msra.mxu0 %v62_v4  ;;  %v101_v11 = vld [vmem:[%s401_s1] sm:$0xff]  ;;  %s308_s1 = smov [#allocation7]  }
  0x13   :  { %190 = vmatpush.msra.mxu3 %v104_v5  ;;  %131 = vmatpush.msra.mxu1 %v104_v5  ;;  %v198_v12 = vld [vmem:[%s404_s4] ss:$0 sm:$0xff]  ;;  %s146_s22 = sshll.u32 %s308_s1, 4  ;;  %s147_s22 = int_to_ptr.vmem [resolvable:$true] %s146_s22 }
  0x14   :  { %187 = vmatpush.msra.mxu2 %v61_v6  ;;  %91 = vmatpush.msra.mxu0 %v61_v6  ;;  %v199_v13 = vld [vmem:[%s405_s5] ss:$0 sm:$0xff] }
  0x15   :  { %191 = vmatpush.msra.mxu3 %v103_v7  ;;  %181 = vmatmul.msk.f32.vlgmr.msra.gmra.mxu2 %vm69_vm0, %v60_v8 }
  0x16   :  { %183 = vmatmul.msk.f32.vlgmr.msra.gmra.mxu3 %vm69_vm0, %v102_v9  ;;  %132 = vmatpush.msra.mxu1 %v103_v7 }
  0x17   :  { %180 = vmatmul.msk.f32.vlgmr.msra.gmra.mxu0 %vm69_vm0, %v59_v10  ;;  %182 = vmatmul.msk.f32.vlgmr.msra.gmra.mxu1 %vm69_vm0, %v101_v11 }
  0x94   :  { %v93_v14 = vpop.f32.mrf.mxu0  ;;  %v134_v15 = vpop.f32.mrf.mxu1 }
  0x95   :  { %v94_v16 = vadd.f32 %v198_v12, %v93_v14  ;;  %v135_v17 = vadd.f32 %v199_v13, %v134_v15 }
  0x97   :  { %99 = vst.msk [vmem:[#allocation7] sm:$0xff] %vm69_vm0, %v94_v16 }
  0x98   :  { %v96_v18 = vpop.f32.mrf.mxu2  ;;  %140 = vst.msk [vmem:[#allocation8] sm:$0xff] %vm69_vm0, %v135_v17 }
  0x99   :  { %v137_v19 = vpop.f32.mrf.mxu3  ;;  %v97_v20 = vadd.f32 %v198_v12, %v96_v18 }
  0x9a   :  { %v138_v21 = vadd.f32 %v199_v13, %v137_v19 }
  0x9b   :  { %100 = vst.msk [vmem:[#allocation7 + $0x8] sm:$0xff] %vm69_vm0, %v97_v20 }
  0x9c   :  { %141 = vst.msk [vmem:[#allocation8 + $0x8] sm:$0xff] %vm69_vm0, %v138_v21  ;;  %154 = dma.vmem_to_hbm [thread:$0]  %s147_s22, 256, %s149_s25, [#allocation4], %s305_s9, %s305_s9, %s306_s10  }
  0x9d   :  { %167 = dma.vmem_to_hbm [thread:$0]  %s160_s27, 256, %s162_s29, [#allocation9], %s305_s9, %s305_s9, %s306_s10  }
  0x9e   :  { %300 = dma.done.wait [#allocation4], 256  }
  0x9f   :  { %301 = vsyncadd [#allocation4], 4294967040 }
  0xa0   :  { %302 = dma.done.wait [#allocation9], 256  }
  0xa1   :  { %303 = vsyncadd [#allocation9], 4294967040 }
  0xa2   :  { %176 = vsyncpa [#allocation3], 1 }
  0xa3   :  { %177 = vsyncpa [#allocation6], 1 }
  0xa4   :  { %178 = vsyncpa [#allocation4], 1 }
  0xa5   :  { %179 = vsyncpa [#allocation9], 1 }

// kernel: guidence_attention_forward.5
= control target key start
LH: loop header
LB: loop body
LE: loop exit
PB: predicated region body
PF: predicated region fallthrough
CT: control target
= control target key end

     0   :  { %17 = vsyncpa [#allocation3], 0  ;;  %s706_s0 = inlined_call_operand.hbm [shape: f32[16,32], index: 0, kind: input, shape index: {}]   ;;  %s707_s1 = inlined_call_operand.hbm [shape: f32[16,32], index: 1, kind: input, shape index: {}]   ;;  %s708_s2 = inlined_call_operand.hbm [shape: f32[16,32], index: 2, kind: input, shape index: {}]   ;;  %s709_s3 = inlined_call_operand.hbm [shape: f32[16,32], index: 3, kind: input, shape index: {}]   ;;  %s710_s4 = inlined_call_operand.hbm [shape: f32[32,32], index: 4, kind: input, shape index: {}]   ;;  %s711_s5 = inlined_call_operand.hbm [shape: f32[32,32], index: 5, kind: input, shape index: {}]   ;;  %s712_s6 = inlined_call_operand.hbm [shape: f32[32,32], index: 6, kind: input, shape index: {}]   ;;  %s713_s7 = inlined_call_operand.hbm [shape: f32[32,32], index: 7, kind: input, shape index: {}]   ;;  %s714_s8 = inlined_call_operand.vmem [shape: f32[16,32], index: 8, kind: output, shape index: {0}]   ;;  %s715_s9 = inlined_call_operand.vmem [shape: f32[16,32], index: 9, kind: output, shape index: {1}]   ;;  %s716_s10 = inlined_call_operand.vmem [shape: f32[16,32], index: 10, kind: output, shape index: {2}]   ;;  %s717_s11 = inlined_call_operand.vmem [shape: f32[16,32], index: 11, kind: output, shape index: {3}]  }
   0x1   :  { %18 = vsyncpa [#allocation5], 0 }
   0x2   :  { %19 = vsyncpa [#allocation8], 0 }
   0x3   :  { %20 = vsyncpa [#allocation11], 0 }
   0x4   :  { %21 = vsyncpa [#allocation14], 0  ;;  %s39_s19 = sshll.u32 %s707_s1, 4  ;;  %s548_s20 = smov [#allocation4]   ;;  %s40_s19 = int_to_ptr.hbm [resolvable:$true] %s39_s19 }
   0x5   :  { %s41_s21 = sshll.u32 %s548_s20, 4  ;;  %s65_s24 = sshll.u32 %s709_s3, 4  ;;  %s42_s21 = int_to_ptr.vmem [resolvable:$true] %s41_s21  ;;  %s66_s24 = int_to_ptr.hbm [resolvable:$true] %s65_s24 }
   0x6   :  { %s549_s25 = smov 128   ;;  %s550_s26 = smov 8  }
   0x7   :  { %47 = dma.hbm_to_vmem [thread:$0]  %s40_s19, 256, %s42_s21, [#allocation5], %s549_s25, %s549_s25, %s550_s26  }
   0x8   :  { %s551_s27 = smov [#allocation7]   ;;  %s91_s1 = sshll.u32 %s711_s5, 4  ;;  %s92_s1 = int_to_ptr.hbm [resolvable:$true] %s91_s1 }
   0x9   :  { %s67_s28 = sshll.u32 %s551_s27, 4  ;;  %s26_s13 = sshll.u32 %s706_s0, 4  ;;  %s68_s28 = int_to_ptr.vmem [resolvable:$true] %s67_s28  ;;  %s27_s13 = int_to_ptr.hbm [resolvable:$true] %s26_s13 }
   0xa   :  { %73 = dma.hbm_to_vmem [thread:$0]  %s66_s24, 256, %s68_s28, [#allocation8], %s549_s25, %s549_s25, %s550_s26  }
   0xb   :  { %s552_s14 = smov [#allocation10]   ;;  %s553_s16 = smov [#allocation2]  }
   0xc   :  { %s93_s15 = sshll.u32 %s552_s14, 4  ;;  %s28_s5 = sshll.u32 %s553_s16, 4  ;;  %s94_s15 = int_to_ptr.vmem [resolvable:$true] %s93_s15  ;;  %s29_s5 = int_to_ptr.vmem [resolvable:$true] %s28_s5 }
   0xd   :  { %99 = dma.hbm_to_vmem [thread:$0]  %s92_s1, 512, %s94_s15, [#allocation11], %s549_s25, %s549_s25, %s550_s26  }
   0xe   :  { %s52_s19 = sshll.u32 %s708_s2, 4  ;;  %s78_s21 = sshll.u32 %s710_s4, 4  ;;  %s53_s19 = int_to_ptr.hbm [resolvable:$true] %s52_s19  ;;  %s79_s21 = int_to_ptr.hbm [resolvable:$true] %s78_s21 }
   0xf   :  { %34 = dma.hbm_to_vmem [thread:$0]  %s27_s13, 256, %s29_s5, [#allocation3], %s549_s25, %s549_s25, %s550_s26  }
  0x10   :  { %s554_s22 = smov [#allocation6]   ;;  %s555_s24 = smov [#allocation9]  }
  0x11   :  { %s54_s23 = sshll.u32 %s554_s22, 4  ;;  %s80_s2 = sshll.u32 %s555_s24, 4  ;;  %s55_s23 = int_to_ptr.vmem [resolvable:$true] %s54_s23  ;;  %s81_s2 = int_to_ptr.vmem [resolvable:$true] %s80_s2 }
  0x12   :  { %60 = dma.hbm_to_vmem [thread:$0]  %s53_s19, 256, %s55_s23, [#allocation5], %s549_s25, %s549_s25, %s550_s26  }
  0x13   :  { %s104_s29 = sshll.u32 %s712_s6, 4  ;;  %s117_s1 = sshll.u32 %s713_s7, 4  ;;  %s105_s29 = int_to_ptr.hbm [resolvable:$true] %s104_s29  ;;  %s118_s1 = int_to_ptr.hbm [resolvable:$true] %s117_s1 }
  0x14   :  { %86 = dma.hbm_to_vmem [thread:$0]  %s79_s21, 512, %s81_s2, [#allocation8], %s549_s25, %s549_s25, %s550_s26  }
  0x15   :  { %s556_s3 = smov [#allocation12]   ;;  %s557_s13 = smov [#allocation13]  }
  0x16   :  { %s106_s12 = sshll.u32 %s556_s3, 4  ;;  %s119_s6 = sshll.u32 %s557_s13, 4  ;;  %s107_s12 = int_to_ptr.vmem [resolvable:$true] %s106_s12  ;;  %s120_s6 = int_to_ptr.vmem [resolvable:$true] %s119_s6 }
  0x17   :  { %112 = dma.hbm_to_vmem [thread:$0]  %s105_s29, 512, %s107_s12, [#allocation11], %s549_s25, %s549_s25, %s550_s26  }
  0x18   :  { %125 = dma.hbm_to_vmem [thread:$0]  %s118_s1, 512, %s120_s6, [#allocation14], %s549_s25, %s549_s25, %s550_s26  }
  0x19   :  { %538 = dma.done.wait [#allocation3], 256  }
  0x1a   :  { %539 = vsyncadd [#allocation3], 4294967040 }
  0x1b   :  { %540 = dma.done.wait [#allocation5], 512  }
  0x1c   :  { %541 = vsyncadd [#allocation5], 4294966784 }
  0x1d   :  { %542 = dma.done.wait [#allocation8], 768  }
  0x1e   :  { %543 = vsyncadd [#allocation8], 4294966528 }
  0x1f   :  { %544 = dma.done.wait [#allocation11], 1024  }
  0x20   :  { %545 = vsyncadd [#allocation11], 4294966272 }
  0x21   :  { %546 = dma.done.wait [#allocation14], 512  }
  0x22   :  { %547 = vsyncadd [#allocation14], 4294966784  ;;  %v238_v0 = vld [vmem:[#allocation12 + $0x18] sm:$0xff]  ;;  %v237_v2 = vld [vmem:[#allocation12 + $0x10] sm:$0xff]  ;;  %vm164_vm0 = vcmask 261120  }
  0x23   :  { %v275_v1 = vld [vmem:[#allocation13 + $0x18] sm:$0xff]  ;;  %257 = vmatpush.msra.mxu2 %v238_v0  ;;  %v274_v3 = vld [vmem:[#allocation13 + $0x10] sm:$0xff]  ;;  %v236_v4 = vld [vmem:[#allocation12 + $0x8] sm:$0xff] }
  0x24   :  { %294 = vmatpush.msra.mxu3 %v275_v1  ;;  %v273_v5 = vld [vmem:[#allocation13 + $0x8] sm:$0xff]  ;;  %v163_v6 = vld [vmem:[#allocation9 + $0x18] sm:$0xff]  ;;  %v235_v8 = vld [vmem:[#allocation12] sm:$0xff] }
  0x25   :  { %v201_v7 = vld [vmem:[#allocation10 + $0x18] sm:$0xff]  ;;  %258 = vmatpush.msra.mxu2 %v237_v2  ;;  %183 = vmatpush.msra.mxu0 %v163_v6  ;;  %v272_v9 = vld [vmem:[#allocation13] sm:$0xff]  ;;  %v162_v10 = vld [vmem:[#allocation9 + $0x10] sm:$0xff] }
  0x26   :  { %295 = vmatpush.msra.mxu3 %v274_v3  ;;  %220 = vmatpush.msra.mxu1 %v201_v7  ;;  %v200_v11 = vld [vmem:[#allocation10 + $0x10] sm:$0xff]  ;;  %v233_v12 = vld [vmem:[#allocation6] sm:$0xff]  ;;  %v161_v14 = vld [vmem:[#allocation9 + $0x8] sm:$0xff] }
  0x27   :  { %259 = vmatpush.msra.mxu2 %v236_v4  ;;  %v270_v13 = vld [vmem:[#allocation7] sm:$0xff]  ;;  %184 = vmatpush.msra.mxu0 %v162_v10  ;;  %v199_v15 = vld [vmem:[#allocation10 + $0x8] sm:$0xff]  ;;  %v160_v16 = vld [vmem:[#allocation9] sm:$0xff] }
  0x28   :  { %296 = vmatpush.msra.mxu3 %v273_v5  ;;  %221 = vmatpush.msra.mxu1 %v200_v11  ;;  %v198_v17 = vld [vmem:[#allocation10] sm:$0xff]  ;;  %v196_v19 = vld [vmem:[#allocation4] sm:$0xff]  ;;  %v234_v20 = vld [vmem:[#allocation6 + $0x8] sm:$0xff] }
  0x29   :  { %260 = vmatpush.msra.mxu2 %v235_v8  ;;  %185 = vmatpush.msra.mxu0 %v161_v14  ;;  %v158_v18 = vld [vmem:[#allocation2] sm:$0xff]  ;;  %v271_v21 = vld [vmem:[#allocation7 + $0x8] sm:$0xff]  ;;  %v159_v22 = vld [vmem:[#allocation2 + $0x8] sm:$0xff] }
  0x2a   :  { %297 = vmatpush.msra.mxu3 %v272_v9  ;;  %332 = vmatmul.msk.f32.vlgmr.msra.gmra.mxu2 %vm164_vm0, %v233_v12  ;;  %v197_v23 = vld [vmem:[#allocation4 + $0x8] sm:$0xff] }
  0x2b   :  { %334 = vmatmul.msk.f32.vlgmr.msra.gmra.mxu3 %vm164_vm0, %v270_v13  ;;  %222 = vmatpush.msra.mxu1 %v199_v15 }
  0x2c   :  { %186 = vmatpush.msra.mxu0 %v160_v16 }
  0x2d   :  { %223 = vmatpush.msra.mxu1 %v198_v17  ;;  %328 = vmatmul.msk.f32.vlgmr.msra.gmra.mxu0 %vm164_vm0, %v158_v18 }
  0x2e   :  { %330 = vmatmul.msk.f32.vlgmr.msra.gmra.mxu1 %vm164_vm0, %v196_v19 }
  0x32   :  { %333 = vmatmul.msk.f32.gmra.mxu2 %vm164_vm0, %v234_v20 }
  0x33   :  { %335 = vmatmul.msk.f32.gmra.mxu3 %vm164_vm0, %v271_v21 }
  0x35   :  { %329 = vmatmul.msk.f32.gmra.mxu0 %vm164_vm0, %v159_v22 }
  0x36   :  { %331 = vmatmul.msk.f32.gmra.mxu1 %vm164_vm0, %v197_v23 }
  0xaa   :  { %v188_v24 = vpop.f32.mrf.mxu0 }
  0xab   :  { %v225_v25 = vpop.f32.mrf.mxu1  ;;  %194 = vst.msk [vmem:[%s714_s8] sm:$0xff] %vm164_vm0, %v188_v24 }
  0xac   :  { %231 = vst.msk [vmem:[%s715_s9] sm:$0xff] %vm164_vm0, %v225_v25 }
  0xad   :  { %v262_v26 = vpop.f32.mrf.mxu2 }
  0xae   :  { %v299_v27 = vpop.f32.mrf.mxu3  ;;  %268 = vst.msk [vmem:[%s716_s10] sm:$0xff] %vm164_vm0, %v262_v26 }
  0xaf   :  { %305 = vst.msk [vmem:[%s717_s11] sm:$0xff] %vm164_vm0, %v299_v27 }
  0xb2   :  { %v191_v28 = vpop.f32.mrf.mxu0 }
  0xb3   :  { %v228_v29 = vpop.f32.mrf.mxu1  ;;  %195 = vst.msk [vmem:[%s714_s8 + $0x8] sm:$0xff] %vm164_vm0, %v191_v28 }
  0xb4   :  { %232 = vst.msk [vmem:[%s715_s9 + $0x8] sm:$0xff] %vm164_vm0, %v228_v29 }
  0xb5   :  { %v265_v30 = vpop.f32.mrf.mxu2 }
  0xb6   :  { %v302_v31 = vpop.f32.mrf.mxu3  ;;  %269 = vst.msk [vmem:[%s716_s10 + $0x8] sm:$0xff] %vm164_vm0, %v265_v30 }
  0xb7   :  { %306 = vst.msk [vmem:[%s717_s11 + $0x8] sm:$0xff] %vm164_vm0, %v302_v31 }
  0xb8   :  { %323 = vsyncpa [#allocation3], 1 }
  0xb9   :  { %324 = vsyncpa [#allocation5], 1 }
  0xba   :  { %325 = vsyncpa [#allocation8], 1 }
  0xbb   :  { %326 = vsyncpa [#allocation11], 1 }
  0xbc   :  { %327 = vsyncpa [#allocation14], 1 }

// kernel: guidence_attention_forward.6
= control target key start
LH: loop header
LB: loop body
LE: loop exit
PB: predicated region body
PF: predicated region fallthrough
CT: control target
= control target key end

     0   :  { %s3315_s24 = smov 0   ;;  %s3317_s25 = smov 0   ;;  %s4226_s0 = inlined_call_operand.vmem [shape: f32[8,2,1,32], index: 0, kind: input, shape index: {}]   ;;  %s4227_s1 = inlined_call_operand.vmem [shape: f32[8,2,1,32], index: 1, kind: input, shape index: {}]   ;;  %s4228_s2 = inlined_call_operand.vmem [shape: f32[8,2,1,32], index: 2, kind: input, shape index: {}]   ;;  %s4229_s3 = inlined_call_operand.vmem [shape: f32[8,2,1,32], index: 3, kind: input, shape index: {}]   ;;  %s4230_s4 = inlined_call_operand.vmem [shape: f32[8,2,1,32], index: 4, kind: input, shape index: {}]   ;;  %s4231_s5 = inlined_call_operand.vmem [shape: f32[8,2,1,32], index: 5, kind: input, shape index: {}]   ;;  %s4232_s6 = inlined_call_operand.vmem [shape: f32[2,8,32], index: 6, kind: output, shape index: {0}]   ;;  %s4233_s7 = inlined_call_operand.vmem [shape: f32[2,8,32], index: 7, kind: output, shape index: {1}]  }
   0x1   :  { %s3319_s26 = smov 0   ;;  %s3321_s27 = smov 0  }
   0x2   :  { %s3323_s28 = smov 0   ;;  %s3325_s29 = smov 0  }
   0x3 LB: > { %s2991_s30 = sadd.s32 4294967295, %s3259_s29   ;;  %s30_s8 = sadd.s32 1, %s3255_s28  ;;  %s3259_s29 = sphi %s3325_s29, %s18_s29   ;;  %s3255_s28 = sphi %s3323_s28, %s4253_s28   ;;  %s3251_s27 = sphi %s3321_s27, %s4252_s27   ;;  %s3247_s26 = sphi %s3319_s26, %s4251_s26   ;;  %s3243_s25 = sphi %s3317_s25, %s4250_s25   ;;  %s3239_s24 = sphi %s3315_s24, %s4249_s24  }
   0x4   : > { %p32_p0 = scmp.ge.s32.totalorder %s30_s8, 2  ;;  %s39_s9 = sadd.s32 1, %s3247_s26 }
   0x5   : > { %p46_p1 = scmp.ne.s32.totalorder %s3247_s26, %s3243_s25  ;;  %p47_p2 = scmp.eq.s32.totalorder %s3259_s29, 0 }
   0x6   : > { %s4255_s8 = smov (%p32_p0, %s30_s8), 0  ;;  %p78_p4 = scmp.ne.s32.totalorder %s3243_s25, %s3239_s24 }
   0x7   : > { %p3351_p3 = por %p47_p2, %p46_p1  ;;  %s35_s11 = ssub.s32 %s3255_s28, %s4255_s8 }
   0x8   : > { %p79_p5 = scmp.eq.s32.totalorder %s2991_s30, 0  ;;  %p37_p6 = scmp.eq.s32.totalorder %s35_s11, 0 }
   0x9   : > { %p2993_p7 = scmp.ge.s32.totalorder %s3259_s29, 1  ;;  %p251_p9 = scmp.lt.s32.totalorder %s3259_s29, 3 }
   0xa   : > { %p3359_p8 = por %p79_p5, %p78_p4 }
   0xb   : > { %s3365_s13 = scalar_select %p37_p6, %s3247_s26, %s39_s9  }
   0xc   : > { %p3367_p10 = pnand %p2993_p7, %p251_p9 }
   0xe   : > { %255 = sbr.rel (%p3367_p10) target bundleno = 59 (0x3b), region = 12 }
  0x13   : > { %259 = sbr.rel (!%p3359_p8) target bundleno = 29 (0x1d), region = 16  ;;  %s260_s17 = scalar_lea.vmem (%p3359_p8), %s4227_s1, %s3251_s27 }
  0x14   : > { %v277_v0 = vld [vmem:[%s260_s17] sm:$0x1] (%p3359_p8)  ;;  %v279_v1 = vld [vmem:[%s260_s17 + $0x2] sm:$0x1] (%p3359_p8)  ;;  %v281_v2 = vld [vmem:[%s260_s17 + $0x4] sm:$0x1] (%p3359_p8) }
  0x15   : > { %278 = vst [vmem:[#allocation3] sm:$0x1] (%p3359_p8), %v277_v0  ;;  %v283_v3 = vld [vmem:[%s260_s17 + $0x6] sm:$0x1] (%p3359_p8)  ;;  %v285_v4 = vld [vmem:[%s260_s17 + $0x8] sm:$0x1] (%p3359_p8) }
  0x16   : > { %280 = vst [vmem:[#allocation3 + $0x1] sm:$0x1] (%p3359_p8), %v279_v1  ;;  %v287_v5 = vld [vmem:[%s260_s17 + $0xa] sm:$0x1] (%p3359_p8)  ;;  %v289_v6 = vld [vmem:[%s260_s17 + $0xc] sm:$0x1] (%p3359_p8) }
  0x17   : > { %282 = vst [vmem:[#allocation3 + $0x2] sm:$0x1] (%p3359_p8), %v281_v2  ;;  %v291_v7 = vld [vmem:[%s260_s17 + $0xe] sm:$0x1] (%p3359_p8) }
  0x18   : > { %284 = vst [vmem:[#allocation3 + $0x3] sm:$0x1] %v283_v3 }
  0x19   : > { %286 = vst [vmem:[#allocation3 + $0x4] sm:$0x1] %v285_v4 }
  0x1a   : > { %288 = vst [vmem:[#allocation3 + $0x5] sm:$0x1] %v287_v5 }
  0x1b   : > { %290 = vst [vmem:[#allocation3 + $0x6] sm:$0x1] %v289_v6 }
  0x1c   : > { %292 = vst [vmem:[#allocation3 + $0x7] sm:$0x1] %v291_v7 }
  0x1d PF: > { %332 = sbr.rel (!%p3359_p8) target bundleno = 39 (0x27), region = 57  ;;  %s333_s20 = scalar_lea.vmem (%p3359_p8), %s4228_s2, %s3251_s27 }
  0x1e   : > { %v350_v8 = vld [vmem:[%s333_s20] sm:$0x1] (%p3359_p8)  ;;  %v352_v9 = vld [vmem:[%s333_s20 + $0x2] sm:$0x1] (%p3359_p8)  ;;  %v354_v10 = vld [vmem:[%s333_s20 + $0x4] sm:$0x1] (%p3359_p8) }
  0x1f   : > { %351 = vst [vmem:[#allocation4] sm:$0x1] (%p3359_p8), %v350_v8  ;;  %v356_v11 = vld [vmem:[%s333_s20 + $0x6] sm:$0x1] (%p3359_p8)  ;;  %v358_v12 = vld [vmem:[%s333_s20 + $0x8] sm:$0x1] (%p3359_p8) }
  0x20   : > { %353 = vst [vmem:[#allocation4 + $0x1] sm:$0x1] (%p3359_p8), %v352_v9  ;;  %v360_v13 = vld [vmem:[%s333_s20 + $0xa] sm:$0x1] (%p3359_p8)  ;;  %v362_v14 = vld [vmem:[%s333_s20 + $0xc] sm:$0x1] (%p3359_p8) }
  0x21   : > { %355 = vst [vmem:[#allocation4 + $0x2] sm:$0x1] (%p3359_p8), %v354_v10  ;;  %v364_v15 = vld [vmem:[%s333_s20 + $0xe] sm:$0x1] (%p3359_p8) }
  0x22   : > { %357 = vst [vmem:[#allocation4 + $0x3] sm:$0x1] %v356_v11 }
  0x23   : > { %359 = vst [vmem:[#allocation4 + $0x4] sm:$0x1] %v358_v12 }
  0x24   : > { %361 = vst [vmem:[#allocation4 + $0x5] sm:$0x1] %v360_v13 }
  0x25   : > { %363 = vst [vmem:[#allocation4 + $0x6] sm:$0x1] %v362_v14 }
  0x26   : > { %365 = vst [vmem:[#allocation4 + $0x7] sm:$0x1] %v364_v15 }
  0x27 PF: > { %405 = sbr.rel (!%p3359_p8) target bundleno = 49 (0x31), region = 98  ;;  %s406_s23 = scalar_lea.vmem (%p3359_p8), %s4230_s4, %s3251_s27 }
  0x28   : > { %v423_v16 = vld [vmem:[%s406_s23] sm:$0x1] (%p3359_p8)  ;;  %v425_v17 = vld [vmem:[%s406_s23 + $0x2] sm:$0x1] (%p3359_p8)  ;;  %v427_v18 = vld [vmem:[%s406_s23 + $0x4] sm:$0x1] (%p3359_p8) }
  0x29   : > { %424 = vst [vmem:[#allocation6] sm:$0x1] (%p3359_p8), %v423_v16  ;;  %v429_v19 = vld [vmem:[%s406_s23 + $0x6] sm:$0x1] (%p3359_p8)  ;;  %v431_v20 = vld [vmem:[%s406_s23 + $0x8] sm:$0x1] (%p3359_p8) }
  0x2a   : > { %426 = vst [vmem:[#allocation6 + $0x1] sm:$0x1] (%p3359_p8), %v425_v17  ;;  %v433_v21 = vld [vmem:[%s406_s23 + $0xa] sm:$0x1] (%p3359_p8)  ;;  %v435_v22 = vld [vmem:[%s406_s23 + $0xc] sm:$0x1] (%p3359_p8) }
  0x2b   : > { %428 = vst [vmem:[#allocation6 + $0x2] sm:$0x1] (%p3359_p8), %v427_v18  ;;  %v437_v23 = vld [vmem:[%s406_s23 + $0xe] sm:$0x1] (%p3359_p8) }
  0x2c   : > { %430 = vst [vmem:[#allocation6 + $0x3] sm:$0x1] %v429_v19 }
  0x2d   : > { %432 = vst [vmem:[#allocation6 + $0x4] sm:$0x1] %v431_v20 }
  0x2e   : > { %434 = vst [vmem:[#allocation6 + $0x5] sm:$0x1] %v433_v21 }
  0x2f   : > { %436 = vst [vmem:[#allocation6 + $0x6] sm:$0x1] %v435_v22 }
  0x30   : > { %438 = vst [vmem:[#allocation6 + $0x7] sm:$0x1] %v437_v23 }
  0x31 PF: > { %478 = sbr.rel (!%p3359_p8) target bundleno = 59 (0x3b), region = 139  ;;  %s479_s9 = scalar_lea.vmem (%p3359_p8), %s4231_s5, %s3251_s27 }
  0x32   : > { %v496_v24 = vld [vmem:[%s479_s9] sm:$0x1] (%p3359_p8)  ;;  %v498_v25 = vld [vmem:[%s479_s9 + $0x2] sm:$0x1] (%p3359_p8)  ;;  %v500_v26 = vld [vmem:[%s479_s9 + $0x4] sm:$0x1] (%p3359_p8) }
  0x33   : > { %497 = vst [vmem:[#allocation7] sm:$0x1] (%p3359_p8), %v496_v24  ;;  %v502_v27 = vld [vmem:[%s479_s9 + $0x6] sm:$0x1] (%p3359_p8)  ;;  %v504_v28 = vld [vmem:[%s479_s9 + $0x8] sm:$0x1] (%p3359_p8) }
  0x34   : > { %499 = vst [vmem:[#allocation7 + $0x1] sm:$0x1] (%p3359_p8), %v498_v25  ;;  %v506_v29 = vld [vmem:[%s479_s9 + $0xa] sm:$0x1] (%p3359_p8)  ;;  %v508_v30 = vld [vmem:[%s479_s9 + $0xc] sm:$0x1] (%p3359_p8) }
  0x35   : > { %501 = vst [vmem:[#allocation7 + $0x2] sm:$0x1] (%p3359_p8), %v500_v26  ;;  %v510_v31 = vld [vmem:[%s479_s9 + $0xe] sm:$0x1] (%p3359_p8) }
  0x36   : > { %503 = vst [vmem:[#allocation7 + $0x3] sm:$0x1] %v502_v27 }
  0x37   : > { %505 = vst [vmem:[#allocation7 + $0x4] sm:$0x1] %v504_v28 }
  0x38   : > { %507 = vst [vmem:[#allocation7 + $0x5] sm:$0x1] %v506_v29 }
  0x39   : > { %509 = vst [vmem:[#allocation7 + $0x6] sm:$0x1] %v508_v30 }
  0x3a   : > { %511 = vst [vmem:[#allocation7 + $0x7] sm:$0x1] %v510_v31 }
  0x3b PF: > { %p2994_p11 = scmp.ge.s32.totalorder %s3259_s29, 2 }
  0x3d   : > { %552 = sbr.rel (%p2994_p11) target bundleno = 90 (0x5a), region = 180 }
  0x42   : > { %555 = sbr.rel (!%p3351_p3) target bundleno = 78 (0x4e), region = 184  ;;  %s557_s11 = sand.u32 (%p3351_p3), 1, %s3247_s26  }
  0x43   : > { %s563_s16 = scalar_lea.vmem (%p3351_p3), %s4226_s0, %s3255_s28  ;;  %s2995_s17 = sshll.u32 (%p3351_p3), %s557_s11, 3 }
  0x44   : > { %v580_v32 = vld [vmem:[%s563_s16] sm:$0x1] (%p3351_p3)  ;;  %v582_v33 = vld [vmem:[%s563_s16 + $0x2] sm:$0x1] (%p3351_p3)  ;;  %v584_v34 = vld [vmem:[%s563_s16 + $0x4] sm:$0x1] (%p3351_p3) }
  0x45   : > { %s559_s18 = scalar_lea.vmem (%p3351_p3), [#allocation2], %s2995_s17  ;;  %v586_v35 = vld [vmem:[%s563_s16 + $0x6] sm:$0x1] (%p3351_p3)  ;;  %v588_v36 = vld [vmem:[%s563_s16 + $0x8] sm:$0x1] (%p3351_p3) }
  0x46   : > { %581 = vst [vmem:[%s559_s18] sm:$0x1] (%p3351_p3), %v580_v32  ;;  %v590_v37 = vld [vmem:[%s563_s16 + $0xa] sm:$0x1] (%p3351_p3)  ;;  %v592_v38 = vld [vmem:[%s563_s16 + $0xc] sm:$0x1] (%p3351_p3) }
  0x47   : > { %583 = vst [vmem:[%s559_s18 + $0x1] sm:$0x1] %v582_v33  ;;  %v594_v39 = vld [vmem:[%s563_s16 + $0xe] sm:$0x1] }
  0x48   : > { %585 = vst [vmem:[%s559_s18 + $0x2] sm:$0x1] %v584_v34 }
  0x49   : > { %587 = vst [vmem:[%s559_s18 + $0x3] sm:$0x1] %v586_v35 }
  0x4a   : > { %589 = vst [vmem:[%s559_s18 + $0x4] sm:$0x1] %v588_v36 }
  0x4b   : > { %591 = vst [vmem:[%s559_s18 + $0x5] sm:$0x1] %v590_v37 }
  0x4c   : > { %593 = vst [vmem:[%s559_s18 + $0x6] sm:$0x1] %v592_v38 }
  0x4d   : > { %595 = vst [vmem:[%s559_s18 + $0x7] sm:$0x1] %v594_v39 }
  0x4e PF: > { %635 = sbr.rel (!%p3351_p3) target bundleno = 90 (0x5a), region = 225  ;;  %s637_s19 = sand.u32 (%p3351_p3), 1, %s3247_s26  }
  0x4f   : > { %s643_s22 = scalar_lea.vmem (%p3351_p3), %s4229_s3, %s3255_s28  ;;  %s2996_s23 = sshll.u32 (%p3351_p3), %s637_s19, 3 }
  0x50   : > { %v660_v40 = vld [vmem:[%s643_s22] sm:$0x1] (%p3351_p3)  ;;  %v662_v41 = vld [vmem:[%s643_s22 + $0x2] sm:$0x1] (%p3351_p3)  ;;  %v664_v42 = vld [vmem:[%s643_s22 + $0x4] sm:$0x1] (%p3351_p3) }
  0x51   : > { %s639_s24 = scalar_lea.vmem (%p3351_p3), [#allocation5], %s2996_s23  ;;  %v666_v43 = vld [vmem:[%s643_s22 + $0x6] sm:$0x1] (%p3351_p3)  ;;  %v668_v44 = vld [vmem:[%s643_s22 + $0x8] sm:$0x1] (%p3351_p3) }
  0x52   : > { %661 = vst [vmem:[%s639_s24] sm:$0x1] (%p3351_p3), %v660_v40  ;;  %v670_v45 = vld [vmem:[%s643_s22 + $0xa] sm:$0x1] (%p3351_p3)  ;;  %v672_v46 = vld [vmem:[%s643_s22 + $0xc] sm:$0x1] (%p3351_p3) }
  0x53   : > { %663 = vst [vmem:[%s639_s24 + $0x1] sm:$0x1] %v662_v41  ;;  %v674_v47 = vld [vmem:[%s643_s22 + $0xe] sm:$0x1] }
  0x54   : > { %665 = vst [vmem:[%s639_s24 + $0x2] sm:$0x1] %v664_v42 }
  0x55   : > { %667 = vst [vmem:[%s639_s24 + $0x3] sm:$0x1] %v666_v43 }
  0x56   : > { %669 = vst [vmem:[%s639_s24 + $0x4] sm:$0x1] %v668_v44 }
  0x57   : > { %671 = vst [vmem:[%s639_s24 + $0x5] sm:$0x1] %v670_v45 }
  0x58   : > { %673 = vst [vmem:[%s639_s24 + $0x6] sm:$0x1] %v672_v46 }
  0x59   : > { %675 = vst [vmem:[%s639_s24 + $0x7] sm:$0x1] %v674_v47 }
  0x5a PF: > { %718 = sbr.rel (%p3367_p10) target bundleno = 1789 (0x6fd), region = 266 }
  0x5f   : > { %s721_s10 = sand.u32 1, %s3243_s25   ;;  %v3442_v0 = vld [vmem:[#allocation3] sm:$0x1]  ;;  %v3444_v1 = vld [vmem:[#allocation3 + $0x1] sm:$0x1]  ;;  %vm912_vm0 = vcmask 31744  }
  0x60   : > { %s3415_s30 = sshll.u32 %s721_s10, 3  ;;  %v3446_v2 = vld [vmem:[#allocation3 + $0x2] sm:$0x1]  ;;  %v3448_v4 = vld [vmem:[#allocation3 + $0x3] sm:$0x1]  ;;  %vm937_vm1 = vcmask 64512  }
  0x61   : > { %s723_s9 = scalar_lea.vmem [#allocation2], %s3415_s30  ;;  %v3451_v5 = vld [vmem:[#allocation3 + $0x4] sm:$0x1]  ;;  %v3454_v6 = vld [vmem:[#allocation3 + $0x5] sm:$0x1]  ;;  %s736_s14 = scalar_lea.vmem [#allocation5], %s3415_s30 }
  0x62   : > { %v800_v48 = vld [vmem:[%s723_s9] sm:$0x1]  ;;  %v801_v49 = vld [vmem:[%s723_s9 + $0x1] sm:$0x1]  ;;  %v802_v50 = vld [vmem:[%s723_s9 + $0x2] sm:$0x1] }
  0x63   : > { %v803_v51 = vld [vmem:[%s723_s9 + $0x3] sm:$0x1]  ;;  %v804_v52 = vld [vmem:[%s723_s9 + $0x4] sm:$0x1]  ;;  %v805_v53 = vld [vmem:[%s723_s9 + $0x5] sm:$0x1] }
  0x64   : > { %v3418_v54 = vmul.f32 0.5, %v800_v48  ;;  %v3420_v55 = vmul.f32 0.5, %v801_v49  ;;  %v806_v56 = vld [vmem:[%s723_s9 + $0x6] sm:$0x1]  ;;  %v3422_v57 = vmul.f32 0.5, %v802_v50  ;;  %v3424_v58 = vmul.f32 0.5, %v803_v51 }
  0x65   : > { %v807_v59 = vld [vmem:[%s723_s9 + $0x7] sm:$0x1]  ;;  %v3426_v60 = vmul.f32 0.5, %v804_v52  ;;  %v3429_v61 = vmul.f32 0.5, %v805_v53  ;;  %v3432_v62 = vmul.f32 0.5, %v806_v56  ;;  %s3261_s11 = smov 124  }
  0x66   : > { %872 = vst [vmem:[#allocation1] ss:$9 sm:$0xff] %v3418_v54  ;;  %v3435_v63 = vmul.f32 0.5, %v807_v59  ;;  %v3457_v7 = vld [vmem:[#allocation3 + $0x6] sm:$0x1]  ;;  %s3262_s12 = smov 120  }
  0x67   : > { %874 = vst [vmem:[#allocation1 + $0x1] ss:$9 sm:$0xff] %v3420_v55  ;;  %v3460_v8 = vld [vmem:[#allocation3 + $0x7] sm:$0x1]  ;;  %v3466_v9 = vld [vmem:[#allocation4] sm:$0x1] }
  0x68   : > { %876 = vst [vmem:[#allocation1 + $0x2] ss:$9 sm:$0xff] %v3422_v57  ;;  %v3468_v10 = vld [vmem:[#allocation4 + $0x1] sm:$0x1]  ;;  %v3470_v12 = vld [vmem:[#allocation4 + $0x2] sm:$0x1] }
  0x69   : > { %878 = vst [vmem:[#allocation1 + $0x3] ss:$9 sm:$0xff] %v3424_v58  ;;  %v3473_v13 = vld [vmem:[#allocation4 + $0x3] sm:$0x1]  ;;  %v3476_v14 = vld [vmem:[#allocation4 + $0x4] sm:$0x1] }
  0x6a   : > { %880 = vst [vmem:[#allocation1 + $0x4] ss:$9 sm:$0xff] %v3426_v60  ;;  %v3479_v15 = vld [vmem:[#allocation4 + $0x5] sm:$0x1]  ;;  %v3483_v16 = vld [vmem:[#allocation4 + $0x6] sm:$0x1] }
  0x6b   : > { %882 = vst [vmem:[#allocation1 + $0x5] ss:$9 sm:$0xff] %v3429_v61  ;;  %v3486_v17 = vld [vmem:[#allocation4 + $0x7] sm:$0x1]  ;;  %v816_v18 = vld [vmem:[%s736_s14] sm:$0x1] }
  0x6c   : > { %884 = vst [vmem:[#allocation1 + $0x6] ss:$9 sm:$0xff] %v3432_v62  ;;  %v817_v19 = vld [vmem:[%s736_s14 + $0x1] sm:$0x1]  ;;  %v818_v20 = vld [vmem:[%s736_s14 + $0x2] sm:$0x1] }
  0x6d   : > { %886 = vst [vmem:[#allocation1 + $0x7] ss:$9 sm:$0xff] %v3435_v63  ;;  %v819_v21 = vld [vmem:[%s736_s14 + $0x3] sm:$0x1]  ;;  %v3493_v22 = vmul.f32 0.5, %v816_v18  ;;  %v3495_v24 = vmul.f32 0.5, %v817_v19 }
  0x6e   : > { %v820_v23 = vld [vmem:[%s736_s14 + $0x4] sm:$0x1]  ;;  %v821_v25 = vld [vmem:[%s736_s14 + $0x5] sm:$0x1]  ;;  %v3497_v26 = vmul.f32 0.5, %v818_v20  ;;  %v3499_v28 = vmul.f32 0.5, %v819_v21 }
  0x6f   : > { %v822_v27 = vld [vmem:[%s736_s14 + $0x6] sm:$0x1]  ;;  %v823_v30 = vld [vmem:[%s736_s14 + $0x7] sm:$0x1]  ;;  %v3501_v31 = vmul.f32 0.5, %v820_v23  ;;  %v3504_v32 = vmul.f32 0.5, %v821_v25 }
  0x70   : > { %v3507_v33 = vmul.f32 0.5, %v822_v27  ;;  %v3510_v34 = vmul.f32 0.5, %v823_v30  ;;  %v3517_v35 = vld [vmem:[#allocation6] sm:$0x1]  ;;  %v3519_v36 = vld [vmem:[#allocation6 + $0x1] sm:$0x1] }
  0x71   : > { %v3521_v37 = vld [vmem:[#allocation6 + $0x2] sm:$0x1]  ;;  %v3523_v39 = vld [vmem:[#allocation6 + $0x3] sm:$0x1]  ;;  %v3526_v40 = vld [vmem:[#allocation6 + $0x4] sm:$0x1] }
  0x72   : > { %v3529_v41 = vld [vmem:[#allocation6 + $0x5] sm:$0x1]  ;;  %v3532_v42 = vld [vmem:[#allocation6 + $0x6] sm:$0x1]  ;;  %v3535_v43 = vld [vmem:[#allocation6 + $0x7] sm:$0x1] }
  0x73   : > { %v3541_v44 = vld [vmem:[#allocation7] sm:$0x1]  ;;  %v3543_v45 = vld [vmem:[#allocation7 + $0x1] sm:$0x1]  ;;  %v3545_v47 = vld [vmem:[#allocation7 + $0x2] sm:$0x1] }
  0x74   : > { %v887_v3 = vld [vmem:[#allocation1] sm:$0xff]  ;;  %s3263_s15 = smov 116   ;;  %s3264_s16 = smov 112   ;;  %vm2748_vm2 = vcmask 97280   ;;  %vm2750_vm3 = vcmask 130048   ;;  %vm2752_vm4 = vcmask 162816  }
  0x75   : > { %896 = vst [vmem:[#allocation1] ss:$9 sm:$0xff] %v3442_v0  ;;  %v3548_v48 = vld [vmem:[#allocation7 + $0x3] sm:$0x1]  ;;  %v3551_v49 = vld [vmem:[#allocation7 + $0x4] sm:$0x1] }
  0x76   : > { %898 = vst [vmem:[#allocation1 + $0x1] ss:$9 sm:$0xff] %v3444_v1  ;;  %v3554_v50 = vld [vmem:[#allocation7 + $0x5] sm:$0x1]  ;;  %v3558_v51 = vld [vmem:[#allocation7 + $0x6] sm:$0x1] }
  0x77   : > { %900 = vst [vmem:[#allocation1 + $0x2] ss:$9 sm:$0xff] %v3446_v2  ;;  %v3561_v52 = vld [vmem:[#allocation7 + $0x7] sm:$0x1]  ;;  %s3265_s17 = smov 108   ;;  %s3266_s18 = smov 104  }
  0x78   : > { %902 = vst [vmem:[#allocation1 + $0x3] ss:$9 sm:$0xff] %v3448_v4  ;;  %s3267_s19 = smov 100   ;;  %s3268_s20 = smov 4   ;;  %vm2754_vm5 = vcmask 195584   ;;  %vm2756_vm6 = vcmask 228352  }
  0x79   : > { %904 = vst [vmem:[#allocation1 + $0x4] ss:$9 sm:$0xff] %v3451_v5  ;;  %s3269_s21 = smov 8   ;;  %s3270_s22 = smov 12   ;;  %vm2758_vm7 = vcmask 261120  }
  0x7a   : > { %906 = vst [vmem:[#allocation1 + $0x5] ss:$9 sm:$0xff] %v3454_v6  ;;  %s3271_s23 = smov 16   ;;  %s3272_s24 = smov 20  }
  0x7b   : > { %908 = vst [vmem:[#allocation1 + $0x6] ss:$9 sm:$0xff] %v3457_v7  ;;  %s3273_s10 = smov 24   ;;  %s3274_s30 = smov 28  }
  0x7c   : > { %910 = vst [vmem:[#allocation1 + $0x7] ss:$9 sm:$0xff] %v3460_v8  ;;  %p786_p12 = scmp.lt.s32.totalorder %s3251_s27, 1 }
  0x7e   : > { %s4257_s27 = smov (!%p786_p12, %s3251_s27), 1 }
  0x7f   : > { %s3000_s9 = sshll.u32 %s4257_s27, 3 }
  0x83   : > { %v911_v11 = vld [vmem:[#allocation1] sm:$0xff] }
  0x84   : > { %3002 = vmatpush.xpose.msk.msra.mxu0 %vm912_vm0, %v911_v11  ;;  %957 = vst [vmem:[#allocation1] ss:$9 sm:$0xff] %v3466_v9 }
  0x85   : > { %959 = vst [vmem:[#allocation1 + $0x1] ss:$9 sm:$0xff] %v3468_v10 }
  0x86   : > { %961 = vst [vmem:[#allocation1 + $0x2] ss:$9 sm:$0xff] %v3470_v12 }
  0x87   : > { %3003 = vmatmul.msk.f32.vlgmr.msra.gmra.mxu0 %vm912_vm0, %v887_v3  ;;  %963 = vst [vmem:[#allocation1 + $0x3] ss:$9 sm:$0xff] %v3473_v13 }
  0x88   : > { %965 = vst [vmem:[#allocation1 + $0x4] ss:$9 sm:$0xff] %v3476_v14 }
  0x89   : > { %967 = vst [vmem:[#allocation1 + $0x5] ss:$9 sm:$0xff] %v3479_v15 }
  0x8a   : > { %969 = vst [vmem:[#allocation1 + $0x6] ss:$9 sm:$0xff] %v3483_v16 }
  0x8b   : > { %971 = vst [vmem:[#allocation1 + $0x7] ss:$9 sm:$0xff] %v3486_v17 }
  0x92   : > { %v972_v29 = vld [vmem:[#allocation1] sm:$0xff] }
  0x93   : > { %1005 = vst [vmem:[#allocation1] ss:$9 sm:$0xff] %v3493_v22  ;;  %992 = vmatpush.msra.mxu1 %v972_v29 }
  0x94   : > { %1007 = vst [vmem:[#allocation1 + $0x1] ss:$9 sm:$0xff] %v3495_v24 }
  0x95   : > { %1009 = vst [vmem:[#allocation1 + $0x2] ss:$9 sm:$0xff] %v3497_v26 }
  0x96   : > { %1011 = vst [vmem:[#allocation1 + $0x3] ss:$9 sm:$0xff] %v3499_v28 }
  0x97   : > { %1013 = vst [vmem:[#allocation1 + $0x4] ss:$9 sm:$0xff] %v3501_v31 }
  0x98   : > { %1015 = vst [vmem:[#allocation1 + $0x5] ss:$9 sm:$0xff] %v3504_v32 }
  0x99   : > { %1017 = vst [vmem:[#allocation1 + $0x6] ss:$9 sm:$0xff] %v3507_v33 }
  0x9a   : > { %1019 = vst [vmem:[#allocation1 + $0x7] ss:$9 sm:$0xff] %v3510_v34 }
  0xa1   : > { %v1020_v38 = vld [vmem:[#allocation1] sm:$0xff] }
  0xa2   : > { %1029 = vst [vmem:[#allocation1] ss:$9 sm:$0xff] %v3517_v35 }
  0xa3   : > { %1031 = vst [vmem:[#allocation1 + $0x1] ss:$9 sm:$0xff] %v3519_v36 }
  0xa4   : > { %1033 = vst [vmem:[#allocation1 + $0x2] ss:$9 sm:$0xff] %v3521_v37 }
  0xa5   : > { %1035 = vst [vmem:[#allocation1 + $0x3] ss:$9 sm:$0xff] %v3523_v39 }
  0xa6   : > { %1037 = vst [vmem:[#allocation1 + $0x4] ss:$9 sm:$0xff] %v3526_v40 }
  0xa7   : > { %1039 = vst [vmem:[#allocation1 + $0x5] ss:$9 sm:$0xff] %v3529_v41 }
  0xa8   : > { %1041 = vst [vmem:[#allocation1 + $0x6] ss:$9 sm:$0xff] %v3532_v42 }
  0xa9   : > { %1043 = vst [vmem:[#allocation1 + $0x7] ss:$9 sm:$0xff] %v3535_v43 }
  0xb0   : > { %v1044_v46 = vld [vmem:[#allocation1] sm:$0xff] }
  0xb1   : > { %3005 = vmatpush.xpose.msk.msra.mxu2 %vm912_vm0, %v1044_v46  ;;  %1088 = vst [vmem:[#allocation1] ss:$9 sm:$0xff] %v3541_v44 }
  0xb2   : > { %1090 = vst [vmem:[#allocation1 + $0x1] ss:$9 sm:$0xff] %v3543_v45 }
  0xb3   : > { %1092 = vst [vmem:[#allocation1 + $0x2] ss:$9 sm:$0xff] %v3545_v47 }
  0xb4   : > { %3006 = vmatmul.msk.f32.vlgmr.msra.gmra.mxu2 %vm912_vm0, %v1020_v38  ;;  %1094 = vst [vmem:[#allocation1 + $0x3] ss:$9 sm:$0xff] %v3548_v48 }
  0xb5   : > { %1096 = vst [vmem:[#allocation1 + $0x4] ss:$9 sm:$0xff] %v3551_v49 }
  0xb6   : > { %1098 = vst [vmem:[#allocation1 + $0x5] ss:$9 sm:$0xff] %v3554_v50 }
  0xb7   : > { %1100 = vst [vmem:[#allocation1 + $0x6] ss:$9 sm:$0xff] %v3558_v51 }
  0xb8   : > { %1102 = vst [vmem:[#allocation1 + $0x7] ss:$9 sm:$0xff] %v3561_v52 }
  0xbf   : > { %v1103_v53 = vld [vmem:[#allocation1] sm:$0xff] }
  0xc0   : > { %1129 = vst [vmem:[#allocation1] ss:$9 sm:$0xff] %v3418_v54  ;;  %1123 = vmatpush.msra.mxu3 %v1103_v53 }
  0xc1   : > { %1131 = vst [vmem:[#allocation1 + $0x1] ss:$9 sm:$0xff] %v3420_v55 }
  0xc2   : > { %1133 = vst [vmem:[#allocation1 + $0x2] ss:$9 sm:$0xff] %v3422_v57 }
  0xc3   : > { %1135 = vst [vmem:[#allocation1 + $0x3] ss:$9 sm:$0xff] %v3424_v58 }
  0xc4   : > { %1137 = vst [vmem:[#allocation1 + $0x4] ss:$9 sm:$0xff] %v3426_v60 }
  0xc5   : > { %1139 = vst [vmem:[#allocation1 + $0x5] ss:$9 sm:$0xff] %v3429_v61 }
  0xc6   : > { %1141 = vst [vmem:[#allocation1 + $0x6] ss:$9 sm:$0xff] %v3432_v62 }
  0xc7   : > { %1143 = vst [vmem:[#allocation1 + $0x7] ss:$9 sm:$0xff] %v3435_v63 }
  0xce   : > { %v1144_v56 = vld [vmem:[#allocation1] sm:$0xff] }
  0xcf   : > { %1147 = vst [vmem:[#allocation1] ss:$9 sm:$0xff] %v3442_v0 }
  0xd0   : > { %1149 = vst [vmem:[#allocation1 + $0x1] ss:$9 sm:$0xff] %v3444_v1 }
  0xd1   : > { %1151 = vst [vmem:[#allocation1 + $0x2] ss:$9 sm:$0xff] %v3446_v2 }
  0xd2   : > { %1153 = vst [vmem:[#allocation1 + $0x3] ss:$9 sm:$0xff] %v3448_v4 }
  0xd3   : > { %1155 = vst [vmem:[#allocation1 + $0x4] ss:$9 sm:$0xff] %v3451_v5 }
  0xd4   : > { %1157 = vst [vmem:[#allocation1 + $0x5] ss:$9 sm:$0xff] %v3454_v6 }
  0xd5   : > { %1159 = vst [vmem:[#allocation1 + $0x6] ss:$9 sm:$0xff] %v3457_v7 }
  0xd6   : > { %1161 = vst [vmem:[#allocation1 + $0x7] ss:$9 sm:$0xff] %v3460_v8 }
  0xdd   : > { %v1162_v59 = vld [vmem:[#allocation1] sm:$0xff] }
  0xde   : > { %1200 = vst [vmem:[#allocation1] ss:$9 sm:$0xff] %v3466_v9  ;;  %1163 = vrot.lane.b32.xlu1 %v1162_v59, %s3261_s11 }
  0xdf   : > { %1202 = vst [vmem:[#allocation1 + $0x1] ss:$9 sm:$0xff] %v3468_v10 }
  0xe0   : > { %1204 = vst [vmem:[#allocation1 + $0x2] ss:$9 sm:$0xff] %v3470_v12 }
  0xe1   : > { %1206 = vst [vmem:[#allocation1 + $0x3] ss:$9 sm:$0xff] %v3473_v13 }
  0xe2   : > { %1208 = vst [vmem:[#allocation1 + $0x4] ss:$9 sm:$0xff] %v3476_v14 }
  0xe3   : > { %1210 = vst [vmem:[#allocation1 + $0x5] ss:$9 sm:$0xff] %v3479_v15 }
  0xe4   : > { %1212 = vst [vmem:[#allocation1 + $0x6] ss:$9 sm:$0xff] %v3483_v16 }
  0xe5   : > { %1214 = vst [vmem:[#allocation1 + $0x7] ss:$9 sm:$0xff] %v3486_v17 }
  0xe6   : > { %1145 = vrot.lane.b32.xlu1 %v1144_v56, %s3261_s11 }
  0xec   : > { %v3591_v3 = vld [vmem:[#allocation1] sm:$0xff] }
  0xed   : > { %1242 = vst [vmem:[#allocation1] ss:$9 sm:$0xff] %v3493_v22 }
  0xee   : > { %1244 = vst [vmem:[#allocation1 + $0x1] ss:$9 sm:$0xff] %v3495_v24 }
  0xef   : > { %1246 = vst [vmem:[#allocation1 + $0x2] ss:$9 sm:$0xff] %v3497_v26 }
  0xf0   : > { %1248 = vst [vmem:[#allocation1 + $0x3] ss:$9 sm:$0xff] %v3499_v28 }
  0xf1   : > { %1250 = vst [vmem:[#allocation1 + $0x4] ss:$9 sm:$0xff] %v3501_v31 }
  0xf2   : > { %1252 = vst [vmem:[#allocation1 + $0x5] ss:$9 sm:$0xff] %v3504_v32 }
  0xf3   : > { %1254 = vst [vmem:[#allocation1 + $0x6] ss:$9 sm:$0xff] %v3507_v33 }
  0xf4   : > { %1256 = vst [vmem:[#allocation1 + $0x7] ss:$9 sm:$0xff] %v3510_v34 }
  0xfb   : > { %v3601_v11 = vld [vmem:[#allocation1] sm:$0xff] }
  0xfc   : > { %1260 = vst [vmem:[#allocation1] ss:$9 sm:$0xff] %v3517_v35 }
  0xfd   : > { %1262 = vst [vmem:[#allocation1 + $0x1] ss:$9 sm:$0xff] %v3519_v36 }
  0xfe   : > { %1264 = vst [vmem:[#allocation1 + $0x2] ss:$9 sm:$0xff] %v3521_v37 }
  0xff   : > { %1266 = vst [vmem:[#allocation1 + $0x3] ss:$9 sm:$0xff] %v3523_v39 }
 0x100   : > { %1268 = vst [vmem:[#allocation1 + $0x4] ss:$9 sm:$0xff] %v3526_v40 }
 0x101   : > { %1270 = vst [vmem:[#allocation1 + $0x5] ss:$9 sm:$0xff] %v3529_v41 }
 0x102   : > { %1272 = vst [vmem:[#allocation1 + $0x6] ss:$9 sm:$0xff] %v3532_v42 }
 0x103   : > { %1274 = vst [vmem:[#allocation1 + $0x7] ss:$9 sm:$0xff] %v3535_v43 }
 0x104   : > { %v3611_v18 = vpop.f32.mrf.mxu0 }
 0x105   : > { %v938_v19 = vsel %vm937_vm1, %v3611_v18, -inf }
 0x106   : > { %939 = vmax.xlane.f32.xlu0 %v938_v19 }
 0x10a   : > { %v3616_v20 = vld [vmem:[#allocation1] sm:$0xff] }
 0x10b   : > { %1313 = vst [vmem:[#allocation1] ss:$9 sm:$0xff] %v3541_v44 }
 0x10c   : > { %1315 = vst [vmem:[#allocation1 + $0x1] ss:$9 sm:$0xff] %v3543_v45 }
 0x10d   : > { %1317 = vst [vmem:[#allocation1 + $0x2] ss:$9 sm:$0xff] %v3545_v47 }
 0x10e   : > { %1319 = vst [vmem:[#allocation1 + $0x3] ss:$9 sm:$0xff] %v3548_v48 }
 0x10f   : > { %1321 = vst [vmem:[#allocation1 + $0x4] ss:$9 sm:$0xff] %v3551_v49 }
 0x110   : > { %1323 = vst [vmem:[#allocation1 + $0x5] ss:$9 sm:$0xff] %v3554_v50 }
 0x111   : > { %1325 = vst [vmem:[#allocation1 + $0x6] ss:$9 sm:$0xff] %v3558_v51 }
 0x112   : > { %1327 = vst [vmem:[#allocation1 + $0x7] ss:$9 sm:$0xff] %v3561_v52 }
 0x119   : > { %v3627_v21 = vld [vmem:[#allocation1] sm:$0xff] }
 0x11a   : > { %1356 = vst [vmem:[#allocation1] ss:$9 sm:$0xff] %v3418_v54 }
 0x11b   : > { %1358 = vst [vmem:[#allocation1 + $0x1] ss:$9 sm:$0xff] %v3420_v55 }
 0x11c   : > { %1360 = vst [vmem:[#allocation1 + $0x2] ss:$9 sm:$0xff] %v3422_v57 }
 0x11d   : > { %1362 = vst [vmem:[#allocation1 + $0x3] ss:$9 sm:$0xff] %v3424_v58 }
 0x11e   : > { %1364 = vst [vmem:[#allocation1 + $0x4] ss:$9 sm:$0xff] %v3426_v60 }
 0x11f   : > { %1366 = vst [vmem:[#allocation1 + $0x5] ss:$9 sm:$0xff] %v3429_v61 }
 0x120   : > { %1368 = vst [vmem:[#allocation1 + $0x6] ss:$9 sm:$0xff] %v3432_v62 }
 0x121   : > { %1370 = vst [vmem:[#allocation1 + $0x7] ss:$9 sm:$0xff] %v3435_v63 }
 0x128   : > { %v1371_v23 = vld [vmem:[#allocation1] sm:$0xff] }
 0x129   : > { %1374 = vst [vmem:[#allocation1] ss:$9 sm:$0xff] %v3442_v0 }
 0x12a   : > { %1376 = vst [vmem:[#allocation1 + $0x1] ss:$9 sm:$0xff] %v3444_v1 }
 0x12b   : > { %1378 = vst [vmem:[#allocation1 + $0x2] ss:$9 sm:$0xff] %v3446_v2 }
 0x12c   : > { %1380 = vst [vmem:[#allocation1 + $0x3] ss:$9 sm:$0xff] %v3448_v4 }
 0x12d   : > { %1382 = vst [vmem:[#allocation1 + $0x4] ss:$9 sm:$0xff] %v3451_v5 }
 0x12e   : > { %1384 = vst [vmem:[#allocation1 + $0x5] ss:$9 sm:$0xff] %v3454_v6 }
 0x12f   : > { %1386 = vst [vmem:[#allocation1 + $0x6] ss:$9 sm:$0xff] %v3457_v7 }
 0x130   : > { %1388 = vst [vmem:[#allocation1 + $0x7] ss:$9 sm:$0xff] %v3460_v8 }
 0x137   : > { %v1389_v25 = vld [vmem:[#allocation1] sm:$0xff] }
 0x138   : > { %1390 = vrot.lane.b32.xlu2 %v1389_v25, %s3262_s12  ;;  %1427 = vst [vmem:[#allocation1] ss:$9 sm:$0xff] %v3466_v9 }
 0x139   : > { %1429 = vst [vmem:[#allocation1 + $0x1] ss:$9 sm:$0xff] %v3468_v10 }
 0x13a   : > { %1431 = vst [vmem:[#allocation1 + $0x2] ss:$9 sm:$0xff] %v3470_v12 }
 0x13b   : > { %1433 = vst [vmem:[#allocation1 + $0x3] ss:$9 sm:$0xff] %v3473_v13 }
 0x13c   : > { %1435 = vst [vmem:[#allocation1 + $0x4] ss:$9 sm:$0xff] %v3476_v14 }
 0x13d   : > { %1437 = vst [vmem:[#allocation1 + $0x5] ss:$9 sm:$0xff] %v3479_v15 }
 0x13e   : > { %1439 = vst [vmem:[#allocation1 + $0x6] ss:$9 sm:$0xff] %v3483_v16 }
 0x13f   : > { %1441 = vst [vmem:[#allocation1 + $0x7] ss:$9 sm:$0xff] %v3486_v17 }
 0x140   : > { %1372 = vrot.lane.b32.xlu2 %v1371_v23, %s3262_s12 }
 0x146   : > { %v3655_v27 = vld [vmem:[#allocation1] sm:$0xff] }
 0x147   : > { %1469 = vst [vmem:[#allocation1] ss:$9 sm:$0xff] %v3493_v22 }
 0x148   : > { %1471 = vst [vmem:[#allocation1 + $0x1] ss:$9 sm:$0xff] %v3495_v24 }
 0x149   : > { %1473 = vst [vmem:[#allocation1 + $0x2] ss:$9 sm:$0xff] %v3497_v26 }
 0x14a   : > { %1475 = vst [vmem:[#allocation1 + $0x3] ss:$9 sm:$0xff] %v3499_v28 }
 0x14b   : > { %1477 = vst [vmem:[#allocation1 + $0x4] ss:$9 sm:$0xff] %v3501_v31 }
 0x14c   : > { %1479 = vst [vmem:[#allocation1 + $0x5] ss:$9 sm:$0xff] %v3504_v32 }
 0x14d   : > { %1481 = vst [vmem:[#allocation1 + $0x6] ss:$9 sm:$0xff] %v3507_v33 }
 0x14e   : > { %1483 = vst [vmem:[#allocation1 + $0x7] ss:$9 sm:$0xff] %v3510_v34 }
 0x155   : > { %v3665_v29 = vld [vmem:[#allocation1] sm:$0xff] }
 0x156   : > { %1487 = vst [vmem:[#allocation1] ss:$9 sm:$0xff] %v3517_v35 }
 0x157   : > { %1489 = vst [vmem:[#allocation1 + $0x1] ss:$9 sm:$0xff] %v3519_v36 }
 0x158   : > { %1491 = vst [vmem:[#allocation1 + $0x2] ss:$9 sm:$0xff] %v3521_v37 }
 0x159   : > { %1493 = vst [vmem:[#allocation1 + $0x3] ss:$9 sm:$0xff] %v3523_v39 }
 0x15a   : > { %1495 = vst [vmem:[#allocation1 + $0x4] ss:$9 sm:$0xff] %v3526_v40 }
 0x15b   : > { %1497 = vst [vmem:[#allocation1 + $0x5] ss:$9 sm:$0xff] %v3529_v41 }
 0x15c   : > { %1499 = vst [vmem:[#allocation1 + $0x6] ss:$9 sm:$0xff] %v3532_v42 }
 0x15d   : > { %1501 = vst [vmem:[#allocation1 + $0x7] ss:$9 sm:$0xff] %v3535_v43 }
 0x164   : > { %v3675_v30 = vld [vmem:[#allocation1] sm:$0xff] }
 0x165   : > { %1540 = vst [vmem:[#allocation1] ss:$9 sm:$0xff] %v3541_v44 }
 0x166   : > { %1542 = vst [vmem:[#allocation1 + $0x1] ss:$9 sm:$0xff] %v3543_v45 }
 0x167   : > { %1544 = vst [vmem:[#allocation1 + $0x2] ss:$9 sm:$0xff] %v3545_v47 }
 0x168   : > { %1546 = vst [vmem:[#allocation1 + $0x3] ss:$9 sm:$0xff] %v3548_v48 }
 0x169   : > { %1548 = vst [vmem:[#allocation1 + $0x4] ss:$9 sm:$0xff] %v3551_v49 }
 0x16a   : > { %1550 = vst [vmem:[#allocation1 + $0x5] ss:$9 sm:$0xff] %v3554_v50 }
 0x16b   : > { %1552 = vst [vmem:[#allocation1 + $0x6] ss:$9 sm:$0xff] %v3558_v51 }
 0x16c   : > { %1554 = vst [vmem:[#allocation1 + $0x7] ss:$9 sm:$0xff] %v3561_v52 }
 0x173   : > { %v3685_v38 = vld [vmem:[#allocation1] sm:$0xff] }
 0x174   : > { %4237 = vst [vmem:[#allocation8_spill] sm:$0xff] %v3685_v38 }
 0x175   : > { %1583 = vst [vmem:[#allocation1] ss:$9 sm:$0xff] %v3418_v54 }
 0x176   : > { %1585 = vst [vmem:[#allocation1 + $0x1] ss:$9 sm:$0xff] %v3420_v55 }
 0x177   : > { %1587 = vst [vmem:[#allocation1 + $0x2] ss:$9 sm:$0xff] %v3422_v57 }
 0x178   : > { %1589 = vst [vmem:[#allocation1 + $0x3] ss:$9 sm:$0xff] %v3424_v58 }
 0x179   : > { %1591 = vst [vmem:[#allocation1 + $0x4] ss:$9 sm:$0xff] %v3426_v60  ;;  %v940_v46 = vpop.xlane.xlu0 %939 }
 0x17a   : > { %1593 = vst [vmem:[#allocation1 + $0x5] ss:$9 sm:$0xff] %v3429_v61  ;;  %v941_v53 = vsub.f32 %v3611_v18, %v940_v46 }
 0x17b   : > { %1595 = vst [vmem:[#allocation1 + $0x6] ss:$9 sm:$0xff] %v3432_v62 }
 0x17c   : > { %1597 = vst [vmem:[#allocation1 + $0x7] ss:$9 sm:$0xff] %v3435_v63  ;;  %v942_v56 = vmul.f32 1.442695, %v941_v53 }
 0x17e   : > { %3149 = vpow2.f32 %v942_v56 }
 0x183   : > { %v1598_v59 = vld [vmem:[#allocation1] sm:$0xff] }
 0x184   : > { %1601 = vst [vmem:[#allocation1] ss:$9 sm:$0xff] %v3442_v0  ;;  %1599 = vrot.lane.b32.xlu1 %v1598_v59, %s3263_s15  ;;  %v3698_v19 = vpop.eup %3149 }
 0x185   : > { %1603 = vst [vmem:[#allocation1 + $0x1] ss:$9 sm:$0xff] %v3444_v1  ;;  %v944_v23 = vsel %vm937_vm1, %v3698_v19, 0.0 }
 0x186   : > { %1605 = vst [vmem:[#allocation1 + $0x2] ss:$9 sm:$0xff] %v3446_v2  ;;  %945 = vadd.xlane.f32.xlu0 %v944_v23 }
 0x187   : > { %1607 = vst [vmem:[#allocation1 + $0x3] ss:$9 sm:$0xff] %v3448_v4 }
 0x188   : > { %1609 = vst [vmem:[#allocation1 + $0x4] ss:$9 sm:$0xff] %v3451_v5 }
 0x189   : > { %1611 = vst [vmem:[#allocation1 + $0x5] ss:$9 sm:$0xff] %v3454_v6 }
 0x18a   : > { %1613 = vst [vmem:[#allocation1 + $0x6] ss:$9 sm:$0xff] %v3457_v7 }
 0x18b   : > { %1615 = vst [vmem:[#allocation1 + $0x7] ss:$9 sm:$0xff] %v3460_v8 }
 0x192   : > { %v1616_v18 = vld [vmem:[#allocation1] sm:$0xff] }
 0x193   : > { %1654 = vst [vmem:[#allocation1] ss:$9 sm:$0xff] %v3466_v9 }
 0x194   : > { %1656 = vst [vmem:[#allocation1 + $0x1] ss:$9 sm:$0xff] %v3468_v10 }
 0x195   : > { %1658 = vst [vmem:[#allocation1 + $0x2] ss:$9 sm:$0xff] %v3470_v12 }
 0x196   : > { %1660 = vst [vmem:[#allocation1 + $0x3] ss:$9 sm:$0xff] %v3473_v13 }
 0x197   : > { %1662 = vst [vmem:[#allocation1 + $0x4] ss:$9 sm:$0xff] %v3476_v14 }
 0x198   : > { %1664 = vst [vmem:[#allocation1 + $0x5] ss:$9 sm:$0xff] %v3479_v15 }
 0x199   : > { %1666 = vst [vmem:[#allocation1 + $0x6] ss:$9 sm:$0xff] %v3483_v16 }
 0x19a   : > { %1668 = vst [vmem:[#allocation1 + $0x7] ss:$9 sm:$0xff] %v3486_v17  ;;  %1617 = vrot.lane.b32.xlu0 %v1616_v18, %s3263_s15 }
 0x1a1   : > { %v3718_v25 = vld [vmem:[#allocation1] sm:$0xff] }
 0x1a2   : > { %4238 = vst [vmem:[#allocation9_spill] sm:$0xff] %v3718_v25 }
 0x1a3   : > { %1696 = vst [vmem:[#allocation1] ss:$9 sm:$0xff] %v3493_v22 }
 0x1a4   : > { %1698 = vst [vmem:[#allocation1 + $0x1] ss:$9 sm:$0xff] %v3495_v24 }
 0x1a5   : > { %1700 = vst [vmem:[#allocation1 + $0x2] ss:$9 sm:$0xff] %v3497_v26 }
 0x1a6   : > { %1702 = vst [vmem:[#allocation1 + $0x3] ss:$9 sm:$0xff] %v3499_v28 }
 0x1a7   : > { %1704 = vst [vmem:[#allocation1 + $0x4] ss:$9 sm:$0xff] %v3501_v31 }
 0x1a8   : > { %1706 = vst [vmem:[#allocation1 + $0x5] ss:$9 sm:$0xff] %v3504_v32 }
 0x1a9   : > { %1708 = vst [vmem:[#allocation1 + $0x6] ss:$9 sm:$0xff] %v3507_v33 }
 0x1aa   : > { %1710 = vst [vmem:[#allocation1 + $0x7] ss:$9 sm:$0xff] %v3510_v34 }
 0x1b1   : > { %v3728_v46 = vld [vmem:[#allocation1] sm:$0xff] }
 0x1b2   : > { %1714 = vst [vmem:[#allocation1] ss:$9 sm:$0xff] %v3517_v35 }
 0x1b3   : > { %1716 = vst [vmem:[#allocation1 + $0x1] ss:$9 sm:$0xff] %v3519_v36 }
 0x1b4   : > { %1718 = vst [vmem:[#allocation1 + $0x2] ss:$9 sm:$0xff] %v3521_v37 }
 0x1b5   : > { %1720 = vst [vmem:[#allocation1 + $0x3] ss:$9 sm:$0xff] %v3523_v39 }
 0x1b6   : > { %1722 = vst [vmem:[#allocation1 + $0x4] ss:$9 sm:$0xff] %v3526_v40 }
 0x1b7   : > { %1724 = vst [vmem:[#allocation1 + $0x5] ss:$9 sm:$0xff] %v3529_v41 }
 0x1b8   : > { %1726 = vst [vmem:[#allocation1 + $0x6] ss:$9 sm:$0xff] %v3532_v42 }
 0x1b9   : > { %1728 = vst [vmem:[#allocation1 + $0x7] ss:$9 sm:$0xff] %v3535_v43 }
 0x1c0   : > { %v3738_v53 = vld [vmem:[#allocation1] sm:$0xff] }
 0x1c1   : > { %1767 = vst [vmem:[#allocation1] ss:$9 sm:$0xff] %v3541_v44 }
 0x1c2   : > { %1769 = vst [vmem:[#allocation1 + $0x1] ss:$9 sm:$0xff] %v3543_v45 }
 0x1c3   : > { %1771 = vst [vmem:[#allocation1 + $0x2] ss:$9 sm:$0xff] %v3545_v47 }
 0x1c4   : > { %1773 = vst [vmem:[#allocation1 + $0x3] ss:$9 sm:$0xff] %v3548_v48 }
 0x1c5   : > { %1775 = vst [vmem:[#allocation1 + $0x4] ss:$9 sm:$0xff] %v3551_v49 }
 0x1c6   : > { %1777 = vst [vmem:[#allocation1 + $0x5] ss:$9 sm:$0xff] %v3554_v50 }
 0x1c7   : > { %1779 = vst [vmem:[#allocation1 + $0x6] ss:$9 sm:$0xff] %v3558_v51 }
 0x1c8   : > { %1781 = vst [vmem:[#allocation1 + $0x7] ss:$9 sm:$0xff] %v3561_v52 }
 0x1cf   : > { %v3748_v56 = vld [vmem:[#allocation1] sm:$0xff] }
 0x1d0   : > { %4239 = vst [vmem:[#allocation10_spill] sm:$0xff] %v3748_v56 }
 0x1d1   : > { %1810 = vst [vmem:[#allocation1] ss:$9 sm:$0xff] %v3418_v54 }
 0x1d2   : > { %1812 = vst [vmem:[#allocation1 + $0x1] ss:$9 sm:$0xff] %v3420_v55 }
 0x1d3   : > { %1814 = vst [vmem:[#allocation1 + $0x2] ss:$9 sm:$0xff] %v3422_v57 }
 0x1d4   : > { %1816 = vst [vmem:[#allocation1 + $0x3] ss:$9 sm:$0xff] %v3424_v58 }
 0x1d5   : > { %1818 = vst [vmem:[#allocation1 + $0x4] ss:$9 sm:$0xff] %v3426_v60 }
 0x1d6   : > { %1820 = vst [vmem:[#allocation1 + $0x5] ss:$9 sm:$0xff] %v3429_v61 }
 0x1d7   : > { %1822 = vst [vmem:[#allocation1 + $0x6] ss:$9 sm:$0xff] %v3432_v62 }
 0x1d8   : > { %1824 = vst [vmem:[#allocation1 + $0x7] ss:$9 sm:$0xff] %v3435_v63 }
 0x1df   : > { %v1825_v59 = vld [vmem:[#allocation1] sm:$0xff] }
 0x1e0   : > { %1826 = vrot.lane.b32.xlu1 %v1825_v59, %s3264_s16  ;;  %1828 = vst [vmem:[#allocation1] ss:$9 sm:$0xff] %v3442_v0 }
 0x1e1   : > { %1830 = vst [vmem:[#allocation1 + $0x1] ss:$9 sm:$0xff] %v3444_v1 }
 0x1e2   : > { %1832 = vst [vmem:[#allocation1 + $0x2] ss:$9 sm:$0xff] %v3446_v2 }
 0x1e3   : > { %1834 = vst [vmem:[#allocation1 + $0x3] ss:$9 sm:$0xff] %v3448_v4 }
 0x1e4   : > { %1836 = vst [vmem:[#allocation1 + $0x4] ss:$9 sm:$0xff] %v3451_v5 }
 0x1e5   : > { %1838 = vst [vmem:[#allocation1 + $0x5] ss:$9 sm:$0xff] %v3454_v6 }
 0x1e6   : > { %1840 = vst [vmem:[#allocation1 + $0x6] ss:$9 sm:$0xff] %v3457_v7 }
 0x1e7   : > { %1842 = vst [vmem:[#allocation1 + $0x7] ss:$9 sm:$0xff] %v3460_v8 }
 0x1ee   : > { %v1843_v23 = vld [vmem:[#allocation1] sm:$0xff] }
 0x1ef   : > { %1844 = vrot.lane.b32.xlu2 %v1843_v23, %s3264_s16  ;;  %1881 = vst [vmem:[#allocation1] ss:$9 sm:$0xff] %v3466_v9 }
 0x1f0   : > { %1883 = vst [vmem:[#allocation1 + $0x1] ss:$9 sm:$0xff] %v3468_v10 }
 0x1f1   : > { %1885 = vst [vmem:[#allocation1 + $0x2] ss:$9 sm:$0xff] %v3470_v12 }
 0x1f2   : > { %1887 = vst [vmem:[#allocation1 + $0x3] ss:$9 sm:$0xff] %v3473_v13 }
 0x1f3   : > { %1889 = vst [vmem:[#allocation1 + $0x4] ss:$9 sm:$0xff] %v3476_v14 }
 0x1f4   : > { %1891 = vst [vmem:[#allocation1 + $0x5] ss:$9 sm:$0xff] %v3479_v15 }
 0x1f5   : > { %1893 = vst [vmem:[#allocation1 + $0x6] ss:$9 sm:$0xff] %v3483_v16 }
 0x1f6   : > { %1895 = vst [vmem:[#allocation1 + $0x7] ss:$9 sm:$0xff] %v3486_v17 }
 0x1fd   : > { %v3776_v18 = vld [vmem:[#allocation1] sm:$0xff] }
 0x1fe   : > { %4240 = vst [vmem:[#allocation11_spill] sm:$0xff] %v3776_v18 }
 0x1ff   : > { %1923 = vst [vmem:[#allocation1] ss:$9 sm:$0xff] %v3493_v22 }
 0x200   : > { %1925 = vst [vmem:[#allocation1 + $0x1] ss:$9 sm:$0xff] %v3495_v24 }
 0x201   : > { %1927 = vst [vmem:[#allocation1 + $0x2] ss:$9 sm:$0xff] %v3497_v26 }
 0x202   : > { %1929 = vst [vmem:[#allocation1 + $0x3] ss:$9 sm:$0xff] %v3499_v28 }
 0x203   : > { %1931 = vst [vmem:[#allocation1 + $0x4] ss:$9 sm:$0xff] %v3501_v31 }
 0x204   : > { %1933 = vst [vmem:[#allocation1 + $0x5] ss:$9 sm:$0xff] %v3504_v32 }
 0x205   : > { %1935 = vst [vmem:[#allocation1 + $0x6] ss:$9 sm:$0xff] %v3507_v33 }
 0x206   : > { %1937 = vst [vmem:[#allocation1 + $0x7] ss:$9 sm:$0xff] %v3510_v34 }
 0x20d   : > { %v3786_v59 = vld [vmem:[#allocation1] sm:$0xff] }
 0x20e   : > { %1941 = vst [vmem:[#allocation1] ss:$9 sm:$0xff] %v3517_v35 }
 0x20f   : > { %1943 = vst [vmem:[#allocation1 + $0x1] ss:$9 sm:$0xff] %v3519_v36 }
 0x210   : > { %1945 = vst [vmem:[#allocation1 + $0x2] ss:$9 sm:$0xff] %v3521_v37 }
 0x211   : > { %1947 = vst [vmem:[#allocation1 + $0x3] ss:$9 sm:$0xff] %v3523_v39 }
 0x212   : > { %1949 = vst [vmem:[#allocation1 + $0x4] ss:$9 sm:$0xff] %v3526_v40 }
 0x213   : > { %1951 = vst [vmem:[#allocation1 + $0x5] ss:$9 sm:$0xff] %v3529_v41 }
 0x214   : > { %1953 = vst [vmem:[#allocation1 + $0x6] ss:$9 sm:$0xff] %v3532_v42 }
 0x215   : > { %1955 = vst [vmem:[#allocation1 + $0x7] ss:$9 sm:$0xff] %v3535_v43 }
 0x21c   : > { %v3796_v23 = vld [vmem:[#allocation1] sm:$0xff] }
 0x21d   : > { %1994 = vst [vmem:[#allocation1] ss:$9 sm:$0xff] %v3541_v44 }
 0x21e   : > { %1996 = vst [vmem:[#allocation1 + $0x1] ss:$9 sm:$0xff] %v3543_v45 }
 0x21f   : > { %1998 = vst [vmem:[#allocation1 + $0x2] ss:$9 sm:$0xff] %v3545_v47 }
 0x220   : > { %2000 = vst [vmem:[#allocation1 + $0x3] ss:$9 sm:$0xff] %v3548_v48 }
 0x221   : > { %2002 = vst [vmem:[#allocation1 + $0x4] ss:$9 sm:$0xff] %v3551_v49 }
 0x222   : > { %2004 = vst [vmem:[#allocation1 + $0x5] ss:$9 sm:$0xff] %v3554_v50 }
 0x223   : > { %2006 = vst [vmem:[#allocation1 + $0x6] ss:$9 sm:$0xff] %v3558_v51 }
 0x224   : > { %2008 = vst [vmem:[#allocation1 + $0x7] ss:$9 sm:$0xff] %v3561_v52 }
 0x22b   : > { %v3806_v25 = vld [vmem:[#allocation1] sm:$0xff] }
 0x22c   : > { %4241 = vst [vmem:[#allocation12_spill] sm:$0xff] %v3806_v25 }
 0x22d   : > { %2037 = vst [vmem:[#allocation1] ss:$9 sm:$0xff] %v3418_v54 }
 0x22e   : > { %2039 = vst [vmem:[#allocation1 + $0x1] ss:$9 sm:$0xff] %v3420_v55 }
 0x22f   : > { %2041 = vst [vmem:[#allocation1 + $0x2] ss:$9 sm:$0xff] %v3422_v57 }
 0x230   : > { %2043 = vst [vmem:[#allocation1 + $0x3] ss:$9 sm:$0xff] %v3424_v58 }
 0x231   : > { %2045 = vst [vmem:[#allocation1 + $0x4] ss:$9 sm:$0xff] %v3426_v60 }
 0x232   : > { %2047 = vst [vmem:[#allocation1 + $0x5] ss:$9 sm:$0xff] %v3429_v61 }
 0x233   : > { %2049 = vst [vmem:[#allocation1 + $0x6] ss:$9 sm:$0xff] %v3432_v62 }
 0x234   : > { %2051 = vst [vmem:[#allocation1 + $0x7] ss:$9 sm:$0xff] %v3435_v63 }
 0x23b   : > { %v2052_v56 = vld [vmem:[#allocation1] sm:$0xff] }
 0x23c   : > { %2053 = vrot.lane.b32.xlu1 %v2052_v56, %s3265_s17  ;;  %2055 = vst [vmem:[#allocation1] ss:$9 sm:$0xff] %v3442_v0 }
 0x23d   : > { %2057 = vst [vmem:[#allocation1 + $0x1] ss:$9 sm:$0xff] %v3444_v1 }
 0x23e   : > { %2059 = vst [vmem:[#allocation1 + $0x2] ss:$9 sm:$0xff] %v3446_v2 }
 0x23f   : > { %2061 = vst [vmem:[#allocation1 + $0x3] ss:$9 sm:$0xff] %v3448_v4 }
 0x240   : > { %2063 = vst [vmem:[#allocation1 + $0x4] ss:$9 sm:$0xff] %v3451_v5 }
 0x241   : > { %2065 = vst [vmem:[#allocation1 + $0x5] ss:$9 sm:$0xff] %v3454_v6 }
 0x242   : > { %2067 = vst [vmem:[#allocation1 + $0x6] ss:$9 sm:$0xff] %v3457_v7 }
 0x243   : > { %2069 = vst [vmem:[#allocation1 + $0x7] ss:$9 sm:$0xff] %v3460_v8 }
 0x24a   : > { %v2070_v18 = vld [vmem:[#allocation1] sm:$0xff] }
 0x24b   : > { %2071 = vrot.lane.b32.xlu2 %v2070_v18, %s3265_s17  ;;  %2108 = vst [vmem:[#allocation1] ss:$9 sm:$0xff] %v3466_v9 }
 0x24c   : > { %2110 = vst [vmem:[#allocation1 + $0x1] ss:$9 sm:$0xff] %v3468_v10 }
 0x24d   : > { %2112 = vst [vmem:[#allocation1 + $0x2] ss:$9 sm:$0xff] %v3470_v12 }
 0x24e   : > { %2114 = vst [vmem:[#allocation1 + $0x3] ss:$9 sm:$0xff] %v3473_v13 }
 0x24f   : > { %2116 = vst [vmem:[#allocation1 + $0x4] ss:$9 sm:$0xff] %v3476_v14 }
 0x250   : > { %2118 = vst [vmem:[#allocation1 + $0x5] ss:$9 sm:$0xff] %v3479_v15 }
 0x251   : > { %2120 = vst [vmem:[#allocation1 + $0x6] ss:$9 sm:$0xff] %v3483_v16 }
 0x252   : > { %2122 = vst [vmem:[#allocation1 + $0x7] ss:$9 sm:$0xff] %v3486_v17 }
 0x259   : > { %v3834_v56 = vld [vmem:[#allocation1] sm:$0xff] }
 0x25a   : > { %4242 = vst [vmem:[#allocation13_spill] sm:$0xff] %v3834_v56 }
 0x25b   : > { %2150 = vst [vmem:[#allocation1] ss:$9 sm:$0xff] %v3493_v22 }
 0x25c   : > { %2152 = vst [vmem:[#allocation1 + $0x1] ss:$9 sm:$0xff] %v3495_v24 }
 0x25d   : > { %2154 = vst [vmem:[#allocation1 + $0x2] ss:$9 sm:$0xff] %v3497_v26 }
 0x25e   : > { %2156 = vst [vmem:[#allocation1 + $0x3] ss:$9 sm:$0xff] %v3499_v28 }
 0x25f   : > { %2158 = vst [vmem:[#allocation1 + $0x4] ss:$9 sm:$0xff] %v3501_v31 }
 0x260   : > { %2160 = vst [vmem:[#allocation1 + $0x5] ss:$9 sm:$0xff] %v3504_v32 }
 0x261   : > { %2162 = vst [vmem:[#allocation1 + $0x6] ss:$9 sm:$0xff] %v3507_v33 }
 0x262   : > { %2164 = vst [vmem:[#allocation1 + $0x7] ss:$9 sm:$0xff] %v3510_v34 }
 0x269   : > { %v2165_v18 = vld [vmem:[#allocation1] sm:$0xff] }
 0x26a   : > { %2168 = vst [vmem:[#allocation1] ss:$9 sm:$0xff] %v3517_v35 }
 0x26b   : > { %2170 = vst [vmem:[#allocation1 + $0x1] ss:$9 sm:$0xff] %v3519_v36 }
 0x26c   : > { %2172 = vst [vmem:[#allocation1 + $0x2] ss:$9 sm:$0xff] %v3521_v37 }
 0x26d   : > { %2174 = vst [vmem:[#allocation1 + $0x3] ss:$9 sm:$0xff] %v3523_v39 }
 0x26e   : > { %2176 = vst [vmem:[#allocation1 + $0x4] ss:$9 sm:$0xff] %v3526_v40 }
 0x26f   : > { %2178 = vst [vmem:[#allocation1 + $0x5] ss:$9 sm:$0xff] %v3529_v41 }
 0x270   : > { %2180 = vst [vmem:[#allocation1 + $0x6] ss:$9 sm:$0xff] %v3532_v42 }
 0x271   : > { %2182 = vst [vmem:[#allocation1 + $0x7] ss:$9 sm:$0xff] %v3535_v43 }
 0x278   : > { %v3852_v56 = vld [vmem:[#allocation1] sm:$0xff] }
 0x279   : > { %2221 = vst [vmem:[#allocation1] ss:$9 sm:$0xff] %v3541_v44 }
 0x27a   : > { %2223 = vst [vmem:[#allocation1 + $0x1] ss:$9 sm:$0xff] %v3543_v45 }
 0x27b   : > { %2225 = vst [vmem:[#allocation1 + $0x2] ss:$9 sm:$0xff] %v3545_v47 }
 0x27c   : > { %2227 = vst [vmem:[#allocation1 + $0x3] ss:$9 sm:$0xff] %v3548_v48 }
 0x27d   : > { %2229 = vst [vmem:[#allocation1 + $0x4] ss:$9 sm:$0xff] %v3551_v49 }
 0x27e   : > { %2231 = vst [vmem:[#allocation1 + $0x5] ss:$9 sm:$0xff] %v3554_v50 }
 0x27f   : > { %2233 = vst [vmem:[#allocation1 + $0x6] ss:$9 sm:$0xff] %v3558_v51 }
 0x280   : > { %2235 = vst [vmem:[#allocation1 + $0x7] ss:$9 sm:$0xff] %v3561_v52 }
 0x287   : > { %v3862_v25 = vld [vmem:[#allocation1] sm:$0xff] }
 0x288   : > { %2264 = vst [vmem:[#allocation1] ss:$9 sm:$0xff] %v3418_v54 }
 0x289   : > { %2266 = vst [vmem:[#allocation1 + $0x1] ss:$9 sm:$0xff] %v3420_v55 }
 0x28a   : > { %2268 = vst [vmem:[#allocation1 + $0x2] ss:$9 sm:$0xff] %v3422_v57 }
 0x28b   : > { %2270 = vst [vmem:[#allocation1 + $0x3] ss:$9 sm:$0xff] %v3424_v58 }
 0x28c   : > { %2272 = vst [vmem:[#allocation1 + $0x4] ss:$9 sm:$0xff] %v3426_v60 }
 0x28d   : > { %2274 = vst [vmem:[#allocation1 + $0x5] ss:$9 sm:$0xff] %v3429_v61 }
 0x28e   : > { %2276 = vst [vmem:[#allocation1 + $0x6] ss:$9 sm:$0xff] %v3432_v62 }
 0x28f   : > { %2278 = vst [vmem:[#allocation1 + $0x7] ss:$9 sm:$0xff] %v3435_v63 }
 0x296   : > { %v2279_v38 = vld [vmem:[#allocation1] sm:$0xff] }
 0x297   : > { %2280 = vrot.lane.b32.xlu0 %v2279_v38, %s3266_s18  ;;  %2282 = vst [vmem:[#allocation1] ss:$9 sm:$0xff] %v3442_v0 }
 0x298   : > { %2284 = vst [vmem:[#allocation1 + $0x1] ss:$9 sm:$0xff] %v3444_v1 }
 0x299   : > { %2286 = vst [vmem:[#allocation1 + $0x2] ss:$9 sm:$0xff] %v3446_v2 }
 0x29a   : > { %2288 = vst [vmem:[#allocation1 + $0x3] ss:$9 sm:$0xff] %v3448_v4 }
 0x29b   : > { %2290 = vst [vmem:[#allocation1 + $0x4] ss:$9 sm:$0xff] %v3451_v5 }
 0x29c   : > { %2292 = vst [vmem:[#allocation1 + $0x5] ss:$9 sm:$0xff] %v3454_v6 }
 0x29d   : > { %2294 = vst [vmem:[#allocation1 + $0x6] ss:$9 sm:$0xff] %v3457_v7 }
 0x29e   : > { %2296 = vst [vmem:[#allocation1 + $0x7] ss:$9 sm:$0xff] %v3460_v8 }
 0x29f   : > { %1276 = vrot.lane.b32.xlu0 %v3616_v20, %s3261_s11 }
 0x2a5   : > { %v2297_v38 = vld [vmem:[#allocation1] sm:$0xff] }
 0x2a6   : > { %2298 = vrot.lane.b32.xlu2 %v2297_v38, %s3266_s18  ;;  %2335 = vst [vmem:[#allocation1] ss:$9 sm:$0xff] %v3466_v9 }
 0x2a7   : > { %2337 = vst [vmem:[#allocation1 + $0x1] ss:$9 sm:$0xff] %v3468_v10  ;;  %1485 = vrot.lane.b32.xlu0 %v3665_v29, %s3262_s12 }
 0x2a8   : > { %2339 = vst [vmem:[#allocation1 + $0x2] ss:$9 sm:$0xff] %v3470_v12 }
 0x2a9   : > { %2341 = vst [vmem:[#allocation1 + $0x3] ss:$9 sm:$0xff] %v3473_v13 }
 0x2aa   : > { %2343 = vst [vmem:[#allocation1 + $0x4] ss:$9 sm:$0xff] %v3476_v14 }
 0x2ab   : > { %2345 = vst [vmem:[#allocation1 + $0x5] ss:$9 sm:$0xff] %v3479_v15 }
 0x2ac   : > { %2347 = vst [vmem:[#allocation1 + $0x6] ss:$9 sm:$0xff] %v3483_v16 }
 0x2ad   : > { %2349 = vst [vmem:[#allocation1 + $0x7] ss:$9 sm:$0xff] %v3486_v17 }
 0x2af   : > { %1957 = vrot.lane.b32.xlu0 %v3796_v23, %s3264_s16 }
 0x2b4   : > { %v3896_v20 = vld [vmem:[#allocation1] sm:$0xff] }
 0x2b5   : > { %2377 = vst [vmem:[#allocation1] ss:$9 sm:$0xff] %v3493_v22 }
 0x2b6   : > { %2379 = vst [vmem:[#allocation1 + $0x1] ss:$9 sm:$0xff] %v3495_v24 }
 0x2b7   : > { %2381 = vst [vmem:[#allocation1 + $0x2] ss:$9 sm:$0xff] %v3497_v26  ;;  %2166 = vrot.lane.b32.xlu0 %v2165_v18, %s3265_s17 }
 0x2b8   : > { %2383 = vst [vmem:[#allocation1 + $0x3] ss:$9 sm:$0xff] %v3499_v28 }
 0x2b9   : > { %2385 = vst [vmem:[#allocation1 + $0x4] ss:$9 sm:$0xff] %v3501_v31 }
 0x2ba   : > { %2387 = vst [vmem:[#allocation1 + $0x5] ss:$9 sm:$0xff] %v3504_v32 }
 0x2bb   : > { %2389 = vst [vmem:[#allocation1 + $0x6] ss:$9 sm:$0xff] %v3507_v33 }
 0x2bc   : > { %2391 = vst [vmem:[#allocation1 + $0x7] ss:$9 sm:$0xff] %v3510_v34 }
 0x2c3   : > { %v3907_v29 = vld [vmem:[#allocation1] sm:$0xff] }
 0x2c4   : > { %2395 = vst [vmem:[#allocation1] ss:$9 sm:$0xff] %v3517_v35 }
 0x2c5   : > { %2397 = vst [vmem:[#allocation1 + $0x1] ss:$9 sm:$0xff] %v3519_v36 }
 0x2c6   : > { %2399 = vst [vmem:[#allocation1 + $0x2] ss:$9 sm:$0xff] %v3521_v37 }
 0x2c7   : > { %2401 = vst [vmem:[#allocation1 + $0x3] ss:$9 sm:$0xff] %v3523_v39 }
 0x2c8   : > { %2403 = vst [vmem:[#allocation1 + $0x4] ss:$9 sm:$0xff] %v3526_v40 }
 0x2c9   : > { %2405 = vst [vmem:[#allocation1 + $0x5] ss:$9 sm:$0xff] %v3529_v41 }
 0x2ca   : > { %2407 = vst [vmem:[#allocation1 + $0x6] ss:$9 sm:$0xff] %v3532_v42 }
 0x2cb   : > { %2409 = vst [vmem:[#allocation1 + $0x7] ss:$9 sm:$0xff] %v3535_v43 }
 0x2d2   : > { %v3917_v23 = vld [vmem:[#allocation1] sm:$0xff] }
 0x2d3   : > { %2448 = vst [vmem:[#allocation1] ss:$9 sm:$0xff] %v3541_v44 }
 0x2d4   : > { %2450 = vst [vmem:[#allocation1 + $0x1] ss:$9 sm:$0xff] %v3543_v45 }
 0x2d5   : > { %2452 = vst [vmem:[#allocation1 + $0x2] ss:$9 sm:$0xff] %v3545_v47 }
 0x2d6   : > { %2454 = vst [vmem:[#allocation1 + $0x3] ss:$9 sm:$0xff] %v3548_v48 }
 0x2d7   : > { %2456 = vst [vmem:[#allocation1 + $0x4] ss:$9 sm:$0xff] %v3551_v49 }
 0x2d8   : > { %2458 = vst [vmem:[#allocation1 + $0x5] ss:$9 sm:$0xff] %v3554_v50 }
 0x2d9   : > { %2460 = vst [vmem:[#allocation1 + $0x6] ss:$9 sm:$0xff] %v3558_v51 }
 0x2da   : > { %2462 = vst [vmem:[#allocation1 + $0x7] ss:$9 sm:$0xff] %v3561_v52 }
 0x2e1   : > { %v3927_v18 = vld [vmem:[#allocation1] sm:$0xff] }
 0x2e2   : > { %2491 = vst [vmem:[#allocation1] ss:$9 sm:$0xff] %v3418_v54  ;;  %v946_v54 = vpop.xlane.xlu0 %945 }
 0x2e3   : > { %2493 = vst [vmem:[#allocation1 + $0x1] ss:$9 sm:$0xff] %v3420_v55  ;;  %v1164_v55 = vpop.permute.xlu1 %1163  ;;  %3151 = vrcp.f32 %v946_v54 }
 0x2e4   : > { %2495 = vst [vmem:[#allocation1 + $0x2] ss:$9 sm:$0xff] %v3422_v57  ;;  %3008 = vmatpush.xpose.msk.msrb.mxu1 %vm912_vm0, %v1164_v55 }
 0x2e5   : > { %2497 = vst [vmem:[#allocation1 + $0x3] ss:$9 sm:$0xff] %v3424_v58 }
 0x2e6   : > { %2499 = vst [vmem:[#allocation1 + $0x4] ss:$9 sm:$0xff] %v3426_v60  ;;  %v1391_v60 = vpop.permute.xlu2 %1390 }
 0x2e7   : > { %2501 = vst [vmem:[#allocation1 + $0x5] ss:$9 sm:$0xff] %v3429_v61 }
 0x2e8   : > { %2503 = vst [vmem:[#allocation1 + $0x6] ss:$9 sm:$0xff] %v3432_v62 }
 0x2e9   : > { %2505 = vst [vmem:[#allocation1 + $0x7] ss:$9 sm:$0xff] %v3435_v63  ;;  %v3152_v57 = vpop.eup %3151 }
 0x2ea   : > { %v948_v58 = vmul.f32 %v3152_v57, %v3698_v19 }
 0x2eb   : > { %v1146_v62 = vpop.permute.xlu1 %1145 }
 0x2ec   : > { %3004 = vmatmul.msk.f32.vlgmr.msra.gmra.mxu1 %vm937_vm1, %v948_v58 }
 0x2ed   : > { %3014 = vmatpush.xpose.msk.msra.mxu1 %vm912_vm0, %v1391_v60 }
 0x2ee   : > { %v1373_v63 = vpop.permute.xlu2 %1372 }
 0x2f0   : > { %v2506_v38 = vld [vmem:[#allocation1] sm:$0xff] }
 0x2f1   : > { %2507 = vrot.lane.b32.xlu2 %v2506_v38, %s3267_s19  ;;  %2509 = vst [vmem:[#allocation1] ss:$9 sm:$0xff] %v3442_v0  ;;  %v1618_v0 = vpop.permute.xlu0 %1617 }
 0x2f2   : > { %2511 = vst [vmem:[#allocation1 + $0x1] ss:$9 sm:$0xff] %v3444_v1 }
 0x2f3   : > { %2513 = vst [vmem:[#allocation1 + $0x2] ss:$9 sm:$0xff] %v3446_v2  ;;  %v1600_v1 = vpop.permute.xlu1 %1599 }
 0x2f4   : > { %2515 = vst [vmem:[#allocation1 + $0x3] ss:$9 sm:$0xff] %v3448_v4  ;;  %3009 = vmatmul.msk.f32.vlgmr.msrb.gmra.mxu1 %vm912_vm0, %v1146_v62 }
 0x2f5   : > { %2517 = vst [vmem:[#allocation1 + $0x4] ss:$9 sm:$0xff] %v3451_v5  ;;  %3020 = vmatpush.xpose.msk.msrb.mxu1 %vm912_vm0, %v1618_v0 }
 0x2f6   : > { %2519 = vst [vmem:[#allocation1 + $0x5] ss:$9 sm:$0xff] %v3454_v6  ;;  %v1845_v2 = vpop.permute.xlu2 %1844 }
 0x2f7   : > { %2521 = vst [vmem:[#allocation1 + $0x6] ss:$9 sm:$0xff] %v3457_v7 }
 0x2f8   : > { %2523 = vst [vmem:[#allocation1 + $0x7] ss:$9 sm:$0xff] %v3460_v8  ;;  %v1066_v8 = vpop.f32.mrf.mxu2 }
 0x2f9   : > { %1503 = vrot.lane.b32.xlu2 %v3675_v30, %s3262_s12 }
 0x2fb   : > { %v1827_v4 = vpop.permute.xlu1 %1826 }
 0x2fc   : > { %3015 = vmatmul.msk.f32.vlgmr.msra.gmra.mxu1 %vm912_vm0, %v1373_v63 }
 0x2fd   : > { %3026 = vmatpush.xpose.msk.msra.mxu1 %vm912_vm0, %v1845_v2 }
 0x2fe   : > { %v2072_v5 = vpop.permute.xlu2 %2071 }
 0x2ff   : > { %v2524_v61 = vld [vmem:[#allocation1] sm:$0xff] }
 0x300   : > { %2525 = vrot.lane.b32.xlu1 %v2524_v61, %s3267_s19  ;;  %2562 = vst [vmem:[#allocation1] ss:$9 sm:$0xff] %v3466_v9 }
 0x301   : > { %2564 = vst [vmem:[#allocation1 + $0x1] ss:$9 sm:$0xff] %v3468_v10  ;;  %1712 = vrot.lane.b32.xlu2 %v3728_v46, %s3263_s15  ;;  %v3984_v10 = vmul.f32 %v1066_v8, %v948_v58 }
 0x302   : > { %2566 = vst [vmem:[#allocation1 + $0x2] ss:$9 sm:$0xff] %v3470_v12 }
 0x303   : > { %2568 = vst [vmem:[#allocation1 + $0x3] ss:$9 sm:$0xff] %v3473_v13  ;;  %v2054_v6 = vpop.permute.xlu1 %2053  ;;  %v1070_v12 = vsel %vm937_vm1, %v3984_v10, -inf }
 0x304   : > { %2570 = vst [vmem:[#allocation1 + $0x4] ss:$9 sm:$0xff] %v3476_v14  ;;  %3021 = vmatmul.msk.f32.vlgmr.msrb.gmra.mxu1 %vm912_vm0, %v1600_v1 }
 0x305   : > { %2572 = vst [vmem:[#allocation1 + $0x5] ss:$9 sm:$0xff] %v3479_v15  ;;  %3032 = vmatpush.xpose.msk.msrb.mxu1 %vm912_vm0, %v2072_v5 }
 0x306   : > { %2574 = vst [vmem:[#allocation1 + $0x6] ss:$9 sm:$0xff] %v3483_v16  ;;  %v2299_v7 = vpop.permute.xlu2 %2298 }
 0x307   : > { %2576 = vst [vmem:[#allocation1 + $0x7] ss:$9 sm:$0xff] %v3486_v17 }
 0x308   : > { %1258 = vrot.lane.b32.xlu1 %v3601_v11, %s3261_s11 }
 0x309   : > { %2184 = vrot.lane.b32.xlu2 %v3852_v56, %s3265_s17  ;;  %v2281_v9 = vpop.permute.xlu0 %2280  ;;  %v3114_v56 = vpack.i.bf16 %v3627_v21, %v3591_v3 }
 0x30c   : > { %3027 = vmatmul.msk.f32.vlgmr.msra.gmra.mxu1 %vm912_vm0, %v1827_v4 }
 0x30d   : > { %3038 = vmatpush.xpose.msk.msra.mxu1 %vm912_vm0, %v2299_v7 }
 0x30e   : > { %v3989_v15 = vld [vmem:[#allocation1] sm:$0xff] }
 0x30f   : > { %2604 = vst [vmem:[#allocation1] ss:$9 sm:$0xff] %v3493_v22 }
 0x310   : > { %1730 = vrot.lane.b32.xlu1 %v3738_v53, %s3263_s15  ;;  %2606 = vst [vmem:[#allocation1 + $0x1] ss:$9 sm:$0xff] %v3495_v24 }
 0x311   : > { %2393 = vrot.lane.b32.xlu2 %v3907_v29, %s3266_s18  ;;  %v1277_v14 = vpop.permute.xlu0 %1276  ;;  %2608 = vst [vmem:[#allocation1 + $0x2] ss:$9 sm:$0xff] %v3497_v26 }
 0x312   : > { %3011 = vmatpush.xpose.msk.msrb.mxu0 %vm912_vm0, %v1277_v14  ;;  %2610 = vst [vmem:[#allocation1 + $0x3] ss:$9 sm:$0xff] %v3499_v28 }
 0x313   : > { %2612 = vst [vmem:[#allocation1 + $0x4] ss:$9 sm:$0xff] %v3501_v31 }
 0x314   : > { %3033 = vmatmul.msk.f32.vlgmr.msrb.gmra.mxu1 %vm912_vm0, %v2054_v6  ;;  %2614 = vst [vmem:[#allocation1 + $0x5] ss:$9 sm:$0xff] %v3504_v32 }
 0x315   : > { %2616 = vst [vmem:[#allocation1 + $0x6] ss:$9 sm:$0xff] %v3507_v33 }
 0x316   : > { %2618 = vst [vmem:[#allocation1 + $0x7] ss:$9 sm:$0xff] %v3510_v34 }
 0x318   : > { %1939 = vrot.lane.b32.xlu1 %v3786_v59, %s3264_s16 }
 0x319   : > { %v1486_v28 = vpop.permute.xlu0 %1485 }
 0x31c   : > { %3039 = vmatmul.msk.f32.vlgmr.msra.gmra.mxu1 %vm912_vm0, %v2281_v9 }
 0x31d   : > { %v2619_v17 = vld [vmem:[#allocation1] sm:$0xff] }
 0x31e   : > { %2622 = vst [vmem:[#allocation1] ss:$9 sm:$0xff] %v3517_v35 }
 0x31f   : > { %2624 = vst [vmem:[#allocation1 + $0x1] ss:$9 sm:$0xff] %v3519_v36 }
 0x320   : > { %2411 = vrot.lane.b32.xlu1 %v3917_v23, %s3266_s18  ;;  %2626 = vst [vmem:[#allocation1 + $0x2] ss:$9 sm:$0xff] %v3521_v37 }
 0x321   : > { %2628 = vst [vmem:[#allocation1 + $0x3] ss:$9 sm:$0xff] %v3523_v39  ;;  %v1958_v33 = vpop.permute.xlu0 %1957 }
 0x322   : > { %2630 = vst [vmem:[#allocation1 + $0x4] ss:$9 sm:$0xff] %v3526_v40 }
 0x323   : > { %2632 = vst [vmem:[#allocation1 + $0x5] ss:$9 sm:$0xff] %v3529_v41 }
 0x324   : > { %2634 = vst [vmem:[#allocation1 + $0x6] ss:$9 sm:$0xff] %v3532_v42 }
 0x325   : > { %2636 = vst [vmem:[#allocation1 + $0x7] ss:$9 sm:$0xff] %v3535_v43 }
 0x328   : > { %2620 = vrot.lane.b32.xlu1 %v2619_v17, %s3267_s19 }
 0x329   : > { %v2167_v40 = vpop.permute.xlu0 %2166 }
 0x32c   : > { %v2637_v24 = vld [vmem:[#allocation1] sm:$0xff] }
 0x32d   : > { %2638 = vrot.lane.b32.xlu0 %v2637_v24, %s3267_s19  ;;  %2675 = vst [vmem:[#allocation1] ss:$9 sm:$0xff] %v3541_v44 }
 0x32e   : > { %2677 = vst [vmem:[#allocation1 + $0x1] ss:$9 sm:$0xff] %v3543_v45 }
 0x32f   : > { %2679 = vst [vmem:[#allocation1 + $0x2] ss:$9 sm:$0xff] %v3545_v47 }
 0x330   : > { %2681 = vst [vmem:[#allocation1 + $0x3] ss:$9 sm:$0xff] %v3548_v48 }
 0x331   : > { %2683 = vst [vmem:[#allocation1 + $0x4] ss:$9 sm:$0xff] %v3551_v49 }
 0x332   : > { %2685 = vst [vmem:[#allocation1 + $0x5] ss:$9 sm:$0xff] %v3554_v50 }
 0x333   : > { %2687 = vst [vmem:[#allocation1 + $0x6] ss:$9 sm:$0xff] %v3558_v51 }
 0x334   : > { %2689 = vst [vmem:[#allocation1 + $0x7] ss:$9 sm:$0xff] %v3561_v52 }
 0x33a   : > { %1071 = vmax.xlane.f32.xlu2 %v1070_v12 }
 0x34b   : > { %v2508_v13 = vpop.permute.xlu2 %2507 }
 0x353   : > { %v1504_v16 = vpop.permute.xlu2 %1503 }
 0x354   : > { %3017 = vmatpush.xpose.msk.msra.mxu0 %vm912_vm0, %v1504_v16 }
 0x35b   : > { %v1713_v31 = vpop.permute.xlu2 %1712 }
 0x363   : > { %v2185_v36 = vpop.permute.xlu2 %2184 }
 0x369   : > { %v4025_v34 = vpop.f32.mrf.mxu1 }
 0x36b   : > { %v2394_v44 = vpop.permute.xlu2 %2393 }
 0x371   : > { %v1186_v39 = vpop.f32.mrf.mxu1 }
 0x372   : > { %v2526_v22 = vpop.permute.xlu1 %2525  ;;  %v1189_v43 = vsel %vm937_vm1, %v1186_v39, -inf }
 0x373   : > { %3044 = vmatpush.xpose.msk.msrb.mxu1 %vm912_vm0, %v2526_v22  ;;  %1190 = vmax.xlane.f32.xlu0 %v1189_v43 }
 0x376   : > { %3045 = vmatmul.msk.f32.vlgmr.msrb.gmra.mxu1 %vm912_vm0, %v2508_v13 }
 0x379   : > { %v1413_v41 = vpop.f32.mrf.mxu1 }
 0x37a   : > { %v1259_v26 = vpop.permute.xlu1 %1258  ;;  %v1416_v42 = vsel %vm937_vm1, %v1413_v41, -inf }
 0x37b   : > { %3012 = vmatmul.msk.f32.vlgmr.msrb.gmra.mxu0 %vm912_vm0, %v1259_v26  ;;  %1417 = vmax.xlane.f32.xlu1 %v1416_v42 }
 0x381   : > { %v1640_v45 = vpop.f32.mrf.mxu1 }
 0x382   : > { %v1731_v32 = vpop.permute.xlu1 %1730  ;;  %v1643_v47 = vsel %vm937_vm1, %v1640_v45, -inf }
 0x383   : > { %3018 = vmatmul.msk.f32.vlgmr.msra.gmra.mxu0 %vm912_vm0, %v1486_v28  ;;  %1644 = vmax.xlane.f32.xlu0 %v1643_v47 }
 0x384   : > { %3023 = vmatpush.xpose.msk.msrb.mxu0 %vm912_vm0, %v1731_v32 }
 0x388   : > { %3029 = vmatpush.xpose.msk.msra.mxu0 %vm912_vm0, %v1958_v33 }
 0x389   : > { %v1867_v48 = vpop.f32.mrf.mxu1 }
 0x38a   : > { %v1940_v35 = vpop.permute.xlu1 %1939  ;;  %v1870_v49 = vsel %vm937_vm1, %v1867_v48, -inf }
 0x38b   : > { %3024 = vmatmul.msk.f32.vlgmr.msrb.gmra.mxu0 %vm912_vm0, %v1713_v31  ;;  %1871 = vmax.xlane.f32.xlu0 %v1870_v49 }
 0x38c   : > { %3035 = vmatpush.xpose.msk.msrb.mxu0 %vm912_vm0, %v2185_v36 }
 0x391   : > { %v2094_v11 = vpop.f32.mrf.mxu1 }
 0x392   : > { %v2412_v37 = vpop.permute.xlu1 %2411  ;;  %v2097_v59 = vsel %vm937_vm1, %v2094_v11, -inf }
 0x393   : > { %3030 = vmatmul.msk.f32.vlgmr.msra.gmra.mxu0 %vm912_vm0, %v1940_v35  ;;  %v4243_v35 = vld [vmem:[#allocation8_spill] sm:$0xff] }
 0x394   : > { %3041 = vmatpush.xpose.msk.msra.mxu0 %vm912_vm0, %v2412_v37  ;;  %3115 = vrot.lane.b32.xlu1 %v3114_v56, %s3261_s11  ;;  %v3119_v36 = vpack.i.bf16 %v4243_v35, %v3655_v27 }
 0x399   : > { %v2321_v46 = vpop.f32.mrf.mxu1 }
 0x39a   : > { %v2324_v53 = vsel %vm937_vm1, %v2321_v46, -inf  ;;  %v2621_v23 = vpop.permute.xlu1 %2620 }
 0x39b   : > { %3036 = vmatmul.msk.f32.vlgmr.msrb.gmra.mxu0 %vm912_vm0, %v2167_v40  ;;  %2325 = vmax.xlane.f32.xlu0 %v2324_v53 }
 0x39f   : > { %v2639_v29 = vpop.permute.xlu0 %2638 }
 0x3a0   : > { %3047 = vmatpush.xpose.msk.msrb.mxu0 %vm912_vm0, %v2639_v29 }
 0x3a3   : > { %3042 = vmatmul.msk.f32.vlgmr.msra.gmra.mxu0 %vm912_vm0, %v2394_v44 }
 0x3ab   : > { %3048 = vmatmul.msk.f32.vlgmr.msrb.gmra.mxu0 %vm912_vm0, %v2621_v23 }
 0x3ad   : > { %v1072_v50 = vpop.xlane.xlu2 %1071 }
 0x3ae   : > { %v1073_v51 = vsub.f32 %v3984_v10, %v1072_v50 }
 0x3b0   : > { %v1074_v52 = vmul.f32 1.442695, %v1073_v51 }
 0x3b2   : > { %3153 = vpow2.f32 %v1074_v52 }
 0x3b8   : > { %v3154_v30 = vpop.eup %3153 }
 0x3b9   : > { %3007 = vmatmul.msk.f32.vlgmr.msra.gmra.mxu3 %vm937_vm1, %v3154_v30  ;;  %v1076_v19 = vsel %vm937_vm1, %v3154_v30, 0.0 }
 0x3ba   : > { %1077 = vadd.xlane.f32.xlu2 %v1076_v19 }
 0x3c2   : > { %2098 = vmax.xlane.f32.xlu2 %v2097_v59 }
 0x3e6   : > { %v1191_v58 = vpop.xlane.xlu0 %1190 }
 0x3e7   : > { %v1192_v61 = vsub.f32 %v1186_v39, %v1191_v58 }
 0x3e9   : > { %v1193_v62 = vmul.f32 1.442695, %v1192_v61  ;;  %v4244_v61 = vld [vmem:[#allocation12_spill] sm:$0xff] }
 0x3ee   : > { %v1418_v55 = vpop.xlane.xlu1 %1417 }
 0x3ef   : > { %v1419_v57 = vsub.f32 %v1413_v41, %v1418_v55 }
 0x3f1   : > { %v1420_v60 = vmul.f32 1.442695, %v1419_v57 }
 0x3f3   : > { %v2548_v38 = vpop.f32.mrf.mxu1  ;;  %3155 = vpow2.f32 %v1420_v60 }
 0x3f4   : > { %v2551_v54 = vsel %vm937_vm1, %v2548_v38, -inf  ;;  %3157 = vpow2.f32 %v1193_v62  ;;  %v4245_v62 = vld [vmem:[#allocation11_spill] sm:$0xff] }
 0x3f5   : > { %2552 = vmax.xlane.f32.xlu2 %v2551_v54 }
 0x3f6   : > { %v1645_v21 = vpop.xlane.xlu0 %1644 }
 0x3f7   : > { %v1646_v63 = vsub.f32 %v1640_v45, %v1645_v21  ;;  %v4246_v21 = vld [vmem:[#allocation10_spill] sm:$0xff] }
 0x3f8   : > { %v1299_v47 = vpop.f32.mrf.mxu0 }
 0x3f9   : > { %v3156_v3 = vpop.eup %3155  ;;  %v1647_v2 = vmul.f32 1.442695, %v1646_v63  ;;  %v4247_v63 = vld [vmem:[#allocation9_spill] sm:$0xff] }
 0x3fa   : > { %v1422_v0 = vsel %vm937_vm1, %v3156_v3, 0.0  ;;  %v3158_v1 = vpop.eup %3157 }
 0x3fb   : > { %1423 = vadd.xlane.f32.xlu1 %v1422_v0  ;;  %v1195_v4 = vsel %vm937_vm1, %v3158_v1, 0.0  ;;  %3159 = vpow2.f32 %v1647_v2  ;;  %v3124_v0 = vpack.i.bf16 %v4247_v63, %v4246_v21 }
 0x3fd   : > { %1196 = vadd.xlane.f32.xlu2 %v1195_v4 }
 0x3fe   : > { %v1872_v5 = vpop.xlane.xlu0 %1871 }
 0x3ff   : > { %v1873_v6 = vsub.f32 %v1867_v48, %v1872_v5 }
 0x400   : > { %v1526_v51 = vpop.f32.mrf.mxu0 }
 0x401   : > { %v3160_v7 = vpop.eup %3159  ;;  %v1874_v8 = vmul.f32 1.442695, %v1873_v6 }
 0x402   : > { %v1649_v9 = vsel %vm937_vm1, %v3160_v7, 0.0 }
 0x403   : > { %3161 = vpow2.f32 %v1874_v8  ;;  %1650 = vadd.xlane.f32.xlu0 %v1649_v9 }
 0x406   : > { %v3116_v37 = vpop.permute.xlu1 %3115 }
 0x407   : > { %v3117_v39 = vunpack.i.l.bf16 %v3116_v37  ;;  %v3118_v40 = vunpack.i.h.bf16 %v3116_v37 }
 0x408   : > { %v1753_v23 = vpop.f32.mrf.mxu0 }
 0x409   : > { %v4051_v10 = vpop.eup %3161  ;;  %1237 = vmatpush.msrb.mxu3 %v3117_v39  ;;  %1350 = vmatpush.msrb.mxu2 %v3118_v40 }
 0x40a   : > { %v1876_v13 = vsel %vm937_vm1, %v4051_v10, 0.0 }
 0x40b   : > { %1877 = vadd.xlane.f32.xlu2 %v1876_v13 }
 0x40e   : > { %v2326_v14 = vpop.xlane.xlu0 %2325 }
 0x40f   : > { %v2327_v22 = vsub.f32 %v2321_v46, %v2326_v14 }
 0x410   : > { %v1980_v5 = vpop.f32.mrf.mxu0 }
 0x411   : > { %v2328_v26 = vmul.f32 1.442695, %v2327_v22 }
 0x423   : > { %3120 = vrot.lane.b32.xlu2 %v3119_v36, %s3262_s12  ;;  %s792_s12 = scalar_lea.vmem %s4232_s6, %s3000_s9 }
 0x42d   : > { %v4053_v12 = vpop.xlane.xlu2 %1077 }
 0x435   : > { %v2099_v16 = vpop.xlane.xlu2 %2098 }
 0x436   : > { %v2100_v17 = vsub.f32 %v2094_v11, %v2099_v16 }
 0x438   : > { %v2101_v24 = vmul.f32 1.442695, %v2100_v17 }
 0x43a   : > { %3163 = vpow2.f32 %v2101_v24 }
 0x43b   : > { %3165 = vpow2.f32 %v2328_v26 }
 0x440   : > { %v4057_v28 = vpop.eup %3163 }
 0x441   : > { %v2103_v31 = vsel %vm937_vm1, %v4057_v28, 0.0  ;;  %v4061_v32 = vpop.eup %3165 }
 0x442   : > { %2104 = vadd.xlane.f32.xlu0 %v2103_v31  ;;  %v2330_v33 = vsel %vm937_vm1, %v4061_v32, 0.0 }
 0x44a   : > { %2331 = vadd.xlane.f32.xlu0 %v2330_v33 }
 0x468   : > { %v2553_v41 = vpop.xlane.xlu2 %2552 }
 0x469   : > { %v2554_v42 = vsub.f32 %v2548_v38, %v2553_v41  ;;  %v2690_v41 = vld [vmem:[#allocation1] sm:$0xff] }
 0x46b   : > { %v2555_v43 = vmul.f32 1.442695, %v2554_v42  ;;  %v3144_v42 = vpack.i.bf16 %v3989_v15, %v2690_v41 }
 0x46d   : > { %3167 = vpow2.f32 %v2555_v43 }
 0x46e   : > { %v1424_v48 = vpop.xlane.xlu1 %1423 }
 0x46f   : > { %3169 = vrcp.f32 %v1424_v48 }
 0x470   : > { %v1197_v27 = vpop.xlane.xlu2 %1196 }
 0x471   : > { %3171 = vrcp.f32 %v1197_v27 }
 0x473   : > { %v4068_v44 = vpop.eup %3167 }
 0x474   : > { %v2557_v45 = vsel %vm937_vm1, %v4068_v44, 0.0 }
 0x475   : > { %2558 = vadd.xlane.f32.xlu0 %v2557_v45  ;;  %v3170_v49 = vpop.eup %3169 }
 0x476   : > { %v1651_v11 = vpop.xlane.xlu0 %1650  ;;  %v1426_v19 = vmul.f32 %v3170_v49, %v3156_v3  ;;  %v3129_v3 = vpack.i.bf16 %v4245_v62, %v4244_v61 }
 0x477   : > { %v3172_v50 = vpop.eup %3171  ;;  %3173 = vrcp.f32 %v1651_v11 }
 0x478   : > { %v1199_v52 = vmul.f32 %v3172_v50, %v3158_v1  ;;  %v4077_v53 = vmul.f32 %v1526_v51, %v1426_v19  ;;  %v4248_v1 = vld [vmem:[#allocation13_spill] sm:$0xff] }
 0x479   : > { %v3134_v2 = vpack.i.bf16 %v4248_v1, %v3862_v25 }
 0x47a   : > { %3010 = vmatmul.msk.f32.vlgmr.msrb.gmra.mxu3 %vm937_vm1, %v1199_v52  ;;  %v4073_v30 = vmul.f32 %v1299_v47, %v1199_v52  ;;  %v1530_v38 = vsel %vm937_vm1, %v4077_v53, -inf  ;;  %v4133_v47 = vpop.f32.mrf.mxu3 }
 0x47c   : > { %v1303_v46 = vsel %vm937_vm1, %v4073_v30, -inf }
 0x47d   : > { %1304 = vmax.xlane.f32.xlu0 %v1303_v46  ;;  %v3174_v59 = vpop.eup %3173 }
 0x47e   : > { %v1878_v56 = vpop.xlane.xlu2 %1877  ;;  %v4079_v29 = vmul.f32 %v3174_v59, %v3160_v7  ;;  %v2207_v7 = vpop.f32.mrf.mxu0 }
 0x480   : > { %v4084_v54 = vmul.f32 %v1753_v23, %v4079_v29 }
 0x482   : > { %v1757_v55 = vsel %vm937_vm1, %v4084_v54, -inf }
 0x483   : > { %1758 = vmax.xlane.f32.xlu1 %v1757_v55 }
 0x485   : > { %1531 = vmax.xlane.f32.xlu0 %v1530_v38 }
 0x486   : > { %v3121_v57 = vpop.permute.xlu2 %3120  ;;  %v2434_v14 = vpop.f32.mrf.mxu0 }
 0x487   : > { %v3123_v58 = vunpack.i.h.bf16 %v3121_v57  ;;  %v3122_v60 = vunpack.i.l.bf16 %v3121_v57 }
 0x489   : > { %1464 = vmatpush.msra.mxu3 %v3122_v60  ;;  %1577 = vmatpush.msra.mxu2 %v3123_v58 }
 0x48a   : > { %3016 = vmatmul.msk.f32.vlgmr.msra.gmra.mxu3 %vm937_vm1, %v1426_v19 }
 0x48e   : > { %v2661_v36 = vpop.f32.mrf.mxu0 }
 0x499   : > { %3130 = vrot.lane.b32.xlu0 %v3129_v3, %s3264_s16 }
 0x49c   : > { %3125 = vrot.lane.b32.xlu1 %v3124_v0, %s3263_s15 }
 0x4a1   : > { %3135 = vrot.lane.b32.xlu0 %v3134_v2, %s3265_s17  ;;  %s799_s17 = scalar_lea.vmem %s4233_s7, %s3000_s9 }
 0x4b5   : > { %v2105_v4 = vpop.xlane.xlu0 %2104 }
 0x4bd   : > { %v2332_v6 = vpop.xlane.xlu0 %2331 }
 0x4be   : > { %3175 = vrcp.f32 %v2332_v6 }
 0x4bf   : > { %3177 = vrcp.f32 %v1878_v56 }
 0x4c0   : > { %3179 = vrcp.f32 %v2105_v4 }
 0x4c4   : > { %v3176_v8 = vpop.eup %3175 }
 0x4c5   : > { %v3178_v9 = vpop.eup %3177  ;;  %v4099_v13 = vmul.f32 %v3176_v8, %v4061_v32 }
 0x4c6   : > { %v4102_v16 = vmul.f32 %v3178_v9, %v4051_v10  ;;  %v3180_v24 = vpop.eup %3179 }
 0x4c7   : > { %v4105_v25 = vmul.f32 %v2434_v14, %v4099_v13  ;;  %v2107_v32 = vmul.f32 %v3180_v24, %v4057_v28  ;;  %v3139_v28 = vpack.i.bf16 %v3896_v20, %v3927_v18 }
 0x4c8   : > { %v4108_v22 = vmul.f32 %v1980_v5, %v4102_v16 }
 0x4c9   : > { %v2438_v26 = vsel %vm937_vm1, %v4105_v25, -inf  ;;  %v4118_v35 = vmul.f32 %v2207_v7, %v2107_v32 }
 0x4ca   : > { %2439 = vmax.xlane.f32.xlu1 %v2438_v26  ;;  %v1984_v31 = vsel %vm937_vm1, %v4108_v22, -inf }
 0x4cb   : > { %1985 = vmax.xlane.f32.xlu0 %v1984_v31  ;;  %v2211_v40 = vsel %vm937_vm1, %v4118_v35, -inf }
 0x4d3   : > { %2212 = vmax.xlane.f32.xlu0 %v2211_v40 }
 0x4e7   : > { %3140 = vrot.lane.b32.xlu0 %v3139_v28, %s3266_s18 }
 0x4e8   : > { %v2559_v17 = vpop.xlane.xlu0 %2558 }
 0x4e9   : > { %3181 = vrcp.f32 %v2559_v17 }
 0x4ef   : > { %v3182_v10 = vpop.eup %3181 }
 0x4f0   : > { %v4116_v33 = vmul.f32 %v3182_v10, %v4068_v44  ;;  %v1305_v43 = vpop.xlane.xlu0 %1304 }
 0x4f1   : > { %v1306_v44 = vsub.f32 %v4073_v30, %v1305_v43 }
 0x4f2   : > { %v4121_v37 = vmul.f32 %v2661_v36, %v4116_v33 }
 0x4f3   : > { %v1307_v45 = vmul.f32 1.442695, %v1306_v44 }
 0x4f4   : > { %v2665_v39 = vsel %vm937_vm1, %v4121_v37, -inf }
 0x4f5   : > { %2666 = vmax.xlane.f32.xlu2 %v2665_v39  ;;  %3183 = vpow2.f32 %v1307_v45 }
 0x4f6   : > { %v1759_v15 = vpop.xlane.xlu1 %1758 }
 0x4f7   : > { %v1760_v51 = vsub.f32 %v4084_v54, %v1759_v15 }
 0x4f8   : > { %v1532_v48 = vpop.xlane.xlu0 %1531 }
 0x4f9   : > { %v1533_v27 = vsub.f32 %v4077_v53, %v1532_v48  ;;  %v1761_v52 = vmul.f32 1.442695, %v1760_v51 }
 0x4fb   : > { %v3184_v49 = vpop.eup %3183  ;;  %v1534_v50 = vmul.f32 1.442695, %v1533_v27 }
 0x4fc   : > { %3013 = vmatmul.msk.f32.vlgmr.msrb.gmra.mxu2 %vm937_vm1, %v3184_v49  ;;  %v1309_v46 = vsel %vm937_vm1, %v3184_v49, 0.0 }
 0x4fd   : > { %3185 = vpow2.f32 %v1534_v50  ;;  %v1239_v20 = vpop.f32.mrf.mxu3 }
 0x4fe   : > { %2719 = vrot.lane.b32.xlu0 %v1239_v20, %s3268_s20  ;;  %3187 = vpow2.f32 %v1761_v52 }
 0x503   : > { %v3186_v18 = vpop.eup %3185 }
 0x504   : > { %3019 = vmatmul.msk.f32.vlgmr.msra.gmra.mxu2 %vm937_vm1, %v3186_v18  ;;  %v3188_v38 = vpop.eup %3187  ;;  %v1536_v58 = vsel %vm937_vm1, %v3186_v18, 0.0 }
 0x505   : > { %v1763_v60 = vsel %vm937_vm1, %v3188_v38, 0.0 }
 0x50b   : > { %v3131_v11 = vpop.permute.xlu0 %3130 }
 0x50c   : > { %v3133_v56 = vunpack.i.h.bf16 %v3131_v11  ;;  %v3132_v55 = vunpack.i.l.bf16 %v3131_v11 }
 0x50d   : > { %3145 = vrot.lane.b32.xlu2 %v3144_v42, %s3267_s19  ;;  %v1466_v30 = vpop.f32.mrf.mxu3 }
 0x50e   : > { %v3126_v19 = vpop.permute.xlu1 %3125  ;;  %2723 = vrot.lane.b32.xlu1 %v1466_v30, %s3269_s21 }
 0x50f   : > { %v3128_v53 = vunpack.i.h.bf16 %v3126_v19  ;;  %v3127_v59 = vunpack.i.l.bf16 %v3126_v19 }
 0x511   : > { %1691 = vmatpush.msrb.mxu3 %v3128_v53  ;;  %1804 = vmatpush.msrb.mxu2 %v3127_v59 }
 0x512   : > { %3022 = vmatmul.msk.f32.vlgmr.msrb.gmra.mxu3 %vm937_vm1, %v4079_v29  ;;  %3025 = vmatmul.msk.f32.vlgmr.msrb.gmra.mxu2 %vm937_vm1, %v3188_v38 }
 0x513   : > { %v3136_v23 = vpop.permute.xlu0 %3135  ;;  %1918 = vmatpush.msra.mxu3 %v3133_v56  ;;  %2031 = vmatpush.msra.mxu2 %v3132_v55 }
 0x514   : > { %v3138_v54 = vunpack.i.h.bf16 %v3136_v23  ;;  %v3137_v57 = vunpack.i.l.bf16 %v3136_v23 }
 0x516   : > { %2145 = vmatpush.msrb.mxu3 %v3138_v54  ;;  %2258 = vmatpush.msrb.mxu2 %v3137_v57 }
 0x51a   : > { %3028 = vmatmul.msk.f32.vlgmr.msra.gmra.mxu3 %vm937_vm1, %v4102_v16 }
 0x522   : > { %3034 = vmatmul.msk.f32.vlgmr.msrb.gmra.mxu3 %vm937_vm1, %v2107_v32 }
 0x528   : > { %1764 = vadd.xlane.f32.xlu0 %v1763_v60 }
 0x536   : > { %1310 = vadd.xlane.f32.xlu2 %v1309_v46 }
 0x53d   : > { %v2440_v21 = vpop.xlane.xlu1 %2439 }
 0x53e   : > { %1537 = vadd.xlane.f32.xlu2 %v1536_v58  ;;  %v1986_v61 = vpop.xlane.xlu0 %1985  ;;  %v2441_v2 = vsub.f32 %v4105_v25, %v2440_v21 }
 0x53f   : > { %v1987_v29 = vsub.f32 %v4108_v22, %v1986_v61 }
 0x540   : > { %v2442_v5 = vmul.f32 1.442695, %v2441_v2 }
 0x541   : > { %v1988_v62 = vmul.f32 1.442695, %v1987_v29 }
 0x543   : > { %3189 = vpow2.f32 %v1988_v62 }
 0x546   : > { %v2213_v3 = vpop.xlane.xlu0 %2212 }
 0x547   : > { %v2214_v63 = vsub.f32 %v4118_v35, %v2213_v3 }
 0x549   : > { %v3190_v0 = vpop.eup %3189  ;;  %v2215_v1 = vmul.f32 1.442695, %v2214_v63 }
 0x54a   : > { %3031 = vmatmul.msk.f32.vlgmr.msra.gmra.mxu2 %vm937_vm1, %v3190_v0  ;;  %v1990_v4 = vsel %vm937_vm1, %v3190_v0, 0.0 }
 0x54b   : > { %1991 = vadd.xlane.f32.xlu2 %v1990_v4  ;;  %3191 = vpow2.f32 %v2215_v1 }
 0x54c   : > { %3193 = vpow2.f32 %v2442_v5 }
 0x551   : > { %v3192_v7 = vpop.eup %3191 }
 0x552   : > { %3037 = vmatmul.msk.f32.vlgmr.msrb.gmra.mxu2 %vm937_vm1, %v3192_v7  ;;  %v2217_v8 = vsel %vm937_vm1, %v3192_v7, 0.0  ;;  %v3194_v16 = vpop.eup %3193 }
 0x553   : > { %2218 = vadd.xlane.f32.xlu1 %v2217_v8  ;;  %v2444_v31 = vsel %vm937_vm1, %v3194_v16, 0.0 }
 0x559   : > { %v3141_v25 = vpop.permute.xlu0 %3140 }
 0x55a   : > { %v3143_v17 = vunpack.i.h.bf16 %v3141_v25  ;;  %v3142_v22 = vunpack.i.l.bf16 %v3141_v25 }
 0x55b   : > { %2445 = vadd.xlane.f32.xlu1 %v2444_v31 }
 0x55c   : > { %2372 = vmatpush.msra.mxu3 %v3143_v17  ;;  %2485 = vmatpush.msra.mxu2 %v3142_v22 }
 0x55d   : > { %3040 = vmatmul.msk.f32.vlgmr.msra.gmra.mxu3 %vm937_vm1, %v4099_v13  ;;  %3043 = vmatmul.msk.f32.vlgmr.msra.gmra.mxu2 %vm937_vm1, %v3194_v16 }
 0x568   : > { %v2667_v6 = vpop.xlane.xlu2 %2666 }
 0x569   : > { %v2668_v9 = vsub.f32 %v4121_v37, %v2667_v6 }
 0x56b   : > { %v2669_v26 = vmul.f32 1.442695, %v2668_v9 }
 0x56d   : > { %3195 = vpow2.f32 %v2669_v26 }
 0x570   : > { %v3146_v14 = vpop.permute.xlu2 %3145  ;;  %v2720_v18 = vpop.permute.xlu0 %2719 }
 0x571   : > { %v3148_v24 = vunpack.i.h.bf16 %v3146_v14  ;;  %v3147_v32 = vunpack.i.l.bf16 %v3146_v14  ;;  %v2746_v60 = vsel %vm912_vm0, %v4025_v34, %v2720_v18 }
 0x573   : > { %2599 = vmatpush.msrb.mxu3 %v3148_v24  ;;  %2712 = vmatpush.msrb.mxu2 %v3147_v32  ;;  %v3196_v10 = vpop.eup %3195 }
 0x574   : > { %3046 = vmatmul.msk.f32.vlgmr.msrb.gmra.mxu3 %vm937_vm1, %v4116_v33  ;;  %3049 = vmatmul.msk.f32.vlgmr.msrb.gmra.mxu2 %vm937_vm1, %v3196_v10  ;;  %v2671_v56 = vsel %vm937_vm1, %v3196_v10, 0.0 }
 0x57f   : > { %v1352_v36 = vpop.f32.mrf.mxu2 }
 0x580   : > { %v2724_v44 = vpop.permute.xlu1 %2723 }
 0x581   : > { %v2747_v61 = vsel %vm937_vm1, %v2746_v60, %v2724_v44 }
 0x587   : > { %v1579_v13 = vpop.f32.mrf.mxu2 }
 0x595   : > { %v1693_v28 = vpop.f32.mrf.mxu3  ;;  %v1806_v45 = vpop.f32.mrf.mxu2 }
 0x596   : > { %2727 = vrot.lane.b32.xlu2 %v1693_v28, %s3270_s22 }
 0x59b   : > { %v1765_v51 = vpop.xlane.xlu0 %1764 }
 0x59d   : > { %v1920_v43 = vpop.f32.mrf.mxu3 }
 0x59e   : > { %2731 = vrot.lane.b32.xlu0 %v1920_v43, %s3271_s23 }
 0x5a5   : > { %v2147_v33 = vpop.f32.mrf.mxu3 }
 0x5a6   : > { %2735 = vrot.lane.b32.xlu0 %v2147_v33, %s3272_s24 }
 0x5a9   : > { %v1311_v35 = vpop.xlane.xlu2 %1310 }
 0x5aa   : > { %3197 = vrcp.f32 %v1311_v35 }
 0x5b0   : > { %v3198_v37 = vpop.eup %3197 }
 0x5b1   : > { %v1355_v39 = vmul.f32 %v3198_v37, %v1352_v36  ;;  %v1538_v40 = vpop.xlane.xlu2 %1537 }
 0x5b2   : > { %3199 = vrcp.f32 %v1538_v40 }
 0x5b8   : > { %v3200_v41 = vpop.eup %3199 }
 0x5b9   : > { %v1582_v42 = vmul.f32 %v3200_v41, %v1579_v13 }
 0x5bb   : > { %2765 = vrot.lane.b32.xlu2 %v1582_v42, %s3269_s21 }
 0x5be   : > { %v1992_v23 = vpop.xlane.xlu2 %1991 }
 0x5c6   : > { %v2219_v48 = vpop.xlane.xlu1 %2218 }
 0x5c7   : > { %3201 = vrcp.f32 %v2219_v48 }
 0x5c8   : > { %3203 = vrcp.f32 %v1765_v51 }
 0x5cd   : > { %v2033_v27 = vpop.f32.mrf.mxu2  ;;  %v3202_v49 = vpop.eup %3201 }
 0x5ce   : > { %v3204_v11 = vpop.eup %3203  ;;  %v2446_v30 = vpop.xlane.xlu1 %2445 }
 0x5cf   : > { %v1809_v19 = vmul.f32 %v3204_v11, %v1806_v45  ;;  %3205 = vrcp.f32 %v2446_v30 }
 0x5d0   : > { %3207 = vrcp.f32 %v1992_v23 }
 0x5d5   : > { %v2260_v50 = vpop.f32.mrf.mxu2  ;;  %v3206_v53 = vpop.eup %3205 }
 0x5d6   : > { %v2263_v20 = vmul.f32 %v3202_v49, %v2260_v50  ;;  %v3208_v38 = vpop.eup %3207 }
 0x5d7   : > { %v2036_v55 = vmul.f32 %v3208_v38, %v2033_v27 }
 0x5d8   : > { %2777 = vrot.lane.b32.xlu2 %v2263_v20, %s3272_s24 }
 0x5e0   : > { %v2374_v15 = vpop.f32.mrf.mxu3  ;;  %v2487_v46 = vpop.f32.mrf.mxu2 }
 0x5e1   : > { %2739 = vrot.lane.b32.xlu1 %v2374_v15, %s3273_s10  ;;  %v2490_v59 = vmul.f32 %v3206_v53, %v2487_v46 }
 0x5f0   : > { %v2728_v58 = vpop.permute.xlu2 %2727 }
 0x5f1   : > { %v2749_v29 = vsel %vm2748_vm2, %v2747_v61, %v2728_v58 }
 0x5f7   : > { %v2601_v52 = vpop.f32.mrf.mxu3  ;;  %v2714_v4 = vpop.f32.mrf.mxu2 }
 0x5f8   : > { %2743 = vrot.lane.b32.xlu0 %v2601_v52, %s3274_s30 }
 0x600   : > { %2769 = vrot.lane.b32.xlu0 %v1809_v19, %s3270_s22 }
 0x608   : > { %2781 = vrot.lane.b32.xlu0 %v2490_v59, %s3273_s10 }
 0x60b   : > { %2672 = vadd.xlane.f32.xlu1 %v2671_v56 }
 0x610   : > { %v2732_v54 = vpop.permute.xlu0 %2731 }
 0x611   : > { %v2751_v3 = vsel %vm2750_vm3, %v2749_v29, %v2732_v54 }
 0x615   : > { %v2766_v14 = vpop.permute.xlu2 %2765 }
 0x618   : > { %v2736_v57 = vpop.permute.xlu0 %2735 }
 0x619   : > { %v2753_v21 = vsel %vm2752_vm4, %v2751_v3, %v2736_v57 }
 0x624   : > { %2761 = vrot.lane.b32.xlu1 %v1355_v39, %s3268_s20 }
 0x62c   : > { %2773 = vrot.lane.b32.xlu1 %v2036_v55, %s3271_s23 }
 0x632   : > { %v2778_v26 = vpop.permute.xlu2 %2777 }
 0x653   : > { %v2740_v62 = vpop.permute.xlu1 %2739 }
 0x654   : > { %v2755_v34 = vsel %vm2754_vm5, %v2753_v21, %v2740_v62 }
 0x66a   : > { %v2744_v63 = vpop.permute.xlu0 %2743 }
 0x66b   : > { %v2757_v0 = vsel %vm2756_vm6, %v2755_v34, %v2744_v63 }
 0x66c   : > { %2759 = vst.msk [vmem:[%s792_s12] sm:$0xff] %vm2758_vm7, %v2757_v0 }
 0x672   : > { %v2770_v16 = vpop.permute.xlu0 %2769 }
 0x67a   : > { %v2782_v32 = vpop.permute.xlu0 %2781 }
 0x67e   : > { %v2673_v1 = vpop.xlane.xlu1 %2672 }
 0x67f   : > { %3209 = vrcp.f32 %v2673_v1 }
 0x680   : > { %3211 = vrcp.f32 %v4053_v12 }
 0x685   : > { %v3210_v2 = vpop.eup %3209 }
 0x686   : > { %v2717_v5 = vmul.f32 %v3210_v2, %v2714_v4  ;;  %v3212_v7 = vpop.eup %3211 }
 0x687   : > { %v1128_v8 = vmul.f32 %v3212_v7, %v4133_v47 }
 0x688   : > { %2785 = vrot.lane.b32.xlu1 %v2717_v5, %s3274_s30 }
 0x696   : > { %v2762_v6 = vpop.permute.xlu1 %2761 }
 0x697   : > { %v2788_v9 = vsel %vm912_vm0, %v1128_v8, %v2762_v6 }
 0x698   : > { %v2789_v25 = vsel %vm937_vm1, %v2788_v9, %v2766_v14 }
 0x699   : > { %v2790_v22 = vsel %vm2748_vm2, %v2789_v25, %v2770_v16 }
 0x69e   : > { %v2774_v17 = vpop.permute.xlu1 %2773 }
 0x69f   : > { %v2791_v24 = vsel %vm2750_vm3, %v2790_v22, %v2774_v17 }
 0x6a0   : > { %v2792_v31 = vsel %vm2752_vm4, %v2791_v24, %v2778_v26 }
 0x6a1   : > { %v2793_v12 = vsel %vm2754_vm5, %v2792_v31, %v2782_v32 }
 0x6fa   : > { %v2786_v47 = vpop.permute.xlu1 %2785 }
 0x6fb   : > { %v2794_v10 = vsel %vm2756_vm6, %v2793_v12, %v2786_v47 }
 0x6fc   : > { %2795 = vst.msk [vmem:[%s799_s17] sm:$0xff] %vm2758_vm7, %v2794_v10 }
 0x6fd PF: > { %s18_s29 = sadd.s32 1, %s3259_s29   ;;  %s4249_s24 = smov %s3243_s25 }
 0x6fe   : > { %p15_p13 = scmp.ge.s32.totalorder %s18_s29, 4   ;;  %s4250_s25 = smov %s3247_s26 }
 0x6ff   : > { %s4251_s26 = smov %s3365_s13  ;;  %s4252_s27 = smov %s3255_s28 }
 0x700   : > { %s4253_s28 = smov %s4255_s8  ;;  %17 = sbr.rel (!%p15_p13) target bundleno = 3 (0x3), region = 701 }

// kernel: guidence_attention_forward.7
= control target key start
LH: loop header
LB: loop body
LE: loop exit
PB: predicated region body
PF: predicated region fallthrough
CT: control target
= control target key end

     0   :  { %13 = vsyncpa [#allocation3], 0  ;;  %s400_s0 = inlined_call_operand.vmem [shape: f32[16,32], index: 0, kind: input, shape index: {}]   ;;  %s401_s1 = inlined_call_operand.vmem [shape: f32[16,32], index: 1, kind: input, shape index: {}]   ;;  %s402_s2 = inlined_call_operand.hbm [shape: f32[32,32], index: 2, kind: input, shape index: {}]   ;;  %s403_s3 = inlined_call_operand.hbm [shape: f32[32,32], index: 3, kind: input, shape index: {}]   ;;  %s404_s4 = inlined_call_operand.vmem [shape: f32[1,32], index: 4, kind: input, shape index: {}]   ;;  %s405_s5 = inlined_call_operand.vmem [shape: f32[1,32], index: 5, kind: input, shape index: {}]   ;;  %s406_s6 = inlined_call_operand.hbm [shape: f32[16,32], index: 6, kind: output, shape index: {0}]   ;;  %s407_s7 = inlined_call_operand.hbm [shape: f32[16,32], index: 7, kind: output, shape index: {1}]  }
   0x1   :  { %14 = vsyncpa [#allocation6], 0 }
   0x2   :  { %15 = vsyncpa [#allocation4], 0 }
   0x3   :  { %16 = vsyncpa [#allocation9], 0  ;;  %s25_s26 = sshll.u32 %s402_s2, 4  ;;  %s304_s27 = smov [#allocation2]   ;;  %s26_s26 = int_to_ptr.hbm [resolvable:$true] %s25_s26 }
   0x4   :  { %s27_s28 = sshll.u32 %s304_s27, 4  ;;  %s38_s8 = sshll.u32 %s403_s3, 4  ;;  %s28_s28 = int_to_ptr.vmem [resolvable:$true] %s27_s28  ;;  %s39_s8 = int_to_ptr.hbm [resolvable:$true] %s38_s8 }
   0x5   :  { %s305_s9 = smov 128   ;;  %s306_s10 = smov 8  }
   0x6   :  { %33 = dma.hbm_to_vmem [thread:$0]  %s26_s26, 512, %s28_s28, [#allocation3], %s305_s9, %s305_s9, %s306_s10  }
   0x7   :  { %s307_s11 = smov [#allocation5]  }
   0x8   :  { %s40_s12 = sshll.u32 %s307_s11, 4  ;;  %s41_s12 = int_to_ptr.vmem [resolvable:$true] %s40_s12 }
   0x9   :  { %46 = dma.hbm_to_vmem [thread:$0]  %s39_s8, 512, %s41_s12, [#allocation6], %s305_s9, %s305_s9, %s306_s10  }
   0xa   :  { %296 = dma.done.wait [#allocation3], 512  }
   0xb   :  { %297 = vsyncadd [#allocation3], 4294966784 }
   0xc   :  { %298 = dma.done.wait [#allocation6], 512  }
   0xd   :  { %299 = vsyncadd [#allocation6], 4294966784  ;;  %v64_v0 = vld [vmem:[#allocation2 + $0x18] sm:$0xff]  ;;  %v63_v2 = vld [vmem:[#allocation2 + $0x10] sm:$0xff]  ;;  %vm69_vm0 = vcmask 261120   ;;  %s148_s25 = sshll.u32 %s406_s6, 4  ;;  %s149_s25 = int_to_ptr.hbm [resolvable:$true] %s148_s25 }
   0xe   :  { %v106_v1 = vld [vmem:[#allocation5 + $0x18] sm:$0xff]  ;;  %184 = vmatpush.msra.mxu2 %v64_v0  ;;  %v105_v3 = vld [vmem:[#allocation5 + $0x10] sm:$0xff]  ;;  %v62_v4 = vld [vmem:[#allocation2 + $0x8] sm:$0xff]  ;;  %88 = vmatpush.msra.mxu0 %v64_v0  ;;  %s309_s26 = smov [#allocation8]   ;;  %s161_s29 = sshll.u32 %s407_s7, 4  ;;  %s162_s29 = int_to_ptr.hbm [resolvable:$true] %s161_s29 }
   0xf   :  { %188 = vmatpush.msra.mxu3 %v106_v1  ;;  %v104_v5 = vld [vmem:[#allocation5 + $0x8] sm:$0xff]  ;;  %129 = vmatpush.msra.mxu1 %v106_v1  ;;  %v61_v6 = vld [vmem:[#allocation2] sm:$0xff]  ;;  %s159_s27 = sshll.u32 %s309_s26, 4  ;;  %s160_s27 = int_to_ptr.vmem [resolvable:$true] %s159_s27 }
  0x10   :  { %185 = vmatpush.msra.mxu2 %v63_v2  ;;  %v103_v7 = vld [vmem:[#allocation5] sm:$0xff]  ;;  %89 = vmatpush.msra.mxu0 %v63_v2  ;;  %v60_v8 = vld [vmem:[%s400_s0 + $0x8] sm:$0xff] }
  0x11   :  { %189 = vmatpush.msra.mxu3 %v105_v3  ;;  %130 = vmatpush.msra.mxu1 %v105_v3  ;;  %v102_v9 = vld [vmem:[%s401_s1 + $0x8] sm:$0xff]  ;;  %v59_v10 = vld [vmem:[%s400_s0] sm:$0xff] }
  0x12   :  { %186 = vmatpush.msra.mxu2 %v62_v4  ;;  %90 = vmatpush.msra.mxu0 %v62_v4  ;;  %v101_v11 = vld [vmem:[%s401_s1] sm:$0xff]  ;;  %s308_s1 = smov [#allocation7]  }
  0x13   :  { %190 = vmatpush.msra.mxu3 %v104_v5  ;;  %131 = vmatpush.msra.mxu1 %v104_v5  ;;  %v198_v12 = vld [vmem:[%s404_s4] ss:$0 sm:$0xff]  ;;  %s146_s22 = sshll.u32 %s308_s1, 4  ;;  %s147_s22 = int_to_ptr.vmem [resolvable:$true] %s146_s22 }
  0x14   :  { %187 = vmatpush.msra.mxu2 %v61_v6  ;;  %91 = vmatpush.msra.mxu0 %v61_v6  ;;  %v199_v13 = vld [vmem:[%s405_s5] ss:$0 sm:$0xff] }
  0x15   :  { %191 = vmatpush.msra.mxu3 %v103_v7  ;;  %181 = vmatmul.msk.f32.vlgmr.msra.gmra.mxu2 %vm69_vm0, %v60_v8 }
  0x16   :  { %183 = vmatmul.msk.f32.vlgmr.msra.gmra.mxu3 %vm69_vm0, %v102_v9  ;;  %132 = vmatpush.msra.mxu1 %v103_v7 }
  0x17   :  { %180 = vmatmul.msk.f32.vlgmr.msra.gmra.mxu0 %vm69_vm0, %v59_v10  ;;  %182 = vmatmul.msk.f32.vlgmr.msra.gmra.mxu1 %vm69_vm0, %v101_v11 }
  0x94   :  { %v93_v14 = vpop.f32.mrf.mxu0  ;;  %v134_v15 = vpop.f32.mrf.mxu1 }
  0x95   :  { %v94_v16 = vadd.f32 %v198_v12, %v93_v14  ;;  %v135_v17 = vadd.f32 %v199_v13, %v134_v15 }
  0x97   :  { %99 = vst.msk [vmem:[#allocation7] sm:$0xff] %vm69_vm0, %v94_v16 }
  0x98   :  { %v96_v18 = vpop.f32.mrf.mxu2  ;;  %140 = vst.msk [vmem:[#allocation8] sm:$0xff] %vm69_vm0, %v135_v17 }
  0x99   :  { %v137_v19 = vpop.f32.mrf.mxu3  ;;  %v97_v20 = vadd.f32 %v198_v12, %v96_v18 }
  0x9a   :  { %v138_v21 = vadd.f32 %v199_v13, %v137_v19 }
  0x9b   :  { %100 = vst.msk [vmem:[#allocation7 + $0x8] sm:$0xff] %vm69_vm0, %v97_v20 }
  0x9c   :  { %141 = vst.msk [vmem:[#allocation8 + $0x8] sm:$0xff] %vm69_vm0, %v138_v21  ;;  %154 = dma.vmem_to_hbm [thread:$0]  %s147_s22, 256, %s149_s25, [#allocation4], %s305_s9, %s305_s9, %s306_s10  }
  0x9d   :  { %167 = dma.vmem_to_hbm [thread:$0]  %s160_s27, 256, %s162_s29, [#allocation9], %s305_s9, %s305_s9, %s306_s10  }
  0x9e   :  { %300 = dma.done.wait [#allocation4], 256  }
  0x9f   :  { %301 = vsyncadd [#allocation4], 4294967040 }
  0xa0   :  { %302 = dma.done.wait [#allocation9], 256  }
  0xa1   :  { %303 = vsyncadd [#allocation9], 4294967040 }
  0xa2   :  { %176 = vsyncpa [#allocation3], 1 }
  0xa3   :  { %177 = vsyncpa [#allocation6], 1 }
  0xa4   :  { %178 = vsyncpa [#allocation4], 1 }
  0xa5   :  { %179 = vsyncpa [#allocation9], 1 }

// kernel: guidence_attention_forward.4
= control target key start
LH: loop header
LB: loop body
LE: loop exit
PB: predicated region body
PF: predicated region fallthrough
CT: control target
= control target key end

     0   :  { %11 = vsyncpa [#allocation3], 0  ;;  %s314_s0 = inlined_call_operand.hbm [shape: f32[16,32], index: 0, kind: input, shape index: {}]   ;;  %s315_s1 = inlined_call_operand.vmem [shape: f32[16,32], index: 1, kind: input, shape index: {}]   ;;  %s316_s2 = inlined_call_operand.hbm [shape: f32[32,32], index: 2, kind: input, shape index: {}]   ;;  %s317_s3 = inlined_call_operand.hbm [shape: f32[32,32], index: 3, kind: input, shape index: {}]   ;;  %s318_s4 = inlined_call_operand.vmem [shape: f32[16,32], index: 4, kind: output, shape index: {0}]   ;;  %s319_s5 = inlined_call_operand.vmem [shape: f32[16,32], index: 5, kind: output, shape index: {1}]  }
   0x1   :  { %12 = vsyncpa [#allocation5], 0  ;;  %s32_s20 = sshll.u32 %s316_s2, 4  ;;  %s244_s21 = smov [#allocation4]   ;;  %s33_s20 = int_to_ptr.hbm [resolvable:$true] %s32_s20 }
   0x2   :  { %s34_s22 = sshll.u32 %s244_s21, 4  ;;  %s17_s25 = sshll.u32 %s314_s0, 4  ;;  %s35_s22 = int_to_ptr.vmem [resolvable:$true] %s34_s22  ;;  %s18_s25 = int_to_ptr.hbm [resolvable:$true] %s17_s25 }
   0x3   :  { %s245_s26 = smov 128   ;;  %s246_s27 = smov 8  }
   0x4   :  { %40 = dma.hbm_to_vmem [thread:$0]  %s33_s20, 512, %s35_s22, [#allocation5], %s245_s26, %s245_s26, %s246_s27  }
   0x5   :  { %s247_s28 = smov [#allocation2]   ;;  %s45_s7 = sshll.u32 %s317_s3, 4  ;;  %s46_s7 = int_to_ptr.hbm [resolvable:$true] %s45_s7 }
   0x6   :  { %s19_s29 = sshll.u32 %s247_s28, 4  ;;  %s248_s2 = smov [#allocation6]   ;;  %s20_s29 = int_to_ptr.vmem [resolvable:$true] %s19_s29 }
   0x7   :  { %25 = dma.hbm_to_vmem [thread:$0]  %s18_s25, 256, %s20_s29, [#allocation3], %s245_s26, %s245_s26, %s246_s27  }
   0x8   :  { %s47_s8 = sshll.u32 %s248_s2, 4  ;;  %s48_s8 = int_to_ptr.vmem [resolvable:$true] %s47_s8 }
   0x9   :  { %53 = dma.hbm_to_vmem [thread:$0]  %s46_s7, 512, %s48_s8, [#allocation5], %s245_s26, %s245_s26, %s246_s27  }
   0xa   :  { %240 = dma.done.wait [#allocation3], 256  }
   0xb   :  { %241 = vsyncadd [#allocation3], 4294967040 }
   0xc   :  { %242 = dma.done.wait [#allocation5], 1024  }
   0xd   :  { %243 = vsyncadd [#allocation5], 4294966272  ;;  %v71_v0 = vld [vmem:[#allocation4 + $0x18] sm:$0xff]  ;;  %v70_v2 = vld [vmem:[#allocation4 + $0x10] sm:$0xff]  ;;  %vm72_vm0 = vcmask 261120  }
   0xe   :  { %v109_v1 = vld [vmem:[#allocation6 + $0x18] sm:$0xff]  ;;  %155 = vmatpush.msra.mxu2 %v71_v0  ;;  %v108_v3 = vld [vmem:[#allocation6 + $0x10] sm:$0xff]  ;;  %v69_v4 = vld [vmem:[#allocation4 + $0x8] sm:$0xff]  ;;  %91 = vmatpush.msra.mxu0 %v71_v0 }
   0xf   :  { %159 = vmatpush.msra.mxu3 %v109_v1  ;;  %v107_v5 = vld [vmem:[#allocation6 + $0x8] sm:$0xff]  ;;  %128 = vmatpush.msra.mxu1 %v109_v1  ;;  %v68_v6 = vld [vmem:[#allocation4] sm:$0xff]  ;;  %v67_v8 = vld [vmem:[#allocation2 + $0x8] sm:$0xff] }
  0x10   :  { %156 = vmatpush.msra.mxu2 %v70_v2  ;;  %v106_v7 = vld [vmem:[#allocation6] sm:$0xff]  ;;  %92 = vmatpush.msra.mxu0 %v70_v2  ;;  %v105_v9 = vld [vmem:[%s315_s1 + $0x8] sm:$0xff]  ;;  %v66_v10 = vld [vmem:[#allocation2] sm:$0xff] }
  0x11   :  { %160 = vmatpush.msra.mxu3 %v108_v3  ;;  %129 = vmatpush.msra.mxu1 %v108_v3  ;;  %v104_v11 = vld [vmem:[%s315_s1] sm:$0xff] }
  0x12   :  { %157 = vmatpush.msra.mxu2 %v69_v4  ;;  %93 = vmatpush.msra.mxu0 %v69_v4 }
  0x13   :  { %161 = vmatpush.msra.mxu3 %v107_v5  ;;  %130 = vmatpush.msra.mxu1 %v107_v5 }
  0x14   :  { %158 = vmatpush.msra.mxu2 %v68_v6  ;;  %94 = vmatpush.msra.mxu0 %v68_v6 }
  0x15   :  { %162 = vmatpush.msra.mxu3 %v106_v7  ;;  %152 = vmatmul.msk.f32.vlgmr.msra.gmra.mxu2 %vm72_vm0, %v67_v8 }
  0x16   :  { %154 = vmatmul.msk.f32.vlgmr.msra.gmra.mxu3 %vm72_vm0, %v105_v9  ;;  %131 = vmatpush.msra.mxu1 %v106_v7 }
  0x17   :  { %151 = vmatmul.msk.f32.vlgmr.msra.gmra.mxu0 %vm72_vm0, %v66_v10  ;;  %153 = vmatmul.msk.f32.vlgmr.msra.gmra.mxu1 %vm72_vm0, %v104_v11 }
  0x94   :  { %v96_v12 = vpop.f32.mrf.mxu0  ;;  %v133_v13 = vpop.f32.mrf.mxu1 }
  0x95   :  { %102 = vst.msk [vmem:[%s318_s4] sm:$0xff] %vm72_vm0, %v96_v12 }
  0x96   :  { %139 = vst.msk [vmem:[%s319_s5] sm:$0xff] %vm72_vm0, %v133_v13 }
  0x98   :  { %v99_v14 = vpop.f32.mrf.mxu2 }
  0x99   :  { %v136_v15 = vpop.f32.mrf.mxu3  ;;  %103 = vst.msk [vmem:[%s318_s4 + $0x8] sm:$0xff] %vm72_vm0, %v99_v14 }
  0x9a   :  { %140 = vst.msk [vmem:[%s319_s5 + $0x8] sm:$0xff] %vm72_vm0, %v136_v15 }
  0x9b   :  { %149 = vsyncpa [#allocation3], 1 }
  0x9c   :  { %150 = vsyncpa [#allocation5], 1 }

// kernel: guidence_attention_forward.5
= control target key start
LH: loop header
LB: loop body
LE: loop exit
PB: predicated region body
PF: predicated region fallthrough
CT: control target
= control target key end

     0   :  { %17 = vsyncpa [#allocation3], 0  ;;  %s706_s0 = inlined_call_operand.hbm [shape: f32[16,32], index: 0, kind: input, shape index: {}]   ;;  %s707_s1 = inlined_call_operand.hbm [shape: f32[16,32], index: 1, kind: input, shape index: {}]   ;;  %s708_s2 = inlined_call_operand.hbm [shape: f32[16,32], index: 2, kind: input, shape index: {}]   ;;  %s709_s3 = inlined_call_operand.hbm [shape: f32[16,32], index: 3, kind: input, shape index: {}]   ;;  %s710_s4 = inlined_call_operand.hbm [shape: f32[32,32], index: 4, kind: input, shape index: {}]   ;;  %s711_s5 = inlined_call_operand.hbm [shape: f32[32,32], index: 5, kind: input, shape index: {}]   ;;  %s712_s6 = inlined_call_operand.hbm [shape: f32[32,32], index: 6, kind: input, shape index: {}]   ;;  %s713_s7 = inlined_call_operand.hbm [shape: f32[32,32], index: 7, kind: input, shape index: {}]   ;;  %s714_s8 = inlined_call_operand.vmem [shape: f32[16,32], index: 8, kind: output, shape index: {0}]   ;;  %s715_s9 = inlined_call_operand.vmem [shape: f32[16,32], index: 9, kind: output, shape index: {1}]   ;;  %s716_s10 = inlined_call_operand.vmem [shape: f32[16,32], index: 10, kind: output, shape index: {2}]   ;;  %s717_s11 = inlined_call_operand.vmem [shape: f32[16,32], index: 11, kind: output, shape index: {3}]  }
   0x1   :  { %18 = vsyncpa [#allocation5], 0 }
   0x2   :  { %19 = vsyncpa [#allocation8], 0 }
   0x3   :  { %20 = vsyncpa [#allocation11], 0 }
   0x4   :  { %21 = vsyncpa [#allocation14], 0  ;;  %s39_s19 = sshll.u32 %s707_s1, 4  ;;  %s548_s20 = smov [#allocation4]   ;;  %s40_s19 = int_to_ptr.hbm [resolvable:$true] %s39_s19 }
   0x5   :  { %s41_s21 = sshll.u32 %s548_s20, 4  ;;  %s65_s24 = sshll.u32 %s709_s3, 4  ;;  %s42_s21 = int_to_ptr.vmem [resolvable:$true] %s41_s21  ;;  %s66_s24 = int_to_ptr.hbm [resolvable:$true] %s65_s24 }
   0x6   :  { %s549_s25 = smov 128   ;;  %s550_s26 = smov 8  }
   0x7   :  { %47 = dma.hbm_to_vmem [thread:$0]  %s40_s19, 256, %s42_s21, [#allocation5], %s549_s25, %s549_s25, %s550_s26  }
   0x8   :  { %s551_s27 = smov [#allocation7]   ;;  %s91_s1 = sshll.u32 %s711_s5, 4  ;;  %s92_s1 = int_to_ptr.hbm [resolvable:$true] %s91_s1 }
   0x9   :  { %s67_s28 = sshll.u32 %s551_s27, 4  ;;  %s26_s13 = sshll.u32 %s706_s0, 4  ;;  %s68_s28 = int_to_ptr.vmem [resolvable:$true] %s67_s28  ;;  %s27_s13 = int_to_ptr.hbm [resolvable:$true] %s26_s13 }
   0xa   :  { %73 = dma.hbm_to_vmem [thread:$0]  %s66_s24, 256, %s68_s28, [#allocation8], %s549_s25, %s549_s25, %s550_s26  }
   0xb   :  { %s552_s14 = smov [#allocation10]   ;;  %s553_s16 = smov [#allocation2]  }
   0xc   :  { %s93_s15 = sshll.u32 %s552_s14, 4  ;;  %s28_s5 = sshll.u32 %s553_s16, 4  ;;  %s94_s15 = int_to_ptr.vmem [resolvable:$true] %s93_s15  ;;  %s29_s5 = int_to_ptr.vmem [resolvable:$true] %s28_s5 }
   0xd   :  { %99 = dma.hbm_to_vmem [thread:$0]  %s92_s1, 512, %s94_s15, [#allocation11], %s549_s25, %s549_s25, %s550_s26  }
   0xe   :  { %s52_s19 = sshll.u32 %s708_s2, 4  ;;  %s78_s21 = sshll.u32 %s710_s4, 4  ;;  %s53_s19 = int_to_ptr.hbm [resolvable:$true] %s52_s19  ;;  %s79_s21 = int_to_ptr.hbm [resolvable:$true] %s78_s21 }
   0xf   :  { %34 = dma.hbm_to_vmem [thread:$0]  %s27_s13, 256, %s29_s5, [#allocation3], %s549_s25, %s549_s25, %s550_s26  }
  0x10   :  { %s554_s22 = smov [#allocation6]   ;;  %s555_s24 = smov [#allocation9]  }
  0x11   :  { %s54_s23 = sshll.u32 %s554_s22, 4  ;;  %s80_s2 = sshll.u32 %s555_s24, 4  ;;  %s55_s23 = int_to_ptr.vmem [resolvable:$true] %s54_s23  ;;  %s81_s2 = int_to_ptr.vmem [resolvable:$true] %s80_s2 }
  0x12   :  { %60 = dma.hbm_to_vmem [thread:$0]  %s53_s19, 256, %s55_s23, [#allocation5], %s549_s25, %s549_s25, %s550_s26  }
  0x13   :  { %s104_s29 = sshll.u32 %s712_s6, 4  ;;  %s117_s1 = sshll.u32 %s713_s7, 4  ;;  %s105_s29 = int_to_ptr.hbm [resolvable:$true] %s104_s29  ;;  %s118_s1 = int_to_ptr.hbm [resolvable:$true] %s117_s1 }
  0x14   :  { %86 = dma.hbm_to_vmem [thread:$0]  %s79_s21, 512, %s81_s2, [#allocation8], %s549_s25, %s549_s25, %s550_s26  }
  0x15   :  { %s556_s3 = smov [#allocation12]   ;;  %s557_s13 = smov [#allocation13]  }
  0x16   :  { %s106_s12 = sshll.u32 %s556_s3, 4  ;;  %s119_s6 = sshll.u32 %s557_s13, 4  ;;  %s107_s12 = int_to_ptr.vmem [resolvable:$true] %s106_s12  ;;  %s120_s6 = int_to_ptr.vmem [resolvable:$true] %s119_s6 }
  0x17   :  { %112 = dma.hbm_to_vmem [thread:$0]  %s105_s29, 512, %s107_s12, [#allocation11], %s549_s25, %s549_s25, %s550_s26  }
  0x18   :  { %125 = dma.hbm_to_vmem [thread:$0]  %s118_s1, 512, %s120_s6, [#allocation14], %s549_s25, %s549_s25, %s550_s26  }
  0x19   :  { %538 = dma.done.wait [#allocation3], 256  }
  0x1a   :  { %539 = vsyncadd [#allocation3], 4294967040 }
  0x1b   :  { %540 = dma.done.wait [#allocation5], 512  }
  0x1c   :  { %541 = vsyncadd [#allocation5], 4294966784 }
  0x1d   :  { %542 = dma.done.wait [#allocation8], 768  }
  0x1e   :  { %543 = vsyncadd [#allocation8], 4294966528 }
  0x1f   :  { %544 = dma.done.wait [#allocation11], 1024  }
  0x20   :  { %545 = vsyncadd [#allocation11], 4294966272 }
  0x21   :  { %546 = dma.done.wait [#allocation14], 512  }
  0x22   :  { %547 = vsyncadd [#allocation14], 4294966784  ;;  %v238_v0 = vld [vmem:[#allocation12 + $0x18] sm:$0xff]  ;;  %v237_v2 = vld [vmem:[#allocation12 + $0x10] sm:$0xff]  ;;  %vm164_vm0 = vcmask 261120  }
  0x23   :  { %v275_v1 = vld [vmem:[#allocation13 + $0x18] sm:$0xff]  ;;  %257 = vmatpush.msra.mxu2 %v238_v0  ;;  %v274_v3 = vld [vmem:[#allocation13 + $0x10] sm:$0xff]  ;;  %v236_v4 = vld [vmem:[#allocation12 + $0x8] sm:$0xff] }
  0x24   :  { %294 = vmatpush.msra.mxu3 %v275_v1  ;;  %v273_v5 = vld [vmem:[#allocation13 + $0x8] sm:$0xff]  ;;  %v163_v6 = vld [vmem:[#allocation9 + $0x18] sm:$0xff]  ;;  %v235_v8 = vld [vmem:[#allocation12] sm:$0xff] }
  0x25   :  { %v201_v7 = vld [vmem:[#allocation10 + $0x18] sm:$0xff]  ;;  %258 = vmatpush.msra.mxu2 %v237_v2  ;;  %183 = vmatpush.msra.mxu0 %v163_v6  ;;  %v272_v9 = vld [vmem:[#allocation13] sm:$0xff]  ;;  %v162_v10 = vld [vmem:[#allocation9 + $0x10] sm:$0xff] }
  0x26   :  { %295 = vmatpush.msra.mxu3 %v274_v3  ;;  %220 = vmatpush.msra.mxu1 %v201_v7  ;;  %v200_v11 = vld [vmem:[#allocation10 + $0x10] sm:$0xff]  ;;  %v233_v12 = vld [vmem:[#allocation6] sm:$0xff]  ;;  %v161_v14 = vld [vmem:[#allocation9 + $0x8] sm:$0xff] }
  0x27   :  { %259 = vmatpush.msra.mxu2 %v236_v4  ;;  %v270_v13 = vld [vmem:[#allocation7] sm:$0xff]  ;;  %184 = vmatpush.msra.mxu0 %v162_v10  ;;  %v199_v15 = vld [vmem:[#allocation10 + $0x8] sm:$0xff]  ;;  %v160_v16 = vld [vmem:[#allocation9] sm:$0xff] }
  0x28   :  { %296 = vmatpush.msra.mxu3 %v273_v5  ;;  %221 = vmatpush.msra.mxu1 %v200_v11  ;;  %v198_v17 = vld [vmem:[#allocation10] sm:$0xff]  ;;  %v196_v19 = vld [vmem:[#allocation4] sm:$0xff]  ;;  %v234_v20 = vld [vmem:[#allocation6 + $0x8] sm:$0xff] }
  0x29   :  { %260 = vmatpush.msra.mxu2 %v235_v8  ;;  %185 = vmatpush.msra.mxu0 %v161_v14  ;;  %v158_v18 = vld [vmem:[#allocation2] sm:$0xff]  ;;  %v271_v21 = vld [vmem:[#allocation7 + $0x8] sm:$0xff]  ;;  %v159_v22 = vld [vmem:[#allocation2 + $0x8] sm:$0xff] }
  0x2a   :  { %297 = vmatpush.msra.mxu3 %v272_v9  ;;  %332 = vmatmul.msk.f32.vlgmr.msra.gmra.mxu2 %vm164_vm0, %v233_v12  ;;  %v197_v23 = vld [vmem:[#allocation4 + $0x8] sm:$0xff] }
  0x2b   :  { %334 = vmatmul.msk.f32.vlgmr.msra.gmra.mxu3 %vm164_vm0, %v270_v13  ;;  %222 = vmatpush.msra.mxu1 %v199_v15 }
  0x2c   :  { %186 = vmatpush.msra.mxu0 %v160_v16 }
  0x2d   :  { %223 = vmatpush.msra.mxu1 %v198_v17  ;;  %328 = vmatmul.msk.f32.vlgmr.msra.gmra.mxu0 %vm164_vm0, %v158_v18 }
  0x2e   :  { %330 = vmatmul.msk.f32.vlgmr.msra.gmra.mxu1 %vm164_vm0, %v196_v19 }
  0x32   :  { %333 = vmatmul.msk.f32.gmra.mxu2 %vm164_vm0, %v234_v20 }
  0x33   :  { %335 = vmatmul.msk.f32.gmra.mxu3 %vm164_vm0, %v271_v21 }
  0x35   :  { %329 = vmatmul.msk.f32.gmra.mxu0 %vm164_vm0, %v159_v22 }
  0x36   :  { %331 = vmatmul.msk.f32.gmra.mxu1 %vm164_vm0, %v197_v23 }
  0xaa   :  { %v188_v24 = vpop.f32.mrf.mxu0 }
  0xab   :  { %v225_v25 = vpop.f32.mrf.mxu1  ;;  %194 = vst.msk [vmem:[%s714_s8] sm:$0xff] %vm164_vm0, %v188_v24 }
  0xac   :  { %231 = vst.msk [vmem:[%s715_s9] sm:$0xff] %vm164_vm0, %v225_v25 }
  0xad   :  { %v262_v26 = vpop.f32.mrf.mxu2 }
  0xae   :  { %v299_v27 = vpop.f32.mrf.mxu3  ;;  %268 = vst.msk [vmem:[%s716_s10] sm:$0xff] %vm164_vm0, %v262_v26 }
  0xaf   :  { %305 = vst.msk [vmem:[%s717_s11] sm:$0xff] %vm164_vm0, %v299_v27 }
  0xb2   :  { %v191_v28 = vpop.f32.mrf.mxu0 }
  0xb3   :  { %v228_v29 = vpop.f32.mrf.mxu1  ;;  %195 = vst.msk [vmem:[%s714_s8 + $0x8] sm:$0xff] %vm164_vm0, %v191_v28 }
  0xb4   :  { %232 = vst.msk [vmem:[%s715_s9 + $0x8] sm:$0xff] %vm164_vm0, %v228_v29 }
  0xb5   :  { %v265_v30 = vpop.f32.mrf.mxu2 }
  0xb6   :  { %v302_v31 = vpop.f32.mrf.mxu3  ;;  %269 = vst.msk [vmem:[%s716_s10 + $0x8] sm:$0xff] %vm164_vm0, %v265_v30 }
  0xb7   :  { %306 = vst.msk [vmem:[%s717_s11 + $0x8] sm:$0xff] %vm164_vm0, %v302_v31 }
  0xb8   :  { %323 = vsyncpa [#allocation3], 1 }
  0xb9   :  { %324 = vsyncpa [#allocation5], 1 }
  0xba   :  { %325 = vsyncpa [#allocation8], 1 }
  0xbb   :  { %326 = vsyncpa [#allocation11], 1 }
  0xbc   :  { %327 = vsyncpa [#allocation14], 1 }

// kernel: guidence_attention_forward.6
= control target key start
LH: loop header
LB: loop body
LE: loop exit
PB: predicated region body
PF: predicated region fallthrough
CT: control target
= control target key end

     0   :  { %s3366_s24 = smov 0   ;;  %s3368_s25 = smov 0   ;;  %s4265_s0 = inlined_call_operand.vmem [shape: f32[8,2,1,32], index: 0, kind: input, shape index: {}]   ;;  %s4266_s1 = inlined_call_operand.vmem [shape: f32[8,2,1,32], index: 1, kind: input, shape index: {}]   ;;  %s4267_s2 = inlined_call_operand.vmem [shape: f32[8,2,1,32], index: 2, kind: input, shape index: {}]   ;;  %s4268_s3 = inlined_call_operand.vmem [shape: f32[8,2,1,32], index: 3, kind: input, shape index: {}]   ;;  %s4269_s4 = inlined_call_operand.vmem [shape: f32[8,2,1,32], index: 4, kind: input, shape index: {}]   ;;  %s4270_s5 = inlined_call_operand.vmem [shape: f32[8,2,1,32], index: 5, kind: input, shape index: {}]   ;;  %s4271_s6 = inlined_call_operand.vmem [shape: f32[2,8,32], index: 6, kind: output, shape index: {0}]   ;;  %s4272_s7 = inlined_call_operand.vmem [shape: f32[2,8,32], index: 7, kind: output, shape index: {1}]  }
   0x1   :  { %s3370_s26 = smov 0   ;;  %s3372_s27 = smov 0  }
   0x2   :  { %s3374_s28 = smov 0  }
   0x3 LB: > { %s30_s29 = sadd.s32 1, %s3306_s27  ;;  %p46_p1 = scmp.ne.s32.totalorder %s3298_s25, %s3294_s24  ;;  %s3310_s28 = sphi %s3374_s28, %s18_s28   ;;  %s3306_s27 = sphi %s3372_s27, %s4289_s27   ;;  %s3302_s26 = sphi %s3370_s26, %s4288_s26   ;;  %s3298_s25 = sphi %s3368_s25, %s4287_s25   ;;  %s3294_s24 = sphi %s3366_s24, %s4286_s24  }
   0x4   : > { %p32_p0 = scmp.ge.s32.totalorder %s30_s29, 2  ;;  %p47_p2 = scmp.eq.s32.totalorder %s3310_s28, 0 }
   0x5   : > { %s39_s9 = sadd.s32 1, %s3298_s25  ;;  %p3053_p5 = scmp.ge.s32.totalorder %s3310_s28, 2 }
   0x6   : > { %s4291_s29 = smov (%p32_p0, %s30_s29), 0  ;;  %p3397_p3 = por %p47_p2, %p46_p1 }
   0x7   : > { %s35_s8 = ssub.s32 %s3306_s27, %s4291_s29  ;;  %260 = sbr.rel (%p3053_p5) target bundleno = 84 (0x54), region = 16 }
   0x8   : > { %p37_p4 = scmp.eq.s32.totalorder %s35_s8, 0 }
   0xa   : > { %s3405_s10 = scalar_select %p37_p4, %s3298_s25, %s39_s9  }
   0xc   : > { %263 = sbr.rel (!%p3397_p3) target bundleno = 24 (0x18), region = 20  ;;  %s265_s11 = sand.u32 (%p3397_p3), 1, %s3298_s25  }
   0xd   : > { %s271_s14 = scalar_lea.vmem (%p3397_p3), %s4265_s0, %s3306_s27  ;;  %s3054_s15 = sshll.u32 (%p3397_p3), %s265_s11, 3 }
   0xe   : > { %v288_v0 = vld [vmem:[%s271_s14] sm:$0x1] (%p3397_p3)  ;;  %v290_v1 = vld [vmem:[%s271_s14 + $0x2] sm:$0x1] (%p3397_p3)  ;;  %v292_v2 = vld [vmem:[%s271_s14 + $0x4] sm:$0x1] (%p3397_p3) }
   0xf   : > { %s267_s16 = scalar_lea.vmem (%p3397_p3), [#allocation2], %s3054_s15  ;;  %v294_v3 = vld [vmem:[%s271_s14 + $0x6] sm:$0x1] (%p3397_p3)  ;;  %v296_v4 = vld [vmem:[%s271_s14 + $0x8] sm:$0x1] (%p3397_p3) }
  0x10   : > { %289 = vst [vmem:[%s267_s16] sm:$0x1] (%p3397_p3), %v288_v0  ;;  %v298_v5 = vld [vmem:[%s271_s14 + $0xa] sm:$0x1] (%p3397_p3)  ;;  %v300_v6 = vld [vmem:[%s271_s14 + $0xc] sm:$0x1] (%p3397_p3) }
  0x11   : > { %291 = vst [vmem:[%s267_s16 + $0x1] sm:$0x1] %v290_v1  ;;  %v302_v7 = vld [vmem:[%s271_s14 + $0xe] sm:$0x1] }
  0x12   : > { %293 = vst [vmem:[%s267_s16 + $0x2] sm:$0x1] %v292_v2 }
  0x13   : > { %295 = vst [vmem:[%s267_s16 + $0x3] sm:$0x1] %v294_v3 }
  0x14   : > { %297 = vst [vmem:[%s267_s16 + $0x4] sm:$0x1] %v296_v4 }
  0x15   : > { %299 = vst [vmem:[%s267_s16 + $0x5] sm:$0x1] %v298_v5 }
  0x16   : > { %301 = vst [vmem:[%s267_s16 + $0x6] sm:$0x1] %v300_v6 }
  0x17   : > { %303 = vst [vmem:[%s267_s16 + $0x7] sm:$0x1] %v302_v7 }
  0x18 PF: > { %343 = sbr.rel (!%p3397_p3) target bundleno = 36 (0x24), region = 61  ;;  %s345_s17 = sand.u32 (%p3397_p3), 1, %s3298_s25  }
  0x19   : > { %s348_s20 = scalar_lea.vmem (%p3397_p3), %s4266_s1, %s3306_s27  ;;  %s3055_s21 = sshll.u32 (%p3397_p3), %s345_s17, 3 }
  0x1a   : > { %v365_v8 = vld [vmem:[%s348_s20] sm:$0x1] (%p3397_p3)  ;;  %v367_v9 = vld [vmem:[%s348_s20 + $0x2] sm:$0x1] (%p3397_p3)  ;;  %v369_v10 = vld [vmem:[%s348_s20 + $0x4] sm:$0x1] (%p3397_p3) }
  0x1b   : > { %s347_s22 = scalar_lea.vmem (%p3397_p3), [#allocation3], %s3055_s21  ;;  %v371_v11 = vld [vmem:[%s348_s20 + $0x6] sm:$0x1] (%p3397_p3)  ;;  %v373_v12 = vld [vmem:[%s348_s20 + $0x8] sm:$0x1] (%p3397_p3) }
  0x1c   : > { %366 = vst [vmem:[%s347_s22] sm:$0x1] (%p3397_p3), %v365_v8  ;;  %v375_v13 = vld [vmem:[%s348_s20 + $0xa] sm:$0x1] (%p3397_p3)  ;;  %v377_v14 = vld [vmem:[%s348_s20 + $0xc] sm:$0x1] (%p3397_p3) }
  0x1d   : > { %368 = vst [vmem:[%s347_s22 + $0x1] sm:$0x1] %v367_v9  ;;  %v379_v15 = vld [vmem:[%s348_s20 + $0xe] sm:$0x1] }
  0x1e   : > { %370 = vst [vmem:[%s347_s22 + $0x2] sm:$0x1] %v369_v10 }
  0x1f   : > { %372 = vst [vmem:[%s347_s22 + $0x3] sm:$0x1] %v371_v11 }
  0x20   : > { %374 = vst [vmem:[%s347_s22 + $0x4] sm:$0x1] %v373_v12 }
  0x21   : > { %376 = vst [vmem:[%s347_s22 + $0x5] sm:$0x1] %v375_v13 }
  0x22   : > { %378 = vst [vmem:[%s347_s22 + $0x6] sm:$0x1] %v377_v14 }
  0x23   : > { %380 = vst [vmem:[%s347_s22 + $0x7] sm:$0x1] %v379_v15 }
  0x24 PF: > { %420 = sbr.rel (!%p3397_p3) target bundleno = 48 (0x30), region = 102  ;;  %s422_s23 = sand.u32 (%p3397_p3), 1, %s3298_s25  }
  0x25   : > { %s425_s11 = scalar_lea.vmem (%p3397_p3), %s4267_s2, %s3306_s27  ;;  %s3056_s12 = sshll.u32 (%p3397_p3), %s422_s23, 3 }
  0x26   : > { %v442_v16 = vld [vmem:[%s425_s11] sm:$0x1] (%p3397_p3)  ;;  %v444_v17 = vld [vmem:[%s425_s11 + $0x2] sm:$0x1] (%p3397_p3)  ;;  %v446_v18 = vld [vmem:[%s425_s11 + $0x4] sm:$0x1] (%p3397_p3) }
  0x27   : > { %s424_s13 = scalar_lea.vmem (%p3397_p3), [#allocation4], %s3056_s12  ;;  %v448_v19 = vld [vmem:[%s425_s11 + $0x6] sm:$0x1] (%p3397_p3)  ;;  %v450_v20 = vld [vmem:[%s425_s11 + $0x8] sm:$0x1] (%p3397_p3) }
  0x28   : > { %443 = vst [vmem:[%s424_s13] sm:$0x1] (%p3397_p3), %v442_v16  ;;  %v452_v21 = vld [vmem:[%s425_s11 + $0xa] sm:$0x1] (%p3397_p3)  ;;  %v454_v22 = vld [vmem:[%s425_s11 + $0xc] sm:$0x1] (%p3397_p3) }
  0x29   : > { %445 = vst [vmem:[%s424_s13 + $0x1] sm:$0x1] %v444_v17  ;;  %v456_v23 = vld [vmem:[%s425_s11 + $0xe] sm:$0x1] }
  0x2a   : > { %447 = vst [vmem:[%s424_s13 + $0x2] sm:$0x1] %v446_v18 }
  0x2b   : > { %449 = vst [vmem:[%s424_s13 + $0x3] sm:$0x1] %v448_v19 }
  0x2c   : > { %451 = vst [vmem:[%s424_s13 + $0x4] sm:$0x1] %v450_v20 }
  0x2d   : > { %453 = vst [vmem:[%s424_s13 + $0x5] sm:$0x1] %v452_v21 }
  0x2e   : > { %455 = vst [vmem:[%s424_s13 + $0x6] sm:$0x1] %v454_v22 }
  0x2f   : > { %457 = vst [vmem:[%s424_s13 + $0x7] sm:$0x1] %v456_v23 }
  0x30 PF: > { %497 = sbr.rel (!%p3397_p3) target bundleno = 60 (0x3c), region = 143  ;;  %s499_s14 = sand.u32 (%p3397_p3), 1, %s3298_s25  }
  0x31   : > { %s505_s17 = scalar_lea.vmem (%p3397_p3), %s4268_s3, %s3306_s27  ;;  %s3057_s18 = sshll.u32 (%p3397_p3), %s499_s14, 3 }
  0x32   : > { %v522_v24 = vld [vmem:[%s505_s17] sm:$0x1] (%p3397_p3)  ;;  %v524_v25 = vld [vmem:[%s505_s17 + $0x2] sm:$0x1] (%p3397_p3)  ;;  %v526_v26 = vld [vmem:[%s505_s17 + $0x4] sm:$0x1] (%p3397_p3) }
  0x33   : > { %s501_s19 = scalar_lea.vmem (%p3397_p3), [#allocation5], %s3057_s18  ;;  %v528_v27 = vld [vmem:[%s505_s17 + $0x6] sm:$0x1] (%p3397_p3)  ;;  %v530_v28 = vld [vmem:[%s505_s17 + $0x8] sm:$0x1] (%p3397_p3) }
  0x34   : > { %523 = vst [vmem:[%s501_s19] sm:$0x1] (%p3397_p3), %v522_v24  ;;  %v532_v29 = vld [vmem:[%s505_s17 + $0xa] sm:$0x1] (%p3397_p3)  ;;  %v534_v30 = vld [vmem:[%s505_s17 + $0xc] sm:$0x1] (%p3397_p3) }
  0x35   : > { %525 = vst [vmem:[%s501_s19 + $0x1] sm:$0x1] %v524_v25  ;;  %v536_v31 = vld [vmem:[%s505_s17 + $0xe] sm:$0x1] }
  0x36   : > { %527 = vst [vmem:[%s501_s19 + $0x2] sm:$0x1] %v526_v26 }
  0x37   : > { %529 = vst [vmem:[%s501_s19 + $0x3] sm:$0x1] %v528_v27 }
  0x38   : > { %531 = vst [vmem:[%s501_s19 + $0x4] sm:$0x1] %v530_v28 }
  0x39   : > { %533 = vst [vmem:[%s501_s19 + $0x5] sm:$0x1] %v532_v29 }
  0x3a   : > { %535 = vst [vmem:[%s501_s19 + $0x6] sm:$0x1] %v534_v30 }
  0x3b   : > { %537 = vst [vmem:[%s501_s19 + $0x7] sm:$0x1] %v536_v31 }
  0x3c PF: > { %577 = sbr.rel (!%p3397_p3) target bundleno = 72 (0x48), region = 184  ;;  %s579_s20 = sand.u32 (%p3397_p3), 1, %s3298_s25  }
  0x3d   : > { %s582_s23 = scalar_lea.vmem (%p3397_p3), %s4269_s4, %s3306_s27  ;;  %s3058_s8 = sshll.u32 (%p3397_p3), %s579_s20, 3 }
  0x3e   : > { %v599_v32 = vld [vmem:[%s582_s23] sm:$0x1] (%p3397_p3)  ;;  %v601_v33 = vld [vmem:[%s582_s23 + $0x2] sm:$0x1] (%p3397_p3)  ;;  %v603_v34 = vld [vmem:[%s582_s23 + $0x4] sm:$0x1] (%p3397_p3) }
  0x3f   : > { %s581_s9 = scalar_lea.vmem (%p3397_p3), [#allocation6], %s3058_s8  ;;  %v605_v35 = vld [vmem:[%s582_s23 + $0x6] sm:$0x1] (%p3397_p3)  ;;  %v607_v36 = vld [vmem:[%s582_s23 + $0x8] sm:$0x1] (%p3397_p3) }
  0x40   : > { %600 = vst [vmem:[%s581_s9] sm:$0x1] (%p3397_p3), %v599_v32  ;;  %v609_v37 = vld [vmem:[%s582_s23 + $0xa] sm:$0x1] (%p3397_p3)  ;;  %v611_v38 = vld [vmem:[%s582_s23 + $0xc] sm:$0x1] (%p3397_p3) }
  0x41   : > { %602 = vst [vmem:[%s581_s9 + $0x1] sm:$0x1] %v601_v33  ;;  %v613_v39 = vld [vmem:[%s582_s23 + $0xe] sm:$0x1] }
  0x42   : > { %604 = vst [vmem:[%s581_s9 + $0x2] sm:$0x1] %v603_v34 }
  0x43   : > { %606 = vst [vmem:[%s581_s9 + $0x3] sm:$0x1] %v605_v35 }
  0x44   : > { %608 = vst [vmem:[%s581_s9 + $0x4] sm:$0x1] %v607_v36 }
  0x45   : > { %610 = vst [vmem:[%s581_s9 + $0x5] sm:$0x1] %v609_v37 }
  0x46   : > { %612 = vst [vmem:[%s581_s9 + $0x6] sm:$0x1] %v611_v38 }
  0x47   : > { %614 = vst [vmem:[%s581_s9 + $0x7] sm:$0x1] %v613_v39 }
  0x48 PF: > { %654 = sbr.rel (!%p3397_p3) target bundleno = 84 (0x54), region = 225  ;;  %s656_s11 = sand.u32 (%p3397_p3), 1, %s3298_s25  }
  0x49   : > { %s659_s14 = scalar_lea.vmem (%p3397_p3), %s4270_s5, %s3306_s27  ;;  %s3059_s15 = sshll.u32 (%p3397_p3), %s656_s11, 3 }
  0x4a   : > { %v676_v40 = vld [vmem:[%s659_s14] sm:$0x1] (%p3397_p3)  ;;  %v678_v41 = vld [vmem:[%s659_s14 + $0x2] sm:$0x1] (%p3397_p3)  ;;  %v680_v42 = vld [vmem:[%s659_s14 + $0x4] sm:$0x1] (%p3397_p3) }
  0x4b   : > { %s658_s16 = scalar_lea.vmem (%p3397_p3), [#allocation7], %s3059_s15  ;;  %v682_v43 = vld [vmem:[%s659_s14 + $0x6] sm:$0x1] (%p3397_p3)  ;;  %v684_v44 = vld [vmem:[%s659_s14 + $0x8] sm:$0x1] (%p3397_p3) }
  0x4c   : > { %677 = vst [vmem:[%s658_s16] sm:$0x1] (%p3397_p3), %v676_v40  ;;  %v686_v45 = vld [vmem:[%s659_s14 + $0xa] sm:$0x1] (%p3397_p3)  ;;  %v688_v46 = vld [vmem:[%s659_s14 + $0xc] sm:$0x1] (%p3397_p3) }
  0x4d   : > { %679 = vst [vmem:[%s658_s16 + $0x1] sm:$0x1] %v678_v41  ;;  %v690_v47 = vld [vmem:[%s659_s14 + $0xe] sm:$0x1] }
  0x4e   : > { %681 = vst [vmem:[%s658_s16 + $0x2] sm:$0x1] %v680_v42 }
  0x4f   : > { %683 = vst [vmem:[%s658_s16 + $0x3] sm:$0x1] %v682_v43 }
  0x50   : > { %685 = vst [vmem:[%s658_s16 + $0x4] sm:$0x1] %v684_v44 }
  0x51   : > { %687 = vst [vmem:[%s658_s16 + $0x5] sm:$0x1] %v686_v45 }
  0x52   : > { %689 = vst [vmem:[%s658_s16 + $0x6] sm:$0x1] %v688_v46 }
  0x53   : > { %691 = vst [vmem:[%s658_s16 + $0x7] sm:$0x1] %v690_v47 }
  0x54 PF: > { %p3060_p6 = scmp.ge.s32.totalorder %s3310_s28, 1  ;;  %p730_p7 = scmp.lt.s32.totalorder %s3310_s28, 3 }
  0x56   : > { %p731_p8 = pnand %p3060_p6, %p730_p7 }
  0x58   : > { %734 = sbr.rel (%p731_p8) target bundleno = 1786 (0x6fa), region = 266 }
  0x5d   : > { %s737_s30 = sand.u32 1, %s3294_s24   ;;  %vm960_vm0 = vcmask 31744   ;;  %vm985_vm1 = vcmask 64512   ;;  %s3312_s23 = smov 124   ;;  %vm2796_vm2 = vcmask 97280   ;;  %vm2798_vm3 = vcmask 130048  }
  0x5e   : > { %s3453_s17 = sshll.u32 %s737_s30, 3  ;;  %s3313_s8 = smov 120   ;;  %vm2800_vm4 = vcmask 162816   ;;  %vm2802_vm5 = vcmask 195584   ;;  %vm2804_vm6 = vcmask 228352   ;;  %vm2806_vm7 = vcmask 261120  }
  0x5f   : > { %s739_s18 = scalar_lea.vmem [#allocation2], %s3453_s17  ;;  %s746_s24 = scalar_lea.vmem [#allocation3], %s3453_s17 }
  0x60   : > { %v848_v48 = vld [vmem:[%s739_s18] sm:$0x1]  ;;  %v849_v49 = vld [vmem:[%s739_s18 + $0x1] sm:$0x1]  ;;  %v850_v50 = vld [vmem:[%s739_s18 + $0x2] sm:$0x1] }
  0x61   : > { %v851_v51 = vld [vmem:[%s739_s18 + $0x3] sm:$0x1]  ;;  %v3456_v52 = vmul.f32 0.5, %v848_v48  ;;  %v852_v53 = vld [vmem:[%s739_s18 + $0x4] sm:$0x1]  ;;  %v3458_v54 = vmul.f32 0.5, %v849_v49 }
  0x62   : > { %v853_v55 = vld [vmem:[%s739_s18 + $0x5] sm:$0x1]  ;;  %v3460_v56 = vmul.f32 0.5, %v850_v50  ;;  %v854_v57 = vld [vmem:[%s739_s18 + $0x6] sm:$0x1]  ;;  %v3462_v58 = vmul.f32 0.5, %v851_v51 }
  0x63   : > { %v855_v59 = vld [vmem:[%s739_s18 + $0x7] sm:$0x1]  ;;  %v3464_v60 = vmul.f32 0.5, %v852_v53  ;;  %920 = vst [vmem:[#allocation1] ss:$9 sm:$0xff] %v3456_v52  ;;  %v3467_v61 = vmul.f32 0.5, %v853_v55 }
  0x64   : > { %922 = vst [vmem:[#allocation1 + $0x1] ss:$9 sm:$0xff] %v3458_v54  ;;  %v3470_v62 = vmul.f32 0.5, %v854_v57  ;;  %v3473_v63 = vmul.f32 0.5, %v855_v59  ;;  %v3481_v0 = vld [vmem:[%s746_s24] sm:$0x1] }
  0x65   : > { %924 = vst [vmem:[#allocation1 + $0x2] ss:$9 sm:$0xff] %v3460_v56  ;;  %v3483_v1 = vld [vmem:[%s746_s24 + $0x1] sm:$0x1]  ;;  %v3485_v2 = vld [vmem:[%s746_s24 + $0x2] sm:$0x1] }
  0x66   : > { %926 = vst [vmem:[#allocation1 + $0x3] ss:$9 sm:$0xff] %v3462_v58  ;;  %v3487_v4 = vld [vmem:[%s746_s24 + $0x3] sm:$0x1]  ;;  %v3490_v5 = vld [vmem:[%s746_s24 + $0x4] sm:$0x1] }
  0x67   : > { %928 = vst [vmem:[#allocation1 + $0x4] ss:$9 sm:$0xff] %v3464_v60  ;;  %v3493_v6 = vld [vmem:[%s746_s24 + $0x5] sm:$0x1]  ;;  %v3496_v7 = vld [vmem:[%s746_s24 + $0x6] sm:$0x1] }
  0x68   : > { %930 = vst [vmem:[#allocation1 + $0x5] ss:$9 sm:$0xff] %v3467_v61  ;;  %v3499_v8 = vld [vmem:[%s746_s24 + $0x7] sm:$0x1]  ;;  %s753_s19 = scalar_lea.vmem [#allocation4], %s3453_s17  ;;  %s760_s20 = scalar_lea.vmem [#allocation5], %s3453_s17 }
  0x69   : > { %932 = vst [vmem:[#allocation1 + $0x6] ss:$9 sm:$0xff] %v3470_v62  ;;  %v3506_v9 = vld [vmem:[%s753_s19] sm:$0x1]  ;;  %v3508_v10 = vld [vmem:[%s753_s19 + $0x1] sm:$0x1] }
  0x6a   : > { %934 = vst [vmem:[#allocation1 + $0x7] ss:$9 sm:$0xff] %v3473_v63  ;;  %v3510_v12 = vld [vmem:[%s753_s19 + $0x2] sm:$0x1]  ;;  %v3513_v13 = vld [vmem:[%s753_s19 + $0x3] sm:$0x1] }
  0x6b   : > { %v3516_v14 = vld [vmem:[%s753_s19 + $0x4] sm:$0x1]  ;;  %v3519_v15 = vld [vmem:[%s753_s19 + $0x5] sm:$0x1]  ;;  %v3523_v16 = vld [vmem:[%s753_s19 + $0x6] sm:$0x1] }
  0x6c   : > { %v3526_v17 = vld [vmem:[%s753_s19 + $0x7] sm:$0x1]  ;;  %v864_v18 = vld [vmem:[%s760_s20] sm:$0x1]  ;;  %v865_v19 = vld [vmem:[%s760_s20 + $0x1] sm:$0x1] }
  0x6d   : > { %v866_v20 = vld [vmem:[%s760_s20 + $0x2] sm:$0x1]  ;;  %v867_v21 = vld [vmem:[%s760_s20 + $0x3] sm:$0x1]  ;;  %v3533_v22 = vmul.f32 0.5, %v864_v18  ;;  %v3535_v24 = vmul.f32 0.5, %v865_v19 }
  0x6e   : > { %v868_v23 = vld [vmem:[%s760_s20 + $0x4] sm:$0x1]  ;;  %v869_v25 = vld [vmem:[%s760_s20 + $0x5] sm:$0x1]  ;;  %v3537_v26 = vmul.f32 0.5, %v866_v20  ;;  %v3539_v28 = vmul.f32 0.5, %v867_v21 }
  0x6f   : > { %v870_v27 = vld [vmem:[%s760_s20 + $0x6] sm:$0x1]  ;;  %v871_v30 = vld [vmem:[%s760_s20 + $0x7] sm:$0x1]  ;;  %v3541_v31 = vmul.f32 0.5, %v868_v23  ;;  %v3544_v32 = vmul.f32 0.5, %v869_v25 }
  0x70   : > { %v3547_v33 = vmul.f32 0.5, %v870_v27  ;;  %v3550_v34 = vmul.f32 0.5, %v871_v30  ;;  %s767_s21 = scalar_lea.vmem [#allocation6], %s3453_s17  ;;  %s774_s22 = scalar_lea.vmem [#allocation7], %s3453_s17 }
  0x71   : > { %v935_v3 = vld [vmem:[#allocation1] sm:$0xff]  ;;  %v3558_v35 = vld [vmem:[%s767_s21] sm:$0x1]  ;;  %v3560_v36 = vld [vmem:[%s767_s21 + $0x1] sm:$0x1]  ;;  %s3314_s9 = smov 116  }
  0x72   : > { %944 = vst [vmem:[#allocation1] ss:$9 sm:$0xff] %v3481_v0  ;;  %v3562_v37 = vld [vmem:[%s767_s21 + $0x2] sm:$0x1]  ;;  %v3564_v39 = vld [vmem:[%s767_s21 + $0x3] sm:$0x1] }
  0x73   : > { %946 = vst [vmem:[#allocation1 + $0x1] ss:$9 sm:$0xff] %v3483_v1  ;;  %v3567_v40 = vld [vmem:[%s767_s21 + $0x4] sm:$0x1]  ;;  %v3570_v41 = vld [vmem:[%s767_s21 + $0x5] sm:$0x1] }
  0x74   : > { %948 = vst [vmem:[#allocation1 + $0x2] ss:$9 sm:$0xff] %v3485_v2  ;;  %v3573_v42 = vld [vmem:[%s767_s21 + $0x6] sm:$0x1]  ;;  %v3576_v43 = vld [vmem:[%s767_s21 + $0x7] sm:$0x1] }
  0x75   : > { %950 = vst [vmem:[#allocation1 + $0x3] ss:$9 sm:$0xff] %v3487_v4  ;;  %v3583_v44 = vld [vmem:[%s774_s22] sm:$0x1]  ;;  %v3585_v45 = vld [vmem:[%s774_s22 + $0x1] sm:$0x1] }
  0x76   : > { %952 = vst [vmem:[#allocation1 + $0x4] ss:$9 sm:$0xff] %v3490_v5  ;;  %v3587_v47 = vld [vmem:[%s774_s22 + $0x2] sm:$0x1]  ;;  %v3590_v48 = vld [vmem:[%s774_s22 + $0x3] sm:$0x1] }
  0x77   : > { %954 = vst [vmem:[#allocation1 + $0x5] ss:$9 sm:$0xff] %v3493_v6  ;;  %v3593_v49 = vld [vmem:[%s774_s22 + $0x4] sm:$0x1]  ;;  %v3596_v50 = vld [vmem:[%s774_s22 + $0x5] sm:$0x1] }
  0x78   : > { %956 = vst [vmem:[#allocation1 + $0x6] ss:$9 sm:$0xff] %v3496_v7  ;;  %v3600_v51 = vld [vmem:[%s774_s22 + $0x6] sm:$0x1]  ;;  %v3603_v53 = vld [vmem:[%s774_s22 + $0x7] sm:$0x1] }
  0x79   : > { %958 = vst [vmem:[#allocation1 + $0x7] ss:$9 sm:$0xff] %v3499_v8  ;;  %s3315_s11 = smov 112   ;;  %s3316_s12 = smov 108  }
  0x7a   : > { %s3317_s13 = smov 104   ;;  %s3318_s14 = smov 100  }
  0x7b   : > { %s3319_s15 = smov 4   ;;  %s3320_s16 = smov 8  }
  0x7c   : > { %s3321_s30 = smov 12   ;;  %s3322_s17 = smov 16  }
  0x7d   : > { %s3323_s18 = smov 20   ;;  %s3324_s24 = smov 24  }
  0x7e   : > { %s3325_s19 = smov 28   ;;  %p834_p9 = scmp.lt.s32.totalorder %s3302_s26, 1 }
  0x80   : > { %v959_v11 = vld [vmem:[#allocation1] sm:$0xff]  ;;  %s4293_s26 = smov (!%p834_p9, %s3302_s26), 1 }
  0x81   : > { %3069 = vmatpush.xpose.msk.msra.mxu0 %vm960_vm0, %v959_v11  ;;  %1005 = vst [vmem:[#allocation1] ss:$9 sm:$0xff] %v3506_v9  ;;  %s3067_s20 = sshll.u32 %s4293_s26, 3 }
  0x82   : > { %1007 = vst [vmem:[#allocation1 + $0x1] ss:$9 sm:$0xff] %v3508_v10 }
  0x83   : > { %1009 = vst [vmem:[#allocation1 + $0x2] ss:$9 sm:$0xff] %v3510_v12 }
  0x84   : > { %3070 = vmatmul.msk.f32.vlgmr.msra.gmra.mxu0 %vm960_vm0, %v935_v3  ;;  %1011 = vst [vmem:[#allocation1 + $0x3] ss:$9 sm:$0xff] %v3513_v13 }
  0x85   : > { %1013 = vst [vmem:[#allocation1 + $0x4] ss:$9 sm:$0xff] %v3516_v14 }
  0x86   : > { %1015 = vst [vmem:[#allocation1 + $0x5] ss:$9 sm:$0xff] %v3519_v15 }
  0x87   : > { %1017 = vst [vmem:[#allocation1 + $0x6] ss:$9 sm:$0xff] %v3523_v16 }
  0x88   : > { %1019 = vst [vmem:[#allocation1 + $0x7] ss:$9 sm:$0xff] %v3526_v17 }
  0x8f   : > { %v1020_v29 = vld [vmem:[#allocation1] sm:$0xff] }
  0x90   : > { %1053 = vst [vmem:[#allocation1] ss:$9 sm:$0xff] %v3533_v22  ;;  %1040 = vmatpush.msra.mxu1 %v1020_v29 }
  0x91   : > { %1055 = vst [vmem:[#allocation1 + $0x1] ss:$9 sm:$0xff] %v3535_v24 }
  0x92   : > { %1057 = vst [vmem:[#allocation1 + $0x2] ss:$9 sm:$0xff] %v3537_v26 }
  0x93   : > { %1059 = vst [vmem:[#allocation1 + $0x3] ss:$9 sm:$0xff] %v3539_v28 }
  0x94   : > { %1061 = vst [vmem:[#allocation1 + $0x4] ss:$9 sm:$0xff] %v3541_v31 }
  0x95   : > { %1063 = vst [vmem:[#allocation1 + $0x5] ss:$9 sm:$0xff] %v3544_v32 }
  0x96   : > { %1065 = vst [vmem:[#allocation1 + $0x6] ss:$9 sm:$0xff] %v3547_v33 }
  0x97   : > { %1067 = vst [vmem:[#allocation1 + $0x7] ss:$9 sm:$0xff] %v3550_v34 }
  0x9e   : > { %v1068_v38 = vld [vmem:[#allocation1] sm:$0xff] }
  0x9f   : > { %1077 = vst [vmem:[#allocation1] ss:$9 sm:$0xff] %v3558_v35 }
  0xa0   : > { %1079 = vst [vmem:[#allocation1 + $0x1] ss:$9 sm:$0xff] %v3560_v36 }
  0xa1   : > { %1081 = vst [vmem:[#allocation1 + $0x2] ss:$9 sm:$0xff] %v3562_v37 }
  0xa2   : > { %1083 = vst [vmem:[#allocation1 + $0x3] ss:$9 sm:$0xff] %v3564_v39 }
  0xa3   : > { %1085 = vst [vmem:[#allocation1 + $0x4] ss:$9 sm:$0xff] %v3567_v40 }
  0xa4   : > { %1087 = vst [vmem:[#allocation1 + $0x5] ss:$9 sm:$0xff] %v3570_v41 }
  0xa5   : > { %1089 = vst [vmem:[#allocation1 + $0x6] ss:$9 sm:$0xff] %v3573_v42 }
  0xa6   : > { %1091 = vst [vmem:[#allocation1 + $0x7] ss:$9 sm:$0xff] %v3576_v43 }
  0xad   : > { %v1092_v46 = vld [vmem:[#allocation1] sm:$0xff] }
  0xae   : > { %3072 = vmatpush.xpose.msk.msra.mxu2 %vm960_vm0, %v1092_v46  ;;  %1136 = vst [vmem:[#allocation1] ss:$9 sm:$0xff] %v3583_v44 }
  0xaf   : > { %1138 = vst [vmem:[#allocation1 + $0x1] ss:$9 sm:$0xff] %v3585_v45 }
  0xb0   : > { %1140 = vst [vmem:[#allocation1 + $0x2] ss:$9 sm:$0xff] %v3587_v47 }
  0xb1   : > { %3073 = vmatmul.msk.f32.vlgmr.msra.gmra.mxu2 %vm960_vm0, %v1068_v38  ;;  %1142 = vst [vmem:[#allocation1 + $0x3] ss:$9 sm:$0xff] %v3590_v48 }
  0xb2   : > { %1144 = vst [vmem:[#allocation1 + $0x4] ss:$9 sm:$0xff] %v3593_v49 }
  0xb3   : > { %1146 = vst [vmem:[#allocation1 + $0x5] ss:$9 sm:$0xff] %v3596_v50 }
  0xb4   : > { %1148 = vst [vmem:[#allocation1 + $0x6] ss:$9 sm:$0xff] %v3600_v51 }
  0xb5   : > { %1150 = vst [vmem:[#allocation1 + $0x7] ss:$9 sm:$0xff] %v3603_v53 }
  0xbc   : > { %v1151_v55 = vld [vmem:[#allocation1] sm:$0xff] }
  0xbd   : > { %1177 = vst [vmem:[#allocation1] ss:$9 sm:$0xff] %v3456_v52  ;;  %1171 = vmatpush.msra.mxu3 %v1151_v55 }
  0xbe   : > { %1179 = vst [vmem:[#allocation1 + $0x1] ss:$9 sm:$0xff] %v3458_v54 }
  0xbf   : > { %1181 = vst [vmem:[#allocation1 + $0x2] ss:$9 sm:$0xff] %v3460_v56 }
  0xc0   : > { %1183 = vst [vmem:[#allocation1 + $0x3] ss:$9 sm:$0xff] %v3462_v58 }
  0xc1   : > { %1185 = vst [vmem:[#allocation1 + $0x4] ss:$9 sm:$0xff] %v3464_v60 }
  0xc2   : > { %1187 = vst [vmem:[#allocation1 + $0x5] ss:$9 sm:$0xff] %v3467_v61 }
  0xc3   : > { %1189 = vst [vmem:[#allocation1 + $0x6] ss:$9 sm:$0xff] %v3470_v62 }
  0xc4   : > { %1191 = vst [vmem:[#allocation1 + $0x7] ss:$9 sm:$0xff] %v3473_v63 }
  0xcb   : > { %v1192_v57 = vld [vmem:[#allocation1] sm:$0xff] }
  0xcc   : > { %1195 = vst [vmem:[#allocation1] ss:$9 sm:$0xff] %v3481_v0 }
  0xcd   : > { %1197 = vst [vmem:[#allocation1 + $0x1] ss:$9 sm:$0xff] %v3483_v1 }
  0xce   : > { %1199 = vst [vmem:[#allocation1 + $0x2] ss:$9 sm:$0xff] %v3485_v2 }
  0xcf   : > { %1201 = vst [vmem:[#allocation1 + $0x3] ss:$9 sm:$0xff] %v3487_v4 }
  0xd0   : > { %1203 = vst [vmem:[#allocation1 + $0x4] ss:$9 sm:$0xff] %v3490_v5 }
  0xd1   : > { %1205 = vst [vmem:[#allocation1 + $0x5] ss:$9 sm:$0xff] %v3493_v6 }
  0xd2   : > { %1207 = vst [vmem:[#allocation1 + $0x6] ss:$9 sm:$0xff] %v3496_v7 }
  0xd3   : > { %1209 = vst [vmem:[#allocation1 + $0x7] ss:$9 sm:$0xff] %v3499_v8 }
  0xda   : > { %v1210_v59 = vld [vmem:[#allocation1] sm:$0xff] }
  0xdb   : > { %1248 = vst [vmem:[#allocation1] ss:$9 sm:$0xff] %v3506_v9  ;;  %1211 = vrot.lane.b32.xlu1 %v1210_v59, %s3312_s23 }
  0xdc   : > { %1250 = vst [vmem:[#allocation1 + $0x1] ss:$9 sm:$0xff] %v3508_v10 }
  0xdd   : > { %1252 = vst [vmem:[#allocation1 + $0x2] ss:$9 sm:$0xff] %v3510_v12 }
  0xde   : > { %1254 = vst [vmem:[#allocation1 + $0x3] ss:$9 sm:$0xff] %v3513_v13 }
  0xdf   : > { %1256 = vst [vmem:[#allocation1 + $0x4] ss:$9 sm:$0xff] %v3516_v14 }
  0xe0   : > { %1258 = vst [vmem:[#allocation1 + $0x5] ss:$9 sm:$0xff] %v3519_v15 }
  0xe1   : > { %1260 = vst [vmem:[#allocation1 + $0x6] ss:$9 sm:$0xff] %v3523_v16 }
  0xe2   : > { %1262 = vst [vmem:[#allocation1 + $0x7] ss:$9 sm:$0xff] %v3526_v17 }
  0xe3   : > { %1193 = vrot.lane.b32.xlu1 %v1192_v57, %s3312_s23 }
  0xe9   : > { %v3633_v3 = vld [vmem:[#allocation1] sm:$0xff] }
  0xea   : > { %1290 = vst [vmem:[#allocation1] ss:$9 sm:$0xff] %v3533_v22 }
  0xeb   : > { %1292 = vst [vmem:[#allocation1 + $0x1] ss:$9 sm:$0xff] %v3535_v24 }
  0xec   : > { %1294 = vst [vmem:[#allocation1 + $0x2] ss:$9 sm:$0xff] %v3537_v26 }
  0xed   : > { %1296 = vst [vmem:[#allocation1 + $0x3] ss:$9 sm:$0xff] %v3539_v28 }
  0xee   : > { %1298 = vst [vmem:[#allocation1 + $0x4] ss:$9 sm:$0xff] %v3541_v31 }
  0xef   : > { %1300 = vst [vmem:[#allocation1 + $0x5] ss:$9 sm:$0xff] %v3544_v32 }
  0xf0   : > { %1302 = vst [vmem:[#allocation1 + $0x6] ss:$9 sm:$0xff] %v3547_v33 }
  0xf1   : > { %1304 = vst [vmem:[#allocation1 + $0x7] ss:$9 sm:$0xff] %v3550_v34 }
  0xf8   : > { %v3643_v11 = vld [vmem:[#allocation1] sm:$0xff] }
  0xf9   : > { %1308 = vst [vmem:[#allocation1] ss:$9 sm:$0xff] %v3558_v35 }
  0xfa   : > { %1310 = vst [vmem:[#allocation1 + $0x1] ss:$9 sm:$0xff] %v3560_v36 }
  0xfb   : > { %1312 = vst [vmem:[#allocation1 + $0x2] ss:$9 sm:$0xff] %v3562_v37 }
  0xfc   : > { %1314 = vst [vmem:[#allocation1 + $0x3] ss:$9 sm:$0xff] %v3564_v39 }
  0xfd   : > { %1316 = vst [vmem:[#allocation1 + $0x4] ss:$9 sm:$0xff] %v3567_v40 }
  0xfe   : > { %1318 = vst [vmem:[#allocation1 + $0x5] ss:$9 sm:$0xff] %v3570_v41 }
  0xff   : > { %1320 = vst [vmem:[#allocation1 + $0x6] ss:$9 sm:$0xff] %v3573_v42 }
 0x100   : > { %1322 = vst [vmem:[#allocation1 + $0x7] ss:$9 sm:$0xff] %v3576_v43 }
 0x101   : > { %v3653_v18 = vpop.f32.mrf.mxu0 }
 0x102   : > { %v986_v19 = vsel %vm985_vm1, %v3653_v18, -inf }
 0x103   : > { %987 = vmax.xlane.f32.xlu0 %v986_v19 }
 0x107   : > { %v3658_v20 = vld [vmem:[#allocation1] sm:$0xff] }
 0x108   : > { %1361 = vst [vmem:[#allocation1] ss:$9 sm:$0xff] %v3583_v44 }
 0x109   : > { %1363 = vst [vmem:[#allocation1 + $0x1] ss:$9 sm:$0xff] %v3585_v45 }
 0x10a   : > { %1365 = vst [vmem:[#allocation1 + $0x2] ss:$9 sm:$0xff] %v3587_v47 }
 0x10b   : > { %1367 = vst [vmem:[#allocation1 + $0x3] ss:$9 sm:$0xff] %v3590_v48 }
 0x10c   : > { %1369 = vst [vmem:[#allocation1 + $0x4] ss:$9 sm:$0xff] %v3593_v49 }
 0x10d   : > { %1371 = vst [vmem:[#allocation1 + $0x5] ss:$9 sm:$0xff] %v3596_v50 }
 0x10e   : > { %1373 = vst [vmem:[#allocation1 + $0x6] ss:$9 sm:$0xff] %v3600_v51 }
 0x10f   : > { %1375 = vst [vmem:[#allocation1 + $0x7] ss:$9 sm:$0xff] %v3603_v53 }
 0x116   : > { %v3669_v21 = vld [vmem:[#allocation1] sm:$0xff] }
 0x117   : > { %1404 = vst [vmem:[#allocation1] ss:$9 sm:$0xff] %v3456_v52 }
 0x118   : > { %1406 = vst [vmem:[#allocation1 + $0x1] ss:$9 sm:$0xff] %v3458_v54 }
 0x119   : > { %1408 = vst [vmem:[#allocation1 + $0x2] ss:$9 sm:$0xff] %v3460_v56 }
 0x11a   : > { %1410 = vst [vmem:[#allocation1 + $0x3] ss:$9 sm:$0xff] %v3462_v58 }
 0x11b   : > { %1412 = vst [vmem:[#allocation1 + $0x4] ss:$9 sm:$0xff] %v3464_v60 }
 0x11c   : > { %1414 = vst [vmem:[#allocation1 + $0x5] ss:$9 sm:$0xff] %v3467_v61 }
 0x11d   : > { %1416 = vst [vmem:[#allocation1 + $0x6] ss:$9 sm:$0xff] %v3470_v62 }
 0x11e   : > { %1418 = vst [vmem:[#allocation1 + $0x7] ss:$9 sm:$0xff] %v3473_v63 }
 0x125   : > { %v1419_v23 = vld [vmem:[#allocation1] sm:$0xff] }
 0x126   : > { %1422 = vst [vmem:[#allocation1] ss:$9 sm:$0xff] %v3481_v0 }
 0x127   : > { %1424 = vst [vmem:[#allocation1 + $0x1] ss:$9 sm:$0xff] %v3483_v1 }
 0x128   : > { %1426 = vst [vmem:[#allocation1 + $0x2] ss:$9 sm:$0xff] %v3485_v2 }
 0x129   : > { %1428 = vst [vmem:[#allocation1 + $0x3] ss:$9 sm:$0xff] %v3487_v4 }
 0x12a   : > { %1430 = vst [vmem:[#allocation1 + $0x4] ss:$9 sm:$0xff] %v3490_v5 }
 0x12b   : > { %1432 = vst [vmem:[#allocation1 + $0x5] ss:$9 sm:$0xff] %v3493_v6 }
 0x12c   : > { %1434 = vst [vmem:[#allocation1 + $0x6] ss:$9 sm:$0xff] %v3496_v7 }
 0x12d   : > { %1436 = vst [vmem:[#allocation1 + $0x7] ss:$9 sm:$0xff] %v3499_v8 }
 0x134   : > { %v1437_v25 = vld [vmem:[#allocation1] sm:$0xff] }
 0x135   : > { %1438 = vrot.lane.b32.xlu2 %v1437_v25, %s3313_s8  ;;  %1475 = vst [vmem:[#allocation1] ss:$9 sm:$0xff] %v3506_v9 }
 0x136   : > { %1477 = vst [vmem:[#allocation1 + $0x1] ss:$9 sm:$0xff] %v3508_v10 }
 0x137   : > { %1479 = vst [vmem:[#allocation1 + $0x2] ss:$9 sm:$0xff] %v3510_v12 }
 0x138   : > { %1481 = vst [vmem:[#allocation1 + $0x3] ss:$9 sm:$0xff] %v3513_v13 }
 0x139   : > { %1483 = vst [vmem:[#allocation1 + $0x4] ss:$9 sm:$0xff] %v3516_v14 }
 0x13a   : > { %1485 = vst [vmem:[#allocation1 + $0x5] ss:$9 sm:$0xff] %v3519_v15 }
 0x13b   : > { %1487 = vst [vmem:[#allocation1 + $0x6] ss:$9 sm:$0xff] %v3523_v16 }
 0x13c   : > { %1489 = vst [vmem:[#allocation1 + $0x7] ss:$9 sm:$0xff] %v3526_v17 }
 0x13d   : > { %1420 = vrot.lane.b32.xlu2 %v1419_v23, %s3313_s8 }
 0x143   : > { %v3697_v27 = vld [vmem:[#allocation1] sm:$0xff] }
 0x144   : > { %1517 = vst [vmem:[#allocation1] ss:$9 sm:$0xff] %v3533_v22 }
 0x145   : > { %1519 = vst [vmem:[#allocation1 + $0x1] ss:$9 sm:$0xff] %v3535_v24 }
 0x146   : > { %1521 = vst [vmem:[#allocation1 + $0x2] ss:$9 sm:$0xff] %v3537_v26 }
 0x147   : > { %1523 = vst [vmem:[#allocation1 + $0x3] ss:$9 sm:$0xff] %v3539_v28 }
 0x148   : > { %1525 = vst [vmem:[#allocation1 + $0x4] ss:$9 sm:$0xff] %v3541_v31 }
 0x149   : > { %1527 = vst [vmem:[#allocation1 + $0x5] ss:$9 sm:$0xff] %v3544_v32 }
 0x14a   : > { %1529 = vst [vmem:[#allocation1 + $0x6] ss:$9 sm:$0xff] %v3547_v33 }
 0x14b   : > { %1531 = vst [vmem:[#allocation1 + $0x7] ss:$9 sm:$0xff] %v3550_v34 }
 0x152   : > { %v3707_v29 = vld [vmem:[#allocation1] sm:$0xff] }
 0x153   : > { %1535 = vst [vmem:[#allocation1] ss:$9 sm:$0xff] %v3558_v35 }
 0x154   : > { %1537 = vst [vmem:[#allocation1 + $0x1] ss:$9 sm:$0xff] %v3560_v36 }
 0x155   : > { %1539 = vst [vmem:[#allocation1 + $0x2] ss:$9 sm:$0xff] %v3562_v37 }
 0x156   : > { %1541 = vst [vmem:[#allocation1 + $0x3] ss:$9 sm:$0xff] %v3564_v39 }
 0x157   : > { %1543 = vst [vmem:[#allocation1 + $0x4] ss:$9 sm:$0xff] %v3567_v40 }
 0x158   : > { %1545 = vst [vmem:[#allocation1 + $0x5] ss:$9 sm:$0xff] %v3570_v41 }
 0x159   : > { %1547 = vst [vmem:[#allocation1 + $0x6] ss:$9 sm:$0xff] %v3573_v42 }
 0x15a   : > { %1549 = vst [vmem:[#allocation1 + $0x7] ss:$9 sm:$0xff] %v3576_v43 }
 0x161   : > { %v3717_v30 = vld [vmem:[#allocation1] sm:$0xff] }
 0x162   : > { %1588 = vst [vmem:[#allocation1] ss:$9 sm:$0xff] %v3583_v44 }
 0x163   : > { %1590 = vst [vmem:[#allocation1 + $0x1] ss:$9 sm:$0xff] %v3585_v45 }
 0x164   : > { %1592 = vst [vmem:[#allocation1 + $0x2] ss:$9 sm:$0xff] %v3587_v47 }
 0x165   : > { %1594 = vst [vmem:[#allocation1 + $0x3] ss:$9 sm:$0xff] %v3590_v48 }
 0x166   : > { %1596 = vst [vmem:[#allocation1 + $0x4] ss:$9 sm:$0xff] %v3593_v49 }
 0x167   : > { %1598 = vst [vmem:[#allocation1 + $0x5] ss:$9 sm:$0xff] %v3596_v50 }
 0x168   : > { %1600 = vst [vmem:[#allocation1 + $0x6] ss:$9 sm:$0xff] %v3600_v51 }
 0x169   : > { %1602 = vst [vmem:[#allocation1 + $0x7] ss:$9 sm:$0xff] %v3603_v53 }
 0x170   : > { %v3727_v38 = vld [vmem:[#allocation1] sm:$0xff] }
 0x171   : > { %4274 = vst [vmem:[#allocation8_spill] sm:$0xff] %v3727_v38 }
 0x172   : > { %1631 = vst [vmem:[#allocation1] ss:$9 sm:$0xff] %v3456_v52 }
 0x173   : > { %1633 = vst [vmem:[#allocation1 + $0x1] ss:$9 sm:$0xff] %v3458_v54 }
 0x174   : > { %1635 = vst [vmem:[#allocation1 + $0x2] ss:$9 sm:$0xff] %v3460_v56 }
 0x175   : > { %1637 = vst [vmem:[#allocation1 + $0x3] ss:$9 sm:$0xff] %v3462_v58 }
 0x176   : > { %1639 = vst [vmem:[#allocation1 + $0x4] ss:$9 sm:$0xff] %v3464_v60  ;;  %v988_v46 = vpop.xlane.xlu0 %987 }
 0x177   : > { %1641 = vst [vmem:[#allocation1 + $0x5] ss:$9 sm:$0xff] %v3467_v61  ;;  %v989_v55 = vsub.f32 %v3653_v18, %v988_v46 }
 0x178   : > { %1643 = vst [vmem:[#allocation1 + $0x6] ss:$9 sm:$0xff] %v3470_v62 }
 0x179   : > { %1645 = vst [vmem:[#allocation1 + $0x7] ss:$9 sm:$0xff] %v3473_v63  ;;  %v990_v57 = vmul.f32 1.442695, %v989_v55 }
 0x17b   : > { %3208 = vpow2.f32 %v990_v57 }
 0x180   : > { %v1646_v59 = vld [vmem:[#allocation1] sm:$0xff] }
 0x181   : > { %1649 = vst [vmem:[#allocation1] ss:$9 sm:$0xff] %v3481_v0  ;;  %1647 = vrot.lane.b32.xlu1 %v1646_v59, %s3314_s9  ;;  %v3740_v19 = vpop.eup %3208 }
 0x182   : > { %1651 = vst [vmem:[#allocation1 + $0x1] ss:$9 sm:$0xff] %v3483_v1  ;;  %v992_v23 = vsel %vm985_vm1, %v3740_v19, 0.0 }
 0x183   : > { %1653 = vst [vmem:[#allocation1 + $0x2] ss:$9 sm:$0xff] %v3485_v2  ;;  %993 = vadd.xlane.f32.xlu0 %v992_v23 }
 0x184   : > { %1655 = vst [vmem:[#allocation1 + $0x3] ss:$9 sm:$0xff] %v3487_v4 }
 0x185   : > { %1657 = vst [vmem:[#allocation1 + $0x4] ss:$9 sm:$0xff] %v3490_v5 }
 0x186   : > { %1659 = vst [vmem:[#allocation1 + $0x5] ss:$9 sm:$0xff] %v3493_v6 }
 0x187   : > { %1661 = vst [vmem:[#allocation1 + $0x6] ss:$9 sm:$0xff] %v3496_v7 }
 0x188   : > { %1663 = vst [vmem:[#allocation1 + $0x7] ss:$9 sm:$0xff] %v3499_v8 }
 0x18f   : > { %v1664_v18 = vld [vmem:[#allocation1] sm:$0xff] }
 0x190   : > { %1702 = vst [vmem:[#allocation1] ss:$9 sm:$0xff] %v3506_v9 }
 0x191   : > { %1704 = vst [vmem:[#allocation1 + $0x1] ss:$9 sm:$0xff] %v3508_v10 }
 0x192   : > { %1706 = vst [vmem:[#allocation1 + $0x2] ss:$9 sm:$0xff] %v3510_v12 }
 0x193   : > { %1708 = vst [vmem:[#allocation1 + $0x3] ss:$9 sm:$0xff] %v3513_v13 }
 0x194   : > { %1710 = vst [vmem:[#allocation1 + $0x4] ss:$9 sm:$0xff] %v3516_v14 }
 0x195   : > { %1712 = vst [vmem:[#allocation1 + $0x5] ss:$9 sm:$0xff] %v3519_v15 }
 0x196   : > { %1714 = vst [vmem:[#allocation1 + $0x6] ss:$9 sm:$0xff] %v3523_v16 }
 0x197   : > { %1716 = vst [vmem:[#allocation1 + $0x7] ss:$9 sm:$0xff] %v3526_v17  ;;  %1665 = vrot.lane.b32.xlu0 %v1664_v18, %s3314_s9 }
 0x19e   : > { %v3760_v25 = vld [vmem:[#allocation1] sm:$0xff] }
 0x19f   : > { %4275 = vst [vmem:[#allocation9_spill] sm:$0xff] %v3760_v25 }
 0x1a0   : > { %1744 = vst [vmem:[#allocation1] ss:$9 sm:$0xff] %v3533_v22 }
 0x1a1   : > { %1746 = vst [vmem:[#allocation1 + $0x1] ss:$9 sm:$0xff] %v3535_v24 }
 0x1a2   : > { %1748 = vst [vmem:[#allocation1 + $0x2] ss:$9 sm:$0xff] %v3537_v26 }
 0x1a3   : > { %1750 = vst [vmem:[#allocation1 + $0x3] ss:$9 sm:$0xff] %v3539_v28 }
 0x1a4   : > { %1752 = vst [vmem:[#allocation1 + $0x4] ss:$9 sm:$0xff] %v3541_v31 }
 0x1a5   : > { %1754 = vst [vmem:[#allocation1 + $0x5] ss:$9 sm:$0xff] %v3544_v32 }
 0x1a6   : > { %1756 = vst [vmem:[#allocation1 + $0x6] ss:$9 sm:$0xff] %v3547_v33 }
 0x1a7   : > { %1758 = vst [vmem:[#allocation1 + $0x7] ss:$9 sm:$0xff] %v3550_v34 }
 0x1ae   : > { %v3770_v46 = vld [vmem:[#allocation1] sm:$0xff] }
 0x1af   : > { %1762 = vst [vmem:[#allocation1] ss:$9 sm:$0xff] %v3558_v35 }
 0x1b0   : > { %1764 = vst [vmem:[#allocation1 + $0x1] ss:$9 sm:$0xff] %v3560_v36 }
 0x1b1   : > { %1766 = vst [vmem:[#allocation1 + $0x2] ss:$9 sm:$0xff] %v3562_v37 }
 0x1b2   : > { %1768 = vst [vmem:[#allocation1 + $0x3] ss:$9 sm:$0xff] %v3564_v39 }
 0x1b3   : > { %1770 = vst [vmem:[#allocation1 + $0x4] ss:$9 sm:$0xff] %v3567_v40 }
 0x1b4   : > { %1772 = vst [vmem:[#allocation1 + $0x5] ss:$9 sm:$0xff] %v3570_v41 }
 0x1b5   : > { %1774 = vst [vmem:[#allocation1 + $0x6] ss:$9 sm:$0xff] %v3573_v42 }
 0x1b6   : > { %1776 = vst [vmem:[#allocation1 + $0x7] ss:$9 sm:$0xff] %v3576_v43 }
 0x1bd   : > { %v3780_v55 = vld [vmem:[#allocation1] sm:$0xff] }
 0x1be   : > { %1815 = vst [vmem:[#allocation1] ss:$9 sm:$0xff] %v3583_v44 }
 0x1bf   : > { %1817 = vst [vmem:[#allocation1 + $0x1] ss:$9 sm:$0xff] %v3585_v45 }
 0x1c0   : > { %1819 = vst [vmem:[#allocation1 + $0x2] ss:$9 sm:$0xff] %v3587_v47 }
 0x1c1   : > { %1821 = vst [vmem:[#allocation1 + $0x3] ss:$9 sm:$0xff] %v3590_v48 }
 0x1c2   : > { %1823 = vst [vmem:[#allocation1 + $0x4] ss:$9 sm:$0xff] %v3593_v49 }
 0x1c3   : > { %1825 = vst [vmem:[#allocation1 + $0x5] ss:$9 sm:$0xff] %v3596_v50 }
 0x1c4   : > { %1827 = vst [vmem:[#allocation1 + $0x6] ss:$9 sm:$0xff] %v3600_v51 }
 0x1c5   : > { %1829 = vst [vmem:[#allocation1 + $0x7] ss:$9 sm:$0xff] %v3603_v53 }
 0x1cc   : > { %v3790_v57 = vld [vmem:[#allocation1] sm:$0xff] }
 0x1cd   : > { %4276 = vst [vmem:[#allocation10_spill] sm:$0xff] %v3790_v57 }
 0x1ce   : > { %1858 = vst [vmem:[#allocation1] ss:$9 sm:$0xff] %v3456_v52 }
 0x1cf   : > { %1860 = vst [vmem:[#allocation1 + $0x1] ss:$9 sm:$0xff] %v3458_v54 }
 0x1d0   : > { %1862 = vst [vmem:[#allocation1 + $0x2] ss:$9 sm:$0xff] %v3460_v56 }
 0x1d1   : > { %1864 = vst [vmem:[#allocation1 + $0x3] ss:$9 sm:$0xff] %v3462_v58 }
 0x1d2   : > { %1866 = vst [vmem:[#allocation1 + $0x4] ss:$9 sm:$0xff] %v3464_v60 }
 0x1d3   : > { %1868 = vst [vmem:[#allocation1 + $0x5] ss:$9 sm:$0xff] %v3467_v61 }
 0x1d4   : > { %1870 = vst [vmem:[#allocation1 + $0x6] ss:$9 sm:$0xff] %v3470_v62 }
 0x1d5   : > { %1872 = vst [vmem:[#allocation1 + $0x7] ss:$9 sm:$0xff] %v3473_v63 }
 0x1dc   : > { %v1873_v59 = vld [vmem:[#allocation1] sm:$0xff] }
 0x1dd   : > { %1874 = vrot.lane.b32.xlu1 %v1873_v59, %s3315_s11  ;;  %1876 = vst [vmem:[#allocation1] ss:$9 sm:$0xff] %v3481_v0 }
 0x1de   : > { %1878 = vst [vmem:[#allocation1 + $0x1] ss:$9 sm:$0xff] %v3483_v1 }
 0x1df   : > { %1880 = vst [vmem:[#allocation1 + $0x2] ss:$9 sm:$0xff] %v3485_v2 }
 0x1e0   : > { %1882 = vst [vmem:[#allocation1 + $0x3] ss:$9 sm:$0xff] %v3487_v4 }
 0x1e1   : > { %1884 = vst [vmem:[#allocation1 + $0x4] ss:$9 sm:$0xff] %v3490_v5 }
 0x1e2   : > { %1886 = vst [vmem:[#allocation1 + $0x5] ss:$9 sm:$0xff] %v3493_v6 }
 0x1e3   : > { %1888 = vst [vmem:[#allocation1 + $0x6] ss:$9 sm:$0xff] %v3496_v7 }
 0x1e4   : > { %1890 = vst [vmem:[#allocation1 + $0x7] ss:$9 sm:$0xff] %v3499_v8 }
 0x1eb   : > { %v1891_v23 = vld [vmem:[#allocation1] sm:$0xff] }
 0x1ec   : > { %1892 = vrot.lane.b32.xlu2 %v1891_v23, %s3315_s11  ;;  %1929 = vst [vmem:[#allocation1] ss:$9 sm:$0xff] %v3506_v9 }
 0x1ed   : > { %1931 = vst [vmem:[#allocation1 + $0x1] ss:$9 sm:$0xff] %v3508_v10 }
 0x1ee   : > { %1933 = vst [vmem:[#allocation1 + $0x2] ss:$9 sm:$0xff] %v3510_v12 }
 0x1ef   : > { %1935 = vst [vmem:[#allocation1 + $0x3] ss:$9 sm:$0xff] %v3513_v13 }
 0x1f0   : > { %1937 = vst [vmem:[#allocation1 + $0x4] ss:$9 sm:$0xff] %v3516_v14 }
 0x1f1   : > { %1939 = vst [vmem:[#allocation1 + $0x5] ss:$9 sm:$0xff] %v3519_v15 }
 0x1f2   : > { %1941 = vst [vmem:[#allocation1 + $0x6] ss:$9 sm:$0xff] %v3523_v16 }
 0x1f3   : > { %1943 = vst [vmem:[#allocation1 + $0x7] ss:$9 sm:$0xff] %v3526_v17 }
 0x1fa   : > { %v3818_v18 = vld [vmem:[#allocation1] sm:$0xff] }
 0x1fb   : > { %4277 = vst [vmem:[#allocation11_spill] sm:$0xff] %v3818_v18 }
 0x1fc   : > { %1971 = vst [vmem:[#allocation1] ss:$9 sm:$0xff] %v3533_v22 }
 0x1fd   : > { %1973 = vst [vmem:[#allocation1 + $0x1] ss:$9 sm:$0xff] %v3535_v24 }
 0x1fe   : > { %1975 = vst [vmem:[#allocation1 + $0x2] ss:$9 sm:$0xff] %v3537_v26 }
 0x1ff   : > { %1977 = vst [vmem:[#allocation1 + $0x3] ss:$9 sm:$0xff] %v3539_v28 }
 0x200   : > { %1979 = vst [vmem:[#allocation1 + $0x4] ss:$9 sm:$0xff] %v3541_v31 }
 0x201   : > { %1981 = vst [vmem:[#allocation1 + $0x5] ss:$9 sm:$0xff] %v3544_v32 }
 0x202   : > { %1983 = vst [vmem:[#allocation1 + $0x6] ss:$9 sm:$0xff] %v3547_v33 }
 0x203   : > { %1985 = vst [vmem:[#allocation1 + $0x7] ss:$9 sm:$0xff] %v3550_v34 }
 0x20a   : > { %v3828_v59 = vld [vmem:[#allocation1] sm:$0xff] }
 0x20b   : > { %1989 = vst [vmem:[#allocation1] ss:$9 sm:$0xff] %v3558_v35 }
 0x20c   : > { %1991 = vst [vmem:[#allocation1 + $0x1] ss:$9 sm:$0xff] %v3560_v36 }
 0x20d   : > { %1993 = vst [vmem:[#allocation1 + $0x2] ss:$9 sm:$0xff] %v3562_v37 }
 0x20e   : > { %1995 = vst [vmem:[#allocation1 + $0x3] ss:$9 sm:$0xff] %v3564_v39 }
 0x20f   : > { %1997 = vst [vmem:[#allocation1 + $0x4] ss:$9 sm:$0xff] %v3567_v40 }
 0x210   : > { %1999 = vst [vmem:[#allocation1 + $0x5] ss:$9 sm:$0xff] %v3570_v41 }
 0x211   : > { %2001 = vst [vmem:[#allocation1 + $0x6] ss:$9 sm:$0xff] %v3573_v42 }
 0x212   : > { %2003 = vst [vmem:[#allocation1 + $0x7] ss:$9 sm:$0xff] %v3576_v43 }
 0x219   : > { %v3838_v23 = vld [vmem:[#allocation1] sm:$0xff] }
 0x21a   : > { %2042 = vst [vmem:[#allocation1] ss:$9 sm:$0xff] %v3583_v44 }
 0x21b   : > { %2044 = vst [vmem:[#allocation1 + $0x1] ss:$9 sm:$0xff] %v3585_v45 }
 0x21c   : > { %2046 = vst [vmem:[#allocation1 + $0x2] ss:$9 sm:$0xff] %v3587_v47 }
 0x21d   : > { %2048 = vst [vmem:[#allocation1 + $0x3] ss:$9 sm:$0xff] %v3590_v48 }
 0x21e   : > { %2050 = vst [vmem:[#allocation1 + $0x4] ss:$9 sm:$0xff] %v3593_v49 }
 0x21f   : > { %2052 = vst [vmem:[#allocation1 + $0x5] ss:$9 sm:$0xff] %v3596_v50 }
 0x220   : > { %2054 = vst [vmem:[#allocation1 + $0x6] ss:$9 sm:$0xff] %v3600_v51 }
 0x221   : > { %2056 = vst [vmem:[#allocation1 + $0x7] ss:$9 sm:$0xff] %v3603_v53 }
 0x228   : > { %v3848_v25 = vld [vmem:[#allocation1] sm:$0xff] }
 0x229   : > { %4278 = vst [vmem:[#allocation12_spill] sm:$0xff] %v3848_v25 }
 0x22a   : > { %2085 = vst [vmem:[#allocation1] ss:$9 sm:$0xff] %v3456_v52 }
 0x22b   : > { %2087 = vst [vmem:[#allocation1 + $0x1] ss:$9 sm:$0xff] %v3458_v54 }
 0x22c   : > { %2089 = vst [vmem:[#allocation1 + $0x2] ss:$9 sm:$0xff] %v3460_v56 }
 0x22d   : > { %2091 = vst [vmem:[#allocation1 + $0x3] ss:$9 sm:$0xff] %v3462_v58 }
 0x22e   : > { %2093 = vst [vmem:[#allocation1 + $0x4] ss:$9 sm:$0xff] %v3464_v60 }
 0x22f   : > { %2095 = vst [vmem:[#allocation1 + $0x5] ss:$9 sm:$0xff] %v3467_v61 }
 0x230   : > { %2097 = vst [vmem:[#allocation1 + $0x6] ss:$9 sm:$0xff] %v3470_v62 }
 0x231   : > { %2099 = vst [vmem:[#allocation1 + $0x7] ss:$9 sm:$0xff] %v3473_v63 }
 0x238   : > { %v2100_v57 = vld [vmem:[#allocation1] sm:$0xff] }
 0x239   : > { %2101 = vrot.lane.b32.xlu1 %v2100_v57, %s3316_s12  ;;  %2103 = vst [vmem:[#allocation1] ss:$9 sm:$0xff] %v3481_v0 }
 0x23a   : > { %2105 = vst [vmem:[#allocation1 + $0x1] ss:$9 sm:$0xff] %v3483_v1 }
 0x23b   : > { %2107 = vst [vmem:[#allocation1 + $0x2] ss:$9 sm:$0xff] %v3485_v2 }
 0x23c   : > { %2109 = vst [vmem:[#allocation1 + $0x3] ss:$9 sm:$0xff] %v3487_v4 }
 0x23d   : > { %2111 = vst [vmem:[#allocation1 + $0x4] ss:$9 sm:$0xff] %v3490_v5 }
 0x23e   : > { %2113 = vst [vmem:[#allocation1 + $0x5] ss:$9 sm:$0xff] %v3493_v6 }
 0x23f   : > { %2115 = vst [vmem:[#allocation1 + $0x6] ss:$9 sm:$0xff] %v3496_v7 }
 0x240   : > { %2117 = vst [vmem:[#allocation1 + $0x7] ss:$9 sm:$0xff] %v3499_v8 }
 0x247   : > { %v2118_v18 = vld [vmem:[#allocation1] sm:$0xff] }
 0x248   : > { %2119 = vrot.lane.b32.xlu2 %v2118_v18, %s3316_s12  ;;  %2156 = vst [vmem:[#allocation1] ss:$9 sm:$0xff] %v3506_v9 }
 0x249   : > { %2158 = vst [vmem:[#allocation1 + $0x1] ss:$9 sm:$0xff] %v3508_v10 }
 0x24a   : > { %2160 = vst [vmem:[#allocation1 + $0x2] ss:$9 sm:$0xff] %v3510_v12 }
 0x24b   : > { %2162 = vst [vmem:[#allocation1 + $0x3] ss:$9 sm:$0xff] %v3513_v13 }
 0x24c   : > { %2164 = vst [vmem:[#allocation1 + $0x4] ss:$9 sm:$0xff] %v3516_v14 }
 0x24d   : > { %2166 = vst [vmem:[#allocation1 + $0x5] ss:$9 sm:$0xff] %v3519_v15 }
 0x24e   : > { %2168 = vst [vmem:[#allocation1 + $0x6] ss:$9 sm:$0xff] %v3523_v16 }
 0x24f   : > { %2170 = vst [vmem:[#allocation1 + $0x7] ss:$9 sm:$0xff] %v3526_v17 }
 0x256   : > { %v3876_v57 = vld [vmem:[#allocation1] sm:$0xff] }
 0x257   : > { %4279 = vst [vmem:[#allocation13_spill] sm:$0xff] %v3876_v57 }
 0x258   : > { %2198 = vst [vmem:[#allocation1] ss:$9 sm:$0xff] %v3533_v22 }
 0x259   : > { %2200 = vst [vmem:[#allocation1 + $0x1] ss:$9 sm:$0xff] %v3535_v24 }
 0x25a   : > { %2202 = vst [vmem:[#allocation1 + $0x2] ss:$9 sm:$0xff] %v3537_v26 }
 0x25b   : > { %2204 = vst [vmem:[#allocation1 + $0x3] ss:$9 sm:$0xff] %v3539_v28 }
 0x25c   : > { %2206 = vst [vmem:[#allocation1 + $0x4] ss:$9 sm:$0xff] %v3541_v31 }
 0x25d   : > { %2208 = vst [vmem:[#allocation1 + $0x5] ss:$9 sm:$0xff] %v3544_v32 }
 0x25e   : > { %2210 = vst [vmem:[#allocation1 + $0x6] ss:$9 sm:$0xff] %v3547_v33 }
 0x25f   : > { %2212 = vst [vmem:[#allocation1 + $0x7] ss:$9 sm:$0xff] %v3550_v34 }
 0x266   : > { %v2213_v18 = vld [vmem:[#allocation1] sm:$0xff] }
 0x267   : > { %2216 = vst [vmem:[#allocation1] ss:$9 sm:$0xff] %v3558_v35 }
 0x268   : > { %2218 = vst [vmem:[#allocation1 + $0x1] ss:$9 sm:$0xff] %v3560_v36 }
 0x269   : > { %2220 = vst [vmem:[#allocation1 + $0x2] ss:$9 sm:$0xff] %v3562_v37 }
 0x26a   : > { %2222 = vst [vmem:[#allocation1 + $0x3] ss:$9 sm:$0xff] %v3564_v39 }
 0x26b   : > { %2224 = vst [vmem:[#allocation1 + $0x4] ss:$9 sm:$0xff] %v3567_v40 }
 0x26c   : > { %2226 = vst [vmem:[#allocation1 + $0x5] ss:$9 sm:$0xff] %v3570_v41 }
 0x26d   : > { %2228 = vst [vmem:[#allocation1 + $0x6] ss:$9 sm:$0xff] %v3573_v42 }
 0x26e   : > { %2230 = vst [vmem:[#allocation1 + $0x7] ss:$9 sm:$0xff] %v3576_v43 }
 0x275   : > { %v3894_v57 = vld [vmem:[#allocation1] sm:$0xff] }
 0x276   : > { %2269 = vst [vmem:[#allocation1] ss:$9 sm:$0xff] %v3583_v44 }
 0x277   : > { %2271 = vst [vmem:[#allocation1 + $0x1] ss:$9 sm:$0xff] %v3585_v45 }
 0x278   : > { %2273 = vst [vmem:[#allocation1 + $0x2] ss:$9 sm:$0xff] %v3587_v47 }
 0x279   : > { %2275 = vst [vmem:[#allocation1 + $0x3] ss:$9 sm:$0xff] %v3590_v48 }
 0x27a   : > { %2277 = vst [vmem:[#allocation1 + $0x4] ss:$9 sm:$0xff] %v3593_v49 }
 0x27b   : > { %2279 = vst [vmem:[#allocation1 + $0x5] ss:$9 sm:$0xff] %v3596_v50 }
 0x27c   : > { %2281 = vst [vmem:[#allocation1 + $0x6] ss:$9 sm:$0xff] %v3600_v51 }
 0x27d   : > { %2283 = vst [vmem:[#allocation1 + $0x7] ss:$9 sm:$0xff] %v3603_v53 }
 0x284   : > { %v3904_v25 = vld [vmem:[#allocation1] sm:$0xff] }
 0x285   : > { %2312 = vst [vmem:[#allocation1] ss:$9 sm:$0xff] %v3456_v52 }
 0x286   : > { %2314 = vst [vmem:[#allocation1 + $0x1] ss:$9 sm:$0xff] %v3458_v54 }
 0x287   : > { %2316 = vst [vmem:[#allocation1 + $0x2] ss:$9 sm:$0xff] %v3460_v56 }
 0x288   : > { %2318 = vst [vmem:[#allocation1 + $0x3] ss:$9 sm:$0xff] %v3462_v58 }
 0x289   : > { %2320 = vst [vmem:[#allocation1 + $0x4] ss:$9 sm:$0xff] %v3464_v60 }
 0x28a   : > { %2322 = vst [vmem:[#allocation1 + $0x5] ss:$9 sm:$0xff] %v3467_v61 }
 0x28b   : > { %2324 = vst [vmem:[#allocation1 + $0x6] ss:$9 sm:$0xff] %v3470_v62 }
 0x28c   : > { %2326 = vst [vmem:[#allocation1 + $0x7] ss:$9 sm:$0xff] %v3473_v63 }
 0x293   : > { %v2327_v38 = vld [vmem:[#allocation1] sm:$0xff] }
 0x294   : > { %2328 = vrot.lane.b32.xlu0 %v2327_v38, %s3317_s13  ;;  %2330 = vst [vmem:[#allocation1] ss:$9 sm:$0xff] %v3481_v0 }
 0x295   : > { %2332 = vst [vmem:[#allocation1 + $0x1] ss:$9 sm:$0xff] %v3483_v1 }
 0x296   : > { %2334 = vst [vmem:[#allocation1 + $0x2] ss:$9 sm:$0xff] %v3485_v2 }
 0x297   : > { %2336 = vst [vmem:[#allocation1 + $0x3] ss:$9 sm:$0xff] %v3487_v4 }
 0x298   : > { %2338 = vst [vmem:[#allocation1 + $0x4] ss:$9 sm:$0xff] %v3490_v5 }
 0x299   : > { %2340 = vst [vmem:[#allocation1 + $0x5] ss:$9 sm:$0xff] %v3493_v6 }
 0x29a   : > { %2342 = vst [vmem:[#allocation1 + $0x6] ss:$9 sm:$0xff] %v3496_v7 }
 0x29b   : > { %2344 = vst [vmem:[#allocation1 + $0x7] ss:$9 sm:$0xff] %v3499_v8 }
 0x29c   : > { %1324 = vrot.lane.b32.xlu0 %v3658_v20, %s3312_s23 }
 0x2a2   : > { %v2345_v38 = vld [vmem:[#allocation1] sm:$0xff] }
 0x2a3   : > { %2346 = vrot.lane.b32.xlu2 %v2345_v38, %s3317_s13  ;;  %2383 = vst [vmem:[#allocation1] ss:$9 sm:$0xff] %v3506_v9 }
 0x2a4   : > { %2385 = vst [vmem:[#allocation1 + $0x1] ss:$9 sm:$0xff] %v3508_v10  ;;  %1533 = vrot.lane.b32.xlu0 %v3707_v29, %s3313_s8 }
 0x2a5   : > { %2387 = vst [vmem:[#allocation1 + $0x2] ss:$9 sm:$0xff] %v3510_v12 }
 0x2a6   : > { %2389 = vst [vmem:[#allocation1 + $0x3] ss:$9 sm:$0xff] %v3513_v13 }
 0x2a7   : > { %2391 = vst [vmem:[#allocation1 + $0x4] ss:$9 sm:$0xff] %v3516_v14 }
 0x2a8   : > { %2393 = vst [vmem:[#allocation1 + $0x5] ss:$9 sm:$0xff] %v3519_v15 }
 0x2a9   : > { %2395 = vst [vmem:[#allocation1 + $0x6] ss:$9 sm:$0xff] %v3523_v16 }
 0x2aa   : > { %2397 = vst [vmem:[#allocation1 + $0x7] ss:$9 sm:$0xff] %v3526_v17 }
 0x2ac   : > { %2005 = vrot.lane.b32.xlu0 %v3838_v23, %s3315_s11 }
 0x2b1   : > { %v3938_v20 = vld [vmem:[#allocation1] sm:$0xff] }
 0x2b2   : > { %2425 = vst [vmem:[#allocation1] ss:$9 sm:$0xff] %v3533_v22 }
 0x2b3   : > { %2427 = vst [vmem:[#allocation1 + $0x1] ss:$9 sm:$0xff] %v3535_v24 }
 0x2b4   : > { %2429 = vst [vmem:[#allocation1 + $0x2] ss:$9 sm:$0xff] %v3537_v26  ;;  %2214 = vrot.lane.b32.xlu0 %v2213_v18, %s3316_s12 }
 0x2b5   : > { %2431 = vst [vmem:[#allocation1 + $0x3] ss:$9 sm:$0xff] %v3539_v28 }
 0x2b6   : > { %2433 = vst [vmem:[#allocation1 + $0x4] ss:$9 sm:$0xff] %v3541_v31 }
 0x2b7   : > { %2435 = vst [vmem:[#allocation1 + $0x5] ss:$9 sm:$0xff] %v3544_v32 }
 0x2b8   : > { %2437 = vst [vmem:[#allocation1 + $0x6] ss:$9 sm:$0xff] %v3547_v33 }
 0x2b9   : > { %2439 = vst [vmem:[#allocation1 + $0x7] ss:$9 sm:$0xff] %v3550_v34 }
 0x2c0   : > { %v3949_v29 = vld [vmem:[#allocation1] sm:$0xff] }
 0x2c1   : > { %2443 = vst [vmem:[#allocation1] ss:$9 sm:$0xff] %v3558_v35 }
 0x2c2   : > { %2445 = vst [vmem:[#allocation1 + $0x1] ss:$9 sm:$0xff] %v3560_v36 }
 0x2c3   : > { %2447 = vst [vmem:[#allocation1 + $0x2] ss:$9 sm:$0xff] %v3562_v37 }
 0x2c4   : > { %2449 = vst [vmem:[#allocation1 + $0x3] ss:$9 sm:$0xff] %v3564_v39 }
 0x2c5   : > { %2451 = vst [vmem:[#allocation1 + $0x4] ss:$9 sm:$0xff] %v3567_v40 }
 0x2c6   : > { %2453 = vst [vmem:[#allocation1 + $0x5] ss:$9 sm:$0xff] %v3570_v41 }
 0x2c7   : > { %2455 = vst [vmem:[#allocation1 + $0x6] ss:$9 sm:$0xff] %v3573_v42 }
 0x2c8   : > { %2457 = vst [vmem:[#allocation1 + $0x7] ss:$9 sm:$0xff] %v3576_v43 }
 0x2cf   : > { %v3959_v23 = vld [vmem:[#allocation1] sm:$0xff] }
 0x2d0   : > { %2496 = vst [vmem:[#allocation1] ss:$9 sm:$0xff] %v3583_v44 }
 0x2d1   : > { %2498 = vst [vmem:[#allocation1 + $0x1] ss:$9 sm:$0xff] %v3585_v45 }
 0x2d2   : > { %2500 = vst [vmem:[#allocation1 + $0x2] ss:$9 sm:$0xff] %v3587_v47 }
 0x2d3   : > { %2502 = vst [vmem:[#allocation1 + $0x3] ss:$9 sm:$0xff] %v3590_v48 }
 0x2d4   : > { %2504 = vst [vmem:[#allocation1 + $0x4] ss:$9 sm:$0xff] %v3593_v49 }
 0x2d5   : > { %2506 = vst [vmem:[#allocation1 + $0x5] ss:$9 sm:$0xff] %v3596_v50 }
 0x2d6   : > { %2508 = vst [vmem:[#allocation1 + $0x6] ss:$9 sm:$0xff] %v3600_v51 }
 0x2d7   : > { %2510 = vst [vmem:[#allocation1 + $0x7] ss:$9 sm:$0xff] %v3603_v53 }
 0x2de   : > { %v3969_v18 = vld [vmem:[#allocation1] sm:$0xff] }
 0x2df   : > { %2539 = vst [vmem:[#allocation1] ss:$9 sm:$0xff] %v3456_v52  ;;  %v994_v52 = vpop.xlane.xlu0 %993 }
 0x2e0   : > { %2541 = vst [vmem:[#allocation1 + $0x1] ss:$9 sm:$0xff] %v3458_v54  ;;  %v1212_v54 = vpop.permute.xlu1 %1211  ;;  %3210 = vrcp.f32 %v994_v52 }
 0x2e1   : > { %2543 = vst [vmem:[#allocation1 + $0x2] ss:$9 sm:$0xff] %v3460_v56  ;;  %3075 = vmatpush.xpose.msk.msrb.mxu1 %vm960_vm0, %v1212_v54 }
 0x2e2   : > { %2545 = vst [vmem:[#allocation1 + $0x3] ss:$9 sm:$0xff] %v3462_v58 }
 0x2e3   : > { %2547 = vst [vmem:[#allocation1 + $0x4] ss:$9 sm:$0xff] %v3464_v60  ;;  %v1439_v60 = vpop.permute.xlu2 %1438 }
 0x2e4   : > { %2549 = vst [vmem:[#allocation1 + $0x5] ss:$9 sm:$0xff] %v3467_v61 }
 0x2e5   : > { %2551 = vst [vmem:[#allocation1 + $0x6] ss:$9 sm:$0xff] %v3470_v62 }
 0x2e6   : > { %2553 = vst [vmem:[#allocation1 + $0x7] ss:$9 sm:$0xff] %v3473_v63  ;;  %v3211_v56 = vpop.eup %3210 }
 0x2e7   : > { %v996_v58 = vmul.f32 %v3211_v56, %v3740_v19 }
 0x2e8   : > { %v1194_v62 = vpop.permute.xlu1 %1193 }
 0x2e9   : > { %3071 = vmatmul.msk.f32.vlgmr.msra.gmra.mxu1 %vm985_vm1, %v996_v58 }
 0x2ea   : > { %3081 = vmatpush.xpose.msk.msra.mxu1 %vm960_vm0, %v1439_v60 }
 0x2eb   : > { %v1421_v63 = vpop.permute.xlu2 %1420 }
 0x2ed   : > { %v2554_v38 = vld [vmem:[#allocation1] sm:$0xff] }
 0x2ee   : > { %2555 = vrot.lane.b32.xlu2 %v2554_v38, %s3318_s14  ;;  %2557 = vst [vmem:[#allocation1] ss:$9 sm:$0xff] %v3481_v0  ;;  %v1666_v0 = vpop.permute.xlu0 %1665 }
 0x2ef   : > { %2559 = vst [vmem:[#allocation1 + $0x1] ss:$9 sm:$0xff] %v3483_v1 }
 0x2f0   : > { %2561 = vst [vmem:[#allocation1 + $0x2] ss:$9 sm:$0xff] %v3485_v2  ;;  %v1648_v1 = vpop.permute.xlu1 %1647 }
 0x2f1   : > { %2563 = vst [vmem:[#allocation1 + $0x3] ss:$9 sm:$0xff] %v3487_v4  ;;  %3076 = vmatmul.msk.f32.vlgmr.msrb.gmra.mxu1 %vm960_vm0, %v1194_v62 }
 0x2f2   : > { %2565 = vst [vmem:[#allocation1 + $0x4] ss:$9 sm:$0xff] %v3490_v5  ;;  %3087 = vmatpush.xpose.msk.msrb.mxu1 %vm960_vm0, %v1666_v0 }
 0x2f3   : > { %2567 = vst [vmem:[#allocation1 + $0x5] ss:$9 sm:$0xff] %v3493_v6  ;;  %v1893_v2 = vpop.permute.xlu2 %1892 }
 0x2f4   : > { %2569 = vst [vmem:[#allocation1 + $0x6] ss:$9 sm:$0xff] %v3496_v7 }
 0x2f5   : > { %2571 = vst [vmem:[#allocation1 + $0x7] ss:$9 sm:$0xff] %v3499_v8  ;;  %v1114_v8 = vpop.f32.mrf.mxu2 }
 0x2f6   : > { %1551 = vrot.lane.b32.xlu2 %v3717_v30, %s3313_s8 }
 0x2f8   : > { %v1875_v4 = vpop.permute.xlu1 %1874 }
 0x2f9   : > { %3082 = vmatmul.msk.f32.vlgmr.msra.gmra.mxu1 %vm960_vm0, %v1421_v63 }
 0x2fa   : > { %3093 = vmatpush.xpose.msk.msra.mxu1 %vm960_vm0, %v1893_v2 }
 0x2fb   : > { %v2120_v5 = vpop.permute.xlu2 %2119 }
 0x2fc   : > { %v2572_v61 = vld [vmem:[#allocation1] sm:$0xff] }
 0x2fd   : > { %2573 = vrot.lane.b32.xlu1 %v2572_v61, %s3318_s14  ;;  %2610 = vst [vmem:[#allocation1] ss:$9 sm:$0xff] %v3506_v9 }
 0x2fe   : > { %2612 = vst [vmem:[#allocation1 + $0x1] ss:$9 sm:$0xff] %v3508_v10  ;;  %1760 = vrot.lane.b32.xlu2 %v3770_v46, %s3314_s9  ;;  %v4026_v10 = vmul.f32 %v1114_v8, %v996_v58 }
 0x2ff   : > { %2614 = vst [vmem:[#allocation1 + $0x2] ss:$9 sm:$0xff] %v3510_v12 }
 0x300   : > { %2616 = vst [vmem:[#allocation1 + $0x3] ss:$9 sm:$0xff] %v3513_v13  ;;  %v2102_v6 = vpop.permute.xlu1 %2101  ;;  %v1118_v12 = vsel %vm985_vm1, %v4026_v10, -inf }
 0x301   : > { %2618 = vst [vmem:[#allocation1 + $0x4] ss:$9 sm:$0xff] %v3516_v14  ;;  %3088 = vmatmul.msk.f32.vlgmr.msrb.gmra.mxu1 %vm960_vm0, %v1648_v1 }
 0x302   : > { %2620 = vst [vmem:[#allocation1 + $0x5] ss:$9 sm:$0xff] %v3519_v15  ;;  %3099 = vmatpush.xpose.msk.msrb.mxu1 %vm960_vm0, %v2120_v5 }
 0x303   : > { %2622 = vst [vmem:[#allocation1 + $0x6] ss:$9 sm:$0xff] %v3523_v16  ;;  %v2347_v7 = vpop.permute.xlu2 %2346 }
 0x304   : > { %2624 = vst [vmem:[#allocation1 + $0x7] ss:$9 sm:$0xff] %v3526_v17 }
 0x305   : > { %1306 = vrot.lane.b32.xlu1 %v3643_v11, %s3312_s23 }
 0x306   : > { %2232 = vrot.lane.b32.xlu2 %v3894_v57, %s3316_s12  ;;  %v2329_v9 = vpop.permute.xlu0 %2328  ;;  %v3173_v57 = vpack.i.bf16 %v3669_v21, %v3633_v3 }
 0x309   : > { %3094 = vmatmul.msk.f32.vlgmr.msra.gmra.mxu1 %vm960_vm0, %v1875_v4 }
 0x30a   : > { %3105 = vmatpush.xpose.msk.msra.mxu1 %vm960_vm0, %v2347_v7 }
 0x30b   : > { %v4031_v15 = vld [vmem:[#allocation1] sm:$0xff] }
 0x30c   : > { %2652 = vst [vmem:[#allocation1] ss:$9 sm:$0xff] %v3533_v22 }
 0x30d   : > { %1778 = vrot.lane.b32.xlu1 %v3780_v55, %s3314_s9  ;;  %2654 = vst [vmem:[#allocation1 + $0x1] ss:$9 sm:$0xff] %v3535_v24 }
 0x30e   : > { %2441 = vrot.lane.b32.xlu2 %v3949_v29, %s3317_s13  ;;  %v1325_v14 = vpop.permute.xlu0 %1324  ;;  %2656 = vst [vmem:[#allocation1 + $0x2] ss:$9 sm:$0xff] %v3537_v26 }
 0x30f   : > { %3078 = vmatpush.xpose.msk.msrb.mxu0 %vm960_vm0, %v1325_v14  ;;  %2658 = vst [vmem:[#allocation1 + $0x3] ss:$9 sm:$0xff] %v3539_v28 }
 0x310   : > { %2660 = vst [vmem:[#allocation1 + $0x4] ss:$9 sm:$0xff] %v3541_v31 }
 0x311   : > { %3100 = vmatmul.msk.f32.vlgmr.msrb.gmra.mxu1 %vm960_vm0, %v2102_v6  ;;  %2662 = vst [vmem:[#allocation1 + $0x5] ss:$9 sm:$0xff] %v3544_v32 }
 0x312   : > { %2664 = vst [vmem:[#allocation1 + $0x6] ss:$9 sm:$0xff] %v3547_v33 }
 0x313   : > { %2666 = vst [vmem:[#allocation1 + $0x7] ss:$9 sm:$0xff] %v3550_v34 }
 0x315   : > { %1987 = vrot.lane.b32.xlu1 %v3828_v59, %s3315_s11 }
 0x316   : > { %v1534_v28 = vpop.permute.xlu0 %1533 }
 0x319   : > { %3106 = vmatmul.msk.f32.vlgmr.msra.gmra.mxu1 %vm960_vm0, %v2329_v9 }
 0x31a   : > { %v2667_v17 = vld [vmem:[#allocation1] sm:$0xff] }
 0x31b   : > { %2670 = vst [vmem:[#allocation1] ss:$9 sm:$0xff] %v3558_v35 }
 0x31c   : > { %2672 = vst [vmem:[#allocation1 + $0x1] ss:$9 sm:$0xff] %v3560_v36 }
 0x31d   : > { %2459 = vrot.lane.b32.xlu1 %v3959_v23, %s3317_s13  ;;  %2674 = vst [vmem:[#allocation1 + $0x2] ss:$9 sm:$0xff] %v3562_v37 }
 0x31e   : > { %2676 = vst [vmem:[#allocation1 + $0x3] ss:$9 sm:$0xff] %v3564_v39  ;;  %v2006_v33 = vpop.permute.xlu0 %2005 }
 0x31f   : > { %2678 = vst [vmem:[#allocation1 + $0x4] ss:$9 sm:$0xff] %v3567_v40 }
 0x320   : > { %2680 = vst [vmem:[#allocation1 + $0x5] ss:$9 sm:$0xff] %v3570_v41 }
 0x321   : > { %2682 = vst [vmem:[#allocation1 + $0x6] ss:$9 sm:$0xff] %v3573_v42 }
 0x322   : > { %2684 = vst [vmem:[#allocation1 + $0x7] ss:$9 sm:$0xff] %v3576_v43 }
 0x325   : > { %2668 = vrot.lane.b32.xlu1 %v2667_v17, %s3318_s14 }
 0x326   : > { %v2215_v40 = vpop.permute.xlu0 %2214 }
 0x329   : > { %v2685_v24 = vld [vmem:[#allocation1] sm:$0xff] }
 0x32a   : > { %2686 = vrot.lane.b32.xlu0 %v2685_v24, %s3318_s14  ;;  %2723 = vst [vmem:[#allocation1] ss:$9 sm:$0xff] %v3583_v44 }
 0x32b   : > { %2725 = vst [vmem:[#allocation1 + $0x1] ss:$9 sm:$0xff] %v3585_v45 }
 0x32c   : > { %2727 = vst [vmem:[#allocation1 + $0x2] ss:$9 sm:$0xff] %v3587_v47 }
 0x32d   : > { %2729 = vst [vmem:[#allocation1 + $0x3] ss:$9 sm:$0xff] %v3590_v48 }
 0x32e   : > { %2731 = vst [vmem:[#allocation1 + $0x4] ss:$9 sm:$0xff] %v3593_v49 }
 0x32f   : > { %2733 = vst [vmem:[#allocation1 + $0x5] ss:$9 sm:$0xff] %v3596_v50 }
 0x330   : > { %2735 = vst [vmem:[#allocation1 + $0x6] ss:$9 sm:$0xff] %v3600_v51 }
 0x331   : > { %2737 = vst [vmem:[#allocation1 + $0x7] ss:$9 sm:$0xff] %v3603_v53 }
 0x337   : > { %1119 = vmax.xlane.f32.xlu2 %v1118_v12 }
 0x348   : > { %v2556_v13 = vpop.permute.xlu2 %2555 }
 0x350   : > { %v1552_v16 = vpop.permute.xlu2 %1551 }
 0x351   : > { %3084 = vmatpush.xpose.msk.msra.mxu0 %vm960_vm0, %v1552_v16 }
 0x358   : > { %v1761_v31 = vpop.permute.xlu2 %1760 }
 0x360   : > { %v2233_v36 = vpop.permute.xlu2 %2232 }
 0x366   : > { %v4067_v34 = vpop.f32.mrf.mxu1 }
 0x368   : > { %v2442_v44 = vpop.permute.xlu2 %2441 }
 0x36e   : > { %v1234_v39 = vpop.f32.mrf.mxu1 }
 0x36f   : > { %v2574_v22 = vpop.permute.xlu1 %2573  ;;  %v1237_v43 = vsel %vm985_vm1, %v1234_v39, -inf }
 0x370   : > { %3111 = vmatpush.xpose.msk.msrb.mxu1 %vm960_vm0, %v2574_v22  ;;  %1238 = vmax.xlane.f32.xlu0 %v1237_v43 }
 0x373   : > { %3112 = vmatmul.msk.f32.vlgmr.msrb.gmra.mxu1 %vm960_vm0, %v2556_v13 }
 0x376   : > { %v1461_v41 = vpop.f32.mrf.mxu1 }
 0x377   : > { %v1307_v26 = vpop.permute.xlu1 %1306  ;;  %v1464_v42 = vsel %vm985_vm1, %v1461_v41, -inf }
 0x378   : > { %3079 = vmatmul.msk.f32.vlgmr.msrb.gmra.mxu0 %vm960_vm0, %v1307_v26  ;;  %1465 = vmax.xlane.f32.xlu1 %v1464_v42 }
 0x37e   : > { %v1688_v45 = vpop.f32.mrf.mxu1 }
 0x37f   : > { %v1779_v32 = vpop.permute.xlu1 %1778  ;;  %v1691_v47 = vsel %vm985_vm1, %v1688_v45, -inf }
 0x380   : > { %3085 = vmatmul.msk.f32.vlgmr.msra.gmra.mxu0 %vm960_vm0, %v1534_v28  ;;  %1692 = vmax.xlane.f32.xlu0 %v1691_v47 }
 0x381   : > { %3090 = vmatpush.xpose.msk.msrb.mxu0 %vm960_vm0, %v1779_v32 }
 0x385   : > { %3096 = vmatpush.xpose.msk.msra.mxu0 %vm960_vm0, %v2006_v33 }
 0x386   : > { %v1915_v48 = vpop.f32.mrf.mxu1 }
 0x387   : > { %v1988_v35 = vpop.permute.xlu1 %1987  ;;  %v1918_v49 = vsel %vm985_vm1, %v1915_v48, -inf }
 0x388   : > { %3091 = vmatmul.msk.f32.vlgmr.msrb.gmra.mxu0 %vm960_vm0, %v1761_v31  ;;  %1919 = vmax.xlane.f32.xlu0 %v1918_v49 }
 0x389   : > { %3102 = vmatpush.xpose.msk.msrb.mxu0 %vm960_vm0, %v2233_v36 }
 0x38e   : > { %v2142_v11 = vpop.f32.mrf.mxu1 }
 0x38f   : > { %v2460_v37 = vpop.permute.xlu1 %2459  ;;  %v2145_v59 = vsel %vm985_vm1, %v2142_v11, -inf }
 0x390   : > { %3097 = vmatmul.msk.f32.vlgmr.msra.gmra.mxu0 %vm960_vm0, %v1988_v35  ;;  %v4280_v35 = vld [vmem:[#allocation8_spill] sm:$0xff] }
 0x391   : > { %3108 = vmatpush.xpose.msk.msra.mxu0 %vm960_vm0, %v2460_v37  ;;  %3174 = vrot.lane.b32.xlu1 %v3173_v57, %s3312_s23  ;;  %v3178_v36 = vpack.i.bf16 %v4280_v35, %v3697_v27  ;;  %s840_s23 = scalar_lea.vmem %s4271_s6, %s3067_s20 }
 0x396   : > { %v2369_v46 = vpop.f32.mrf.mxu1 }
 0x397   : > { %v2372_v55 = vsel %vm985_vm1, %v2369_v46, -inf  ;;  %v2669_v23 = vpop.permute.xlu1 %2668 }
 0x398   : > { %3103 = vmatmul.msk.f32.vlgmr.msrb.gmra.mxu0 %vm960_vm0, %v2215_v40  ;;  %2373 = vmax.xlane.f32.xlu0 %v2372_v55 }
 0x39c   : > { %v2687_v29 = vpop.permute.xlu0 %2686 }
 0x39d   : > { %3114 = vmatpush.xpose.msk.msrb.mxu0 %vm960_vm0, %v2687_v29 }
 0x3a0   : > { %3109 = vmatmul.msk.f32.vlgmr.msra.gmra.mxu0 %vm960_vm0, %v2442_v44 }
 0x3a8   : > { %3115 = vmatmul.msk.f32.vlgmr.msrb.gmra.mxu0 %vm960_vm0, %v2669_v23 }
 0x3aa   : > { %v1120_v50 = vpop.xlane.xlu2 %1119 }
 0x3ab   : > { %v1121_v51 = vsub.f32 %v4026_v10, %v1120_v50 }
 0x3ad   : > { %v1122_v53 = vmul.f32 1.442695, %v1121_v51 }
 0x3af   : > { %3212 = vpow2.f32 %v1122_v53 }
 0x3b5   : > { %v3213_v30 = vpop.eup %3212 }
 0x3b6   : > { %3074 = vmatmul.msk.f32.vlgmr.msra.gmra.mxu3 %vm985_vm1, %v3213_v30  ;;  %v1124_v19 = vsel %vm985_vm1, %v3213_v30, 0.0 }
 0x3b7   : > { %1125 = vadd.xlane.f32.xlu2 %v1124_v19 }
 0x3bf   : > { %2146 = vmax.xlane.f32.xlu2 %v2145_v59 }
 0x3e3   : > { %v1239_v58 = vpop.xlane.xlu0 %1238 }
 0x3e4   : > { %v1240_v61 = vsub.f32 %v1234_v39, %v1239_v58 }
 0x3e6   : > { %v1241_v62 = vmul.f32 1.442695, %v1240_v61  ;;  %v4281_v61 = vld [vmem:[#allocation12_spill] sm:$0xff] }
 0x3eb   : > { %v1466_v54 = vpop.xlane.xlu1 %1465 }
 0x3ec   : > { %v1467_v56 = vsub.f32 %v1461_v41, %v1466_v54 }
 0x3ee   : > { %v1468_v60 = vmul.f32 1.442695, %v1467_v56 }
 0x3f0   : > { %v2596_v38 = vpop.f32.mrf.mxu1  ;;  %3214 = vpow2.f32 %v1468_v60 }
 0x3f1   : > { %v2599_v52 = vsel %vm985_vm1, %v2596_v38, -inf  ;;  %3216 = vpow2.f32 %v1241_v62  ;;  %v4282_v62 = vld [vmem:[#allocation11_spill] sm:$0xff] }
 0x3f2   : > { %2600 = vmax.xlane.f32.xlu2 %v2599_v52 }
 0x3f3   : > { %v1693_v21 = vpop.xlane.xlu0 %1692 }
 0x3f4   : > { %v1694_v63 = vsub.f32 %v1688_v45, %v1693_v21  ;;  %v4283_v21 = vld [vmem:[#allocation10_spill] sm:$0xff] }
 0x3f5   : > { %v1347_v47 = vpop.f32.mrf.mxu0 }
 0x3f6   : > { %v3215_v3 = vpop.eup %3214  ;;  %v1695_v2 = vmul.f32 1.442695, %v1694_v63  ;;  %v4284_v63 = vld [vmem:[#allocation9_spill] sm:$0xff] }
 0x3f7   : > { %v1470_v0 = vsel %vm985_vm1, %v3215_v3, 0.0  ;;  %v3217_v1 = vpop.eup %3216 }
 0x3f8   : > { %1471 = vadd.xlane.f32.xlu1 %v1470_v0  ;;  %v1243_v4 = vsel %vm985_vm1, %v3217_v1, 0.0  ;;  %3218 = vpow2.f32 %v1695_v2  ;;  %v3183_v0 = vpack.i.bf16 %v4284_v63, %v4283_v21 }
 0x3fa   : > { %1244 = vadd.xlane.f32.xlu2 %v1243_v4 }
 0x3fb   : > { %v1920_v5 = vpop.xlane.xlu0 %1919 }
 0x3fc   : > { %v1921_v6 = vsub.f32 %v1915_v48, %v1920_v5 }
 0x3fd   : > { %v1574_v51 = vpop.f32.mrf.mxu0 }
 0x3fe   : > { %v3219_v7 = vpop.eup %3218  ;;  %v1922_v8 = vmul.f32 1.442695, %v1921_v6 }
 0x3ff   : > { %v1697_v9 = vsel %vm985_vm1, %v3219_v7, 0.0 }
 0x400   : > { %3220 = vpow2.f32 %v1922_v8  ;;  %1698 = vadd.xlane.f32.xlu0 %v1697_v9 }
 0x403   : > { %v3175_v37 = vpop.permute.xlu1 %3174 }
 0x404   : > { %v3176_v39 = vunpack.i.l.bf16 %v3175_v37  ;;  %v3177_v40 = vunpack.i.h.bf16 %v3175_v37 }
 0x405   : > { %v1801_v23 = vpop.f32.mrf.mxu0 }
 0x406   : > { %v4093_v10 = vpop.eup %3220  ;;  %1285 = vmatpush.msrb.mxu3 %v3176_v39  ;;  %1398 = vmatpush.msrb.mxu2 %v3177_v40 }
 0x407   : > { %v1924_v13 = vsel %vm985_vm1, %v4093_v10, 0.0 }
 0x408   : > { %1925 = vadd.xlane.f32.xlu2 %v1924_v13 }
 0x40b   : > { %v2374_v14 = vpop.xlane.xlu0 %2373 }
 0x40c   : > { %v2375_v22 = vsub.f32 %v2369_v46, %v2374_v14 }
 0x40d   : > { %v2028_v5 = vpop.f32.mrf.mxu0 }
 0x40e   : > { %v2376_v26 = vmul.f32 1.442695, %v2375_v22 }
 0x420   : > { %3179 = vrot.lane.b32.xlu2 %v3178_v36, %s3313_s8 }
 0x42a   : > { %v4095_v12 = vpop.xlane.xlu2 %1125 }
 0x432   : > { %v2147_v16 = vpop.xlane.xlu2 %2146 }
 0x433   : > { %v2148_v17 = vsub.f32 %v2142_v11, %v2147_v16 }
 0x435   : > { %v2149_v24 = vmul.f32 1.442695, %v2148_v17 }
 0x437   : > { %3222 = vpow2.f32 %v2149_v24 }
 0x438   : > { %3224 = vpow2.f32 %v2376_v26 }
 0x43d   : > { %v4099_v28 = vpop.eup %3222 }
 0x43e   : > { %v2151_v31 = vsel %vm985_vm1, %v4099_v28, 0.0  ;;  %v4103_v32 = vpop.eup %3224 }
 0x43f   : > { %2152 = vadd.xlane.f32.xlu0 %v2151_v31  ;;  %v2378_v33 = vsel %vm985_vm1, %v4103_v32, 0.0 }
 0x447   : > { %2379 = vadd.xlane.f32.xlu0 %v2378_v33 }
 0x465   : > { %v2601_v41 = vpop.xlane.xlu2 %2600 }
 0x466   : > { %v2602_v42 = vsub.f32 %v2596_v38, %v2601_v41  ;;  %v2738_v41 = vld [vmem:[#allocation1] sm:$0xff] }
 0x468   : > { %v2603_v43 = vmul.f32 1.442695, %v2602_v42  ;;  %v3203_v42 = vpack.i.bf16 %v4031_v15, %v2738_v41 }
 0x46a   : > { %3226 = vpow2.f32 %v2603_v43 }
 0x46b   : > { %v1472_v48 = vpop.xlane.xlu1 %1471 }
 0x46c   : > { %3228 = vrcp.f32 %v1472_v48 }
 0x46d   : > { %v1245_v27 = vpop.xlane.xlu2 %1244 }
 0x46e   : > { %3230 = vrcp.f32 %v1245_v27 }
 0x470   : > { %v4110_v44 = vpop.eup %3226 }
 0x471   : > { %v2605_v45 = vsel %vm985_vm1, %v4110_v44, 0.0 }
 0x472   : > { %2606 = vadd.xlane.f32.xlu0 %v2605_v45  ;;  %v3229_v49 = vpop.eup %3228 }
 0x473   : > { %v1699_v11 = vpop.xlane.xlu0 %1698  ;;  %v1474_v19 = vmul.f32 %v3229_v49, %v3215_v3  ;;  %v3188_v3 = vpack.i.bf16 %v4282_v62, %v4281_v61 }
 0x474   : > { %v3231_v50 = vpop.eup %3230  ;;  %3232 = vrcp.f32 %v1699_v11 }
 0x475   : > { %v1247_v53 = vmul.f32 %v3231_v50, %v3217_v1  ;;  %v4119_v55 = vmul.f32 %v1574_v51, %v1474_v19  ;;  %v4285_v1 = vld [vmem:[#allocation13_spill] sm:$0xff] }
 0x476   : > { %v3193_v2 = vpack.i.bf16 %v4285_v1, %v3904_v25 }
 0x477   : > { %3077 = vmatmul.msk.f32.vlgmr.msrb.gmra.mxu3 %vm985_vm1, %v1247_v53  ;;  %v4115_v30 = vmul.f32 %v1347_v47, %v1247_v53  ;;  %v1578_v38 = vsel %vm985_vm1, %v4119_v55, -inf  ;;  %v4175_v47 = vpop.f32.mrf.mxu3 }
 0x479   : > { %v1351_v46 = vsel %vm985_vm1, %v4115_v30, -inf }
 0x47a   : > { %1352 = vmax.xlane.f32.xlu0 %v1351_v46  ;;  %v3233_v59 = vpop.eup %3232 }
 0x47b   : > { %v1926_v57 = vpop.xlane.xlu2 %1925  ;;  %v4121_v29 = vmul.f32 %v3233_v59, %v3219_v7  ;;  %v2255_v7 = vpop.f32.mrf.mxu0 }
 0x47d   : > { %v4126_v52 = vmul.f32 %v1801_v23, %v4121_v29 }
 0x47f   : > { %v1805_v54 = vsel %vm985_vm1, %v4126_v52, -inf }
 0x480   : > { %1806 = vmax.xlane.f32.xlu1 %v1805_v54 }
 0x482   : > { %1579 = vmax.xlane.f32.xlu0 %v1578_v38 }
 0x483   : > { %v3180_v56 = vpop.permute.xlu2 %3179  ;;  %v2482_v14 = vpop.f32.mrf.mxu0 }
 0x484   : > { %v3182_v58 = vunpack.i.h.bf16 %v3180_v56  ;;  %v3181_v60 = vunpack.i.l.bf16 %v3180_v56 }
 0x486   : > { %1512 = vmatpush.msra.mxu3 %v3181_v60  ;;  %1625 = vmatpush.msra.mxu2 %v3182_v58 }
 0x487   : > { %3083 = vmatmul.msk.f32.vlgmr.msra.gmra.mxu3 %vm985_vm1, %v1474_v19 }
 0x48b   : > { %v2709_v36 = vpop.f32.mrf.mxu0 }
 0x496   : > { %3189 = vrot.lane.b32.xlu0 %v3188_v3, %s3315_s11  ;;  %s847_s11 = scalar_lea.vmem %s4272_s7, %s3067_s20 }
 0x499   : > { %3184 = vrot.lane.b32.xlu1 %v3183_v0, %s3314_s9 }
 0x49e   : > { %3194 = vrot.lane.b32.xlu0 %v3193_v2, %s3316_s12 }
 0x4b2   : > { %v2153_v4 = vpop.xlane.xlu0 %2152 }
 0x4ba   : > { %v2380_v6 = vpop.xlane.xlu0 %2379 }
 0x4bb   : > { %3234 = vrcp.f32 %v2380_v6 }
 0x4bc   : > { %3236 = vrcp.f32 %v1926_v57 }
 0x4bd   : > { %3238 = vrcp.f32 %v2153_v4 }
 0x4c1   : > { %v3235_v8 = vpop.eup %3234 }
 0x4c2   : > { %v3237_v9 = vpop.eup %3236  ;;  %v4141_v13 = vmul.f32 %v3235_v8, %v4103_v32 }
 0x4c3   : > { %v4144_v16 = vmul.f32 %v3237_v9, %v4093_v10  ;;  %v3239_v24 = vpop.eup %3238 }
 0x4c4   : > { %v4147_v25 = vmul.f32 %v2482_v14, %v4141_v13  ;;  %v2155_v32 = vmul.f32 %v3239_v24, %v4099_v28  ;;  %v3198_v28 = vpack.i.bf16 %v3938_v20, %v3969_v18 }
 0x4c5   : > { %v4150_v22 = vmul.f32 %v2028_v5, %v4144_v16 }
 0x4c6   : > { %v2486_v26 = vsel %vm985_vm1, %v4147_v25, -inf  ;;  %v4160_v35 = vmul.f32 %v2255_v7, %v2155_v32 }
 0x4c7   : > { %2487 = vmax.xlane.f32.xlu1 %v2486_v26  ;;  %v2032_v31 = vsel %vm985_vm1, %v4150_v22, -inf }
 0x4c8   : > { %2033 = vmax.xlane.f32.xlu0 %v2032_v31  ;;  %v2259_v40 = vsel %vm985_vm1, %v4160_v35, -inf }
 0x4d0   : > { %2260 = vmax.xlane.f32.xlu0 %v2259_v40 }
 0x4e4   : > { %3199 = vrot.lane.b32.xlu0 %v3198_v28, %s3317_s13 }
 0x4e5   : > { %v2607_v17 = vpop.xlane.xlu0 %2606 }
 0x4e6   : > { %3240 = vrcp.f32 %v2607_v17 }
 0x4ec   : > { %v3241_v10 = vpop.eup %3240 }
 0x4ed   : > { %v4158_v33 = vmul.f32 %v3241_v10, %v4110_v44  ;;  %v1353_v43 = vpop.xlane.xlu0 %1352 }
 0x4ee   : > { %v1354_v44 = vsub.f32 %v4115_v30, %v1353_v43 }
 0x4ef   : > { %v4163_v37 = vmul.f32 %v2709_v36, %v4158_v33 }
 0x4f0   : > { %v1355_v45 = vmul.f32 1.442695, %v1354_v44 }
 0x4f1   : > { %v2713_v39 = vsel %vm985_vm1, %v4163_v37, -inf }
 0x4f2   : > { %2714 = vmax.xlane.f32.xlu2 %v2713_v39  ;;  %3242 = vpow2.f32 %v1355_v45 }
 0x4f3   : > { %v1807_v15 = vpop.xlane.xlu1 %1806 }
 0x4f4   : > { %v1808_v51 = vsub.f32 %v4126_v52, %v1807_v15 }
 0x4f5   : > { %v1580_v48 = vpop.xlane.xlu0 %1579 }
 0x4f6   : > { %v1581_v27 = vsub.f32 %v4119_v55, %v1580_v48  ;;  %v1809_v53 = vmul.f32 1.442695, %v1808_v51 }
 0x4f8   : > { %v3243_v49 = vpop.eup %3242  ;;  %v1582_v50 = vmul.f32 1.442695, %v1581_v27 }
 0x4f9   : > { %3080 = vmatmul.msk.f32.vlgmr.msrb.gmra.mxu2 %vm985_vm1, %v3243_v49  ;;  %v1357_v46 = vsel %vm985_vm1, %v3243_v49, 0.0 }
 0x4fa   : > { %3244 = vpow2.f32 %v1582_v50  ;;  %v1287_v20 = vpop.f32.mrf.mxu3 }
 0x4fb   : > { %2767 = vrot.lane.b32.xlu0 %v1287_v20, %s3319_s15  ;;  %3246 = vpow2.f32 %v1809_v53 }
 0x500   : > { %v3245_v18 = vpop.eup %3244 }
 0x501   : > { %3086 = vmatmul.msk.f32.vlgmr.msra.gmra.mxu2 %vm985_vm1, %v3245_v18  ;;  %v3247_v38 = vpop.eup %3246  ;;  %v1584_v58 = vsel %vm985_vm1, %v3245_v18, 0.0 }
 0x502   : > { %v1811_v60 = vsel %vm985_vm1, %v3247_v38, 0.0 }
 0x508   : > { %v3190_v11 = vpop.permute.xlu0 %3189 }
 0x509   : > { %v3192_v57 = vunpack.i.h.bf16 %v3190_v11  ;;  %v3191_v54 = vunpack.i.l.bf16 %v3190_v11 }
 0x50a   : > { %3204 = vrot.lane.b32.xlu2 %v3203_v42, %s3318_s14  ;;  %v1514_v30 = vpop.f32.mrf.mxu3 }
 0x50b   : > { %v3185_v19 = vpop.permute.xlu1 %3184  ;;  %2771 = vrot.lane.b32.xlu1 %v1514_v30, %s3320_s16 }
 0x50c   : > { %v3187_v55 = vunpack.i.h.bf16 %v3185_v19  ;;  %v3186_v59 = vunpack.i.l.bf16 %v3185_v19 }
 0x50e   : > { %1739 = vmatpush.msrb.mxu3 %v3187_v55  ;;  %1852 = vmatpush.msrb.mxu2 %v3186_v59 }
 0x50f   : > { %3089 = vmatmul.msk.f32.vlgmr.msrb.gmra.mxu3 %vm985_vm1, %v4121_v29  ;;  %3092 = vmatmul.msk.f32.vlgmr.msrb.gmra.mxu2 %vm985_vm1, %v3247_v38 }
 0x510   : > { %v3195_v23 = vpop.permute.xlu0 %3194  ;;  %1966 = vmatpush.msra.mxu3 %v3192_v57  ;;  %2079 = vmatpush.msra.mxu2 %v3191_v54 }
 0x511   : > { %v3197_v52 = vunpack.i.h.bf16 %v3195_v23  ;;  %v3196_v56 = vunpack.i.l.bf16 %v3195_v23 }
 0x513   : > { %2193 = vmatpush.msrb.mxu3 %v3197_v52  ;;  %2306 = vmatpush.msrb.mxu2 %v3196_v56 }
 0x517   : > { %3095 = vmatmul.msk.f32.vlgmr.msra.gmra.mxu3 %vm985_vm1, %v4144_v16 }
 0x51f   : > { %3101 = vmatmul.msk.f32.vlgmr.msrb.gmra.mxu3 %vm985_vm1, %v2155_v32 }
 0x525   : > { %1812 = vadd.xlane.f32.xlu0 %v1811_v60 }
 0x533   : > { %1358 = vadd.xlane.f32.xlu2 %v1357_v46 }
 0x53a   : > { %v2488_v21 = vpop.xlane.xlu1 %2487 }
 0x53b   : > { %1585 = vadd.xlane.f32.xlu2 %v1584_v58  ;;  %v2034_v61 = vpop.xlane.xlu0 %2033  ;;  %v2489_v2 = vsub.f32 %v4147_v25, %v2488_v21 }
 0x53c   : > { %v2035_v29 = vsub.f32 %v4150_v22, %v2034_v61 }
 0x53d   : > { %v2490_v5 = vmul.f32 1.442695, %v2489_v2 }
 0x53e   : > { %v2036_v62 = vmul.f32 1.442695, %v2035_v29 }
 0x540   : > { %3248 = vpow2.f32 %v2036_v62 }
 0x543   : > { %v2261_v3 = vpop.xlane.xlu0 %2260 }
 0x544   : > { %v2262_v63 = vsub.f32 %v4160_v35, %v2261_v3 }
 0x546   : > { %v3249_v0 = vpop.eup %3248  ;;  %v2263_v1 = vmul.f32 1.442695, %v2262_v63 }
 0x547   : > { %3098 = vmatmul.msk.f32.vlgmr.msra.gmra.mxu2 %vm985_vm1, %v3249_v0  ;;  %v2038_v4 = vsel %vm985_vm1, %v3249_v0, 0.0 }
 0x548   : > { %2039 = vadd.xlane.f32.xlu2 %v2038_v4  ;;  %3250 = vpow2.f32 %v2263_v1 }
 0x549   : > { %3252 = vpow2.f32 %v2490_v5 }
 0x54e   : > { %v3251_v7 = vpop.eup %3250 }
 0x54f   : > { %3104 = vmatmul.msk.f32.vlgmr.msrb.gmra.mxu2 %vm985_vm1, %v3251_v7  ;;  %v2265_v8 = vsel %vm985_vm1, %v3251_v7, 0.0  ;;  %v3253_v16 = vpop.eup %3252 }
 0x550   : > { %2266 = vadd.xlane.f32.xlu1 %v2265_v8  ;;  %v2492_v31 = vsel %vm985_vm1, %v3253_v16, 0.0 }
 0x556   : > { %v3200_v25 = vpop.permute.xlu0 %3199 }
 0x557   : > { %v3202_v17 = vunpack.i.h.bf16 %v3200_v25  ;;  %v3201_v22 = vunpack.i.l.bf16 %v3200_v25 }
 0x558   : > { %2493 = vadd.xlane.f32.xlu1 %v2492_v31 }
 0x559   : > { %2420 = vmatpush.msra.mxu3 %v3202_v17  ;;  %2533 = vmatpush.msra.mxu2 %v3201_v22 }
 0x55a   : > { %3107 = vmatmul.msk.f32.vlgmr.msra.gmra.mxu3 %vm985_vm1, %v4141_v13  ;;  %3110 = vmatmul.msk.f32.vlgmr.msra.gmra.mxu2 %vm985_vm1, %v3253_v16 }
 0x565   : > { %v2715_v6 = vpop.xlane.xlu2 %2714 }
 0x566   : > { %v2716_v9 = vsub.f32 %v4163_v37, %v2715_v6 }
 0x568   : > { %v2717_v26 = vmul.f32 1.442695, %v2716_v9 }
 0x56a   : > { %3254 = vpow2.f32 %v2717_v26 }
 0x56d   : > { %v3205_v14 = vpop.permute.xlu2 %3204  ;;  %v2768_v18 = vpop.permute.xlu0 %2767 }
 0x56e   : > { %v3207_v24 = vunpack.i.h.bf16 %v3205_v14  ;;  %v3206_v32 = vunpack.i.l.bf16 %v3205_v14  ;;  %v2794_v60 = vsel %vm960_vm0, %v4067_v34, %v2768_v18 }
 0x570   : > { %2647 = vmatpush.msrb.mxu3 %v3207_v24  ;;  %2760 = vmatpush.msrb.mxu2 %v3206_v32  ;;  %v3255_v10 = vpop.eup %3254 }
 0x571   : > { %3113 = vmatmul.msk.f32.vlgmr.msrb.gmra.mxu3 %vm985_vm1, %v4158_v33  ;;  %3116 = vmatmul.msk.f32.vlgmr.msrb.gmra.mxu2 %vm985_vm1, %v3255_v10  ;;  %v2719_v57 = vsel %vm985_vm1, %v3255_v10, 0.0 }
 0x57c   : > { %v1400_v36 = vpop.f32.mrf.mxu2 }
 0x57d   : > { %v2772_v44 = vpop.permute.xlu1 %2771 }
 0x57e   : > { %v2795_v61 = vsel %vm985_vm1, %v2794_v60, %v2772_v44 }
 0x584   : > { %v1627_v13 = vpop.f32.mrf.mxu2 }
 0x592   : > { %v1741_v28 = vpop.f32.mrf.mxu3  ;;  %v1854_v45 = vpop.f32.mrf.mxu2 }
 0x593   : > { %2775 = vrot.lane.b32.xlu2 %v1741_v28, %s3321_s30 }
 0x598   : > { %v1813_v51 = vpop.xlane.xlu0 %1812 }
 0x59a   : > { %v1968_v43 = vpop.f32.mrf.mxu3 }
 0x59b   : > { %2779 = vrot.lane.b32.xlu0 %v1968_v43, %s3322_s17 }
 0x5a2   : > { %v2195_v33 = vpop.f32.mrf.mxu3 }
 0x5a3   : > { %2783 = vrot.lane.b32.xlu0 %v2195_v33, %s3323_s18 }
 0x5a6   : > { %v1359_v35 = vpop.xlane.xlu2 %1358 }
 0x5a7   : > { %3256 = vrcp.f32 %v1359_v35 }
 0x5ad   : > { %v3257_v37 = vpop.eup %3256 }
 0x5ae   : > { %v1403_v39 = vmul.f32 %v3257_v37, %v1400_v36  ;;  %v1586_v40 = vpop.xlane.xlu2 %1585 }
 0x5af   : > { %3258 = vrcp.f32 %v1586_v40 }
 0x5b5   : > { %v3259_v41 = vpop.eup %3258 }
 0x5b6   : > { %v1630_v42 = vmul.f32 %v3259_v41, %v1627_v13 }
 0x5b8   : > { %2813 = vrot.lane.b32.xlu2 %v1630_v42, %s3320_s16 }
 0x5bb   : > { %v2040_v23 = vpop.xlane.xlu2 %2039 }
 0x5c3   : > { %v2267_v48 = vpop.xlane.xlu1 %2266 }
 0x5c4   : > { %3260 = vrcp.f32 %v2267_v48 }
 0x5c5   : > { %3262 = vrcp.f32 %v1813_v51 }
 0x5ca   : > { %v2081_v27 = vpop.f32.mrf.mxu2  ;;  %v3261_v49 = vpop.eup %3260 }
 0x5cb   : > { %v3263_v11 = vpop.eup %3262  ;;  %v2494_v30 = vpop.xlane.xlu1 %2493 }
 0x5cc   : > { %v1857_v19 = vmul.f32 %v3263_v11, %v1854_v45  ;;  %3264 = vrcp.f32 %v2494_v30 }
 0x5cd   : > { %3266 = vrcp.f32 %v2040_v23 }
 0x5d2   : > { %v2308_v50 = vpop.f32.mrf.mxu2  ;;  %v3265_v55 = vpop.eup %3264 }
 0x5d3   : > { %v2311_v20 = vmul.f32 %v3261_v49, %v2308_v50  ;;  %v3267_v38 = vpop.eup %3266 }
 0x5d4   : > { %v2084_v54 = vmul.f32 %v3267_v38, %v2081_v27 }
 0x5d5   : > { %2825 = vrot.lane.b32.xlu2 %v2311_v20, %s3323_s18 }
 0x5dd   : > { %v2422_v15 = vpop.f32.mrf.mxu3  ;;  %v2535_v46 = vpop.f32.mrf.mxu2 }
 0x5de   : > { %2787 = vrot.lane.b32.xlu1 %v2422_v15, %s3324_s24  ;;  %v2538_v59 = vmul.f32 %v3265_v55, %v2535_v46 }
 0x5ed   : > { %v2776_v58 = vpop.permute.xlu2 %2775 }
 0x5ee   : > { %v2797_v29 = vsel %vm2796_vm2, %v2795_v61, %v2776_v58 }
 0x5f4   : > { %v2649_v53 = vpop.f32.mrf.mxu3  ;;  %v2762_v4 = vpop.f32.mrf.mxu2 }
 0x5f5   : > { %2791 = vrot.lane.b32.xlu0 %v2649_v53, %s3325_s19 }
 0x5fd   : > { %2817 = vrot.lane.b32.xlu0 %v1857_v19, %s3321_s30 }
 0x605   : > { %2829 = vrot.lane.b32.xlu0 %v2538_v59, %s3324_s24 }
 0x608   : > { %2720 = vadd.xlane.f32.xlu1 %v2719_v57 }
 0x60d   : > { %v2780_v52 = vpop.permute.xlu0 %2779 }
 0x60e   : > { %v2799_v3 = vsel %vm2798_vm3, %v2797_v29, %v2780_v52 }
 0x612   : > { %v2814_v14 = vpop.permute.xlu2 %2813 }
 0x615   : > { %v2784_v56 = vpop.permute.xlu0 %2783 }
 0x616   : > { %v2801_v21 = vsel %vm2800_vm4, %v2799_v3, %v2784_v56 }
 0x621   : > { %2809 = vrot.lane.b32.xlu1 %v1403_v39, %s3319_s15 }
 0x629   : > { %2821 = vrot.lane.b32.xlu1 %v2084_v54, %s3322_s17 }
 0x62f   : > { %v2826_v26 = vpop.permute.xlu2 %2825 }
 0x650   : > { %v2788_v62 = vpop.permute.xlu1 %2787 }
 0x651   : > { %v2803_v34 = vsel %vm2802_vm5, %v2801_v21, %v2788_v62 }
 0x667   : > { %v2792_v63 = vpop.permute.xlu0 %2791 }
 0x668   : > { %v2805_v0 = vsel %vm2804_vm6, %v2803_v34, %v2792_v63 }
 0x669   : > { %2807 = vst.msk [vmem:[%s840_s23] sm:$0xff] %vm2806_vm7, %v2805_v0 }
 0x66f   : > { %v2818_v16 = vpop.permute.xlu0 %2817 }
 0x677   : > { %v2830_v32 = vpop.permute.xlu0 %2829 }
 0x67b   : > { %v2721_v1 = vpop.xlane.xlu1 %2720 }
 0x67c   : > { %3268 = vrcp.f32 %v2721_v1 }
 0x67d   : > { %3270 = vrcp.f32 %v4095_v12 }
 0x682   : > { %v3269_v2 = vpop.eup %3268 }
 0x683   : > { %v2765_v5 = vmul.f32 %v3269_v2, %v2762_v4  ;;  %v3271_v7 = vpop.eup %3270 }
 0x684   : > { %v1176_v8 = vmul.f32 %v3271_v7, %v4175_v47 }
 0x685   : > { %2833 = vrot.lane.b32.xlu1 %v2765_v5, %s3325_s19 }
 0x693   : > { %v2810_v6 = vpop.permute.xlu1 %2809 }
 0x694   : > { %v2836_v9 = vsel %vm960_vm0, %v1176_v8, %v2810_v6 }
 0x695   : > { %v2837_v25 = vsel %vm985_vm1, %v2836_v9, %v2814_v14 }
 0x696   : > { %v2838_v22 = vsel %vm2796_vm2, %v2837_v25, %v2818_v16 }
 0x69b   : > { %v2822_v17 = vpop.permute.xlu1 %2821 }
 0x69c   : > { %v2839_v24 = vsel %vm2798_vm3, %v2838_v22, %v2822_v17 }
 0x69d   : > { %v2840_v31 = vsel %vm2800_vm4, %v2839_v24, %v2826_v26 }
 0x69e   : > { %v2841_v12 = vsel %vm2802_vm5, %v2840_v31, %v2830_v32 }
 0x6f7   : > { %v2834_v47 = vpop.permute.xlu1 %2833 }
 0x6f8   : > { %v2842_v10 = vsel %vm2804_vm6, %v2841_v12, %v2834_v47 }
 0x6f9   : > { %2843 = vst.msk [vmem:[%s847_s11] sm:$0xff] %vm2806_vm7, %v2842_v10 }
 0x6fa PF: > { %s18_s28 = sadd.s32 1, %s3310_s28   ;;  %s4286_s24 = smov %s3298_s25 }
 0x6fb   : > { %p15_p10 = scmp.ge.s32.totalorder %s18_s28, 4   ;;  %s4287_s25 = smov %s3405_s10 }
 0x6fc   : > { %s4288_s26 = smov %s3306_s27  ;;  %s4289_s27 = smov %s4291_s29 }
 0x6fd   :  { %17 = sbr.rel (!%p15_p10) target bundleno = 3 (0x3), region = 713 }

</bundles_post_ra>
